<compile_context>
chip_gen: v6e
topology: v6e:2x2x1
jax: 0.10.0
libtpu: 0.0.40
codegen_flags: <defaults>
</compile_context>

<pallas_src>
import functools

import jax
import jax.numpy as jnp
from jax.experimental import pallas as pl
from jax.experimental.pallas import tpu as pltpu

EPS = 1e-5


# ---------------------------------------------------------------------------
# In-kernel helpers (all operate on VMEM-resident values)
# ---------------------------------------------------------------------------
def _pad_h(x, mode):
    """Pad H (axis 1 of NHWC) by 1 on each side.  H is a leading (untiled) axis,
    so this concat does not disturb the (8,128) layout of the (W, C) minor dims."""
    H = x.shape[1]
    if mode == "reflect":
        top, bot = x[:, 1:2], x[:, H - 2:H - 1]
    elif mode == "replicate":
        top, bot = x[:, 0:1], x[:, H - 1:H]
    else:  # zero
        top = jnp.zeros_like(x[:, 0:1])
        bot = top
    return jnp.concatenate([top, x, bot], axis=1)          # [N, H+2, W, C]


def _shifted_w(xp, mode):
    """Return the (kw=0, kw=1, kw=2) W-neighbor variants of xp [N,Hp,W,C] (f32).

    Instead of padding W (which breaks 8-sublane tiling), the +-1 column shifts
    are XLU rotates (pltpu.roll, jnp.roll semantics) and the pad boundary is a
    single column-select per side.
    """
    _, _, W, C = xp.shape
    col = jax.lax.broadcasted_iota(jnp.int32, (1, 1, W, C), 2)

    # kw=0 tap: value at w-1.  roll(+1): out[w] = xp[w-1].
    left = pltpu.roll(xp, shift=1, axis=2)
    # kw=2 tap: value at w+1.  roll(W-1): out[w] = xp[(w+1) % W].
    right = pltpu.roll(xp, shift=W - 1, axis=2)

    if mode == "reflect":
        l_edge, r_edge = xp[:, :, 1:2, :], xp[:, :, W - 2:W - 1, :]
    elif mode == "replicate":
        l_edge, r_edge = xp[:, :, 0:1, :], xp[:, :, W - 1:W, :]
    else:  # zero
        l_edge = jnp.zeros_like(xp[:, :, 0:1, :])
        r_edge = l_edge
    left = jnp.where(col == 0, l_edge, left)
    right = jnp.where(col == W - 1, r_edge, right)
    return left, xp, right


def _conv3x3(x_nhwc, w_ref, mode):
    """3x3 stride-1 conv with pad 1: nine accumulating MXU matmuls, no im2col.

    x_nhwc: [N,H,W,C] f32 value.  w_ref: [9, Cin, Cout] bf16 ref (kh*3+kw major).
    Returns [N*H*W, Cout] f32.
    """
    N, H, W, C = x_nhwc.shape
    xp = _pad_h(x_nhwc, mode)                              # [N, H+2, W, C] f32
    # One bf16 cast per shifted variant (3 per conv) instead of 9 per-tap casts.
    shifted = tuple(s.astype(jnp.bfloat16) for s in _shifted_w(xp, mode))
    M = N * H * W
    acc = None
    for kh in range(3):
        for kw in range(3):
            tap = shifted[kw][:, kh:kh + H].reshape(M, C)  # aligned view, no relayout
            part = jnp.dot(tap, w_ref[kh * 3 + kw],
                           preferred_element_type=jnp.float32)
            acc = part if acc is None else acc + part      # MRB accumulate on v7x
    return acc


def _bn_affine(h, gamma, beta):
    """Training-mode BatchNorm2d on [M, C]: batch stats, biased variance.
    Two-pass (mean, then E[(x-mean)^2]) to avoid E[x^2]-E[x]^2 cancellation."""
    mean = jnp.mean(h, axis=0, keepdims=True)
    d = h - mean
    var = jnp.mean(d * d, axis=0, keepdims=True)
    return d * (gamma * jax.lax.rsqrt(var + EPS)) + beta


# ---------------------------------------------------------------------------
# Fused ResnetBlock kernel (single pallas_call, everything VMEM-resident)
# ---------------------------------------------------------------------------
def _resnet_block_kernel(pad_mode, x_ref, w1_ref, g1_ref, b1_ref,
                         w2_ref, g2_ref, b2_ref, o_ref):
    N, H, W, C = x_ref.shape
    x = x_ref[...]                                         # [N,H,W,C] f32 (residual)

    h = _conv3x3(x, w1_ref, pad_mode)                      # conv1 -> [M, C] f32
    h = jnp.maximum(_bn_affine(h, g1_ref[...], b1_ref[...]), 0.0)   # BN1 + ReLU
    # TODO(synk): use_dropout=True (nn.Dropout(0.5)) would go here.

    h = _conv3x3(h.reshape(N, H, W, C), w2_ref, pad_mode)           # conv2
    h = _bn_affine(h, g2_ref[...], b2_ref[...])                     # BN2

    o_ref[...] = h.reshape(N, H, W, C) + x                 # residual add + store


# ---------------------------------------------------------------------------
# One-time parameter packing (NOT in the per-call path)
# ---------------------------------------------------------------------------
def pack_params(raw):
    """Convert torch-layout params to kernel layout once, at model setup."""
    C = raw["w1"].shape[0]

    def w_pack(w):  # torch [Cout, Cin, 3, 3] -> [kh*3+kw, Cin, Cout] bf16
        return jnp.transpose(w, (2, 3, 1, 0)).reshape(9, C, C).astype(jnp.bfloat16)

    def ch(v):      # per-channel BN param -> [1, C] f32
        return v.reshape(1, C).astype(jnp.float32)

    return dict(w1=w_pack(raw["w1"]), g1=ch(raw["g1"]), b1=ch(raw["b1"]),
                w2=w_pack(raw["w2"]), g2=ch(raw["g2"]), b2=ch(raw["b2"]))


# ---------------------------------------------------------------------------
# Wrapper (NHWC boundary; pre-packed weights)
# ---------------------------------------------------------------------------
def resnet_block_nhwc(x_nhwc, packed, padding_type="reflect"):
    """ResnetBlock.forward on an NHWC activation: x + conv_block(x).
    use_bias=False (BatchNorm norm_layer).  Weights must be packed with pack_params()."""
    if padding_type not in ("reflect", "replicate", "zero"):
        raise NotImplementedError(f"padding [{padding_type}] is not implemented")
    N, H, W, C = x_nhwc.shape
    M = N * H * W

    vmem = pl.BlockSpec(memory_space=pltpu.MemorySpace.VMEM)
    kern = functools.partial(_resnet_block_kernel, padding_type)

    cost = pl.CostEstimate(
        flops=2 * (2 * M * 9 * C * C),                 # two 3x3 convs
        transcendentals=2 * C,                         # two per-channel rsqrt
        bytes_accessed=2 * M * C * 4 + 2 * 9 * C * C * 2 + 4 * C * 4)

    return pl.pallas_call(
        kern,
        out_shape=jax.ShapeDtypeStruct((N, H, W, C), jnp.float32),
        in_specs=[vmem] * 7,
        out_specs=vmem,
        cost_estimate=cost,
        compiler_params=pltpu.CompilerParams(vmem_limit_bytes=32 * 1024 * 1024),
    )(x_nhwc.astype(jnp.float32), packed["w1"], packed["g1"], packed["b1"],
      packed["w2"], packed["g2"], packed["b2"])


# ---------------------------------------------------------------------------
# Pure-JAX f32 reference (for a loose correctness check in main)
# ---------------------------------------------------------------------------
def _ref_forward(x_nhwc, raw, padding_type):
    jmode = {"reflect": "reflect", "replicate": "edge", "zero": "constant"}[padding_type]

    def conv(h, w):
        hp = jnp.pad(h, ((0, 0), (1, 1), (1, 1), (0, 0)), mode=jmode)
        return jax.lax.conv_general_dilated(
            hp, jnp.transpose(w, (2, 3, 1, 0)), (1, 1), "VALID",
            dimension_numbers=("NHWC", "HWIO", "NHWC"),
            precision=jax.lax.Precision.HIGHEST,
            preferred_element_type=jnp.float32)

    def bn(h, g, b):
        mean = h.mean(axis=(0, 1, 2), keepdims=True)
        var = jnp.mean((h - mean) ** 2, axis=(0, 1, 2), keepdims=True)
        return (h - mean) * (g / jnp.sqrt(var + EPS)) + b

    h = jnp.maximum(bn(conv(x_nhwc, raw["w1"]), raw["g1"], raw["b1"]), 0.0)
    h = bn(conv(h, raw["w2"]), raw["g2"], raw["b2"])
    return x_nhwc + h


# ---------------------------------------------------------------------------
# Deterministic synthetic parameters (torch layout)
# ---------------------------------------------------------------------------
def make_params(key, dim):
    k1, k2, k3, k4, k5, k6 = jax.random.split(key, 6)
    return dict(
        w1=0.05 * jax.random.normal(k1, (dim, dim, 3, 3), jnp.float32),
        w2=0.05 * jax.random.normal(k2, (dim, dim, 3, 3), jnp.float32),
        g1=1.0 + 0.1 * jax.random.normal(k3, (dim,), jnp.float32),
        b1=0.1 * jax.random.normal(k4, (dim,), jnp.float32),
        g2=1.0 + 0.1 * jax.random.normal(k5, (dim,), jnp.float32),
        b2=0.1 * jax.random.normal(k6, (dim,), jnp.float32),
    )


if __name__ == "__main__":
    key = jax.random.PRNGKey(0)
    kp, kx = jax.random.split(key)

    dim = 128                     # lane-dense channel count (multiple of 128 lanes)
    N, Hs, Ws = 2, 16, 16
    padding_type = "reflect"

    raw = make_params(kp, dim)
    packed = pack_params(raw)     # one-time weight packing, outside the jitted call

    x_nchw = jax.random.normal(kx, (N, dim, Hs, Ws), jnp.float32)   # PyTorch layout
    # Layout conversion happens once at the model boundary; a stack of blocks
    # would stay NHWC and call resnet_block_nhwc directly.
    x_nhwc = jnp.transpose(x_nchw, (0, 2, 3, 1))

    fwd = jax.jit(functools.partial(resnet_block_nhwc, padding_type=padding_type))
    out_nhwc = jax.block_until_ready(fwd(x_nhwc, packed))

    assert out_nhwc.shape == (N, Hs, Ws, dim), out_nhwc.shape
    assert bool(jnp.all(jnp.isfinite(out_nhwc)))

    # Loose check vs f32 reference (kernel uses bf16 MXU inputs -> ~1e-2 level diffs).
    ref = _ref_forward(x_nhwc, raw, padding_type)
    max_err = float(jnp.max(jnp.abs(out_nhwc - ref)))
    assert max_err < 1e-1, f"max abs error vs reference: {max_err}"

    out_nchw = jnp.transpose(out_nhwc, (0, 3, 1, 2))      # back to PyTorch layout
    assert out_nchw.shape == (N, dim, Hs, Ws)
    print("KERNEL_OK")
</pallas_src>

<mosaic_0001>
module attributes {stable_mosaic.version = 11 : i64} {
  func.func @_resnet_block_kernel(%arg0: memref<2x16x16x128xf32, #tpu.memory_space<vmem>>, %arg1: memref<9x128x128xbf16, #tpu.memory_space<vmem>>, %arg2: memref<1x128xf32, #tpu.memory_space<vmem>>, %arg3: memref<1x128xf32, #tpu.memory_space<vmem>>, %arg4: memref<9x128x128xbf16, #tpu.memory_space<vmem>>, %arg5: memref<1x128xf32, #tpu.memory_space<vmem>>, %arg6: memref<1x128xf32, #tpu.memory_space<vmem>>, %arg7: memref<2x16x16x128xf32, #tpu.memory_space<vmem>>) attributes {dimension_semantics = [], scalar_prefetch = 0 : i64, scratch_operands = 0 : i64, tpu.core_type = #tpu.core_type<tc>} {
    %c0 = arith.constant 0 : index
    %c0_0 = arith.constant 0 : index
    %c0_1 = arith.constant 0 : index
    %c0_2 = arith.constant 0 : index
    %0 = vector.load %arg0[%c0, %c0_0, %c0_1, %c0_2] : memref<2x16x16x128xf32, #tpu.memory_space<vmem>>, vector<2x16x16x128xf32>
    %1 = vector.extract_strided_slice %0 {offsets = [0, 1, 0, 0], sizes = [2, 1, 16, 128], strides = [1, 1, 1, 1]} : vector<2x16x16x128xf32> to vector<2x1x16x128xf32>
    %2 = vector.extract_strided_slice %0 {offsets = [0, 14, 0, 0], sizes = [2, 1, 16, 128], strides = [1, 1, 1, 1]} : vector<2x16x16x128xf32> to vector<2x1x16x128xf32>
    %3 = tpu.concatenate %1, %0, %2 in 1 : vector<2x1x16x128xf32>, vector<2x16x16x128xf32>, vector<2x1x16x128xf32> -> vector<2x18x16x128xf32>
    %4 = tpu.iota {dimensions = array<i32: 2>} : vector<1x1x16x128xi32>
    %c1_i32 = arith.constant 1 : i32
    %5 = tpu.dynamic_rotate %3 by %c1_i32 dim 2 : vector<2x18x16x128xf32>, i32 -> vector<2x18x16x128xf32>
    %c15_i32 = arith.constant 15 : i32
    %6 = tpu.dynamic_rotate %3 by %c15_i32 dim 2 : vector<2x18x16x128xf32>, i32 -> vector<2x18x16x128xf32>
    %7 = vector.extract_strided_slice %3 {offsets = [0, 0, 1, 0], sizes = [2, 18, 1, 128], strides = [1, 1, 1, 1]} : vector<2x18x16x128xf32> to vector<2x18x1x128xf32>
    %8 = vector.extract_strided_slice %3 {offsets = [0, 0, 14, 0], sizes = [2, 18, 1, 128], strides = [1, 1, 1, 1]} : vector<2x18x16x128xf32> to vector<2x18x1x128xf32>
    %c0_i32 = arith.constant 0 : i32
    %9 = vector.broadcast %c0_i32 : i32 to vector<1x1x16x128xi32>
    %10 = arith.cmpi eq, %4, %9 : vector<1x1x16x128xi32>
    %11 = vector.shape_cast %10 : vector<1x1x16x128xi1> to vector<1x1x16x128xi1>
    %12 = vector.broadcast %11 : vector<1x1x16x128xi1> to vector<2x18x16x128xi1>
    %13 = vector.shape_cast %7 : vector<2x18x1x128xf32> to vector<2x18x1x128xf32>
    %14 = vector.broadcast %13 : vector<2x18x1x128xf32> to vector<2x18x16x128xf32>
    %15 = arith.select %12, %14, %5 : vector<2x18x16x128xi1>, vector<2x18x16x128xf32>
    %c15_i32_3 = arith.constant 15 : i32
    %16 = vector.broadcast %c15_i32_3 : i32 to vector<1x1x16x128xi32>
    %17 = arith.cmpi eq, %4, %16 : vector<1x1x16x128xi32>
    %18 = vector.shape_cast %17 : vector<1x1x16x128xi1> to vector<1x1x16x128xi1>
    %19 = vector.broadcast %18 : vector<1x1x16x128xi1> to vector<2x18x16x128xi1>
    %20 = vector.shape_cast %8 : vector<2x18x1x128xf32> to vector<2x18x1x128xf32>
    %21 = vector.broadcast %20 : vector<2x18x1x128xf32> to vector<2x18x16x128xf32>
    %22 = arith.select %19, %21, %6 : vector<2x18x16x128xi1>, vector<2x18x16x128xf32>
    %23 = arith.truncf %15 : vector<2x18x16x128xf32> to vector<2x18x16x128xbf16>
    %24 = arith.truncf %3 : vector<2x18x16x128xf32> to vector<2x18x16x128xbf16>
    %25 = arith.truncf %22 : vector<2x18x16x128xf32> to vector<2x18x16x128xbf16>
    %26 = vector.extract_strided_slice %23 {offsets = [0, 0, 0, 0], sizes = [2, 16, 16, 128], strides = [1, 1, 1, 1]} : vector<2x18x16x128xbf16> to vector<2x16x16x128xbf16>
    %27 = vector.shape_cast %26 : vector<2x16x16x128xbf16> to vector<512x128xbf16>
    %c0_4 = arith.constant 0 : index
    %c0_5 = arith.constant 0 : index
    %c0_6 = arith.constant 0 : index
    %28 = vector.load %arg1[%c0_4, %c0_5, %c0_6] : memref<9x128x128xbf16, #tpu.memory_space<vmem>>, vector<1x128x128xbf16>
    %29 = vector.shape_cast %28 : vector<1x128x128xbf16> to vector<128x128xbf16>
    %cst = arith.constant dense<0.000000e+00> : vector<512x128xf32>
    %30 = tpu.matmul %27, %29, %cst {dimension_numbers = #tpu.dot_dimension_numbers<[1], [0], [0], [1], [0, 0, 1, 1], [], []>} : vector<512x128xbf16>, vector<128x128xbf16>, vector<512x128xf32> -> vector<512x128xf32>
    %31 = vector.extract_strided_slice %24 {offsets = [0, 0, 0, 0], sizes = [2, 16, 16, 128], strides = [1, 1, 1, 1]} : vector<2x18x16x128xbf16> to vector<2x16x16x128xbf16>
    %32 = vector.shape_cast %31 : vector<2x16x16x128xbf16> to vector<512x128xbf16>
    %c1 = arith.constant 1 : index
    %c0_7 = arith.constant 0 : index
    %c0_8 = arith.constant 0 : index
    %33 = vector.load %arg1[%c1, %c0_7, %c0_8] : memref<9x128x128xbf16, #tpu.memory_space<vmem>>, vector<1x128x128xbf16>
    %34 = vector.shape_cast %33 : vector<1x128x128xbf16> to vector<128x128xbf16>
    %cst_9 = arith.constant dense<0.000000e+00> : vector<512x128xf32>
    %35 = tpu.matmul %32, %34, %cst_9 {dimension_numbers = #tpu.dot_dimension_numbers<[1], [0], [0], [1], [0, 0, 1, 1], [], []>} : vector<512x128xbf16>, vector<128x128xbf16>, vector<512x128xf32> -> vector<512x128xf32>
    %36 = arith.addf %30, %35 : vector<512x128xf32>
    %37 = vector.extract_strided_slice %25 {offsets = [0, 0, 0, 0], sizes = [2, 16, 16, 128], strides = [1, 1, 1, 1]} : vector<2x18x16x128xbf16> to vector<2x16x16x128xbf16>
    %38 = vector.shape_cast %37 : vector<2x16x16x128xbf16> to vector<512x128xbf16>
    %c2 = arith.constant 2 : index
    %c0_10 = arith.constant 0 : index
    %c0_11 = arith.constant 0 : index
    %39 = vector.load %arg1[%c2, %c0_10, %c0_11] : memref<9x128x128xbf16, #tpu.memory_space<vmem>>, vector<1x128x128xbf16>
    %40 = vector.shape_cast %39 : vector<1x128x128xbf16> to vector<128x128xbf16>
    %cst_12 = arith.constant dense<0.000000e+00> : vector<512x128xf32>
    %41 = tpu.matmul %38, %40, %cst_12 {dimension_numbers = #tpu.dot_dimension_numbers<[1], [0], [0], [1], [0, 0, 1, 1], [], []>} : vector<512x128xbf16>, vector<128x128xbf16>, vector<512x128xf32> -> vector<512x128xf32>
    %42 = arith.addf %36, %41 : vector<512x128xf32>
    %43 = vector.extract_strided_slice %23 {offsets = [0, 1, 0, 0], sizes = [2, 16, 16, 128], strides = [1, 1, 1, 1]} : vector<2x18x16x128xbf16> to vector<2x16x16x128xbf16>
    %44 = vector.shape_cast %43 : vector<2x16x16x128xbf16> to vector<512x128xbf16>
    %c3 = arith.constant 3 : index
    %c0_13 = arith.constant 0 : index
    %c0_14 = arith.constant 0 : index
    %45 = vector.load %arg1[%c3, %c0_13, %c0_14] : memref<9x128x128xbf16, #tpu.memory_space<vmem>>, vector<1x128x128xbf16>
    %46 = vector.shape_cast %45 : vector<1x128x128xbf16> to vector<128x128xbf16>
    %cst_15 = arith.constant dense<0.000000e+00> : vector<512x128xf32>
    %47 = tpu.matmul %44, %46, %cst_15 {dimension_numbers = #tpu.dot_dimension_numbers<[1], [0], [0], [1], [0, 0, 1, 1], [], []>} : vector<512x128xbf16>, vector<128x128xbf16>, vector<512x128xf32> -> vector<512x128xf32>
    %48 = arith.addf %42, %47 : vector<512x128xf32>
    %49 = vector.extract_strided_slice %24 {offsets = [0, 1, 0, 0], sizes = [2, 16, 16, 128], strides = [1, 1, 1, 1]} : vector<2x18x16x128xbf16> to vector<2x16x16x128xbf16>
    %50 = vector.shape_cast %49 : vector<2x16x16x128xbf16> to vector<512x128xbf16>
    %c4 = arith.constant 4 : index
    %c0_16 = arith.constant 0 : index
    %c0_17 = arith.constant 0 : index
    %51 = vector.load %arg1[%c4, %c0_16, %c0_17] : memref<9x128x128xbf16, #tpu.memory_space<vmem>>, vector<1x128x128xbf16>
    %52 = vector.shape_cast %51 : vector<1x128x128xbf16> to vector<128x128xbf16>
    %cst_18 = arith.constant dense<0.000000e+00> : vector<512x128xf32>
    %53 = tpu.matmul %50, %52, %cst_18 {dimension_numbers = #tpu.dot_dimension_numbers<[1], [0], [0], [1], [0, 0, 1, 1], [], []>} : vector<512x128xbf16>, vector<128x128xbf16>, vector<512x128xf32> -> vector<512x128xf32>
    %54 = arith.addf %48, %53 : vector<512x128xf32>
    %55 = vector.extract_strided_slice %25 {offsets = [0, 1, 0, 0], sizes = [2, 16, 16, 128], strides = [1, 1, 1, 1]} : vector<2x18x16x128xbf16> to vector<2x16x16x128xbf16>
    %56 = vector.shape_cast %55 : vector<2x16x16x128xbf16> to vector<512x128xbf16>
    %c5 = arith.constant 5 : index
    %c0_19 = arith.constant 0 : index
    %c0_20 = arith.constant 0 : index
    %57 = vector.load %arg1[%c5, %c0_19, %c0_20] : memref<9x128x128xbf16, #tpu.memory_space<vmem>>, vector<1x128x128xbf16>
    %58 = vector.shape_cast %57 : vector<1x128x128xbf16> to vector<128x128xbf16>
    %cst_21 = arith.constant dense<0.000000e+00> : vector<512x128xf32>
    %59 = tpu.matmul %56, %58, %cst_21 {dimension_numbers = #tpu.dot_dimension_numbers<[1], [0], [0], [1], [0, 0, 1, 1], [], []>} : vector<512x128xbf16>, vector<128x128xbf16>, vector<512x128xf32> -> vector<512x128xf32>
    %60 = arith.addf %54, %59 : vector<512x128xf32>
    %61 = vector.extract_strided_slice %23 {offsets = [0, 2, 0, 0], sizes = [2, 16, 16, 128], strides = [1, 1, 1, 1]} : vector<2x18x16x128xbf16> to vector<2x16x16x128xbf16>
    %62 = vector.shape_cast %61 : vector<2x16x16x128xbf16> to vector<512x128xbf16>
    %c6 = arith.constant 6 : index
    %c0_22 = arith.constant 0 : index
    %c0_23 = arith.constant 0 : index
    %63 = vector.load %arg1[%c6, %c0_22, %c0_23] : memref<9x128x128xbf16, #tpu.memory_space<vmem>>, vector<1x128x128xbf16>
    %64 = vector.shape_cast %63 : vector<1x128x128xbf16> to vector<128x128xbf16>
    %cst_24 = arith.constant dense<0.000000e+00> : vector<512x128xf32>
    %65 = tpu.matmul %62, %64, %cst_24 {dimension_numbers = #tpu.dot_dimension_numbers<[1], [0], [0], [1], [0, 0, 1, 1], [], []>} : vector<512x128xbf16>, vector<128x128xbf16>, vector<512x128xf32> -> vector<512x128xf32>
    %66 = arith.addf %60, %65 : vector<512x128xf32>
    %67 = vector.extract_strided_slice %24 {offsets = [0, 2, 0, 0], sizes = [2, 16, 16, 128], strides = [1, 1, 1, 1]} : vector<2x18x16x128xbf16> to vector<2x16x16x128xbf16>
    %68 = vector.shape_cast %67 : vector<2x16x16x128xbf16> to vector<512x128xbf16>
    %c7 = arith.constant 7 : index
    %c0_25 = arith.constant 0 : index
    %c0_26 = arith.constant 0 : index
    %69 = vector.load %arg1[%c7, %c0_25, %c0_26] : memref<9x128x128xbf16, #tpu.memory_space<vmem>>, vector<1x128x128xbf16>
    %70 = vector.shape_cast %69 : vector<1x128x128xbf16> to vector<128x128xbf16>
    %cst_27 = arith.constant dense<0.000000e+00> : vector<512x128xf32>
    %71 = tpu.matmul %68, %70, %cst_27 {dimension_numbers = #tpu.dot_dimension_numbers<[1], [0], [0], [1], [0, 0, 1, 1], [], []>} : vector<512x128xbf16>, vector<128x128xbf16>, vector<512x128xf32> -> vector<512x128xf32>
    %72 = arith.addf %66, %71 : vector<512x128xf32>
    %73 = vector.extract_strided_slice %25 {offsets = [0, 2, 0, 0], sizes = [2, 16, 16, 128], strides = [1, 1, 1, 1]} : vector<2x18x16x128xbf16> to vector<2x16x16x128xbf16>
    %74 = vector.shape_cast %73 : vector<2x16x16x128xbf16> to vector<512x128xbf16>
    %c8 = arith.constant 8 : index
    %c0_28 = arith.constant 0 : index
    %c0_29 = arith.constant 0 : index
    %75 = vector.load %arg1[%c8, %c0_28, %c0_29] : memref<9x128x128xbf16, #tpu.memory_space<vmem>>, vector<1x128x128xbf16>
    %76 = vector.shape_cast %75 : vector<1x128x128xbf16> to vector<128x128xbf16>
    %cst_30 = arith.constant dense<0.000000e+00> : vector<512x128xf32>
    %77 = tpu.matmul %74, %76, %cst_30 {dimension_numbers = #tpu.dot_dimension_numbers<[1], [0], [0], [1], [0, 0, 1, 1], [], []>} : vector<512x128xbf16>, vector<128x128xbf16>, vector<512x128xf32> -> vector<512x128xf32>
    %78 = arith.addf %72, %77 : vector<512x128xf32>
    %c0_31 = arith.constant 0 : index
    %c0_32 = arith.constant 0 : index
    %79 = vector.load %arg2[%c0_31, %c0_32] : memref<1x128xf32, #tpu.memory_space<vmem>>, vector<1x128xf32>
    %c0_33 = arith.constant 0 : index
    %c0_34 = arith.constant 0 : index
    %80 = vector.load %arg3[%c0_33, %c0_34] : memref<1x128xf32, #tpu.memory_space<vmem>>, vector<1x128xf32>
    %cst_35 = arith.constant dense<0.000000e+00> : vector<128xf32>
    %81 = vector.multi_reduction <add>, %78, %cst_35 [0] : vector<512x128xf32> to vector<128xf32>
    %82 = vector.shape_cast %81 : vector<128xf32> to vector<1x128xf32>
    %cst_36 = arith.constant 5.120000e+02 : f32
    %83 = vector.broadcast %cst_36 : f32 to vector<1x128xf32>
    %84 = arith.divf %82, %83 : vector<1x128xf32>
    %85 = vector.broadcast %84 : vector<1x128xf32> to vector<512x128xf32>
    %86 = arith.subf %78, %85 : vector<512x128xf32>
    %87 = arith.mulf %86, %86 : vector<512x128xf32>
    %cst_37 = arith.constant dense<0.000000e+00> : vector<128xf32>
    %88 = vector.multi_reduction <add>, %87, %cst_37 [0] : vector<512x128xf32> to vector<128xf32>
    %89 = vector.shape_cast %88 : vector<128xf32> to vector<1x128xf32>
    %cst_38 = arith.constant 5.120000e+02 : f32
    %90 = vector.broadcast %cst_38 : f32 to vector<1x128xf32>
    %91 = arith.divf %89, %90 : vector<1x128xf32>
    %cst_39 = arith.constant 9.99999974E-6 : f32
    %92 = vector.broadcast %cst_39 : f32 to vector<1x128xf32>
    %93 = arith.addf %91, %92 : vector<1x128xf32>
    %94 = math.rsqrt %93 : vector<1x128xf32>
    %95 = arith.mulf %79, %94 : vector<1x128xf32>
    %96 = vector.broadcast %95 : vector<1x128xf32> to vector<512x128xf32>
    %97 = arith.mulf %86, %96 : vector<512x128xf32>
    %98 = vector.broadcast %80 : vector<1x128xf32> to vector<512x128xf32>
    %99 = arith.addf %97, %98 : vector<512x128xf32>
    %cst_40 = arith.constant 0.000000e+00 : f32
    %100 = vector.broadcast %cst_40 : f32 to vector<512x128xf32>
    %101 = arith.maximumf %99, %100 : vector<512x128xf32>
    %102 = vector.shape_cast %101 : vector<512x128xf32> to vector<2x16x16x128xf32>
    %103 = vector.extract_strided_slice %102 {offsets = [0, 1, 0, 0], sizes = [2, 1, 16, 128], strides = [1, 1, 1, 1]} : vector<2x16x16x128xf32> to vector<2x1x16x128xf32>
    %104 = vector.extract_strided_slice %102 {offsets = [0, 14, 0, 0], sizes = [2, 1, 16, 128], strides = [1, 1, 1, 1]} : vector<2x16x16x128xf32> to vector<2x1x16x128xf32>
    %105 = tpu.concatenate %103, %102, %104 in 1 : vector<2x1x16x128xf32>, vector<2x16x16x128xf32>, vector<2x1x16x128xf32> -> vector<2x18x16x128xf32>
    %106 = tpu.iota {dimensions = array<i32: 2>} : vector<1x1x16x128xi32>
    %c1_i32_41 = arith.constant 1 : i32
    %107 = tpu.dynamic_rotate %105 by %c1_i32_41 dim 2 : vector<2x18x16x128xf32>, i32 -> vector<2x18x16x128xf32>
    %c15_i32_42 = arith.constant 15 : i32
    %108 = tpu.dynamic_rotate %105 by %c15_i32_42 dim 2 : vector<2x18x16x128xf32>, i32 -> vector<2x18x16x128xf32>
    %109 = vector.extract_strided_slice %105 {offsets = [0, 0, 1, 0], sizes = [2, 18, 1, 128], strides = [1, 1, 1, 1]} : vector<2x18x16x128xf32> to vector<2x18x1x128xf32>
    %110 = vector.extract_strided_slice %105 {offsets = [0, 0, 14, 0], sizes = [2, 18, 1, 128], strides = [1, 1, 1, 1]} : vector<2x18x16x128xf32> to vector<2x18x1x128xf32>
    %c0_i32_43 = arith.constant 0 : i32
    %111 = vector.broadcast %c0_i32_43 : i32 to vector<1x1x16x128xi32>
    %112 = arith.cmpi eq, %106, %111 : vector<1x1x16x128xi32>
    %113 = vector.shape_cast %112 : vector<1x1x16x128xi1> to vector<1x1x16x128xi1>
    %114 = vector.broadcast %113 : vector<1x1x16x128xi1> to vector<2x18x16x128xi1>
    %115 = vector.shape_cast %109 : vector<2x18x1x128xf32> to vector<2x18x1x128xf32>
    %116 = vector.broadcast %115 : vector<2x18x1x128xf32> to vector<2x18x16x128xf32>
    %117 = arith.select %114, %116, %107 : vector<2x18x16x128xi1>, vector<2x18x16x128xf32>
    %c15_i32_44 = arith.constant 15 : i32
    %118 = vector.broadcast %c15_i32_44 : i32 to vector<1x1x16x128xi32>
    %119 = arith.cmpi eq, %106, %118 : vector<1x1x16x128xi32>
    %120 = vector.shape_cast %119 : vector<1x1x16x128xi1> to vector<1x1x16x128xi1>
    %121 = vector.broadcast %120 : vector<1x1x16x128xi1> to vector<2x18x16x128xi1>
    %122 = vector.shape_cast %110 : vector<2x18x1x128xf32> to vector<2x18x1x128xf32>
    %123 = vector.broadcast %122 : vector<2x18x1x128xf32> to vector<2x18x16x128xf32>
    %124 = arith.select %121, %123, %108 : vector<2x18x16x128xi1>, vector<2x18x16x128xf32>
    %125 = arith.truncf %117 : vector<2x18x16x128xf32> to vector<2x18x16x128xbf16>
    %126 = arith.truncf %105 : vector<2x18x16x128xf32> to vector<2x18x16x128xbf16>
    %127 = arith.truncf %124 : vector<2x18x16x128xf32> to vector<2x18x16x128xbf16>
    %128 = vector.extract_strided_slice %125 {offsets = [0, 0, 0, 0], sizes = [2, 16, 16, 128], strides = [1, 1, 1, 1]} : vector<2x18x16x128xbf16> to vector<2x16x16x128xbf16>
    %129 = vector.shape_cast %128 : vector<2x16x16x128xbf16> to vector<512x128xbf16>
    %c0_45 = arith.constant 0 : index
    %c0_46 = arith.constant 0 : index
    %c0_47 = arith.constant 0 : index
    %130 = vector.load %arg4[%c0_45, %c0_46, %c0_47] : memref<9x128x128xbf16, #tpu.memory_space<vmem>>, vector<1x128x128xbf16>
    %131 = vector.shape_cast %130 : vector<1x128x128xbf16> to vector<128x128xbf16>
    %cst_48 = arith.constant dense<0.000000e+00> : vector<512x128xf32>
    %132 = tpu.matmul %129, %131, %cst_48 {dimension_numbers = #tpu.dot_dimension_numbers<[1], [0], [0], [1], [0, 0, 1, 1], [], []>} : vector<512x128xbf16>, vector<128x128xbf16>, vector<512x128xf32> -> vector<512x128xf32>
    %133 = vector.extract_strided_slice %126 {offsets = [0, 0, 0, 0], sizes = [2, 16, 16, 128], strides = [1, 1, 1, 1]} : vector<2x18x16x128xbf16> to vector<2x16x16x128xbf16>
    %134 = vector.shape_cast %133 : vector<2x16x16x128xbf16> to vector<512x128xbf16>
    %c1_49 = arith.constant 1 : index
    %c0_50 = arith.constant 0 : index
    %c0_51 = arith.constant 0 : index
    %135 = vector.load %arg4[%c1_49, %c0_50, %c0_51] : memref<9x128x128xbf16, #tpu.memory_space<vmem>>, vector<1x128x128xbf16>
    %136 = vector.shape_cast %135 : vector<1x128x128xbf16> to vector<128x128xbf16>
    %cst_52 = arith.constant dense<0.000000e+00> : vector<512x128xf32>
    %137 = tpu.matmul %134, %136, %cst_52 {dimension_numbers = #tpu.dot_dimension_numbers<[1], [0], [0], [1], [0, 0, 1, 1], [], []>} : vector<512x128xbf16>, vector<128x128xbf16>, vector<512x128xf32> -> vector<512x128xf32>
    %138 = arith.addf %132, %137 : vector<512x128xf32>
    %139 = vector.extract_strided_slice %127 {offsets = [0, 0, 0, 0], sizes = [2, 16, 16, 128], strides = [1, 1, 1, 1]} : vector<2x18x16x128xbf16> to vector<2x16x16x128xbf16>
    %140 = vector.shape_cast %139 : vector<2x16x16x128xbf16> to vector<512x128xbf16>
    %c2_53 = arith.constant 2 : index
    %c0_54 = arith.constant 0 : index
    %c0_55 = arith.constant 0 : index
    %141 = vector.load %arg4[%c2_53, %c0_54, %c0_55] : memref<9x128x128xbf16, #tpu.memory_space<vmem>>, vector<1x128x128xbf16>
    %142 = vector.shape_cast %141 : vector<1x128x128xbf16> to vector<128x128xbf16>
    %cst_56 = arith.constant dense<0.000000e+00> : vector<512x128xf32>
    %143 = tpu.matmul %140, %142, %cst_56 {dimension_numbers = #tpu.dot_dimension_numbers<[1], [0], [0], [1], [0, 0, 1, 1], [], []>} : vector<512x128xbf16>, vector<128x128xbf16>, vector<512x128xf32> -> vector<512x128xf32>
    %144 = arith.addf %138, %143 : vector<512x128xf32>
    %145 = vector.extract_strided_slice %125 {offsets = [0, 1, 0, 0], sizes = [2, 16, 16, 128], strides = [1, 1, 1, 1]} : vector<2x18x16x128xbf16> to vector<2x16x16x128xbf16>
    %146 = vector.shape_cast %145 : vector<2x16x16x128xbf16> to vector<512x128xbf16>
    %c3_57 = arith.constant 3 : index
    %c0_58 = arith.constant 0 : index
    %c0_59 = arith.constant 0 : index
    %147 = vector.load %arg4[%c3_57, %c0_58, %c0_59] : memref<9x128x128xbf16, #tpu.memory_space<vmem>>, vector<1x128x128xbf16>
    %148 = vector.shape_cast %147 : vector<1x128x128xbf16> to vector<128x128xbf16>
    %cst_60 = arith.constant dense<0.000000e+00> : vector<512x128xf32>
    %149 = tpu.matmul %146, %148, %cst_60 {dimension_numbers = #tpu.dot_dimension_numbers<[1], [0], [0], [1], [0, 0, 1, 1], [], []>} : vector<512x128xbf16>, vector<128x128xbf16>, vector<512x128xf32> -> vector<512x128xf32>
    %150 = arith.addf %144, %149 : vector<512x128xf32>
    %151 = vector.extract_strided_slice %126 {offsets = [0, 1, 0, 0], sizes = [2, 16, 16, 128], strides = [1, 1, 1, 1]} : vector<2x18x16x128xbf16> to vector<2x16x16x128xbf16>
    %152 = vector.shape_cast %151 : vector<2x16x16x128xbf16> to vector<512x128xbf16>
    %c4_61 = arith.constant 4 : index
    %c0_62 = arith.constant 0 : index
    %c0_63 = arith.constant 0 : index
    %153 = vector.load %arg4[%c4_61, %c0_62, %c0_63] : memref<9x128x128xbf16, #tpu.memory_space<vmem>>, vector<1x128x128xbf16>
    %154 = vector.shape_cast %153 : vector<1x128x128xbf16> to vector<128x128xbf16>
    %cst_64 = arith.constant dense<0.000000e+00> : vector<512x128xf32>
    %155 = tpu.matmul %152, %154, %cst_64 {dimension_numbers = #tpu.dot_dimension_numbers<[1], [0], [0], [1], [0, 0, 1, 1], [], []>} : vector<512x128xbf16>, vector<128x128xbf16>, vector<512x128xf32> -> vector<512x128xf32>
    %156 = arith.addf %150, %155 : vector<512x128xf32>
    %157 = vector.extract_strided_slice %127 {offsets = [0, 1, 0, 0], sizes = [2, 16, 16, 128], strides = [1, 1, 1, 1]} : vector<2x18x16x128xbf16> to vector<2x16x16x128xbf16>
    %158 = vector.shape_cast %157 : vector<2x16x16x128xbf16> to vector<512x128xbf16>
    %c5_65 = arith.constant 5 : index
    %c0_66 = arith.constant 0 : index
    %c0_67 = arith.constant 0 : index
    %159 = vector.load %arg4[%c5_65, %c0_66, %c0_67] : memref<9x128x128xbf16, #tpu.memory_space<vmem>>, vector<1x128x128xbf16>
    %160 = vector.shape_cast %159 : vector<1x128x128xbf16> to vector<128x128xbf16>
    %cst_68 = arith.constant dense<0.000000e+00> : vector<512x128xf32>
    %161 = tpu.matmul %158, %160, %cst_68 {dimension_numbers = #tpu.dot_dimension_numbers<[1], [0], [0], [1], [0, 0, 1, 1], [], []>} : vector<512x128xbf16>, vector<128x128xbf16>, vector<512x128xf32> -> vector<512x128xf32>
    %162 = arith.addf %156, %161 : vector<512x128xf32>
    %163 = vector.extract_strided_slice %125 {offsets = [0, 2, 0, 0], sizes = [2, 16, 16, 128], strides = [1, 1, 1, 1]} : vector<2x18x16x128xbf16> to vector<2x16x16x128xbf16>
    %164 = vector.shape_cast %163 : vector<2x16x16x128xbf16> to vector<512x128xbf16>
    %c6_69 = arith.constant 6 : index
    %c0_70 = arith.constant 0 : index
    %c0_71 = arith.constant 0 : index
    %165 = vector.load %arg4[%c6_69, %c0_70, %c0_71] : memref<9x128x128xbf16, #tpu.memory_space<vmem>>, vector<1x128x128xbf16>
    %166 = vector.shape_cast %165 : vector<1x128x128xbf16> to vector<128x128xbf16>
    %cst_72 = arith.constant dense<0.000000e+00> : vector<512x128xf32>
    %167 = tpu.matmul %164, %166, %cst_72 {dimension_numbers = #tpu.dot_dimension_numbers<[1], [0], [0], [1], [0, 0, 1, 1], [], []>} : vector<512x128xbf16>, vector<128x128xbf16>, vector<512x128xf32> -> vector<512x128xf32>
    %168 = arith.addf %162, %167 : vector<512x128xf32>
    %169 = vector.extract_strided_slice %126 {offsets = [0, 2, 0, 0], sizes = [2, 16, 16, 128], strides = [1, 1, 1, 1]} : vector<2x18x16x128xbf16> to vector<2x16x16x128xbf16>
    %170 = vector.shape_cast %169 : vector<2x16x16x128xbf16> to vector<512x128xbf16>
    %c7_73 = arith.constant 7 : index
    %c0_74 = arith.constant 0 : index
    %c0_75 = arith.constant 0 : index
    %171 = vector.load %arg4[%c7_73, %c0_74, %c0_75] : memref<9x128x128xbf16, #tpu.memory_space<vmem>>, vector<1x128x128xbf16>
    %172 = vector.shape_cast %171 : vector<1x128x128xbf16> to vector<128x128xbf16>
    %cst_76 = arith.constant dense<0.000000e+00> : vector<512x128xf32>
    %173 = tpu.matmul %170, %172, %cst_76 {dimension_numbers = #tpu.dot_dimension_numbers<[1], [0], [0], [1], [0, 0, 1, 1], [], []>} : vector<512x128xbf16>, vector<128x128xbf16>, vector<512x128xf32> -> vector<512x128xf32>
    %174 = arith.addf %168, %173 : vector<512x128xf32>
    %175 = vector.extract_strided_slice %127 {offsets = [0, 2, 0, 0], sizes = [2, 16, 16, 128], strides = [1, 1, 1, 1]} : vector<2x18x16x128xbf16> to vector<2x16x16x128xbf16>
    %176 = vector.shape_cast %175 : vector<2x16x16x128xbf16> to vector<512x128xbf16>
    %c8_77 = arith.constant 8 : index
    %c0_78 = arith.constant 0 : index
    %c0_79 = arith.constant 0 : index
    %177 = vector.load %arg4[%c8_77, %c0_78, %c0_79] : memref<9x128x128xbf16, #tpu.memory_space<vmem>>, vector<1x128x128xbf16>
    %178 = vector.shape_cast %177 : vector<1x128x128xbf16> to vector<128x128xbf16>
    %cst_80 = arith.constant dense<0.000000e+00> : vector<512x128xf32>
    %179 = tpu.matmul %176, %178, %cst_80 {dimension_numbers = #tpu.dot_dimension_numbers<[1], [0], [0], [1], [0, 0, 1, 1], [], []>} : vector<512x128xbf16>, vector<128x128xbf16>, vector<512x128xf32> -> vector<512x128xf32>
    %180 = arith.addf %174, %179 : vector<512x128xf32>
    %c0_81 = arith.constant 0 : index
    %c0_82 = arith.constant 0 : index
    %181 = vector.load %arg5[%c0_81, %c0_82] : memref<1x128xf32, #tpu.memory_space<vmem>>, vector<1x128xf32>
    %c0_83 = arith.constant 0 : index
    %c0_84 = arith.constant 0 : index
    %182 = vector.load %arg6[%c0_83, %c0_84] : memref<1x128xf32, #tpu.memory_space<vmem>>, vector<1x128xf32>
    %cst_85 = arith.constant dense<0.000000e+00> : vector<128xf32>
    %183 = vector.multi_reduction <add>, %180, %cst_85 [0] : vector<512x128xf32> to vector<128xf32>
    %184 = vector.shape_cast %183 : vector<128xf32> to vector<1x128xf32>
    %cst_86 = arith.constant 5.120000e+02 : f32
    %185 = vector.broadcast %cst_86 : f32 to vector<1x128xf32>
    %186 = arith.divf %184, %185 : vector<1x128xf32>
    %187 = vector.broadcast %186 : vector<1x128xf32> to vector<512x128xf32>
    %188 = arith.subf %180, %187 : vector<512x128xf32>
    %189 = arith.mulf %188, %188 : vector<512x128xf32>
    %cst_87 = arith.constant dense<0.000000e+00> : vector<128xf32>
    %190 = vector.multi_reduction <add>, %189, %cst_87 [0] : vector<512x128xf32> to vector<128xf32>
    %191 = vector.shape_cast %190 : vector<128xf32> to vector<1x128xf32>
    %cst_88 = arith.constant 5.120000e+02 : f32
    %192 = vector.broadcast %cst_88 : f32 to vector<1x128xf32>
    %193 = arith.divf %191, %192 : vector<1x128xf32>
    %cst_89 = arith.constant 9.99999974E-6 : f32
    %194 = vector.broadcast %cst_89 : f32 to vector<1x128xf32>
    %195 = arith.addf %193, %194 : vector<1x128xf32>
    %196 = math.rsqrt %195 : vector<1x128xf32>
    %197 = arith.mulf %181, %196 : vector<1x128xf32>
    %198 = vector.broadcast %197 : vector<1x128xf32> to vector<512x128xf32>
    %199 = arith.mulf %188, %198 : vector<512x128xf32>
    %200 = vector.broadcast %182 : vector<1x128xf32> to vector<512x128xf32>
    %201 = arith.addf %199, %200 : vector<512x128xf32>
    %202 = vector.shape_cast %201 : vector<512x128xf32> to vector<2x16x16x128xf32>
    %203 = arith.addf %202, %0 : vector<2x16x16x128xf32>
    %c0_90 = arith.constant 0 : index
    %c0_91 = arith.constant 0 : index
    %c0_92 = arith.constant 0 : index
    %c0_93 = arith.constant 0 : index
    %204 = vector.load %arg7[%c0_90, %c0_91, %c0_92, %c0_93] : memref<2x16x16x128xf32, #tpu.memory_space<vmem>>, vector<2x16x16x128xf32>
    tpu.vector_store %arg7[%c0_90, %c0_91, %c0_92, %c0_93], %203 {strides = array<i32>} : memref<2x16x16x128xf32, #tpu.memory_space<vmem>>, vector<2x16x16x128xf32>,
    return
  }
}

</mosaic_0001>

<bundles_post_ra>
// kernel: resnet_block_nhwc.1
= control target key start
LH: loop header
LB: loop body
LE: loop exit
PB: predicated region body
PF: predicated region fallthrough
CT: control target
= control target key end

     0   :  { %12 = vsyncpa [#allocation3], 0  ;;  %s19238_s0 = inlined_call_operand.hbm [shape: f32[2,16,16,128], index: 0, kind: input, shape index: {}]   ;;  %s19239_s1 = inlined_call_operand.hbm [shape: bf16[9,128,128], index: 1, kind: input, shape index: {}]   ;;  %s19240_s2 = inlined_call_operand.vmem [shape: f32[1,128], index: 2, kind: input, shape index: {}]   ;;  %s19241_s3 = inlined_call_operand.hbm [shape: f32[1,128], index: 3, kind: input, shape index: {}]   ;;  %s19242_s4 = inlined_call_operand.hbm [shape: bf16[9,128,128], index: 4, kind: input, shape index: {}]   ;;  %s19243_s5 = inlined_call_operand.vmem [shape: f32[1,128], index: 5, kind: input, shape index: {}]   ;;  %s19244_s6 = inlined_call_operand.vmem [shape: f32[1,128], index: 6, kind: input, shape index: {}]   ;;  %s19245_s7 = inlined_call_operand.hbm [shape: f32[2,16,16,128], index: 7, kind: output, shape index: {}]  }
   0x1   :  { %13 = vsyncpa [#allocation6], 0 }
   0x2   :  { %14 = vsyncpa [#allocation9], 0 }
   0x3   :  { %15 = vsyncpa [#allocation4], 0  ;;  %s12615_s24 = smov [#allocation5]  }
   0x4   :  { %s33_s25 = sshll.u32 %s12615_s24, 4  ;;  %s34_s25 = int_to_ptr.vmem [resolvable:$true] %s33_s25 }
   0x5   :  { %s12515_s26 = scalar_lea.vmem %s34_s25, 9216  ;;  %p12520_p1 = scmp.lt.s32.totalorder %s34_s25, %s34_s25 }
   0x6   :  { %p12516_p0 = scmp.ne.s32.totalorder %s34_s25, %s12515_s26  ;;  %p12521_p2 = scmp.lt.s32.totalorder %s12515_s26, %s12515_s26 }
   0x8   :  { %p12522_p3 = por %p12521_p2, %p12520_p1 }
   0xa   :  { %p12523_p4 = pnand %p12522_p3, %p12516_p0 }
   0xc   :  { %12526 = shalt.err (!%p12523_p4)
}
   0xd   :  { %s12616_s27 = smov 64   ;;  %s12617_s28 = smov 4  }
   0xe   :  { %39 = dma.hbm_to_vmem [thread:$0]  %s19239_s1, 9216, %s34_s25, [#allocation6], %s12616_s27, %s12616_s27, %s12617_s28  }
   0xf   :  { %s12618_s8 = smov [#allocation2]  }
  0x10   :  { %s21_s9 = sshll.u32 %s12618_s8, 4  ;;  %s22_s9 = int_to_ptr.vmem [resolvable:$true] %s21_s9 }
  0x11   :  { %s12535_s10 = scalar_lea.vmem %s22_s9, 8192  ;;  %p12540_p6 = scmp.lt.s32.totalorder %s22_s9, %s22_s9 }
  0x12   :  { %p12536_p5 = scmp.ne.s32.totalorder %s22_s9, %s12535_s10  ;;  %p12541_p7 = scmp.lt.s32.totalorder %s12535_s10, %s12535_s10 }
  0x14   :  { %p12542_p8 = por %p12541_p7, %p12540_p6 }
  0x16   :  { %p12543_p9 = pnand %p12542_p8, %p12536_p5 }
  0x18   :  { %12546 = shalt.err (!%p12543_p9)
}
  0x19   :  { %s12619_s11 = smov 128   ;;  %s12620_s12 = smov 8  }
  0x1a   :  { %27 = dma.hbm_to_vmem [thread:$0]  %s19238_s0, 8192, %s22_s9, [#allocation3], %s12619_s11, %s12619_s11, %s12620_s12  }
  0x1b   :  { %s12621_s1 = smov [#allocation7]   ;;  %s12622_s16 = smov [#allocation8]  }
  0x1c   :  { %s48_s15 = sshll.u32 %s12621_s1, 4  ;;  %s57_s17 = sshll.u32 %s12622_s16, 4  ;;  %s49_s15 = int_to_ptr.vmem [resolvable:$true] %s48_s15  ;;  %s58_s17 = int_to_ptr.vmem [resolvable:$true] %s57_s17 }
  0x1d   :  { %s12555_s18 = scalar_lea.vmem %s49_s15, 16  ;;  %s12559_s19 = scalar_lea.vmem %s49_s15, 32 }
  0x1e   :  { %p12556_p10 = scmp.ne.s32.totalorder %s49_s15, %s12555_s18  ;;  %p12560_p11 = scmp.lt.s32.totalorder %s49_s15, %s49_s15 }
  0x1f   :  { %p12561_p12 = scmp.lt.s32.totalorder %s12559_s19, %s12555_s18 }
  0x21   :  { %p12562_p13 = por %p12561_p12, %p12560_p11 }
  0x23   :  { %p12563_p0 = pnand %p12562_p13, %p12556_p10 }
  0x25   :  { %12566 = shalt.err (!%p12563_p0)
}
  0x26   :  { %51 = dma.hbm_to_vmem [thread:$0]  %s19241_s3, 16, %s49_s15, [#allocation6]  }
  0x27   :  { %s12575_s22 = scalar_lea.vmem %s58_s17, 9216  ;;  %p12580_p2 = scmp.lt.s32.totalorder %s58_s17, %s58_s17 }
  0x28   :  { %p12576_p1 = scmp.ne.s32.totalorder %s58_s17, %s12575_s22  ;;  %p12581_p3 = scmp.lt.s32.totalorder %s12575_s22, %s12575_s22 }
  0x2a   :  { %p12582_p4 = por %p12581_p3, %p12580_p2 }
  0x2c   :  { %p12583_p5 = pnand %p12582_p4, %p12576_p1 }
  0x2e   :  { %12586 = shalt.err (!%p12583_p5)
}
  0x2f   :  { %63 = dma.hbm_to_vmem [thread:$0]  %s19242_s4, 9216, %s58_s17, [#allocation9], %s12616_s27, %s12616_s27, %s12617_s28  }
  0x30   :  { %12607 = dma.done.wait [#allocation3], 8192  }
  0x31   :  { %12608 = vsyncadd [#allocation3], 4294959104 }
  0x32   :  { %12609 = dma.done.wait [#allocation6], 9232  }
  0x33   :  { %12610 = vsyncadd [#allocation6], 4294958064 }
  0x34   :  { %12611 = dma.done.wait [#allocation9], 9216  }
  0x35   :  { %12612 = vsyncadd [#allocation9], 4294958080  ;;  %v12253_v0 = vld [vmem:[#allocation5 + $0x78] sm:$0xff]   ;;  %v12255_v2 = vld [vmem:[#allocation5 + $0x70] sm:$0xff]   ;;  %v145_v6 = vlaneseq }
  0x36   :  { %v12254_v1 = vld [vmem:[#allocation5 + $0x38] sm:$0xff]   ;;  %10804 = vmatprep.subr.bf16.mxu0 %v12253_v0  ;;  %v12256_v3 = vld [vmem:[#allocation5 + $0x30] sm:$0xff]   ;;  %v12257_v4 = vld [vmem:[#allocation5 + $0x68] sm:$0xff]  }
  0x37   :  { %10884 = vmatprep.subr.bf16.mxu1 %v12254_v1  ;;  %10805 = vmatpush3.bf16.msra.mxu0 %v12253_v0  ;;  %v12258_v5 = vld [vmem:[#allocation5 + $0x28] sm:$0xff]   ;;  %v12259_v7 = vld [vmem:[#allocation5 + $0x60] sm:$0xff]   ;;  %v12685_v9 = vshrl.u32 %v145_v6, 7  ;;  %v12261_v10 = vld [vmem:[#allocation5 + $0x58] sm:$0xff]  }
  0x38   :  { %10885 = vmatpush3.bf16.msra.mxu1 %v12254_v1  ;;  %10806 = vmatprep.subr.bf16.mxu0 %v12255_v2  ;;  %v12260_v8 = vld [vmem:[#allocation5 + $0x20] sm:$0xff]   ;;  %v12262_v11 = vld [vmem:[#allocation5 + $0x18] sm:$0xff]   ;;  %v12263_v13 = vld [vmem:[#allocation5 + $0x50] sm:$0xff]  }
  0x39   :  { %10886 = vmatprep.subr.bf16.mxu1 %v12256_v3  ;;  %19706 = vst [vmem:[#allocation15_spill] sm:$0xff] %v12685_v9  ;;  %v12688_v12 = vsub.s32 1, %v12685_v9  ;;  %v83_v14 = vld [vmem:[#allocation2 + $0x10] sm:$0xff]  ;;  %v84_v15 = vld [vmem:[#allocation2 + $0x18] sm:$0xff]  ;;  %vm212_vm0 = vcmp.lt.s32.totalorder %v12685_v9, 1  ;;  %vm406_vm1 = vcmp.eq.s32.totalorder %v12685_v9, 0 }
  0x3a   :  { %v12264_v16 = vld [vmem:[#allocation5 + $0x10] sm:$0xff]   ;;  %v12692_v17 = vpack.c.bf16 %v84_v15, %v83_v14  ;;  %v148_v18 = vrot.slane %v83_v14, 7  ;;  %v180_v19 = vrot.slane %v84_v15, 7  ;;  %v81_v21 = vld [vmem:[#allocation2] sm:$0xff]  ;;  %v82_v22 = vld [vmem:[#allocation2 + $0x8] sm:$0xff]  ;;  %vm341_vm2 = vcmp.lt.s32.totalorder %v12685_v9, 7 }
  0x3b   :  { %10807 = vmatpush3.bf16.msra.mxu0 %v12255_v2  ;;  %19707 = vst [vmem:[#allocation16_spill] sm:$0xff] %v12688_v12  ;;  %v415_v20 = vrot.slane %v83_v14, %v12688_v12  ;;  %v12265_v25 = vld [vmem:[#allocation5 + $0x48] sm:$0xff]   ;;  %v149_v29 = vrot.slane %v81_v21, 7  ;;  %v181_v30 = vrot.slane %v82_v22, 7  ;;  %v12267_v31 = vld [vmem:[#allocation5 + $0x40] sm:$0xff]   ;;  %v419_v32 = vrot.slane %v81_v21, %v12688_v12  ;;  %v87_v37 = vld [vmem:[#allocation2 + $0x30] sm:$0xff] }
  0x3c   :  { %10887 = vmatpush3.bf16.msra.mxu1 %v12256_v3  ;;  %10808 = vmatprep.subr.bf16.mxu0 %v12257_v4  ;;  %19708 = vst [vmem:[#allocation17_spill] sm:$0xff] %v12692_v17  ;;  %v213_v23 = vsel %vm212_vm0, %v148_v18, %v180_v19  ;;  %v245_v24 = vsel %vm212_vm0, %v180_v19, %v148_v18  ;;  %v12266_v27 = vld [vmem:[#allocation5 + $0x8] sm:$0xff]   ;;  %v12268_v33 = vld [vmem:[#allocation5] sm:$0xff]   ;;  %v88_v38 = vld [vmem:[#allocation2 + $0x38] sm:$0xff]  ;;  %v151_v45 = vrot.slane %v87_v37, 7 }
  0x3d   :  { %10888 = vmatprep.subr.bf16.mxu1 %v12258_v5  ;;  %10820 = vmatprep.mubr.bf16.mxu0 %v12692_v17  ;;  %v540_v26 = vsel %vm406_vm1, %v415_v20, %v245_v24  ;;  %v246_v34 = vsel %vm212_vm0, %v181_v30, %v149_v29  ;;  %v85_v35 = vld [vmem:[#allocation2 + $0x20] sm:$0xff]  ;;  %v86_v36 = vld [vmem:[#allocation2 + $0x28] sm:$0xff]  ;;  %v214_v39 = vsel %vm212_vm0, %v149_v29, %v181_v30  ;;  %v12269_v41 = vld [vmem:[#allocation5 + $0xb8] sm:$0xff]   ;;  %v183_v46 = vrot.slane %v88_v38, 7 }
  0x3e   :  { %v12702_v28 = vpack.c.bf16 %v213_v23, %v540_v26  ;;  %v542_v40 = vsel %vm406_vm1, %v419_v32, %v246_v34  ;;  %v150_v42 = vrot.slane %v85_v35, 7  ;;  %v182_v43 = vrot.slane %v86_v36, 7  ;;  %v89_v51 = vld [vmem:[#allocation2 + $0x40] sm:$0xff]  ;;  %v12270_v52 = vld [vmem:[#allocation5 + $0xb0] sm:$0xff]   ;;  %v90_v54 = vld [vmem:[#allocation2 + $0x48] sm:$0xff] }
  0x3f   :  { %10809 = vmatpush3.bf16.msra.mxu0 %v12257_v4  ;;  %v12712_v44 = vpack.c.bf16 %v82_v22, %v81_v21  ;;  %v12714_v47 = vpack.c.bf16 %v214_v39, %v542_v40  ;;  %v423_v48 = vrot.slane %v85_v35, %v12688_v12  ;;  %v427_v50 = vrot.slane %v87_v37, %v12688_v12  ;;  %v91_v55 = vld [vmem:[#allocation2 + $0x50] sm:$0xff]  ;;  %v92_v56 = vld [vmem:[#allocation2 + $0x58] sm:$0xff]  ;;  %v12271_v59 = vld [vmem:[#allocation5 + $0xa8] sm:$0xff]  }
  0x40   :  { %10889 = vmatpush3.bf16.msra.mxu1 %v12258_v5  ;;  %10810 = vmatprep.subr.bf16.mxu0 %v12259_v7  ;;  %19709 = vst [vmem:[#allocation18_spill] sm:$0xff] %v12702_v28  ;;  %v247_v49 = vsel %vm212_vm0, %v182_v43, %v150_v42  ;;  %v248_v53 = vsel %vm212_vm0, %v183_v46, %v151_v45  ;;  %v152_v62 = vrot.slane %v89_v51, 7  ;;  %v184_v63 = vrot.slane %v90_v54, 7  ;;  %v12276_v5 = vld [vmem:[#allocation5 + $0xf8] sm:$0xff]   ;;  %v12748_v14 = vld [vmem:[#allocation2 + $0x70] sm:$0xff]  ;;  %v12272_v15 = vld [vmem:[#allocation5 + $0xa0] sm:$0xff]  }
  0x41   :  { %10890 = vmatprep.subr.bf16.mxu1 %v12260_v8  ;;  %10900 = vmatprep.mubr.bf16.mxu1 %v12702_v28  ;;  %19710 = vst [vmem:[#allocation19_spill] sm:$0xff] %v12712_v44  ;;  %v215_v57 = vsel %vm212_vm0, %v150_v42, %v182_v43  ;;  %v544_v58 = vsel %vm406_vm1, %v423_v48, %v247_v49  ;;  %v153_v1 = vrot.slane %v91_v55, 7  ;;  %v185_v2 = vrot.slane %v92_v56, 7  ;;  %v96_v19 = vld [vmem:[#allocation2 + $0x78] sm:$0xff]  ;;  %v12278_v20 = vld [vmem:[#allocation5 + $0xe8] sm:$0xff]   ;;  %v12782_v40 = vld [vmem:[#allocation2 + $0x90] sm:$0xff] }
  0x42   :  { %v216_v60 = vsel %vm212_vm0, %v151_v45, %v183_v46  ;;  %v546_v61 = vsel %vm406_vm1, %v427_v50, %v248_v53  ;;  %v12734_v0 = vpack.c.bf16 %v86_v36, %v85_v35  ;;  %v12736_v3 = vpack.c.bf16 %v215_v57, %v544_v58  ;;  %v12776_v36 = vld [vmem:[#allocation2 + $0x80] sm:$0xff]  ;;  %v100_v45 = vld [vmem:[#allocation2 + $0x98] sm:$0xff] }
  0x43   :  { %10811 = vmatpush3.bf16.msra.mxu0 %v12259_v7  ;;  %v12738_v4 = vpack.c.bf16 %v88_v38, %v87_v37  ;;  %v12740_v6 = vpack.c.bf16 %v216_v60, %v546_v61  ;;  %v431_v7 = vrot.slane %v89_v51, %v12688_v12  ;;  %v250_v18 = vsel %vm212_vm0, %v185_v2, %v153_v1  ;;  %v98_v37 = vld [vmem:[#allocation2 + $0x88] sm:$0xff]  ;;  %v12279_v42 = vld [vmem:[#allocation5 + $0xe0] sm:$0xff]   ;;  %v12281_v46 = vld [vmem:[#allocation5 + $0xd8] sm:$0xff]  }
  0x44   :  { %10891 = vmatpush3.bf16.msra.mxu1 %v12260_v8  ;;  %10812 = vmatprep.subr.bf16.mxu0 %v12261_v10  ;;  %19711 = vst [vmem:[#allocation20_spill] sm:$0xff] %v12734_v0  ;;  %19712 = vst [vmem:[#allocation21_spill] sm:$0xff] %v12736_v3  ;;  %v12743_v8 = vld [vmem:[#allocation2 + $0x60] sm:$0xff]  ;;  %v217_v21 = vsel %vm212_vm0, %v152_v62, %v184_v63  ;;  %v218_v23 = vsel %vm212_vm0, %v153_v1, %v185_v2  ;;  %v155_v30 = vrot.slane %v12748_v14, 7 }
  0x45   :  { %10892 = vmatprep.subr.bf16.mxu1 %v12262_v11  ;;  %19713 = vst [vmem:[#allocation22_spill] sm:$0xff] %v12738_v4  ;;  %19714 = vst [vmem:[#allocation23_spill] sm:$0xff] %v12740_v6  ;;  %v12765_v29 = vpack.c.bf16 %v90_v54, %v89_v51  ;;  %v439_v35 = vrot.slane %v12743_v8, %v12688_v12  ;;  %v443_v39 = vrot.slane %v12748_v14, %v12688_v12  ;;  %v12275_v54 = vld [vmem:[#allocation5 + $0x88] sm:$0xff]   ;;  %v101_v60 = vld [vmem:[#allocation2 + $0xa0] sm:$0xff] }
  0x46   :  { %v156_v50 = vrot.slane %v12776_v36, 7  ;;  %v188_v53 = vrot.slane %v98_v37, 7  ;;  %v189_v57 = vrot.slane %v100_v45, 7  ;;  %v12280_v1 = vld [vmem:[#allocation5 + $0x80] sm:$0xff]  }
  0x47   :  { %10813 = vmatpush3.bf16.msra.mxu0 %v12261_v10  ;;  %v94_v10 = vld [vmem:[#allocation2 + $0x68] sm:$0xff]  ;;  %19715 = vst [vmem:[#allocation24_spill] sm:$0xff] %v12765_v29 }
  0x48   :  { %10893 = vmatpush3.bf16.msra.mxu1 %v12262_v11  ;;  %10814 = vmatprep.subr.bf16.mxu0 %v12263_v13  ;;  %v249_v11 = vsel %vm212_vm0, %v184_v63, %v152_v62  ;;  %v186_v26 = vrot.slane %v94_v10, 7  ;;  %v447_v62 = vrot.slane %v12776_v36, %v12688_v12  ;;  %v102_v63 = vld [vmem:[#allocation2 + $0xa8] sm:$0xff]  ;;  %v253_v2 = vsel %vm212_vm0, %v188_v53, %v156_v50 }
  0x49   :  { %10894 = vmatprep.subr.bf16.mxu1 %v12264_v16  ;;  %v548_v22 = vsel %vm406_vm1, %v431_v7, %v249_v11  ;;  %v103_v7 = vld [vmem:[#allocation2 + $0xb0] sm:$0xff]  ;;  %v104_v11 = vld [vmem:[#allocation2 + $0xb8] sm:$0xff] }
  0x4a   :  { %v12768_v32 = vpack.c.bf16 %v217_v21, %v548_v22  ;;  %v12830_v21 = vld [vmem:[#allocation5 + $0x138] sm:$0xff]   ;;  %v12833_v22 = vpack.c.bf16 %v98_v37, %v12776_v36  ;;  %v459_v37 = vrot.slane %v103_v7, %v12688_v12 }
  0x4b   :  { %10815 = vmatpush3.bf16.msra.mxu0 %v12263_v13  ;;  %v435_v13 = vrot.slane %v91_v55, %v12688_v12 }
  0x4c   :  { %10895 = vmatpush3.bf16.msra.mxu1 %v12264_v16  ;;  %10816 = vmatprep.subr.bf16.mxu0 %v12265_v25  ;;  %v12277_v16 = vld [vmem:[#allocation5 + $0xf0] sm:$0xff]   ;;  %19716 = vst [vmem:[#allocation25_spill] sm:$0xff] %v12768_v32  ;;  %19723 = vst [vmem:[#allocation32_spill] sm:$0xff] %v12833_v22 }
  0x4d   :  { %10896 = vmatprep.subr.bf16.mxu1 %v12266_v27  ;;  %v550_v24 = vsel %vm406_vm1, %v435_v13, %v250_v18  ;;  %v12283_v13 = vld [vmem:[#allocation5 + $0xc8] sm:$0xff]  }
  0x4e   :  { %v12772_v34 = vpack.c.bf16 %v218_v23, %v550_v24  ;;  %v159_v23 = vrot.slane %v103_v7, 7  ;;  %v191_v24 = vrot.slane %v104_v11, 7 }
  0x4f   :  { %10817 = vmatpush3.bf16.msra.mxu0 %v12265_v25  ;;  %v154_v25 = vrot.slane %v12743_v8, 7 }
  0x50   :  { %10897 = vmatpush3.bf16.msra.mxu1 %v12266_v27  ;;  %10818 = vmatprep.subr.bf16.mxu0 %v12267_v31  ;;  %v12273_v27 = vld [vmem:[#allocation5 + $0x98] sm:$0xff]   ;;  %19718 = vst [vmem:[#allocation27_spill] sm:$0xff] %v12772_v34 }
  0x51   :  { %10898 = vmatprep.subr.bf16.mxu1 %v12268_v33  ;;  %v251_v38 = vsel %vm212_vm0, %v186_v26, %v154_v25  ;;  %v219_v48 = vsel %vm212_vm0, %v154_v25, %v186_v26  ;;  %v12838_v26 = vpack.c.bf16 %v100_v45, %v12782_v40  ;;  %v224_v45 = vsel %vm212_vm0, %v159_v23, %v191_v24 }
  0x52   :  { %v552_v49 = vsel %vm406_vm1, %v439_v35, %v251_v38  ;;  %v12284_v35 = vld [vmem:[#allocation5 + $0xc0] sm:$0xff]   ;;  %v106_v38 = vld [vmem:[#allocation2 + $0xc8] sm:$0xff] }
  0x53   :  { %10819 = vmatpush3.bf16.msra.mxu0 %v12267_v31  ;;  %v187_v31 = vrot.slane %v96_v19, 7  ;;  %v12803_v58 = vpack.c.bf16 %v219_v48, %v552_v49  ;;  %19725 = vst [vmem:[#allocation34_spill] sm:$0xff] %v12838_v26  ;;  %v192_v49 = vrot.slane %v106_v38, 7 }
  0x54   :  { %10899 = vmatpush3.bf16.msra.mxu1 %v12268_v33  ;;  %10964 = vmatprep.subr.bf16.mxu0 %v12269_v41  ;;  %v12770_v33 = vpack.c.bf16 %v92_v56, %v91_v55  ;;  %v12800_v55 = vpack.c.bf16 %v94_v10, %v12743_v8  ;;  %v157_v56 = vrot.slane %v12782_v40, 7  ;;  %v12282_v8 = vld [vmem:[#allocation5 + $0xd0] sm:$0xff]  }
  0x55   :  { %11044 = vmatprep.subr.bf16.mxu1 %v12276_v5  ;;  %v252_v43 = vsel %vm212_vm0, %v187_v31, %v155_v30  ;;  %v220_v51 = vsel %vm212_vm0, %v155_v30, %v187_v31  ;;  %19720 = vst [vmem:[#allocation29_spill] sm:$0xff] %v12803_v58  ;;  %v455_v30 = vrot.slane %v101_v60, %v12688_v12  ;;  %v105_v31 = vld [vmem:[#allocation2 + $0xc0] sm:$0xff] }
  0x56   :  { %10821 = vmatmul.mubr.bf16.vlgmr.msra.gmra.mxu0 %v12712_v44  ;;  %19717 = vst [vmem:[#allocation26_spill] sm:$0xff] %v12770_v33  ;;  %19719 = vst [vmem:[#allocation28_spill] sm:$0xff] %v12800_v55  ;;  %v254_v10 = vsel %vm212_vm0, %v189_v57, %v157_v56  ;;  %v222_v18 = vsel %vm212_vm0, %v157_v56, %v189_v57  ;;  %v160_v48 = vrot.slane %v105_v31, 7  ;;  %v13159_v44 = vsub.s32 6, %v12685_v9 }
  0x57   :  { %10901 = vmatmul.mubr.bf16.vlgmr.msra.gmra.mxu1 %v12714_v47  ;;  %10965 = vmatpush3.bf16.msra.mxu0 %v12269_v41  ;;  %v12274_v41 = vld [vmem:[#allocation5 + $0x90] sm:$0xff]   ;;  %v463_v57 = vrot.slane %v105_v31, %v12688_v12 }
  0x58   :  { %10824 = vmatprep.mubr.bf16.mxu0 %v12692_v17  ;;  %10904 = vmatprep.mubr.bf16.mxu1 %v12702_v28  ;;  %19764 = vst [vmem:[#allocation73_spill] sm:$0xff] %v13159_v44 }
  0x59   :  { %10966 = vmatprep.subr.bf16.mxu0 %v12270_v52  ;;  %11045 = vmatpush3.bf16.msra.mxu1 %v12276_v5  ;;  %v451_v5 = vrot.slane %v12782_v40, %v12688_v12  ;;  %v107_v40 = vld [vmem:[#allocation2 + $0xd0] sm:$0xff] }
  0x5a   :  { %11046 = vmatprep.subr.bf16.mxu1 %v12277_v16 }
  0x5b   :  { %10967 = vmatpush3.bf16.msra.mxu0 %v12270_v52  ;;  %v554_v52 = vsel %vm406_vm1, %v443_v39, %v252_v43  ;;  %v256_v39 = vsel %vm212_vm0, %v191_v24, %v159_v23 }
  0x5c   :  { %10968 = vmatprep.subr.bf16.mxu0 %v12271_v59  ;;  %v12808_v61 = vpack.c.bf16 %v220_v51, %v554_v52  ;;  %v161_v51 = vrot.slane %v107_v40, 7 }
  0x5d   :  { %11047 = vmatpush3.bf16.msra.mxu1 %v12277_v16  ;;  %v158_v16 = vrot.slane %v101_v60, 7 }
  0x5e   :  { %10825 = vmatmul.mubr.bf16.gmra.mxu0 %v12734_v0  ;;  %11048 = vmatprep.subr.bf16.mxu1 %v12278_v20  ;;  %19722 = vst [vmem:[#allocation31_spill] sm:$0xff] %v12808_v61 }
  0x5f   :  { %10905 = vmatmul.mubr.bf16.gmra.mxu1 %v12736_v3  ;;  %10828 = vmatprep.mubr.bf16.mxu0 %v12738_v4 }
  0x60   :  { %10908 = vmatprep.mubr.bf16.mxu1 %v12740_v6  ;;  %10969 = vmatpush3.bf16.msra.mxu0 %v12271_v59  ;;  %v12806_v59 = vpack.c.bf16 %v96_v19, %v12748_v14  ;;  %v221_v14 = vsel %vm212_vm0, %v156_v50, %v188_v53  ;;  %v558_v19 = vsel %vm406_vm1, %v451_v5, %v254_v10  ;;  %v110_v5 = vld [vmem:[#allocation2 + $0xe8] sm:$0xff] }
  0x61   :  { %10970 = vmatprep.subr.bf16.mxu0 %v12272_v15  ;;  %11049 = vmatpush3.bf16.msra.mxu1 %v12278_v20  ;;  %v190_v20 = vrot.slane %v102_v63, 7  ;;  %v12861_v50 = vpack.c.bf16 %v102_v63, %v101_v60  ;;  %v115_v63 = vld [vmem:[#allocation2 + $0x110] sm:$0xff] }
  0x62   :  { %11050 = vmatprep.subr.bf16.mxu1 %v12279_v42  ;;  %19721 = vst [vmem:[#allocation30_spill] sm:$0xff] %v12806_v59 }
  0x63   :  { %v255_v36 = vsel %vm212_vm0, %v190_v20, %v158_v16  ;;  %19727 = vst [vmem:[#allocation36_spill] sm:$0xff] %v12861_v50 }
  0x64   :  { %10971 = vmatpush3.bf16.msra.mxu0 %v12272_v15  ;;  %v556_v15 = vsel %vm406_vm1, %v447_v62, %v253_v2  ;;  %v560_v43 = vsel %vm406_vm1, %v455_v30, %v255_v36  ;;  %v109_v62 = vld [vmem:[#allocation2 + $0xe0] sm:$0xff]  ;;  %v467_v2 = vrot.slane %v107_v40, %v12688_v12  ;;  %v479_v36 = vrot.slane %v115_v63, %v12688_v12 }
  0x65   :  { %10972 = vmatprep.subr.bf16.mxu0 %v12273_v27  ;;  %11051 = vmatpush3.bf16.msra.mxu1 %v12279_v42  ;;  %v12835_v25 = vpack.c.bf16 %v221_v14, %v556_v15  ;;  %v223_v42 = vsel %vm212_vm0, %v158_v16, %v190_v20  ;;  %v162_v14 = vrot.slane %v109_v62, 7  ;;  %v194_v15 = vrot.slane %v110_v5, 7 }
  0x66   :  { %10829 = vmatmul.mubr.bf16.gmra.mxu0 %v12765_v29  ;;  %11052 = vmatprep.subr.bf16.mxu1 %v12281_v46  ;;  %v12863_v53 = vpack.c.bf16 %v223_v42, %v560_v43  ;;  %v12887_v16 = vpack.c.bf16 %v106_v38, %v105_v31  ;;  %v471_v30 = vrot.slane %v109_v62, %v12688_v12  ;;  %v114_v38 = vld [vmem:[#allocation2 + $0x108] sm:$0xff] }
  0x67   :  { %10909 = vmatmul.mubr.bf16.gmra.mxu1 %v12768_v32  ;;  %10832 = vmatprep.mubr.bf16.mxu0 %v12770_v33  ;;  %19724 = vst [vmem:[#allocation33_spill] sm:$0xff] %v12835_v25 }
  0x68   :  { %10912 = vmatprep.mubr.bf16.mxu1 %v12772_v34  ;;  %10973 = vmatpush3.bf16.msra.mxu0 %v12273_v27  ;;  %v12840_v27 = vpack.c.bf16 %v222_v18, %v558_v19  ;;  %19728 = vst [vmem:[#allocation37_spill] sm:$0xff] %v12863_v53  ;;  %19731 = vst [vmem:[#allocation40_spill] sm:$0xff] %v12887_v16  ;;  %v164_v18 = vrot.slane %v115_v63, 7 }
  0x69   :  { %10974 = vmatprep.subr.bf16.mxu0 %v12274_v41  ;;  %11053 = vmatpush3.bf16.msra.mxu1 %v12281_v46  ;;  %v562_v46 = vsel %vm406_vm1, %v459_v37, %v256_v39  ;;  %v113_v37 = vld [vmem:[#allocation2 + $0x100] sm:$0xff]  ;;  %v227_v39 = vsel %vm212_vm0, %v162_v14, %v194_v15 }
  0x6a   :  { %11054 = vmatprep.subr.bf16.mxu1 %v12282_v8  ;;  %19726 = vst [vmem:[#allocation35_spill] sm:$0xff] %v12840_v27  ;;  %v12867_v56 = vpack.c.bf16 %v224_v45, %v562_v46  ;;  %v165_v43 = vrot.slane %v113_v37, 7  ;;  %v197_v45 = vrot.slane %v114_v38, 7  ;;  %v12913_v46 = vpack.c.bf16 %v110_v5, %v109_v62 }
  0x6c   :  { %10975 = vmatpush3.bf16.msra.mxu0 %v12274_v41  ;;  %v108_v41 = vld [vmem:[#allocation2 + $0xd8] sm:$0xff]  ;;  %19730 = vst [vmem:[#allocation39_spill] sm:$0xff] %v12867_v56  ;;  %19735 = vst [vmem:[#allocation44_spill] sm:$0xff] %v12913_v46  ;;  %v230_v62 = vsel %vm212_vm0, %v165_v43, %v197_v45 }
  0x6d   :  { %10976 = vmatprep.subr.bf16.mxu0 %v12275_v54  ;;  %11055 = vmatpush3.bf16.msra.mxu1 %v12282_v8  ;;  %v193_v52 = vrot.slane %v108_v41, 7  ;;  %v225_v8 = vsel %vm212_vm0, %v160_v48, %v192_v49  ;;  %v12891_v23 = vpack.c.bf16 %v108_v41, %v107_v40 }
  0x6e   :  { %10833 = vmatmul.mubr.bf16.gmra.mxu0 %v12800_v55  ;;  %11056 = vmatprep.subr.bf16.mxu1 %v12283_v13 }
  0x6f   :  { %10913 = vmatmul.mubr.bf16.gmra.mxu1 %v12803_v58  ;;  %10836 = vmatprep.mubr.bf16.mxu0 %v12806_v59  ;;  %v258_v60 = vsel %vm212_vm0, %v193_v52, %v161_v51  ;;  %19733 = vst [vmem:[#allocation42_spill] sm:$0xff] %v12891_v23  ;;  %v13105_v59 = vld [vmem:[#allocation2 + $0x1d8] sm:$0xff] }
  0x70   :  { %10916 = vmatprep.mubr.bf16.mxu1 %v12808_v61  ;;  %10977 = vmatpush3.bf16.msra.mxu0 %v12275_v54  ;;  %v12865_v54 = vpack.c.bf16 %v104_v11, %v103_v7  ;;  %v116_v7 = vld [vmem:[#allocation2 + $0x118] sm:$0xff]  ;;  %v226_v11 = vsel %vm212_vm0, %v161_v51, %v193_v52  ;;  %v117_v51 = vld [vmem:[#allocation2 + $0x120] sm:$0xff]  ;;  %v118_v52 = vld [vmem:[#allocation2 + $0x128] sm:$0xff]  ;;  %19759 = vst [vmem:[#allocation68_spill] sm:$0xff] %v13105_v59  ;;  %v209_v17 = vrot.slane %v13105_v59, 7 }
  0x71   :  { %10978 = vmatprep.subr.bf16.mxu0 %v12280_v1  ;;  %11057 = vmatpush3.bf16.msra.mxu1 %v12283_v13  ;;  %v566_v13 = vsel %vm406_vm1, %v467_v2, %v258_v60  ;;  %v196_v19 = vrot.slane %v116_v7, 7  ;;  %v119_v2 = vld [vmem:[#allocation2 + $0x130] sm:$0xff]  ;;  %v262_v60 = vsel %vm212_vm0, %v197_v45, %v165_v43  ;;  %v12958_v45 = vpack.c.bf16 %v118_v52, %v117_v51 }
  0x72   :  { %11058 = vmatprep.subr.bf16.mxu1 %v12284_v35  ;;  %19729 = vst [vmem:[#allocation38_spill] sm:$0xff] %v12865_v54  ;;  %v12893_v24 = vpack.c.bf16 %v226_v11, %v566_v13  ;;  %v12932_v13 = vpack.c.bf16 %v114_v38, %v113_v37 }
  0x73   :  { %v261_v31 = vsel %vm212_vm0, %v196_v19, %v164_v18  ;;  %v229_v41 = vsel %vm212_vm0, %v164_v18, %v196_v19  ;;  %v121_v18 = vld [vmem:[#allocation2 + $0x140] sm:$0xff]  ;;  %19740 = vst [vmem:[#allocation49_spill] sm:$0xff] %v12958_v45 }
  0x74   :  { %10979 = vmatpush3.bf16.msra.mxu0 %v12280_v1  ;;  %v257_v1 = vsel %vm212_vm0, %v192_v49, %v160_v48  ;;  %19734 = vst [vmem:[#allocation43_spill] sm:$0xff] %v12893_v24  ;;  %v572_v42 = vsel %vm406_vm1, %v479_v36, %v261_v31  ;;  %v12917_v49 = vpack.c.bf16 %v116_v7, %v115_v63  ;;  %v166_v63 = vrot.slane %v117_v51, 7  ;;  %v12943_v31 = vld [vmem:[#allocation2 + $0x150] sm:$0xff] }
  0x75   :  { %11124 = vmatprep.subr.bf16.mxu0 %v12830_v21  ;;  %11059 = vmatpush3.bf16.msra.mxu1 %v12284_v35  ;;  %v564_v10 = vsel %vm406_vm1, %v463_v57, %v257_v1  ;;  %v259_v35 = vsel %vm212_vm0, %v194_v15, %v162_v14  ;;  %v12919_v57 = vpack.c.bf16 %v229_v41, %v572_v42  ;;  %v198_v7 = vrot.slane %v118_v52, 7 }
  0x76   :  { %10837 = vmatmul.mubr.bf16.gmra.mxu0 %v12833_v22  ;;  %v12889_v20 = vpack.c.bf16 %v225_v8, %v564_v10  ;;  %v568_v40 = vsel %vm406_vm1, %v471_v30, %v259_v35  ;;  %19737 = vst [vmem:[#allocation46_spill] sm:$0xff] %v12917_v49  ;;  %v483_v1 = vrot.slane %v113_v37, %v12688_v12  ;;  %v120_v8 = vld [vmem:[#allocation2 + $0x138] sm:$0xff]  ;;  %v167_v10 = vrot.slane %v119_v2, 7  ;;  %v122_v35 = vld [vmem:[#allocation2 + $0x148] sm:$0xff] }
  0x77   :  { %10917 = vmatmul.mubr.bf16.gmra.mxu1 %v12835_v25  ;;  %10840 = vmatprep.mubr.bf16.mxu0 %v12838_v26  ;;  %v12915_v48 = vpack.c.bf16 %v227_v39, %v568_v40  ;;  %19738 = vst [vmem:[#allocation47_spill] sm:$0xff] %v12919_v57  ;;  %v199_v11 = vrot.slane %v120_v8, 7  ;;  %19739 = vst [vmem:[#allocation48_spill] sm:$0xff] %v12932_v13  ;;  %v487_v15 = vrot.slane %v117_v51, %v12688_v12  ;;  %v12947_v37 = vld [vmem:[#allocation2 + $0x158] sm:$0xff] }
  0x78   :  { %10920 = vmatprep.mubr.bf16.mxu1 %v12840_v27  ;;  %19732 = vst [vmem:[#allocation41_spill] sm:$0xff] %v12889_v20  ;;  %v574_v5 = vsel %vm406_vm1, %v483_v1, %v262_v60  ;;  %v263_v19 = vsel %vm212_vm0, %v198_v7, %v166_v63  ;;  %v491_v30 = vrot.slane %v119_v2, %v12688_v12  ;;  %v168_v42 = vrot.slane %v121_v18, 7 }
  0x79   :  { %19736 = vst [vmem:[#allocation45_spill] sm:$0xff] %v12915_v48  ;;  %v12934_v14 = vpack.c.bf16 %v230_v62, %v574_v5  ;;  %v264_v36 = vsel %vm212_vm0, %v199_v11, %v167_v10  ;;  %v231_v38 = vsel %vm212_vm0, %v166_v63, %v198_v7  ;;  %v576_v39 = vsel %vm406_vm1, %v487_v15, %v263_v19  ;;  %v12962_v62 = vld [vmem:[#allocation2 + $0x160] sm:$0xff]  ;;  %v12977_v15 = vld [vmem:[#allocation2 + $0x170] sm:$0xff] }
  0x7a   :  { %v232_v40 = vsel %vm212_vm0, %v167_v10, %v199_v11  ;;  %v578_v41 = vsel %vm406_vm1, %v491_v30, %v264_v36  ;;  %v200_v43 = vrot.slane %v122_v35, 7  ;;  %v169_v1 = vrot.slane %v12943_v31, 7  ;;  %v12971_v11 = vld [vmem:[#allocation2 + $0x168] sm:$0xff] }
  0x7b   :  { %v201_v60 = vrot.slane %v12947_v37, 7  ;;  %v12964_v5 = vpack.c.bf16 %v231_v38, %v576_v39  ;;  %v12966_v63 = vpack.c.bf16 %v120_v8, %v119_v2  ;;  %v12968_v7 = vpack.c.bf16 %v232_v40, %v578_v41  ;;  %v12982_v8 = vld [vmem:[#allocation2 + $0x178] sm:$0xff] }
  0x7c   :  { %v495_v10 = vrot.slane %v121_v18, %v12688_v12  ;;  %v265_v51 = vsel %vm212_vm0, %v200_v43, %v168_v42  ;;  %v499_v52 = vrot.slane %v12943_v31, %v12688_v12  ;;  %v170_v19 = vrot.slane %v12962_v62, 7 }
  0x7d   :  { %19741 = vst [vmem:[#allocation50_spill] sm:$0xff] %v12964_v5  ;;  %19742 = vst [vmem:[#allocation51_spill] sm:$0xff] %v12966_v63  ;;  %v266_v2 = vsel %vm212_vm0, %v201_v60, %v169_v1  ;;  %v202_v30 = vrot.slane %v12971_v11, 7  ;;  %v233_v36 = vsel %vm212_vm0, %v168_v42, %v200_v43  ;;  %v234_v39 = vsel %vm212_vm0, %v169_v1, %v201_v60  ;;  %v13007_v43 = vld [vmem:[#allocation2 + $0x180] sm:$0xff]  ;;  %v13017_v60 = vld [vmem:[#allocation2 + $0x198] sm:$0xff] }
  0x7e   :  { %10841 = vmatmul.mubr.bf16.gmra.mxu0 %v12861_v50  ;;  %19743 = vst [vmem:[#allocation52_spill] sm:$0xff] %v12968_v7  ;;  %v580_v38 = vsel %vm406_vm1, %v495_v10, %v265_v51  ;;  %v582_v40 = vsel %vm406_vm1, %v499_v52, %v266_v2  ;;  %v12997_v41 = vpack.c.bf16 %v122_v35, %v121_v18  ;;  %v13009_v10 = vld [vmem:[#allocation2 + $0x188] sm:$0xff]  ;;  %v13015_v35 = vld [vmem:[#allocation2 + $0x190] sm:$0xff] }
  0x7f   :  { %10921 = vmatmul.mubr.bf16.gmra.mxu1 %v12863_v53  ;;  %10844 = vmatprep.mubr.bf16.mxu0 %v12865_v54  ;;  %v13005_v42 = vpack.c.bf16 %v12947_v37, %v12943_v31  ;;  %v13011_v1 = vpack.c.bf16 %v234_v39, %v582_v40  ;;  %v503_v18 = vrot.slane %v12962_v62, %v12688_v12  ;;  %v172_v39 = vrot.slane %v13007_v43, 7 }
  0x80   :  { %10924 = vmatprep.mubr.bf16.mxu1 %v12867_v56  ;;  %19744 = vst [vmem:[#allocation53_spill] sm:$0xff] %v12997_v41  ;;  %v267_v51 = vsel %vm212_vm0, %v202_v30, %v170_v19  ;;  %v507_v52 = vrot.slane %v12977_v15, %v12688_v12  ;;  %v204_v40 = vrot.slane %v13009_v10, 7 }
  0x81   :  { %19746 = vst [vmem:[#allocation55_spill] sm:$0xff] %v13005_v42  ;;  %19747 = vst [vmem:[#allocation56_spill] sm:$0xff] %v13011_v1 }
  0x86   :  { %10845 = vmatmul.mubr.bf16.gmra.mxu0 %v12887_v16 }
  0x87   :  { %10925 = vmatmul.mubr.bf16.gmra.mxu1 %v12889_v20  ;;  %10848 = vmatprep.mubr.bf16.mxu0 %v12891_v23  ;;  %v13061_v23 = vld [vmem:[#allocation2 + $0x1b8] sm:$0xff] }
  0x88   :  { %10928 = vmatprep.mubr.bf16.mxu1 %v12893_v24  ;;  %19754 = vst [vmem:[#allocation63_spill] sm:$0xff] %v13061_v23  ;;  %v207_v22 = vrot.slane %v13061_v23, 7 }
  0x8e   :  { %10849 = vmatmul.mubr.bf16.gmra.mxu0 %v12913_v46  ;;  %v205_v46 = vrot.slane %v13017_v60, 7 }
  0x8f   :  { %10929 = vmatmul.mubr.bf16.gmra.mxu1 %v12915_v48  ;;  %10852 = vmatprep.mubr.bf16.mxu0 %v12917_v49 }
  0x90   :  { %10932 = vmatprep.mubr.bf16.mxu1 %v12919_v57 }
  0x96   :  { %10853 = vmatmul.mubr.bf16.gmra.mxu0 %v12932_v13 }
  0x97   :  { %10933 = vmatmul.mubr.bf16.gmra.mxu1 %v12934_v14  ;;  %10856 = vmatprep.mubr.bf16.mxu0 %v12917_v49  ;;  %v13001_v49 = vpack.c.bf16 %v233_v36, %v580_v38  ;;  %v235_v36 = vsel %vm212_vm0, %v170_v19, %v202_v30  ;;  %v584_v38 = vsel %vm406_vm1, %v503_v18, %v267_v51  ;;  %v13051_v51 = vld [vmem:[#allocation2 + $0x1a0] sm:$0xff] }
  0x98   :  { %10936 = vmatprep.mubr.bf16.mxu1 %v12919_v57  ;;  %v13043_v19 = vpack.c.bf16 %v12971_v11, %v12962_v62  ;;  %v13045_v30 = vpack.c.bf16 %v235_v36, %v584_v38  ;;  %v13049_v18 = vpack.c.bf16 %v12982_v8, %v12977_v15  ;;  %v269_v36 = vsel %vm212_vm0, %v204_v40, %v172_v39 }
  0x99   :  { %19745 = vst [vmem:[#allocation54_spill] sm:$0xff] %v13001_v49  ;;  %v515_v38 = vrot.slane %v13015_v35, %v12688_v12  ;;  %v174_v54 = vrot.slane %v13051_v51, 7 }
  0x9a   :  { %19748 = vst [vmem:[#allocation57_spill] sm:$0xff] %v13043_v19  ;;  %19749 = vst [vmem:[#allocation58_spill] sm:$0xff] %v13045_v30 }
  0x9b   :  { %19750 = vst [vmem:[#allocation59_spill] sm:$0xff] %v13049_v18 }
  0x9e   :  { %10857 = vmatmul.mubr.bf16.gmra.mxu0 %v12958_v45  ;;  %v203_v45 = vrot.slane %v12982_v8, 7 }
  0x9f   :  { %10937 = vmatmul.mubr.bf16.gmra.mxu1 %v12964_v5  ;;  %10860 = vmatprep.mubr.bf16.mxu0 %v12966_v63  ;;  %v171_v63 = vrot.slane %v12977_v15, 7 }
  0xa0   :  { %10940 = vmatprep.mubr.bf16.mxu1 %v12968_v7 }
  0xa1   :  { %v268_v2 = vsel %vm212_vm0, %v203_v45, %v171_v63 }
  0xa2   :  { %v586_v13 = vsel %vm406_vm1, %v507_v52, %v268_v2  ;;  %v511_v52 = vrot.slane %v13007_v43, %v12688_v12  ;;  %v13059_v2 = vld [vmem:[#allocation2 + $0x1b0] sm:$0xff] }
  0xa3   :  { %19753 = vst [vmem:[#allocation62_spill] sm:$0xff] %v13059_v2 }
  0xa6   :  { %10861 = vmatmul.mubr.bf16.gmra.mxu0 %v12997_v41  ;;  %v236_v41 = vsel %vm212_vm0, %v171_v63, %v203_v45  ;;  %v13053_v45 = vld [vmem:[#allocation2 + $0x1a8] sm:$0xff] }
  0xa7   :  { %10941 = vmatmul.mubr.bf16.gmra.mxu1 %v13001_v49  ;;  %10864 = vmatprep.mubr.bf16.mxu0 %v13005_v42  ;;  %v173_v42 = vrot.slane %v13015_v35, 7  ;;  %19751 = vst [vmem:[#allocation60_spill] sm:$0xff] %v13053_v45  ;;  %v13055_v63 = vpack.c.bf16 %v236_v41, %v586_v13  ;;  %v237_v13 = vsel %vm212_vm0, %v172_v39, %v204_v40  ;;  %v206_v50 = vrot.slane %v13053_v45, 7 }
  0xa8   :  { %10944 = vmatprep.mubr.bf16.mxu1 %v13011_v1  ;;  %v588_v41 = vsel %vm406_vm1, %v511_v52, %v269_v36  ;;  %v13087_v39 = vpack.c.bf16 %v13009_v10, %v13007_v43  ;;  %v13093_v52 = vpack.c.bf16 %v13017_v60, %v13015_v35  ;;  %v13095_v36 = vld [vmem:[#allocation2 + $0x1c0] sm:$0xff] }
  0xa9   :  { %19752 = vst [vmem:[#allocation61_spill] sm:$0xff] %v13055_v63  ;;  %v270_v16 = vsel %vm212_vm0, %v205_v46, %v173_v42  ;;  %v13089_v40 = vpack.c.bf16 %v237_v13, %v588_v41  ;;  %v271_v13 = vsel %vm212_vm0, %v206_v50, %v174_v54  ;;  %v523_v41 = vrot.slane %v13059_v2, %v12688_v12 }
  0xaa   :  { %v590_v26 = vsel %vm406_vm1, %v515_v38, %v270_v16  ;;  %19755 = vst [vmem:[#allocation64_spill] sm:$0xff] %v13087_v39  ;;  %19757 = vst [vmem:[#allocation66_spill] sm:$0xff] %v13093_v52  ;;  %v519_v16 = vrot.slane %v13051_v51, %v12688_v12  ;;  %v13103_v38 = vld [vmem:[#allocation2 + $0x1d0] sm:$0xff]  ;;  %v176_v29 = vrot.slane %v13095_v36, 7 }
  0xab   :  { %19756 = vst [vmem:[#allocation65_spill] sm:$0xff] %v13089_v40  ;;  %v177_v0 = vrot.slane %v13103_v38, 7 }
  0xac   :  { %v592_v33 = vsel %vm406_vm1, %v519_v16, %v271_v13  ;;  %v527_v13 = vrot.slane %v13095_v36, %v12688_v12 }
  0xae   :  { %10865 = vmatmul.mubr.bf16.gmra.mxu0 %v13043_v19  ;;  %v238_v19 = vsel %vm212_vm0, %v173_v42, %v205_v46  ;;  %v13097_v46 = vld [vmem:[#allocation2 + $0x1c8] sm:$0xff] }
  0xaf   :  { %10945 = vmatmul.mubr.bf16.gmra.mxu1 %v13045_v30  ;;  %10868 = vmatprep.mubr.bf16.mxu0 %v13049_v18  ;;  %v175_v18 = vrot.slane %v13059_v2, 7  ;;  %v13099_v42 = vpack.c.bf16 %v238_v19, %v590_v26  ;;  %v13116_v26 = vld [vmem:[#allocation5 + $0x178] sm:$0xff]   ;;  %v239_v19 = vsel %vm212_vm0, %v174_v54, %v206_v50  ;;  %v13134_v50 = vpack.c.bf16 %v13053_v45, %v13051_v51 }
  0xb0   :  { %10948 = vmatprep.mubr.bf16.mxu1 %v13055_v63  ;;  %11204 = vmatprep.subr.bf16.mxu1 %v13116_v26  ;;  %v13137_v54 = vpack.c.bf16 %v239_v19, %v592_v33  ;;  %v531_v33 = vrot.slane %v13103_v38, %v12688_v12  ;;  %v274_v19 = vsel %vm212_vm0, %v209_v17, %v177_v0 }
  0xb1   :  { %19758 = vst [vmem:[#allocation67_spill] sm:$0xff] %v13099_v42  ;;  %v272_v55 = vsel %vm212_vm0, %v207_v22, %v175_v18  ;;  %v240_v4 = vsel %vm212_vm0, %v175_v18, %v207_v22  ;;  %19760 = vst [vmem:[#allocation69_spill] sm:$0xff] %v13134_v50  ;;  %v13141_v22 = vpack.c.bf16 %v13061_v23, %v13059_v2  ;;  %v13143_v18 = vld [vmem:[#allocation2 + $0x1e0] sm:$0xff]  ;;  %v12401_v2 = vld [vmem:[#allocation2 + $0x10] sm:$0xff] }
  0xb2   :  { %19761 = vst [vmem:[#allocation70_spill] sm:$0xff] %v13137_v54  ;;  %v277_v45 = vrot.slane %v12401_v2, 1 }
  0xb3   :  { %19762 = vst [vmem:[#allocation71_spill] sm:$0xff] %v13141_v22 }
  0xb6   :  { %10869 = vmatmul.mubr.bf16.gmra.mxu0 %v13087_v39  ;;  %v208_v39 = vrot.slane %v13097_v46, 7 }
  0xb7   :  { %10949 = vmatmul.mubr.bf16.gmra.mxu1 %v13089_v40  ;;  %10872 = vmatprep.mubr.bf16.mxu0 %v13093_v52  ;;  %v594_v52 = vsel %vm406_vm1, %v523_v41, %v272_v55  ;;  %v13145_v55 = vld [vmem:[#allocation2 + $0x1e8] sm:$0xff]  ;;  %v12402_v40 = vld [vmem:[#allocation2 + $0x18] sm:$0xff] }
  0xb8   :  { %10952 = vmatprep.mubr.bf16.mxu1 %v13099_v42  ;;  %v13147_v16 = vpack.c.bf16 %v240_v4, %v594_v52  ;;  %v273_v41 = vsel %vm212_vm0, %v208_v39, %v176_v29  ;;  %v13164_v4 = vadd.s32 8, %v12685_v9  ;;  %v241_v52 = vsel %vm212_vm0, %v176_v29, %v208_v39 }
  0xb9   :  { %v178_v42 = vrot.slane %v13143_v18, 7  ;;  %v210_v23 = vrot.slane %v13145_v55, 7  ;;  %v13179_v29 = vpack.c.bf16 %v13097_v46, %v13095_v36  ;;  %v613_v2 = vrot.slane %v12402_v40, %v13159_v44 }
  0xba   :  { %19763 = vst [vmem:[#allocation72_spill] sm:$0xff] %v13147_v16  ;;  %19765 = vst [vmem:[#allocation74_spill] sm:$0xff] %v13164_v4  ;;  %vm605_vm3 = vcmp.eq.s32.totalorder %v13164_v4, 15 }
  0xbb   :  { %19766 = vst [vmem:[#allocation75_spill] sm:$0xff] %v13179_v29 }
  0xbe   :  { %10873 = vmatmul.mubr.bf16.gmra.mxu0 %v13134_v50  ;;  %v596_v50 = vsel %vm406_vm1, %v527_v13, %v273_v41  ;;  %v13185_v13 = vpack.c.bf16 %v13105_v59, %v13103_v38  ;;  %v275_v41 = vsel %vm212_vm0, %v210_v23, %v178_v42 }
  0xbf   :  { %10953 = vmatmul.mubr.bf16.gmra.mxu1 %v13137_v54  ;;  %10876 = vmatprep.mubr.bf16.mxu0 %v13141_v22  ;;  %v242_v54 = vsel %vm212_vm0, %v177_v0, %v209_v17  ;;  %v598_v22 = vsel %vm406_vm1, %v531_v33, %v274_v19  ;;  %v13181_v39 = vpack.c.bf16 %v241_v52, %v596_v50  ;;  %v12403_v33 = vld [vmem:[#allocation2] sm:$0xff]  ;;  %v12404_v52 = vld [vmem:[#allocation2 + $0x8] sm:$0xff] }
  0xc0   :  { %10956 = vmatprep.mubr.bf16.mxu1 %v13147_v16  ;;  %v309_v16 = vrot.slane %v12402_v40, 1  ;;  %19768 = vst [vmem:[#allocation77_spill] sm:$0xff] %v13185_v13  ;;  %v13188_v17 = vpack.c.bf16 %v242_v54, %v598_v22  ;;  %v535_v0 = vrot.slane %v13143_v18, %v12688_v12  ;;  %v278_v19 = vrot.slane %v12403_v33, 1 }
  0xc1   :  { %19767 = vst [vmem:[#allocation76_spill] sm:$0xff] %v13181_v39  ;;  %v310_v59 = vrot.slane %v12404_v52, 1  ;;  %v243_v40 = vsel %vm212_vm0, %v178_v42, %v210_v23 }
  0xc2   :  { %19769 = vst [vmem:[#allocation78_spill] sm:$0xff] %v13188_v17  ;;  %v374_v50 = vsel %vm341_vm2, %v309_v16, %v277_v45  ;;  %v600_v54 = vsel %vm406_vm1, %v535_v0, %v275_v41  ;;  %v342_v22 = vsel %vm341_vm2, %v277_v45, %v309_v16  ;;  %v12405_v16 = vld [vmem:[#allocation2 + $0x20] sm:$0xff] }
  0xc3   :  { %v739_v33 = vsel %vm605_vm3, %v613_v2, %v374_v50  ;;  %v375_v23 = vsel %vm341_vm2, %v310_v59, %v278_v19  ;;  %v343_v45 = vsel %vm341_vm2, %v278_v19, %v310_v59  ;;  %v279_v0 = vrot.slane %v12405_v16, 1  ;;  %v12406_v2 = vld [vmem:[#allocation2 + $0x28] sm:$0xff]  ;;  %v12407_v50 = vld [vmem:[#allocation2 + $0x30] sm:$0xff] }
  0xc4   :  { %v311_v41 = vrot.slane %v12406_v2, 1 }
  0xc6   :  { %10877 = vmatmul.mubr.bf16.gmra.mxu0 %v13179_v29  ;;  %v13211_v29 = vpack.c.bf16 %v13145_v55, %v13143_v18  ;;  %v376_v59 = vsel %vm341_vm2, %v311_v41, %v279_v0 }
  0xc7   :  { %10957 = vmatmul.mubr.bf16.gmra.mxu1 %v13181_v39  ;;  %10880 = vmatprep.mubr.bf16.mxu0 %v13185_v13  ;;  %v617_v13 = vrot.slane %v12404_v52, %v13159_v44  ;;  %v13214_v39 = vpack.c.bf16 %v243_v40, %v600_v54  ;;  %v280_v52 = vrot.slane %v12407_v50, 1  ;;  %v12408_v40 = vld [vmem:[#allocation2 + $0x38] sm:$0xff]  ;;  %v12409_v50 = vld [vmem:[#allocation2 + $0x40] sm:$0xff] }
  0xc8   :  { %10960 = vmatprep.mubr.bf16.mxu1 %v13188_v17  ;;  %19770 = vst [vmem:[#allocation79_spill] sm:$0xff] %v13211_v29  ;;  %v13216_v17 = vpack.c.bf16 %v739_v33, %v342_v22  ;;  %v312_v54 = vrot.slane %v12408_v40, 1  ;;  %v621_v33 = vrot.slane %v12406_v2, %v13159_v44  ;;  %v625_v19 = vrot.slane %v12408_v40, %v13159_v44  ;;  %v12410_v40 = vld [vmem:[#allocation2 + $0x48] sm:$0xff] }
  0xc9   :  { %19771 = vst [vmem:[#allocation80_spill] sm:$0xff] %v13214_v39  ;;  %v741_v42 = vsel %vm605_vm3, %v617_v13, %v375_v23  ;;  %v12286_v13 = vld [vmem:[#allocation5 + $0x130] sm:$0xff]  }
  0xca   :  { %19772 = vst [vmem:[#allocation81_spill] sm:$0xff] %v13216_v17  ;;  %v13228_v22 = vpack.c.bf16 %v741_v42, %v343_v45  ;;  %v12293_v23 = vld [vmem:[#allocation5 + $0x170] sm:$0xff]   ;;  %v344_v45 = vsel %vm341_vm2, %v279_v0, %v311_v41  ;;  %v743_v42 = vsel %vm605_vm3, %v621_v33, %v376_v59  ;;  %v345_v16 = vsel %vm341_vm2, %v280_v52, %v312_v54 }
  0xcb   :  { %v12411_v0 = vld [vmem:[#allocation2 + $0x50] sm:$0xff]  ;;  %v13250_v59 = vpack.c.bf16 %v743_v42, %v344_v45  ;;  %v12413_v42 = vld [vmem:[#allocation2 + $0x60] sm:$0xff] }
  0xcc   :  { %19773 = vst [vmem:[#allocation82_spill] sm:$0xff] %v13228_v22  ;;  %v282_v41 = vrot.slane %v12411_v0, 1  ;;  %v12288_v0 = vld [vmem:[#allocation5 + $0x120] sm:$0xff]  }
  0xcd   :  { %19774 = vst [vmem:[#allocation83_spill] sm:$0xff] %v13250_v59 }
  0xce   :  { %10881 = vmatmul.mubr.bf16.gmra.mxu0 %v13211_v29  ;;  %v12287_v29 = vld [vmem:[#allocation5 + $0x128] sm:$0xff]  }
  0xcf   :  { %10961 = vmatmul.mubr.bf16.gmra.mxu1 %v13214_v39  ;;  %10980 = vmatprep.mubr.bf16.mxu0 %v13216_v17 }
  0xd0   :  { %11060 = vmatprep.mubr.bf16.mxu1 %v12714_v47  ;;  %v377_v47 = vsel %vm341_vm2, %v312_v54, %v280_v52  ;;  %v629_v54 = vrot.slane %v12410_v40, %v13159_v44 }
  0xd1   :  { %v745_v2 = vsel %vm605_vm3, %v625_v19, %v377_v47 }
  0xd2   :  { %v13252_v52 = vpack.c.bf16 %v745_v2, %v345_v16  ;;  %v283_v16 = vrot.slane %v12413_v42, 1  ;;  %v12414_v2 = vld [vmem:[#allocation2 + $0x68] sm:$0xff] }
  0xd4   :  { %19775 = vst [vmem:[#allocation84_spill] sm:$0xff] %v13252_v52 }
  0xd6   :  { %10981 = vmatmul.mubr.bf16.vlgmr.msra.gmra.mxu0 %v13228_v22  ;;  %v12412_v22 = vld [vmem:[#allocation2 + $0x58] sm:$0xff] }
  0xd7   :  { %11125 = vmatpush3.bf16.msra.mxu0 %v12830_v21  ;;  %11061 = vmatmul.mubr.bf16.vlgmr.msra.gmra.mxu1 %v12702_v28  ;;  %v281_v21 = vrot.slane %v12409_v50, 1  ;;  %v313_v28 = vrot.slane %v12410_v40, 1  ;;  %v314_v33 = vrot.slane %v12412_v22, 1  ;;  %v633_v47 = vrot.slane %v12412_v22, %v13159_v44 }
  0xd8   :  { %10984 = vmatprep.mubr.bf16.mxu0 %v13216_v17  ;;  %11064 = vmatprep.mubr.bf16.mxu1 %v12736_v3  ;;  %v12294_v3 = vld [vmem:[#allocation5 + $0x168] sm:$0xff]   ;;  %v315_v40 = vrot.slane %v12414_v2, 1 }
  0xd9   :  { %11126 = vmatprep.subr.bf16.mxu0 %v12286_v13  ;;  %11205 = vmatpush3.bf16.msra.mxu1 %v13116_v26  ;;  %v378_v19 = vsel %vm341_vm2, %v313_v28, %v281_v21  ;;  %v379_v50 = vsel %vm341_vm2, %v314_v33, %v282_v41  ;;  %v12295_v26 = vld [vmem:[#allocation5 + $0x160] sm:$0xff]   ;;  %v347_v45 = vsel %vm341_vm2, %v282_v41, %v314_v33 }
  0xda   :  { %11206 = vmatprep.subr.bf16.mxu1 %v12293_v23  ;;  %v747_v22 = vsel %vm605_vm3, %v629_v54, %v378_v19  ;;  %v12297_v19 = vld [vmem:[#allocation5 + $0x158] sm:$0xff]   ;;  %v637_v33 = vrot.slane %v12414_v2, %v13159_v44  ;;  %v12419_v2 = vld [vmem:[#allocation2 + $0x90] sm:$0xff] }
  0xdb   :  { %11127 = vmatpush3.bf16.msra.mxu0 %v12286_v13  ;;  %v346_v13 = vsel %vm341_vm2, %v281_v21, %v313_v28  ;;  %v12289_v21 = vld [vmem:[#allocation5 + $0x118] sm:$0xff]  }
  0xdc   :  { %11128 = vmatprep.subr.bf16.mxu0 %v12287_v29  ;;  %v13272_v54 = vpack.c.bf16 %v747_v22, %v346_v13  ;;  %v348_v13 = vsel %vm341_vm2, %v283_v16, %v315_v40  ;;  %v12417_v22 = vld [vmem:[#allocation2 + $0x80] sm:$0xff] }
  0xdd   :  { %11207 = vmatpush3.bf16.msra.mxu1 %v12293_v23  ;;  %v749_v23 = vsel %vm605_vm3, %v633_v47, %v379_v50  ;;  %v380_v47 = vsel %vm341_vm2, %v315_v40, %v283_v16  ;;  %v12290_v50 = vld [vmem:[#allocation5 + $0x110] sm:$0xff]   ;;  %v12291_v40 = vld [vmem:[#allocation5 + $0x108] sm:$0xff]  }
  0xde   :  { %10985 = vmatmul.mubr.bf16.gmra.mxu0 %v13250_v59  ;;  %11208 = vmatprep.subr.bf16.mxu1 %v12294_v3  ;;  %v12416_v59 = vld [vmem:[#allocation2 + $0x78] sm:$0xff]  ;;  %19776 = vst [vmem:[#allocation85_spill] sm:$0xff] %v13272_v54  ;;  %v13274_v41 = vpack.c.bf16 %v749_v23, %v347_v45  ;;  %v285_v45 = vrot.slane %v12417_v22, 1  ;;  %v12418_v23 = vld [vmem:[#allocation2 + $0x88] sm:$0xff]  ;;  %v12296_v22 = vld [vmem:[#allocation5 + $0x100] sm:$0xff]  }
  0xdf   :  { %11065 = vmatmul.mubr.bf16.gmra.mxu1 %v12740_v6  ;;  %10988 = vmatprep.mubr.bf16.mxu0 %v13252_v52  ;;  %v12415_v6 = vld [vmem:[#allocation2 + $0x70] sm:$0xff]  ;;  %v316_v28 = vrot.slane %v12416_v59, 1  ;;  %v317_v42 = vrot.slane %v12418_v23, 1 }
  0xe0   :  { %11068 = vmatprep.mubr.bf16.mxu1 %v12768_v32  ;;  %11129 = vmatpush3.bf16.msra.mxu0 %v12287_v29  ;;  %v284_v52 = vrot.slane %v12415_v6, 1  ;;  %19777 = vst [vmem:[#allocation86_spill] sm:$0xff] %v13274_v41  ;;  %v641_v29 = vrot.slane %v12416_v59, %v13159_v44  ;;  %v751_v59 = vsel %vm605_vm3, %v637_v33, %v380_v47  ;;  %v12420_v32 = vld [vmem:[#allocation2 + $0x98] sm:$0xff]  ;;  %v12299_v47 = vld [vmem:[#allocation5 + $0x148] sm:$0xff]  }
  0xe1   :  { %11130 = vmatprep.subr.bf16.mxu0 %v12288_v0  ;;  %11209 = vmatpush3.bf16.msra.mxu1 %v12294_v3  ;;  %v12298_v3 = vld [vmem:[#allocation5 + $0x150] sm:$0xff]   ;;  %v318_v16 = vrot.slane %v12420_v32, 1  ;;  %v13294_v33 = vpack.c.bf16 %v751_v59, %v348_v13  ;;  %v350_v13 = vsel %vm341_vm2, %v285_v45, %v317_v42  ;;  %v12421_v59 = vld [vmem:[#allocation2 + $0xa0] sm:$0xff] }
  0xe2   :  { %11210 = vmatprep.subr.bf16.mxu1 %v12295_v26  ;;  %v381_v6 = vsel %vm341_vm2, %v316_v28, %v284_v52 }
  0xe3   :  { %19778 = vst [vmem:[#allocation87_spill] sm:$0xff] %v13294_v33 }
  0xe4   :  { %11131 = vmatpush3.bf16.msra.mxu0 %v12288_v0  ;;  %v349_v0 = vsel %vm341_vm2, %v284_v52, %v316_v28  ;;  %v645_v28 = vrot.slane %v12418_v23, %v13159_v44 }
  0xe5   :  { %11132 = vmatprep.subr.bf16.mxu0 %v12289_v21  ;;  %11211 = vmatpush3.bf16.msra.mxu1 %v12295_v26  ;;  %v753_v26 = vsel %vm605_vm3, %v641_v29, %v381_v6  ;;  %v382_v29 = vsel %vm341_vm2, %v317_v42, %v285_v45  ;;  %v13316_v42 = vld [vmem:[#allocation5 + $0x1b8] sm:$0xff]  }
  0xe6   :  { %10989 = vmatmul.mubr.bf16.gmra.mxu0 %v13272_v54  ;;  %11212 = vmatprep.subr.bf16.mxu1 %v12297_v19  ;;  %v13296_v52 = vpack.c.bf16 %v753_v26, %v349_v0  ;;  %v287_v0 = vrot.slane %v12421_v59, 1  ;;  %v12422_v26 = vld [vmem:[#allocation2 + $0xa8] sm:$0xff] }
  0xe7   :  { %11069 = vmatmul.mubr.bf16.gmra.mxu1 %v12772_v34  ;;  %10992 = vmatprep.mubr.bf16.mxu0 %v13274_v41  ;;  %v286_v34 = vrot.slane %v12419_v2, 1  ;;  %v319_v23 = vrot.slane %v12422_v26, 1  ;;  %v12423_v2 = vld [vmem:[#allocation2 + $0xb0] sm:$0xff] }
  0xe8   :  { %11072 = vmatprep.mubr.bf16.mxu1 %v12803_v58  ;;  %11133 = vmatpush3.bf16.msra.mxu0 %v12289_v21  ;;  %19779 = vst [vmem:[#allocation88_spill] sm:$0xff] %v13296_v52  ;;  %v649_v21 = vrot.slane %v12420_v32, %v13159_v44  ;;  %v755_v32 = vsel %vm605_vm3, %v645_v28, %v382_v29  ;;  %v12424_v58 = vld [vmem:[#allocation2 + $0xb8] sm:$0xff] }
  0xe9   :  { %11134 = vmatprep.subr.bf16.mxu0 %v12290_v50  ;;  %11213 = vmatpush3.bf16.msra.mxu1 %v12297_v19  ;;  %v383_v6 = vsel %vm341_vm2, %v318_v16, %v286_v34  ;;  %v12300_v19 = vld [vmem:[#allocation5 + $0x140] sm:$0xff]   ;;  %v320_v45 = vrot.slane %v12424_v58, 1  ;;  %v13318_v28 = vpack.c.bf16 %v755_v32, %v350_v13  ;;  %v384_v29 = vsel %vm341_vm2, %v319_v23, %v287_v0  ;;  %v12426_v32 = vld [vmem:[#allocation2 + $0xc8] sm:$0xff] }
  0xea   :  { %11214 = vmatprep.subr.bf16.mxu1 %v12298_v3 }
  0xeb   :  { %19780 = vst [vmem:[#allocation89_spill] sm:$0xff] %v13318_v28 }
  0xec   :  { %11135 = vmatpush3.bf16.msra.mxu0 %v12290_v50  ;;  %v351_v50 = vsel %vm341_vm2, %v286_v34, %v318_v16  ;;  %v653_v16 = vrot.slane %v12422_v26, %v13159_v44  ;;  %v12428_v26 = vld [vmem:[#allocation2 + $0xd8] sm:$0xff] }
  0xed   :  { %11136 = vmatprep.subr.bf16.mxu0 %v12291_v40  ;;  %11215 = vmatpush3.bf16.msra.mxu1 %v12298_v3  ;;  %v757_v3 = vsel %vm605_vm3, %v649_v21, %v383_v6 }
  0xee   :  { %10993 = vmatmul.mubr.bf16.gmra.mxu0 %v13294_v33  ;;  %11216 = vmatprep.subr.bf16.mxu1 %v12299_v47  ;;  %v13320_v34 = vpack.c.bf16 %v757_v3, %v351_v50  ;;  %v759_v6 = vsel %vm605_vm3, %v653_v16, %v384_v29  ;;  %v321_v50 = vrot.slane %v12426_v32, 1  ;;  %v12427_v3 = vld [vmem:[#allocation2 + $0xd0] sm:$0xff]  ;;  %v661_v16 = vrot.slane %v12426_v32, %v13159_v44 }
  0xef   :  { %11073 = vmatmul.mubr.bf16.gmra.mxu1 %v12808_v61  ;;  %10996 = vmatprep.mubr.bf16.mxu0 %v13296_v52  ;;  %v288_v61 = vrot.slane %v12423_v2, 1  ;;  %v290_v59 = vrot.slane %v12427_v3, 1  ;;  %v322_v2 = vrot.slane %v12428_v26, 1  ;;  %v12430_v3 = vld [vmem:[#allocation2 + $0xe8] sm:$0xff] }
  0xf0   :  { %11076 = vmatprep.mubr.bf16.mxu1 %v12835_v25  ;;  %11137 = vmatpush3.bf16.msra.mxu0 %v12291_v40  ;;  %19781 = vst [vmem:[#allocation90_spill] sm:$0xff] %v13320_v34  ;;  %v657_v40 = vrot.slane %v12424_v58, %v13159_v44 }
  0xf1   :  { %11138 = vmatprep.subr.bf16.mxu0 %v12296_v22  ;;  %11217 = vmatpush3.bf16.msra.mxu1 %v12299_v47  ;;  %v385_v21 = vsel %vm341_vm2, %v320_v45, %v288_v61  ;;  %v352_v47 = vsel %vm341_vm2, %v287_v0, %v319_v23  ;;  %v353_v58 = vsel %vm341_vm2, %v288_v61, %v320_v45 }
  0xf2   :  { %11218 = vmatprep.subr.bf16.mxu1 %v12300_v19  ;;  %v13341_v0 = vpack.c.bf16 %v759_v6, %v352_v47  ;;  %v665_v45 = vrot.slane %v12428_v26, %v13159_v44  ;;  %v387_v29 = vsel %vm341_vm2, %v322_v2, %v290_v59  ;;  %v323_v26 = vrot.slane %v12430_v3, 1 }
  0xf4   :  { %11139 = vmatpush3.bf16.msra.mxu0 %v12296_v22  ;;  %v761_v22 = vsel %vm605_vm3, %v657_v40, %v385_v21  ;;  %19782 = vst [vmem:[#allocation91_spill] sm:$0xff] %v13341_v0  ;;  %v13351_v40 = vld [vmem:[#allocation2 + $0xf0] sm:$0xff]  ;;  %v13353_v21 = vld [vmem:[#allocation2 + $0xf8] sm:$0xff]  ;;  %v765_v32 = vsel %vm605_vm3, %v665_v45, %v387_v29 }
  0xf5   :  { %11219 = vmatpush3.bf16.msra.mxu1 %v12300_v19  ;;  %11284 = vmatprep.subr.bf16.mxu0 %v13316_v42  ;;  %v12425_v19 = vld [vmem:[#allocation2 + $0xc0] sm:$0xff]  ;;  %v13343_v23 = vpack.c.bf16 %v761_v22, %v353_v58  ;;  %v355_v58 = vsel %vm341_vm2, %v290_v59, %v322_v2  ;;  %v669_v2 = vrot.slane %v12430_v3, %v13159_v44 }
  0xf6   :  { %10997 = vmatmul.mubr.bf16.gmra.mxu0 %v13318_v28  ;;  %v289_v13 = vrot.slane %v12425_v19, 1  ;;  %v12429_v22 = vld [vmem:[#allocation2 + $0xe0] sm:$0xff]  ;;  %v13371_v59 = vpack.c.bf16 %v765_v32, %v355_v58 }
  0xf7   :  { %11077 = vmatmul.mubr.bf16.gmra.mxu1 %v12840_v27  ;;  %11000 = vmatprep.mubr.bf16.mxu0 %v13320_v34  ;;  %19783 = vst [vmem:[#allocation92_spill] sm:$0xff] %v13343_v23  ;;  %v291_v19 = vrot.slane %v12429_v22, 1  ;;  %v12432_v27 = vld [vmem:[#allocation2 + $0x118] sm:$0xff]  ;;  %v475_v22 = vrot.slane %v13351_v40, %v12688_v12  ;;  %v12433_v3 = vld [vmem:[#allocation2 + $0x100] sm:$0xff] }
  0xf8   :  { %11080 = vmatprep.mubr.bf16.mxu1 %v12863_v53  ;;  %v386_v61 = vsel %vm341_vm2, %v321_v50, %v289_v13  ;;  %v354_v47 = vsel %vm341_vm2, %v289_v13, %v321_v50  ;;  %v195_v53 = vrot.slane %v13353_v21, 7  ;;  %v12431_v13 = vld [vmem:[#allocation2 + $0x110] sm:$0xff]  ;;  %19785 = vst [vmem:[#allocation94_spill] sm:$0xff] %v13371_v59 }
  0xf9   :  { %v763_v6 = vsel %vm605_vm3, %v661_v16, %v386_v61  ;;  %v293_v50 = vrot.slane %v12431_v13, 1  ;;  %v325_v16 = vrot.slane %v12432_v27, 1  ;;  %v388_v45 = vsel %vm341_vm2, %v323_v26, %v291_v19 }
  0xfa   :  { %v13369_v61 = vpack.c.bf16 %v763_v6, %v354_v47  ;;  %v356_v47 = vsel %vm341_vm2, %v291_v19, %v323_v26  ;;  %v767_v6 = vsel %vm605_vm3, %v669_v2, %v388_v45  ;;  %v294_v26 = vrot.slane %v12433_v3, 1 }
  0xfb   :  { %v390_v13 = vsel %vm341_vm2, %v325_v16, %v293_v50  ;;  %v358_v32 = vsel %vm341_vm2, %v293_v50, %v325_v16  ;;  %v12435_v16 = vld [vmem:[#allocation2 + $0x120] sm:$0xff] }
  0xfc   :  { %19784 = vst [vmem:[#allocation93_spill] sm:$0xff] %v13369_v61  ;;  %v295_v45 = vrot.slane %v12435_v16, 1 }
  0xfe   :  { %11001 = vmatmul.mubr.bf16.gmra.mxu0 %v13341_v0 }
  0xff   :  { %11081 = vmatmul.mubr.bf16.gmra.mxu1 %v12867_v56  ;;  %11004 = vmatprep.mubr.bf16.mxu0 %v13343_v23  ;;  %v163_v56 = vrot.slane %v13351_v40, 7 }
 0x100   :  { %11084 = vmatprep.mubr.bf16.mxu1 %v12889_v20  ;;  %v677_v20 = vrot.slane %v12432_v27, %v13159_v44 }
 0x101   :  { %v260_v29 = vsel %vm212_vm0, %v195_v53, %v163_v56  ;;  %v228_v58 = vsel %vm212_vm0, %v163_v56, %v195_v53 }
 0x102   :  { %v570_v27 = vsel %vm406_vm1, %v475_v22, %v260_v29  ;;  %v771_v19 = vsel %vm605_vm3, %v677_v20, %v390_v13  ;;  %v12437_v13 = vld [vmem:[#allocation2 + $0x130] sm:$0xff] }
 0x103   :  { %v13401_v2 = vpack.c.bf16 %v228_v58, %v570_v27  ;;  %v13403_v53 = vpack.c.bf16 %v771_v19, %v358_v32 }
 0x105   :  { %19787 = vst [vmem:[#allocation96_spill] sm:$0xff] %v13401_v2  ;;  %19788 = vst [vmem:[#allocation97_spill] sm:$0xff] %v13403_v53 }
 0x106   :  { %11005 = vmatmul.mubr.bf16.gmra.mxu0 %v13369_v61 }
 0x107   :  { %11085 = vmatmul.mubr.bf16.gmra.mxu1 %v12893_v24  ;;  %11008 = vmatprep.mubr.bf16.mxu0 %v13371_v59  ;;  %v12434_v24 = vld [vmem:[#allocation2 + $0x108] sm:$0xff]  ;;  %v13399_v59 = vpack.c.bf16 %v767_v6, %v356_v47  ;;  %v296_v47 = vrot.slane %v12437_v13, 1  ;;  %v12438_v6 = vld [vmem:[#allocation2 + $0x138] sm:$0xff] }
 0x108   :  { %11088 = vmatprep.mubr.bf16.mxu1 %v12915_v48  ;;  %v326_v25 = vrot.slane %v12434_v24, 1  ;;  %v681_v56 = vrot.slane %v12434_v24, %v13159_v44  ;;  %v12436_v24 = vld [vmem:[#allocation2 + $0x128] sm:$0xff]  ;;  %v328_v58 = vrot.slane %v12438_v6, 1  ;;  %v689_v19 = vrot.slane %v12438_v6, %v13159_v44 }
 0x109   :  { %19786 = vst [vmem:[#allocation95_spill] sm:$0xff] %v13399_v59  ;;  %v327_v29 = vrot.slane %v12436_v24, 1  ;;  %v685_v32 = vrot.slane %v12436_v24, %v13159_v44 }
 0x10a   :  { %v391_v22 = vsel %vm341_vm2, %v326_v25, %v294_v26  ;;  %v359_v20 = vsel %vm341_vm2, %v294_v26, %v326_v25  ;;  %v361_v13 = vsel %vm341_vm2, %v296_v47, %v328_v58 }
 0x10b   :  { %v773_v50 = vsel %vm605_vm3, %v681_v56, %v391_v22  ;;  %v392_v25 = vsel %vm341_vm2, %v327_v29, %v295_v45  ;;  %v360_v56 = vsel %vm341_vm2, %v295_v45, %v327_v29  ;;  %v298_v45 = vrot.slane %v12943_v31, 1 }
 0x10c   :  { %v13416_v27 = vpack.c.bf16 %v773_v50, %v359_v20  ;;  %v775_v22 = vsel %vm605_vm3, %v685_v32, %v392_v25  ;;  %v12439_v20 = vld [vmem:[#allocation2 + $0x140] sm:$0xff]  ;;  %v330_v29 = vrot.slane %v12947_v37, 1 }
 0x10d   :  { %v297_v50 = vrot.slane %v12439_v20, 1 }
 0x10e   :  { %11009 = vmatmul.mubr.bf16.gmra.mxu0 %v13399_v59 }
 0x10f   :  { %11089 = vmatmul.mubr.bf16.gmra.mxu1 %v13401_v2  ;;  %11012 = vmatprep.mubr.bf16.mxu0 %v13403_v53 }
 0x110   :  { %11092 = vmatprep.mubr.bf16.mxu1 %v12934_v14  ;;  %v393_v14 = vsel %vm341_vm2, %v328_v58, %v296_v47 }
 0x111   :  { %v777_v6 = vsel %vm605_vm3, %v689_v19, %v393_v14 }
 0x112   :  { %v13444_v20 = vpack.c.bf16 %v777_v6, %v361_v13  ;;  %v299_v13 = vrot.slane %v12962_v62, 1 }
 0x114   :  { %19790 = vst [vmem:[#allocation99_spill] sm:$0xff] %v13444_v20 }
 0x116   :  { %v10822_v3 = vpop.f32.mrf.mxu0  ;;  %11013 = vmatmul.mubr.bf16.gmra.mxu0 %v13416_v27 }
 0x117   :  { %v10902_v26 = vpop.f32.mrf.mxu1  ;;  %11093 = vmatmul.mubr.bf16.gmra.mxu1 %v12919_v57  ;;  %11016 = vmatprep.mubr.bf16.mxu0 %v13403_v53  ;;  %v12440_v57 = vld [vmem:[#allocation2 + $0x148] sm:$0xff] }
 0x118   :  { %v13431_v16 = vadd.f32 %v10902_v26, %v10822_v3  ;;  %v1013_v24 = vpop.f32.mrf.mxu0  ;;  %11096 = vmatprep.mubr.bf16.mxu1 %v12964_v5  ;;  %v329_v2 = vrot.slane %v12440_v57, 1  ;;  %v13442_v3 = vpack.c.bf16 %v775_v22, %v360_v56  ;;  %v693_v47 = vrot.slane %v12440_v57, %v13159_v44  ;;  %v12441_v5 = vld [vmem:[#allocation2 + $0x158] sm:$0xff] }
 0x119   :  { %v1350_v48 = vpop.f32.mrf.mxu1  ;;  %v697_v31 = vrot.slane %v12441_v5, %v13159_v44 }
 0x11a   :  { %v13440_v32 = vadd.f32 %v1350_v48, %v1013_v24  ;;  %v10823_v25 = vpop.f32.mrf.mxu0  ;;  %19789 = vst [vmem:[#allocation98_spill] sm:$0xff] %v13442_v3  ;;  %v394_v14 = vsel %vm341_vm2, %v329_v2, %v297_v50  ;;  %v395_v48 = vsel %vm341_vm2, %v330_v29, %v298_v45  ;;  %v362_v57 = vsel %vm341_vm2, %v297_v50, %v329_v2 }
 0x11b   :  { %v10903_v26 = vpop.f32.mrf.mxu1  ;;  %v779_v5 = vsel %vm605_vm3, %v693_v47, %v394_v14  ;;  %v300_v2 = vrot.slane %v12977_v15, 1  ;;  %v332_v50 = vrot.slane %v12982_v8, 1  ;;  %v705_v15 = vrot.slane %v12982_v8, %v13159_v44 }
 0x11c   :  { %v13447_v58 = vadd.f32 %v10903_v26, %v10823_v25  ;;  %v1016_v19 = vpop.f32.mrf.mxu0  ;;  %v363_v26 = vsel %vm341_vm2, %v298_v45, %v330_v29  ;;  %v13476_v14 = vpack.c.bf16 %v779_v5, %v362_v57 }
 0x11d   :  { %v1353_v37 = vpop.f32.mrf.mxu1 }
 0x11e   :  { %v13454_v56 = vadd.f32 %v1353_v37, %v1016_v19  ;;  %v10826_v22 = vpop.f32.mrf.mxu0  ;;  %11017 = vmatmul.mubr.bf16.gmra.mxu0 %v13442_v3  ;;  %v781_v19 = vsel %vm605_vm3, %v697_v31, %v395_v48  ;;  %v331_v37 = vrot.slane %v12971_v11, 1  ;;  %19791 = vst [vmem:[#allocation100_spill] sm:$0xff] %v13476_v14  ;;  %v397_v48 = vsel %vm341_vm2, %v332_v50, %v300_v2 }
 0x11f   :  { %v10906_v24 = vpop.f32.mrf.mxu1  ;;  %11097 = vmatmul.mubr.bf16.gmra.mxu1 %v12968_v7  ;;  %11020 = vmatprep.mubr.bf16.mxu0 %v13444_v20 }
 0x120   :  { %v13464_v6 = vadd.f32 %v10906_v24, %v10826_v22  ;;  %v1029_v25 = vpop.f32.mrf.mxu0  ;;  %11100 = vmatprep.mubr.bf16.mxu1 %v13001_v49  ;;  %v13478_v24 = vpack.c.bf16 %v781_v19, %v363_v26  ;;  %v12442_v49 = vld [vmem:[#allocation2 + $0x168] sm:$0xff]  ;;  %v396_v11 = vsel %vm341_vm2, %v331_v37, %v299_v13  ;;  %v301_v26 = vrot.slane %v13007_v43, 1 }
 0x121   :  { %v1366_v7 = vpop.f32.mrf.mxu1  ;;  %v701_v45 = vrot.slane %v12442_v49, %v13159_v44  ;;  %v364_v49 = vsel %vm341_vm2, %v299_v13, %v331_v37  ;;  %v302_v13 = vrot.slane %v13015_v35, 1  ;;  %v334_v37 = vrot.slane %v13017_v60, 1 }
 0x122   :  { %v13474_v47 = vadd.f32 %v1366_v7, %v1029_v25  ;;  %v10827_v62 = vpop.f32.mrf.mxu0  ;;  %19792 = vst [vmem:[#allocation101_spill] sm:$0xff] %v13478_v24  ;;  %v713_v35 = vrot.slane %v13017_v60, %v13159_v44 }
 0x123   :  { %v10907_v22 = vpop.f32.mrf.mxu1  ;;  %v783_v8 = vsel %vm605_vm3, %v701_v45, %v396_v11 }
 0x124   :  { %v13481_v29 = vadd.f32 %v10907_v22, %v10827_v62  ;;  %v1032_v31 = vpop.f32.mrf.mxu0  ;;  %v365_v22 = vsel %vm341_vm2, %v300_v2, %v332_v50  ;;  %v13511_v11 = vpack.c.bf16 %v783_v8, %v364_v49  ;;  %v709_v2 = vrot.slane %v13009_v10, %v13159_v44 }
 0x125   :  { %v1369_v7 = vpop.f32.mrf.mxu1  ;;  %v399_v49 = vsel %vm341_vm2, %v334_v37, %v302_v13 }
 0x126   :  { %v13489_v57 = vadd.f32 %v1369_v7, %v1032_v31  ;;  %v10830_v5 = vpop.f32.mrf.mxu0  ;;  %11021 = vmatmul.mubr.bf16.gmra.mxu0 %v13476_v14  ;;  %v785_v31 = vsel %vm605_vm3, %v705_v15, %v397_v48  ;;  %v333_v7 = vrot.slane %v13009_v10, 1  ;;  %19793 = vst [vmem:[#allocation102_spill] sm:$0xff] %v13511_v11 }
 0x127   :  { %v10910_v25 = vpop.f32.mrf.mxu1  ;;  %11101 = vmatmul.mubr.bf16.gmra.mxu1 %v13011_v1  ;;  %11024 = vmatprep.mubr.bf16.mxu0 %v13478_v24 }
 0x128   :  { %v13499_v19 = vadd.f32 %v10910_v25, %v10830_v5  ;;  %v1045_v62 = vpop.f32.mrf.mxu0  ;;  %11104 = vmatprep.mubr.bf16.mxu1 %v13045_v30  ;;  %v13513_v25 = vpack.c.bf16 %v785_v31, %v365_v22  ;;  %v398_v48 = vsel %vm341_vm2, %v333_v7, %v301_v26  ;;  %v366_v10 = vsel %vm341_vm2, %v301_v26, %v333_v7  ;;  %v19798_v30 = vld [vmem:[#allocation60_spill] sm:$0xff]  ;;  %v19799_v26 = vld [vmem:[#allocation62_spill] sm:$0xff] }
 0x129   :  { %v1382_v1 = vpop.f32.mrf.mxu1  ;;  %v787_v60 = vsel %vm605_vm3, %v709_v2, %v398_v48  ;;  %v303_v31 = vrot.slane %v13051_v51, 1  ;;  %v304_v7 = vrot.slane %v19799_v26, 1 }
 0x12a   :  { %v13509_v45 = vadd.f32 %v1382_v1, %v1045_v62  ;;  %v10831_v43 = vpop.f32.mrf.mxu0  ;;  %19794 = vst [vmem:[#allocation103_spill] sm:$0xff] %v13513_v25 }
 0x12b   :  { %v10911_v5 = vpop.f32.mrf.mxu1 }
 0x12c   :  { %v13517_v50 = vadd.f32 %v10911_v5, %v10831_v43  ;;  %v1048_v15 = vpop.f32.mrf.mxu0 }
 0x12d   :  { %v1385_v1 = vpop.f32.mrf.mxu1 }
 0x12e   :  { %19795 = vst [vmem:[#allocation104_spill] sm:$0xff] %v13517_v50  ;;  %v13525_v8 = vadd.f32 %v1385_v1, %v1048_v15  ;;  %v10834_v62 = vpop.f32.mrf.mxu0  ;;  %11025 = vmatmul.mubr.bf16.gmra.mxu0 %v13511_v11  ;;  %v19797_v15 = vld [vmem:[#allocation65_spill] sm:$0xff]  ;;  %v367_v1 = vsel %vm341_vm2, %v302_v13, %v334_v37  ;;  %v19800_v50 = vld [vmem:[#allocation63_spill] sm:$0xff]  ;;  %v717_v13 = vrot.slane %v19798_v30, %v13159_v44 }
 0x12f   :  { %v10914_v22 = vpop.f32.mrf.mxu1  ;;  %11105 = vmatmul.mubr.bf16.gmra.mxu1 %v13055_v63  ;;  %11028 = vmatprep.mubr.bf16.mxu0 %v13513_v25  ;;  %v789_v63 = vsel %vm605_vm3, %v713_v35, %v399_v49  ;;  %v335_v25 = vrot.slane %v19798_v30, 1  ;;  %v336_v2 = vrot.slane %v19800_v50, 1  ;;  %v721_v26 = vrot.slane %v19800_v50, %v13159_v44  ;;  %v19805_v30 = vld [vmem:[#allocation67_spill] sm:$0xff] }
 0x130   :  { %19796 = vst [vmem:[#allocation105_spill] sm:$0xff] %v13525_v8  ;;  %v13535_v43 = vadd.f32 %v10914_v22, %v10834_v62  ;;  %v1061_v5 = vpop.f32.mrf.mxu0  ;;  %11108 = vmatprep.mubr.bf16.mxu1 %v19797_v15  ;;  %v13547_v62 = vpack.c.bf16 %v787_v60, %v366_v10  ;;  %v13549_v15 = vpack.c.bf16 %v789_v63, %v367_v1 }
 0x131   :  { %v1398_v8 = vpop.f32.mrf.mxu1  ;;  %v400_v49 = vsel %vm341_vm2, %v335_v25, %v303_v31  ;;  %v401_v10 = vsel %vm341_vm2, %v336_v2, %v304_v7  ;;  %v368_v1 = vsel %vm341_vm2, %v303_v31, %v335_v25  ;;  %v337_v25 = vrot.slane %v13097_v46, 1 }
 0x132   :  { %v13545_v48 = vadd.f32 %v1398_v8, %v1061_v5  ;;  %v10835_v51 = vpop.f32.mrf.mxu0  ;;  %19801 = vst [vmem:[#allocation60_spill] sm:$0xff] %v13547_v62  ;;  %19802 = vst [vmem:[#allocation62_spill] sm:$0xff] %v13549_v15  ;;  %v791_v50 = vsel %vm605_vm3, %v717_v13, %v400_v49  ;;  %v306_v13 = vrot.slane %v13103_v38, 1  ;;  %v19808_v49 = vld [vmem:[#allocation68_spill] sm:$0xff] }
 0x133   :  { %v10915_v22 = vpop.f32.mrf.mxu1 }
 0x134   :  { %v13553_v37 = vadd.f32 %v10915_v22, %v10835_v51  ;;  %v1064_v35 = vpop.f32.mrf.mxu0  ;;  %v305_v51 = vrot.slane %v13095_v36, 1  ;;  %v13571_v22 = vld [vmem:[#allocation5 + $0x1f8] sm:$0xff]   ;;  %v338_v36 = vrot.slane %v19808_v49, 1 }
 0x135   :  { %v1401_v8 = vpop.f32.mrf.mxu1  ;;  %11364 = vmatprep.subr.bf16.mxu1 %v13571_v22 }
 0x136   :  { %19803 = vst [vmem:[#allocation63_spill] sm:$0xff] %v13553_v37  ;;  %v13561_v60 = vadd.f32 %v1401_v8, %v1064_v35  ;;  %v10838_v63 = vpop.f32.mrf.mxu0  ;;  %11029 = vmatmul.mubr.bf16.gmra.mxu0 %v13547_v62  ;;  %v402_v38 = vsel %vm341_vm2, %v337_v25, %v305_v51 }
 0x137   :  { %v10918_v5 = vpop.f32.mrf.mxu1  ;;  %11109 = vmatmul.mubr.bf16.gmra.mxu1 %v19805_v30  ;;  %11032 = vmatprep.mubr.bf16.mxu0 %v13549_v15  ;;  %v369_v30 = vsel %vm341_vm2, %v304_v7, %v336_v2  ;;  %v793_v15 = vsel %vm605_vm3, %v721_v26, %v401_v10  ;;  %v725_v7 = vrot.slane %v13097_v46, %v13159_v44  ;;  %v13605_v46 = vld [vmem:[#allocation2 + $0x1f8] sm:$0xff] }
 0x138   :  { %19804 = vst [vmem:[#allocation106_spill] sm:$0xff] %v13561_v60  ;;  %v13573_v35 = vadd.f32 %v10918_v5, %v10838_v63  ;;  %v1077_v8 = vpop.f32.mrf.mxu0  ;;  %v19807_v60 = vld [vmem:[#allocation70_spill] sm:$0xff]  ;;  %v13588_v37 = vpack.c.bf16 %v793_v15, %v369_v30  ;;  %v729_v10 = vrot.slane %v19808_v49, %v13159_v44  ;;  %v13603_v30 = vld [vmem:[#allocation2 + $0x1f0] sm:$0xff]  ;;  %v370_v49 = vsel %vm341_vm2, %v305_v51, %v337_v25 }
 0x139   :  { %11112 = vmatprep.mubr.bf16.mxu1 %v19807_v60  ;;  %v1414_v31 = vpop.f32.mrf.mxu1  ;;  %v179_v51 = vrot.slane %v13603_v30, 7  ;;  %v211_v25 = vrot.slane %v13605_v46, 7 }
 0x13a   :  { %19806 = vst [vmem:[#allocation107_spill] sm:$0xff] %v13573_v35  ;;  %v13584_v63 = vadd.f32 %v1414_v31, %v1077_v8  ;;  %v10839_v5 = vpop.f32.mrf.mxu0  ;;  %v13586_v35 = vpack.c.bf16 %v791_v50, %v368_v1  ;;  %19811 = vst [vmem:[#allocation109_spill] sm:$0xff] %v13588_v37  ;;  %v403_v1 = vsel %vm341_vm2, %v338_v36, %v306_v13  ;;  %v19814_v31 = vld [vmem:[#allocation72_spill] sm:$0xff] }
 0x13b   :  { %v10919_v60 = vpop.f32.mrf.mxu1 }
 0x13c   :  { %19809 = vst [vmem:[#allocation68_spill] sm:$0xff] %v13584_v63  ;;  %19810 = vst [vmem:[#allocation108_spill] sm:$0xff] %v13586_v35  ;;  %v13592_v2 = vadd.f32 %v10919_v60, %v10839_v5  ;;  %v1080_v26 = vpop.f32.mrf.mxu0  ;;  %v795_v5 = vsel %vm605_vm3, %v725_v7, %v402_v38  ;;  %v371_v63 = vsel %vm341_vm2, %v306_v13, %v338_v36 }
 0x13d   :  { %v1417_v8 = vpop.f32.mrf.mxu1  ;;  %v13626_v38 = vpack.c.bf16 %v795_v5, %v370_v49  ;;  %v733_v13 = vrot.slane %v13145_v55, %v13159_v44 }
 0x13e   :  { %19812 = vst [vmem:[#allocation110_spill] sm:$0xff] %v13592_v2  ;;  %v13600_v50 = vadd.f32 %v1417_v8, %v1080_v26  ;;  %v10842_v15 = vpop.f32.mrf.mxu0  ;;  %11033 = vmatmul.mubr.bf16.gmra.mxu0 %v13586_v35  ;;  %v307_v26 = vrot.slane %v13143_v18, 1  ;;  %v19815_v2 = vld [vmem:[#allocation76_spill] sm:$0xff] }
 0x13f   :  { %v10922_v60 = vpop.f32.mrf.mxu1  ;;  %11113 = vmatmul.mubr.bf16.gmra.mxu1 %v19814_v31  ;;  %11036 = vmatprep.mubr.bf16.mxu0 %v13588_v37  ;;  %v797_v31 = vsel %vm605_vm3, %v729_v10, %v403_v1  ;;  %v339_v37 = vrot.slane %v13145_v55, 1  ;;  %19816 = vst [vmem:[#allocation112_spill] sm:$0xff] %v13626_v38  ;;  %v19820_v55 = vld [vmem:[#allocation78_spill] sm:$0xff] }
 0x140   :  { %19813 = vst [vmem:[#allocation111_spill] sm:$0xff] %v13600_v50  ;;  %v13614_v8 = vadd.f32 %v10922_v60, %v10842_v15  ;;  %v1093_v50 = vpop.f32.mrf.mxu0  ;;  %11116 = vmatprep.mubr.bf16.mxu1 %v19815_v2  ;;  %v13628_v60 = vpack.c.bf16 %v797_v31, %v371_v63  ;;  %v539_v2 = vrot.slane %v13603_v30, %v12688_v12 }
 0x141   :  { %v1430_v35 = vpop.f32.mrf.mxu1  ;;  %v404_v1 = vsel %vm341_vm2, %v339_v37, %v307_v26  ;;  %v372_v5 = vsel %vm341_vm2, %v307_v26, %v339_v37 }
 0x142   :  { %v13624_v7 = vadd.f32 %v1430_v35, %v1093_v50  ;;  %v10843_v18 = vpop.f32.mrf.mxu0  ;;  %19817 = vst [vmem:[#allocation113_spill] sm:$0xff] %v13628_v60  ;;  %v276_v50 = vsel %vm212_vm0, %v211_v25, %v179_v51 }
 0x143   :  { %v10923_v15 = vpop.f32.mrf.mxu1 }
 0x144   :  { %v13632_v36 = vadd.f32 %v10923_v15, %v10843_v18  ;;  %v1096_v10 = vpop.f32.mrf.mxu0  ;;  %v799_v18 = vsel %vm605_vm3, %v733_v13, %v404_v1 }
 0x145   :  { %v1433_v35 = vpop.f32.mrf.mxu1 }
 0x146   :  { %19818 = vst [vmem:[#allocation114_spill] sm:$0xff] %v13632_v36  ;;  %v13640_v49 = vadd.f32 %v1433_v35, %v1096_v10  ;;  %v10846_v63 = vpop.f32.mrf.mxu0  ;;  %11037 = vmatmul.mubr.bf16.gmra.mxu0 %v13626_v38  ;;  %v244_v10 = vsel %vm212_vm0, %v179_v51, %v211_v25  ;;  %v602_v35 = vsel %vm406_vm1, %v539_v2, %v276_v50  ;;  %v19825_v50 = vld [vmem:[#allocation82_spill] sm:$0xff] }
 0x147   :  { %v10926_v31 = vpop.f32.mrf.mxu1  ;;  %11117 = vmatmul.mubr.bf16.gmra.mxu1 %v19820_v55  ;;  %11040 = vmatprep.mubr.bf16.mxu0 %v13628_v60  ;;  %v13658_v36 = vpack.c.bf16 %v799_v18, %v372_v5  ;;  %v13660_v26 = vpack.c.bf16 %v244_v10, %v602_v35 }
 0x148   :  { %19819 = vst [vmem:[#allocation115_spill] sm:$0xff] %v13640_v49  ;;  %v13649_v15 = vadd.f32 %v10926_v31, %v10846_v63  ;;  %v1109_v12 = vpop.f32.mrf.mxu0  ;;  %11120 = vmatprep.mubr.bf16.mxu1 %v13214_v39 }
 0x149   :  { %v1446_v55 = vpop.f32.mrf.mxu1  ;;  %19821 = vst [vmem:[#allocation116_spill] sm:$0xff] %v13658_v36  ;;  %19822 = vst [vmem:[#allocation117_spill] sm:$0xff] %v13660_v26 }
 0x14a   :  { %v13656_v49 = vadd.f32 %v1446_v55, %v1109_v12  ;;  %v10847_v60 = vpop.f32.mrf.mxu0  ;;  %v19824_v12 = vld [vmem:[#allocation19_spill] sm:$0xff] }
 0x14b   :  { %v10927_v37 = vpop.f32.mrf.mxu1 }
 0x14c   :  { %v13662_v13 = vadd.f32 %v10927_v37, %v10847_v60  ;;  %v1112_v1 = vpop.f32.mrf.mxu0 }
 0x14d   :  { %v1449_v63 = vpop.f32.mrf.mxu1 }
 0x14e   :  { %v13664_v31 = vadd.f32 %v1449_v63, %v1112_v1  ;;  %v10850_v39 = vpop.f32.mrf.mxu0  ;;  %11041 = vmatmul.mubr.bf16.gmra.mxu0 %v13658_v36  ;;  %v12302_v1 = vld [vmem:[#allocation5 + $0x1b0] sm:$0xff]  }
 0x14f   :  { %v10930_v51 = vpop.f32.mrf.mxu1  ;;  %11121 = vmatmul.mubr.bf16.gmra.mxu1 %v13660_v26  ;;  %11140 = vmatprep.mubr.bf16.mxu0 %v19824_v12 }
 0x150   :  { %19823 = vst [vmem:[#allocation118_spill] sm:$0xff] %v13664_v31  ;;  %v13669_v2 = vadd.f32 %v10930_v51, %v10850_v39  ;;  %v1125_v25 = vpop.f32.mrf.mxu0  ;;  %11220 = vmatprep.mubr.bf16.mxu1 %v19825_v50  ;;  %v19828_v31 = vld [vmem:[#allocation17_spill] sm:$0xff]  ;;  %v19830_v50 = vld [vmem:[#allocation20_spill] sm:$0xff] }
 0x151   :  { %v1462_v55 = vpop.f32.mrf.mxu1  ;;  %v12309_v39 = vld [vmem:[#allocation5 + $0x1f0] sm:$0xff]  }
 0x152   :  { %v13672_v60 = vadd.f32 %v1462_v55, %v1125_v25  ;;  %v10851_v5 = vpop.f32.mrf.mxu0  ;;  %v19831_v55 = vld [vmem:[#allocation83_spill] sm:$0xff] }
 0x153   :  { %v10931_v18 = vpop.f32.mrf.mxu1 }
 0x154   :  { %v13674_v10 = vadd.f32 %v10931_v18, %v10851_v5  ;;  %v1128_v35 = vpop.f32.mrf.mxu0  ;;  %v12303_v5 = vld [vmem:[#allocation5 + $0x1a8] sm:$0xff]  }
 0x155   :  { %v1465_v37 = vpop.f32.mrf.mxu1 }
 0x156   :  { %19826 = vst [vmem:[#allocation19_spill] sm:$0xff] %v13674_v10  ;;  %v13676_v63 = vadd.f32 %v1465_v37, %v1128_v35  ;;  %v10854_v26 = vpop.f32.mrf.mxu0  ;;  %11141 = vmatmul.mubr.bf16.vlgmr.msra.gmra.mxu0 %v19828_v31  ;;  %v19835_v10 = vld [vmem:[#allocation22_spill] sm:$0xff] }
 0x157   :  { %v10934_v51 = vpop.f32.mrf.mxu1  ;;  %11285 = vmatpush3.bf16.msra.mxu0 %v13316_v42  ;;  %11221 = vmatmul.mubr.bf16.vlgmr.msra.gmra.mxu1 %v13216_v17 }
 0x158   :  { %19827 = vst [vmem:[#allocation82_spill] sm:$0xff] %v13676_v63  ;;  %v13681_v12 = vadd.f32 %v10934_v51, %v10854_v26  ;;  %v1141_v25 = vpop.f32.mrf.mxu0  ;;  %11144 = vmatprep.mubr.bf16.mxu0 %v19830_v50  ;;  %11224 = vmatprep.mubr.bf16.mxu1 %v19831_v55  ;;  %v12310_v63 = vld [vmem:[#allocation5 + $0x1e8] sm:$0xff]   ;;  %v12304_v50 = vld [vmem:[#allocation5 + $0x1a0] sm:$0xff]  }
 0x159   :  { %v1478_v18 = vpop.f32.mrf.mxu1  ;;  %11286 = vmatprep.subr.bf16.mxu0 %v12302_v1  ;;  %11365 = vmatpush3.bf16.msra.mxu1 %v13571_v22  ;;  %v12311_v22 = vld [vmem:[#allocation5 + $0x1e0] sm:$0xff]  }
 0x15a   :  { %19829 = vst [vmem:[#allocation17_spill] sm:$0xff] %v13681_v12  ;;  %v13686_v35 = vadd.f32 %v1478_v18, %v1141_v25  ;;  %v10855_v37 = vpop.f32.mrf.mxu0  ;;  %11366 = vmatprep.subr.bf16.mxu1 %v12309_v39  ;;  %v19836_v18 = vld [vmem:[#allocation84_spill] sm:$0xff] }
 0x15b   :  { %v10935_v42 = vpop.f32.mrf.mxu1  ;;  %11287 = vmatpush3.bf16.msra.mxu0 %v12302_v1 }
 0x15c   :  { %19832 = vst [vmem:[#allocation119_spill] sm:$0xff] %v13686_v35  ;;  %v13688_v17 = vadd.f32 %v10935_v42, %v10855_v37  ;;  %v1144_v26 = vpop.f32.mrf.mxu0  ;;  %11288 = vmatprep.subr.bf16.mxu0 %v12303_v5  ;;  %v19837_v35 = vld [vmem:[#allocation24_spill] sm:$0xff] }
 0x15d   :  { %v1481_v51 = vpop.f32.mrf.mxu1  ;;  %11367 = vmatpush3.bf16.msra.mxu1 %v12309_v39  ;;  %v12305_v39 = vld [vmem:[#allocation5 + $0x198] sm:$0xff]  }
 0x15e   :  { %19833 = vst [vmem:[#allocation120_spill] sm:$0xff] %v13688_v17  ;;  %v13690_v55 = vadd.f32 %v1481_v51, %v1144_v26  ;;  %v10858_v12 = vpop.f32.mrf.mxu0  ;;  %11145 = vmatmul.mubr.bf16.gmra.mxu0 %v19835_v10  ;;  %11368 = vmatprep.subr.bf16.mxu1 %v12310_v63 }
 0x15f   :  { %v10938_v25 = vpop.f32.mrf.mxu1  ;;  %11225 = vmatmul.mubr.bf16.gmra.mxu1 %v19836_v18  ;;  %11148 = vmatprep.mubr.bf16.mxu0 %v19837_v35  ;;  %v19841_v35 = vld [vmem:[#allocation26_spill] sm:$0xff] }
 0x160   :  { %19834 = vst [vmem:[#allocation121_spill] sm:$0xff] %v13690_v55  ;;  %v13695_v1 = vadd.f32 %v10938_v25, %v10858_v12  ;;  %v1157_v37 = vpop.f32.mrf.mxu0  ;;  %11228 = vmatprep.mubr.bf16.mxu1 %v13272_v54  ;;  %11289 = vmatpush3.bf16.msra.mxu0 %v12303_v5  ;;  %v12313_v55 = vld [vmem:[#allocation5 + $0x1d8] sm:$0xff]   ;;  %v12306_v25 = vld [vmem:[#allocation5 + $0x190] sm:$0xff]  }
 0x161   :  { %v1494_v42 = vpop.f32.mrf.mxu1  ;;  %11290 = vmatprep.subr.bf16.mxu0 %v12304_v50  ;;  %11369 = vmatpush3.bf16.msra.mxu1 %v12310_v63  ;;  %v12314_v63 = vld [vmem:[#allocation5 + $0x1d0] sm:$0xff]  }
 0x162   :  { %v13698_v26 = vadd.f32 %v1494_v42, %v1157_v37  ;;  %v10859_v51 = vpop.f32.mrf.mxu0  ;;  %11370 = vmatprep.subr.bf16.mxu1 %v12311_v22  ;;  %v19842_v42 = vld [vmem:[#allocation28_spill] sm:$0xff] }
 0x163   :  { %v10939_v17 = vpop.f32.mrf.mxu1 }
 0x164   :  { %19838 = vst [vmem:[#allocation122_spill] sm:$0xff] %v13698_v26  ;;  %v13700_v10 = vadd.f32 %v10939_v17, %v10859_v51  ;;  %v1160_v18 = vpop.f32.mrf.mxu0  ;;  %11291 = vmatpush3.bf16.msra.mxu0 %v12304_v50 }
 0x165   :  { %v1497_v12 = vpop.f32.mrf.mxu1  ;;  %11292 = vmatprep.subr.bf16.mxu0 %v12305_v39  ;;  %11371 = vmatpush3.bf16.msra.mxu1 %v12311_v22  ;;  %v12307_v22 = vld [vmem:[#allocation5 + $0x188] sm:$0xff]  }
 0x166   :  { %19839 = vst [vmem:[#allocation123_spill] sm:$0xff] %v13700_v10  ;;  %v13702_v54 = vadd.f32 %v1497_v12, %v1160_v18  ;;  %v10862_v5 = vpop.f32.mrf.mxu0  ;;  %11149 = vmatmul.mubr.bf16.gmra.mxu0 %v19841_v35  ;;  %11372 = vmatprep.subr.bf16.mxu1 %v12313_v55 }
 0x167   :  { %v10942_v37 = vpop.f32.mrf.mxu1  ;;  %11229 = vmatmul.mubr.bf16.gmra.mxu1 %v13274_v41  ;;  %11152 = vmatprep.mubr.bf16.mxu0 %v19842_v42  ;;  %v19845_v42 = vld [vmem:[#allocation30_spill] sm:$0xff] }
 0x168   :  { %19840 = vst [vmem:[#allocation124_spill] sm:$0xff] %v13702_v54  ;;  %v13707_v17 = vadd.f32 %v10942_v37, %v10862_v5  ;;  %v1173_v51 = vpop.f32.mrf.mxu0  ;;  %11232 = vmatprep.mubr.bf16.mxu1 %v13294_v33  ;;  %11293 = vmatpush3.bf16.msra.mxu0 %v12305_v39  ;;  %v12315_v54 = vld [vmem:[#allocation5 + $0x1c8] sm:$0xff]   ;;  %v12312_v37 = vld [vmem:[#allocation5 + $0x180] sm:$0xff]  }
 0x169   :  { %v1510_v50 = vpop.f32.mrf.mxu1  ;;  %11294 = vmatprep.subr.bf16.mxu0 %v12306_v25  ;;  %11373 = vmatpush3.bf16.msra.mxu1 %v12313_v55  ;;  %v12316_v55 = vld [vmem:[#allocation5 + $0x1c0] sm:$0xff]  }
 0x16a   :  { %v13710_v18 = vadd.f32 %v1510_v50, %v1173_v51  ;;  %v10863_v12 = vpop.f32.mrf.mxu0  ;;  %11374 = vmatprep.subr.bf16.mxu1 %v12314_v63  ;;  %v19846_v50 = vld [vmem:[#allocation32_spill] sm:$0xff] }
 0x16b   :  { %v10943_v10 = vpop.f32.mrf.mxu1 }
 0x16c   :  { %v13712_v26 = vadd.f32 %v10943_v10, %v10863_v12  ;;  %v1176_v41 = vpop.f32.mrf.mxu0  ;;  %11295 = vmatpush3.bf16.msra.mxu0 %v12306_v25 }
 0x16d   :  { %v1513_v5 = vpop.f32.mrf.mxu1  ;;  %11296 = vmatprep.subr.bf16.mxu0 %v12307_v22  ;;  %11375 = vmatpush3.bf16.msra.mxu1 %v12314_v63 }
 0x16e   :  { %19843 = vst [vmem:[#allocation26_spill] sm:$0xff] %v13712_v26  ;;  %v13714_v33 = vadd.f32 %v1513_v5, %v1176_v41  ;;  %v10866_v39 = vpop.f32.mrf.mxu0  ;;  %11153 = vmatmul.mubr.bf16.gmra.mxu0 %v19845_v42  ;;  %11376 = vmatprep.subr.bf16.mxu1 %v12315_v54  ;;  %v13722_v41 = vld [vmem:[#allocation5 + $0x238] sm:$0xff]  }
 0x16f   :  { %v10946_v51 = vpop.f32.mrf.mxu1  ;;  %11233 = vmatmul.mubr.bf16.gmra.mxu1 %v13296_v52  ;;  %11156 = vmatprep.mubr.bf16.mxu0 %v19846_v50 }
 0x170   :  { %19844 = vst [vmem:[#allocation125_spill] sm:$0xff] %v13714_v33  ;;  %v13719_v10 = vadd.f32 %v10946_v51, %v10866_v39  ;;  %v1189_v12 = vpop.f32.mrf.mxu0  ;;  %11236 = vmatprep.mubr.bf16.mxu1 %v13318_v28  ;;  %11297 = vmatpush3.bf16.msra.mxu0 %v12307_v22  ;;  %v19850_v28 = vld [vmem:[#allocation34_spill] sm:$0xff] }
 0x171   :  { %v1526_v25 = vpop.f32.mrf.mxu1  ;;  %11298 = vmatprep.subr.bf16.mxu0 %v12312_v37  ;;  %11377 = vmatpush3.bf16.msra.mxu1 %v12315_v54 }
 0x172   :  { %v13724_v63 = vadd.f32 %v1526_v25, %v1189_v12  ;;  %v10867_v5 = vpop.f32.mrf.mxu0  ;;  %11378 = vmatprep.subr.bf16.mxu1 %v12316_v55  ;;  %v19851_v12 = vld [vmem:[#allocation36_spill] sm:$0xff] }
 0x173   :  { %v10947_v33 = vpop.f32.mrf.mxu1 }
 0x174   :  { %19847 = vst [vmem:[#allocation30_spill] sm:$0xff] %v13724_v63  ;;  %v13726_v26 = vadd.f32 %v10947_v33, %v10867_v5  ;;  %v1192_v52 = vpop.f32.mrf.mxu0  ;;  %11299 = vmatpush3.bf16.msra.mxu0 %v12312_v37 }
 0x175   :  { %v1529_v39 = vpop.f32.mrf.mxu1  ;;  %11379 = vmatpush3.bf16.msra.mxu1 %v12316_v55  ;;  %11444 = vmatprep.subr.bf16.mxu0 %v13722_v41 }
 0x176   :  { %19848 = vst [vmem:[#allocation32_spill] sm:$0xff] %v13726_v26  ;;  %v13729_v51 = vadd.f32 %v1529_v39, %v1192_v52  ;;  %v10870_v22 = vpop.f32.mrf.mxu0  ;;  %11157 = vmatmul.mubr.bf16.gmra.mxu0 %v19850_v28 }
 0x177   :  { %v10950_v54 = vpop.f32.mrf.mxu1  ;;  %11237 = vmatmul.mubr.bf16.gmra.mxu1 %v13320_v34  ;;  %11160 = vmatprep.mubr.bf16.mxu0 %v19851_v12  ;;  %v19855_v34 = vld [vmem:[#allocation38_spill] sm:$0xff] }
 0x178   :  { %19849 = vst [vmem:[#allocation126_spill] sm:$0xff] %v13729_v51  ;;  %v13734_v25 = vadd.f32 %v10950_v54, %v10870_v22  ;;  %v1205_v33 = vpop.f32.mrf.mxu0  ;;  %11240 = vmatprep.mubr.bf16.mxu1 %v13341_v0  ;;  %v19856_v22 = vld [vmem:[#allocation40_spill] sm:$0xff] }
 0x179   :  { %v1542_v37 = vpop.f32.mrf.mxu1 }
 0x17a   :  { %v13737_v5 = vadd.f32 %v1542_v37, %v1205_v33  ;;  %v10871_v55 = vpop.f32.mrf.mxu0 }
 0x17b   :  { %v10951_v26 = vpop.f32.mrf.mxu1 }
 0x17c   :  { %19852 = vst [vmem:[#allocation127_spill] sm:$0xff] %v13737_v5  ;;  %v13739_v52 = vadd.f32 %v10951_v26, %v10871_v55  ;;  %v1208_v39 = vpop.f32.mrf.mxu0  ;;  %v292_v26 = vrot.slane %v13351_v40, 1  ;;  %v324_v55 = vrot.slane %v13353_v21, 1 }
 0x17d   :  { %v1545_v51 = vpop.f32.mrf.mxu1 }
 0x17e   :  { %19853 = vst [vmem:[#allocation128_spill] sm:$0xff] %v13739_v52  ;;  %v13741_v63 = vadd.f32 %v1545_v51, %v1208_v39  ;;  %v10874_v28 = vpop.f32.mrf.mxu0  ;;  %11161 = vmatmul.mubr.bf16.gmra.mxu0 %v19855_v34 }
 0x17f   :  { %v10954_v12 = vpop.f32.mrf.mxu1  ;;  %11241 = vmatmul.mubr.bf16.gmra.mxu1 %v13343_v23  ;;  %11164 = vmatprep.mubr.bf16.mxu0 %v19856_v22  ;;  %v673_v23 = vrot.slane %v13353_v21, %v13159_v44 }
 0x180   :  { %19854 = vst [vmem:[#allocation129_spill] sm:$0xff] %v13741_v63  ;;  %v13746_v54 = vadd.f32 %v10954_v12, %v10874_v28  ;;  %v1221_v33 = vpop.f32.mrf.mxu0  ;;  %11244 = vmatprep.mubr.bf16.mxu1 %v13369_v61  ;;  %v389_v12 = vsel %vm341_vm2, %v324_v55, %v292_v26 }
 0x181   :  { %v1558_v37 = vpop.f32.mrf.mxu1 }
 0x182   :  { %19857 = vst [vmem:[#allocation38_spill] sm:$0xff] %v13746_v54  ;;  %v13751_v51 = vadd.f32 %v1558_v37, %v1221_v33  ;;  %v10875_v39 = vpop.f32.mrf.mxu0  ;;  %v19861_v54 = vld [vmem:[#allocation42_spill] sm:$0xff]  ;;  %v19863_v37 = vld [vmem:[#allocation44_spill] sm:$0xff] }
 0x183   :  { %v10955_v0 = vpop.f32.mrf.mxu1  ;;  %v19862_v33 = vld [vmem:[#allocation94_spill] sm:$0xff] }
 0x184   :  { %19858 = vst [vmem:[#allocation130_spill] sm:$0xff] %v13751_v51  ;;  %v13753_v63 = vadd.f32 %v10955_v0, %v10875_v39  ;;  %v1224_v52 = vpop.f32.mrf.mxu0 }
 0x185   :  { %v1561_v28 = vpop.f32.mrf.mxu1 }
 0x186   :  { %19859 = vst [vmem:[#allocation131_spill] sm:$0xff] %v13753_v63  ;;  %v13759_v61 = vadd.f32 %v1561_v28, %v1224_v52  ;;  %v10878_v22 = vpop.f32.mrf.mxu0  ;;  %11165 = vmatmul.mubr.bf16.gmra.mxu0 %v19861_v54  ;;  %v357_v63 = vsel %vm341_vm2, %v292_v26, %v324_v55  ;;  %v769_v52 = vsel %vm605_vm3, %v673_v23, %v389_v12  ;;  %v19866_v55 = vld [vmem:[#allocation48_spill] sm:$0xff] }
 0x187   :  { %v10958_v5 = vpop.f32.mrf.mxu1  ;;  %11245 = vmatmul.mubr.bf16.gmra.mxu1 %v19862_v33  ;;  %11168 = vmatprep.mubr.bf16.mxu0 %v19863_v37  ;;  %v13775_v33 = vpack.c.bf16 %v13353_v21, %v13351_v40 }
 0x188   :  { %19860 = vst [vmem:[#allocation132_spill] sm:$0xff] %v13759_v61  ;;  %v13764_v0 = vadd.f32 %v10958_v5, %v10878_v22  ;;  %v1237_v39 = vpop.f32.mrf.mxu0  ;;  %11248 = vmatprep.mubr.bf16.mxu1 %v13399_v59  ;;  %v13777_v5 = vpack.c.bf16 %v769_v52, %v357_v63 }
 0x189   :  { %v1574_v28 = vpop.f32.mrf.mxu1 }
 0x18a   :  { %19864 = vst [vmem:[#allocation133_spill] sm:$0xff] %v13764_v0  ;;  %v13771_v61 = vadd.f32 %v1574_v28, %v1237_v39  ;;  %v10879_v51 = vpop.f32.mrf.mxu0  ;;  %19865 = vst [vmem:[#allocation134_spill] sm:$0xff] %v13777_v5 }
 0x18b   :  { %v10959_v37 = vpop.f32.mrf.mxu1 }
 0x18c   :  { %v13779_v22 = vadd.f32 %v10959_v37, %v10879_v51  ;;  %v1240_v59 = vpop.f32.mrf.mxu0 }
 0x18d   :  { %v1577_v0 = vpop.f32.mrf.mxu1 }
 0x18e   :  { %v13781_v54 = vadd.f32 %v1577_v0, %v1240_v59  ;;  %v10882_v26 = vpop.f32.mrf.mxu0  ;;  %11169 = vmatmul.mubr.bf16.gmra.mxu0 %v13775_v33 }
 0x18f   :  { %v10962_v23 = vpop.f32.mrf.mxu1  ;;  %11249 = vmatmul.mubr.bf16.gmra.mxu1 %v13777_v5  ;;  %11172 = vmatprep.mubr.bf16.mxu0 %v19866_v55  ;;  %v19870_v5 = vld [vmem:[#allocation46_spill] sm:$0xff] }
 0x190   :  { %v13786_v12 = vadd.f32 %v10962_v23, %v10882_v26  ;;  %v1253_v40 = vpop.f32.mrf.mxu0  ;;  %11252 = vmatprep.mubr.bf16.mxu1 %v13416_v27  ;;  %v19871_v27 = vld [vmem:[#allocation49_spill] sm:$0xff] }
 0x191   :  { %v1590_v21 = vpop.f32.mrf.mxu1 }
 0x192   :  { %v13789_v63 = vadd.f32 %v1590_v21, %v1253_v40  ;;  %v10883_v51 = vpop.f32.mrf.mxu0 }
 0x193   :  { %v10963_v37 = vpop.f32.mrf.mxu1 }
 0x194   :  { %19867 = vst [vmem:[#allocation48_spill] sm:$0xff] %v13789_v63  ;;  %v13791_v59 = vadd.f32 %v10963_v37, %v10883_v51  ;;  %v1256_v0 = vpop.f32.mrf.mxu0  ;;  %v19872_v63 = vld [vmem:[#allocation51_spill] sm:$0xff] }
 0x195   :  { %v1593_v39 = vpop.f32.mrf.mxu1 }
 0x196   :  { %19868 = vst [vmem:[#allocation135_spill] sm:$0xff] %v13791_v59  ;;  %v13793_v52 = vadd.f32 %v1593_v39, %v1256_v0  ;;  %v10982_v28 = vpop.f32.mrf.mxu0  ;;  %11173 = vmatmul.mubr.bf16.gmra.mxu0 %v19870_v5 }
 0x197   :  { %v1961_v26 = vadd.f32 %v10982_v28, %v13431_v16  ;;  %v11062_v23 = vpop.f32.mrf.mxu1  ;;  %11253 = vmatmul.mubr.bf16.gmra.mxu1 %v13403_v53  ;;  %11176 = vmatprep.mubr.bf16.mxu0 %v19871_v27 }
 0x198   :  { %19869 = vst [vmem:[#allocation136_spill] sm:$0xff] %v13793_v52  ;;  %v1704_v55 = vpop.f32.mrf.mxu0  ;;  %11256 = vmatprep.mubr.bf16.mxu1 %v13442_v3  ;;  %v19874_v3 = vld [vmem:[#allocation55_spill] sm:$0xff] }
 0x199   :  { %v1959_v40 = vadd.f32 %v1704_v55, %v13440_v32  ;;  %v13801_v21 = vadd.f32 %v11062_v23, %v1961_v26  ;;  %v2122_v51 = vpop.f32.mrf.mxu1 }
 0x19a   :  { %v10983_v37 = vpop.f32.mrf.mxu0 }
 0x19b   :  { %v1962_v0 = vadd.f32 %v10983_v37, %v13447_v58  ;;  %v13804_v39 = vadd.f32 %v2122_v51, %v1959_v40  ;;  %v11063_v52 = vpop.f32.mrf.mxu1  ;;  %v19873_v58 = vld [vmem:[#allocation53_spill] sm:$0xff] }
 0x19c   :  { %v1707_v16 = vpop.f32.mrf.mxu0 }
 0x19d   :  { %v1960_v28 = vadd.f32 %v1707_v16, %v13454_v56  ;;  %v13807_v53 = vadd.f32 %v11063_v52, %v1962_v0  ;;  %v2125_v27 = vpop.f32.mrf.mxu1 }
 0x19e   :  { %v10986_v59 = vpop.f32.mrf.mxu0  ;;  %11177 = vmatmul.mubr.bf16.gmra.mxu0 %v19872_v63 }
 0x19f   :  { %v1965_v32 = vadd.f32 %v10986_v59, %v13464_v6  ;;  %v13811_v26 = vadd.f32 %v2125_v27, %v1960_v28  ;;  %v11066_v23 = vpop.f32.mrf.mxu1  ;;  %11257 = vmatmul.mubr.bf16.gmra.mxu1 %v13444_v20  ;;  %11180 = vmatprep.mubr.bf16.mxu0 %v19873_v58 }
 0x1a0   :  { %v1720_v55 = vpop.f32.mrf.mxu0  ;;  %11260 = vmatprep.mubr.bf16.mxu1 %v13476_v14 }
 0x1a1   :  { %v1963_v56 = vadd.f32 %v1720_v55, %v13474_v47  ;;  %v13817_v52 = vadd.f32 %v11066_v23, %v1965_v32  ;;  %v2138_v40 = vpop.f32.mrf.mxu1 }
 0x1a2   :  { %v10987_v51 = vpop.f32.mrf.mxu0 }
 0x1a3   :  { %v1966_v37 = vadd.f32 %v10987_v51, %v13481_v29  ;;  %v13820_v0 = vadd.f32 %v2138_v40, %v1963_v56  ;;  %v11067_v6 = vpop.f32.mrf.mxu1  ;;  %v19876_v29 = vld [vmem:[#allocation57_spill] sm:$0xff] }
 0x1a4   :  { %v1723_v59 = vpop.f32.mrf.mxu0 }
 0x1a5   :  { %v1964_v27 = vadd.f32 %v1723_v59, %v13489_v57  ;;  %v13823_v16 = vadd.f32 %v11067_v6, %v1966_v37  ;;  %v2141_v28 = vpop.f32.mrf.mxu1  ;;  %v19877_v37 = vld [vmem:[#allocation104_spill] sm:$0xff] }
 0x1a6   :  { %v10990_v20 = vpop.f32.mrf.mxu0  ;;  %11181 = vmatmul.mubr.bf16.gmra.mxu0 %v19874_v3 }
 0x1a7   :  { %v1969_v47 = vadd.f32 %v10990_v20, %v13499_v19  ;;  %v13827_v32 = vadd.f32 %v2141_v28, %v1964_v27  ;;  %v11070_v23 = vpop.f32.mrf.mxu1  ;;  %11261 = vmatmul.mubr.bf16.gmra.mxu1 %v13478_v24  ;;  %11184 = vmatprep.mubr.bf16.mxu0 %v19876_v29  ;;  %v19878_v27 = vld [vmem:[#allocation105_spill] sm:$0xff] }
 0x1a8   :  { %v1736_v55 = vpop.f32.mrf.mxu0  ;;  %11264 = vmatprep.mubr.bf16.mxu1 %v13511_v11 }
 0x1a9   :  { %19875 = vst [vmem:[#allocation46_spill] sm:$0xff] %v13827_v32  ;;  %v1967_v57 = vadd.f32 %v1736_v55, %v13509_v45  ;;  %v13833_v56 = vadd.f32 %v11070_v23, %v1969_v47  ;;  %v2154_v40 = vpop.f32.mrf.mxu1  ;;  %v19880_v32 = vld [vmem:[#allocation59_spill] sm:$0xff] }
 0x1aa   :  { %v10991_v51 = vpop.f32.mrf.mxu0  ;;  %v19882_v55 = vld [vmem:[#allocation103_spill] sm:$0xff] }
 0x1ab   :  { %v1970_v6 = vadd.f32 %v10991_v51, %v19877_v37  ;;  %v13836_v59 = vadd.f32 %v2154_v40, %v1967_v57  ;;  %v11071_v20 = vpop.f32.mrf.mxu1  ;;  %v19883_v51 = vld [vmem:[#allocation64_spill] sm:$0xff] }
 0x1ac   :  { %v1739_v19 = vpop.f32.mrf.mxu0 }
 0x1ad   :  { %v1968_v28 = vadd.f32 %v1739_v19, %v19878_v27  ;;  %v13839_v24 = vadd.f32 %v11071_v20, %v1970_v6  ;;  %v2157_v14 = vpop.f32.mrf.mxu1  ;;  %v19885_v19 = vld [vmem:[#allocation63_spill] sm:$0xff] }
 0x1ae   :  { %v10994_v29 = vpop.f32.mrf.mxu0  ;;  %11185 = vmatmul.mubr.bf16.gmra.mxu0 %v19880_v32 }
 0x1af   :  { %19879 = vst [vmem:[#allocation51_spill] sm:$0xff] %v13839_v24  ;;  %v1973_v45 = vadd.f32 %v10994_v29, %v13535_v43  ;;  %v13843_v47 = vadd.f32 %v2157_v14, %v1968_v28  ;;  %v11074_v23 = vpop.f32.mrf.mxu1  ;;  %11265 = vmatmul.mubr.bf16.gmra.mxu1 %v19882_v55  ;;  %11188 = vmatprep.mubr.bf16.mxu0 %v19883_v51  ;;  %v19887_v29 = vld [vmem:[#allocation106_spill] sm:$0xff] }
 0x1b0   :  { %v1752_v57 = vpop.f32.mrf.mxu0  ;;  %11268 = vmatprep.mubr.bf16.mxu1 %v13547_v62  ;;  %v19889_v24 = vld [vmem:[#allocation66_spill] sm:$0xff]  ;;  %v19890_v62 = vld [vmem:[#allocation107_spill] sm:$0xff] }
 0x1b1   :  { %19881 = vst [vmem:[#allocation53_spill] sm:$0xff] %v13843_v47  ;;  %v1971_v40 = vadd.f32 %v1752_v57, %v13545_v48  ;;  %v13849_v37 = vadd.f32 %v11074_v23, %v1973_v45  ;;  %v2170_v6 = vpop.f32.mrf.mxu1  ;;  %v19892_v57 = vld [vmem:[#allocation62_spill] sm:$0xff] }
 0x1b2   :  { %v10995_v20 = vpop.f32.mrf.mxu0 }
 0x1b3   :  { %19884 = vst [vmem:[#allocation55_spill] sm:$0xff] %v13849_v37  ;;  %v1974_v27 = vadd.f32 %v10995_v20, %v19885_v19  ;;  %v13852_v11 = vadd.f32 %v2170_v6, %v1971_v40  ;;  %v11075_v14 = vpop.f32.mrf.mxu1  ;;  %v19893_v20 = vld [vmem:[#allocation69_spill] sm:$0xff]  ;;  %v19894_v6 = vld [vmem:[#allocation108_spill] sm:$0xff]  ;;  %v19898_v37 = vld [vmem:[#allocation71_spill] sm:$0xff] }
 0x1b4   :  { %v1755_v43 = vpop.f32.mrf.mxu0  ;;  %v19895_v19 = vld [vmem:[#allocation68_spill] sm:$0xff] }
 0x1b5   :  { %19886 = vst [vmem:[#allocation104_spill] sm:$0xff] %v13852_v11  ;;  %v1972_v28 = vadd.f32 %v1755_v43, %v19887_v29  ;;  %v13855_v55 = vadd.f32 %v11075_v14, %v1974_v27  ;;  %v2173_v51 = vpop.f32.mrf.mxu1 }
 0x1b6   :  { %v10998_v47 = vpop.f32.mrf.mxu0  ;;  %11189 = vmatmul.mubr.bf16.gmra.mxu0 %v19889_v24 }
 0x1b7   :  { %19888 = vst [vmem:[#allocation105_spill] sm:$0xff] %v13855_v55  ;;  %v1977_v48 = vadd.f32 %v10998_v47, %v19890_v62  ;;  %v13859_v45 = vadd.f32 %v2173_v51, %v1972_v28  ;;  %v11078_v23 = vpop.f32.mrf.mxu1  ;;  %11269 = vmatmul.mubr.bf16.gmra.mxu1 %v19892_v57  ;;  %11192 = vmatprep.mubr.bf16.mxu0 %v19893_v20  ;;  %v19896_v55 = vld [vmem:[#allocation110_spill] sm:$0xff]  ;;  %v19897_v51 = vld [vmem:[#allocation111_spill] sm:$0xff] }
 0x1b8   :  { %v1768_v40 = vpop.f32.mrf.mxu0  ;;  %11272 = vmatprep.mubr.bf16.mxu1 %v19894_v6  ;;  %v737_v6 = vrot.slane %v13605_v46, %v13159_v44 }
 0x1b9   :  { %19891 = vst [vmem:[#allocation59_spill] sm:$0xff] %v13859_v45  ;;  %v1975_v43 = vadd.f32 %v1768_v40, %v19895_v19  ;;  %v13865_v27 = vadd.f32 %v11078_v23, %v1977_v48  ;;  %v2186_v14 = vpop.f32.mrf.mxu1  ;;  %v19899_v19 = vld [vmem:[#allocation109_spill] sm:$0xff] }
 0x1ba   :  { %v10999_v29 = vpop.f32.mrf.mxu0 }
 0x1bb   :  { %v1978_v11 = vadd.f32 %v10999_v29, %v19896_v55  ;;  %v13868_v24 = vadd.f32 %v2186_v14, %v1975_v43  ;;  %v11079_v62 = vpop.f32.mrf.mxu1  ;;  %v19900_v55 = vld [vmem:[#allocation75_spill] sm:$0xff] }
 0x1bc   :  { %v1771_v47 = vpop.f32.mrf.mxu0 }
 0x1bd   :  { %v1976_v28 = vadd.f32 %v1771_v47, %v19897_v51  ;;  %v13871_v57 = vadd.f32 %v11079_v62, %v1978_v11  ;;  %v2189_v20 = vpop.f32.mrf.mxu1  ;;  %v308_v62 = vrot.slane %v13603_v30, 1  ;;  %v340_v47 = vrot.slane %v13605_v46, 1 }
 0x1be   :  { %v11002_v45 = vpop.f32.mrf.mxu0  ;;  %11193 = vmatmul.mubr.bf16.gmra.mxu0 %v19898_v37 }
 0x1bf   :  { %v1981_v40 = vadd.f32 %v11002_v45, %v13614_v8  ;;  %v13875_v48 = vadd.f32 %v2189_v20, %v1976_v28  ;;  %v11082_v23 = vpop.f32.mrf.mxu1  ;;  %11273 = vmatmul.mubr.bf16.gmra.mxu1 %v19899_v19  ;;  %11196 = vmatprep.mubr.bf16.mxu0 %v19900_v55  ;;  %v19902_v45 = vld [vmem:[#allocation114_spill] sm:$0xff] }
 0x1c0   :  { %v1784_v43 = vpop.f32.mrf.mxu0  ;;  %11276 = vmatprep.mubr.bf16.mxu1 %v13626_v38  ;;  %v19904_v38 = vld [vmem:[#allocation115_spill] sm:$0xff] }
 0x1c1   :  { %v1979_v14 = vadd.f32 %v1784_v43, %v13624_v7  ;;  %v13881_v11 = vadd.f32 %v11082_v23, %v1981_v40  ;;  %v2202_v29 = vpop.f32.mrf.mxu1  ;;  %v405_v23 = vsel %vm341_vm2, %v340_v47, %v308_v62 }
 0x1c2   :  { %v11003_v8 = vpop.f32.mrf.mxu0 }
 0x1c3   :  { %19901 = vst [vmem:[#allocation63_spill] sm:$0xff] %v13881_v11  ;;  %v1982_v20 = vadd.f32 %v11003_v8, %v19902_v45  ;;  %v13886_v51 = vadd.f32 %v2202_v29, %v1979_v14  ;;  %v11083_v28 = vpop.f32.mrf.mxu1  ;;  %v19905_v11 = vld [vmem:[#allocation77_spill] sm:$0xff] }
 0x1c4   :  { %v1787_v19 = vpop.f32.mrf.mxu0  ;;  %v19906_v45 = vld [vmem:[#allocation113_spill] sm:$0xff] }
 0x1c5   :  { %19903 = vst [vmem:[#allocation106_spill] sm:$0xff] %v13886_v51  ;;  %v1980_v55 = vadd.f32 %v1787_v19, %v19904_v38  ;;  %v13891_v7 = vadd.f32 %v11083_v28, %v1982_v20  ;;  %v2205_v40 = vpop.f32.mrf.mxu1  ;;  %v19907_v51 = vld [vmem:[#allocation79_spill] sm:$0xff]  ;;  %v373_v38 = vsel %vm341_vm2, %v308_v62, %v340_v47  ;;  %v801_v19 = vsel %vm605_vm3, %v737_v6, %v405_v23  ;;  %v19909_v47 = vld [vmem:[#allocation118_spill] sm:$0xff] }
 0x1c6   :  { %v11006_v43 = vpop.f32.mrf.mxu0  ;;  %11197 = vmatmul.mubr.bf16.gmra.mxu0 %v19905_v11  ;;  %v13916_v9 = vpack.c.bf16 %v801_v19, %v373_v38 }
 0x1c7   :  { %v1985_v8 = vadd.f32 %v11006_v43, %v13649_v15  ;;  %v13897_v14 = vadd.f32 %v2205_v40, %v1980_v55  ;;  %v11086_v29 = vpop.f32.mrf.mxu1  ;;  %11277 = vmatmul.mubr.bf16.gmra.mxu1 %v19906_v45  ;;  %11200 = vmatprep.mubr.bf16.mxu0 %v19907_v51  ;;  %v13911_v40 = vpack.c.bf16 %v13605_v46, %v13603_v30 }
 0x1c8   :  { %v1800_v44 = vpop.f32.mrf.mxu0  ;;  %11280 = vmatprep.mubr.bf16.mxu1 %v13658_v36  ;;  %19908 = vst [vmem:[#allocation107_spill] sm:$0xff] %v13916_v9 }
 0x1c9   :  { %v1983_v20 = vadd.f32 %v1800_v44, %v13656_v49  ;;  %v13907_v28 = vadd.f32 %v11086_v29, %v1985_v8  ;;  %v2218_v15 = vpop.f32.mrf.mxu1 }
 0x1ca   :  { %v11007_v55 = vpop.f32.mrf.mxu0 }
 0x1cb   :  { %v1986_v43 = vadd.f32 %v11007_v55, %v13662_v13  ;;  %v13914_v45 = vadd.f32 %v2218_v15, %v1983_v20  ;;  %v11087_v36 = vpop.f32.mrf.mxu1  ;;  %v19910_v13 = vld [vmem:[#allocation18_spill] sm:$0xff]  ;;  %v19911_v15 = vld [vmem:[#allocation19_spill] sm:$0xff] }
 0x1cc   :  { %v1803_v62 = vpop.f32.mrf.mxu0 }
 0x1cd   :  { %v1984_v6 = vadd.f32 %v1803_v62, %v19909_v47  ;;  %v13919_v23 = vadd.f32 %v11087_v36, %v1986_v43  ;;  %v2221_v44 = vpop.f32.mrf.mxu1  ;;  %v19912_v47 = vld [vmem:[#allocation82_spill] sm:$0xff] }
 0x1ce   :  { %v11010_v49 = vpop.f32.mrf.mxu0  ;;  %11201 = vmatmul.mubr.bf16.gmra.mxu0 %v13911_v40 }
 0x1cf   :  { %v1989_v8 = vadd.f32 %v11010_v49, %v13669_v2  ;;  %v13923_v30 = vadd.f32 %v2221_v44, %v1984_v6  ;;  %v11090_v46 = vpop.f32.mrf.mxu1  ;;  %11281 = vmatmul.mubr.bf16.gmra.mxu1 %v13916_v9  ;;  %11300 = vmatprep.mubr.bf16.mxu0 %v19910_v13  ;;  %v12318_v13 = vld [vmem:[#allocation5 + $0x230] sm:$0xff]  }
 0x1d0   :  { %v1816_v29 = vpop.f32.mrf.mxu0  ;;  %11380 = vmatprep.mubr.bf16.mxu1 %v19828_v31  ;;  %v19914_v31 = vld [vmem:[#allocation21_spill] sm:$0xff] }
 0x1d1   :  { %v1987_v38 = vadd.f32 %v1816_v29, %v13672_v60  ;;  %v13929_v36 = vadd.f32 %v11090_v46, %v1989_v8  ;;  %v2234_v19 = vpop.f32.mrf.mxu1  ;;  %v19915_v60 = vld [vmem:[#allocation17_spill] sm:$0xff] }
 0x1d2   :  { %v11011_v20 = vpop.f32.mrf.mxu0  ;;  %v19922_v9 = vld [vmem:[#allocation121_spill] sm:$0xff] }
 0x1d3   :  { %v1990_v55 = vadd.f32 %v11011_v20, %v19911_v15  ;;  %v13932_v43 = vadd.f32 %v2234_v19, %v1987_v38  ;;  %v11091_v2 = vpop.f32.mrf.mxu1  ;;  %v19917_v38 = vld [vmem:[#allocation20_spill] sm:$0xff]  ;;  %v19918_v20 = vld [vmem:[#allocation23_spill] sm:$0xff]  ;;  %v19919_v15 = vld [vmem:[#allocation22_spill] sm:$0xff] }
 0x1d4   :  { %v1819_v62 = vpop.f32.mrf.mxu0 }
 0x1d5   :  { %v1988_v6 = vadd.f32 %v1819_v62, %v19912_v47  ;;  %v13935_v44 = vadd.f32 %v11091_v2, %v1990_v55  ;;  %v2237_v49 = vpop.f32.mrf.mxu1  ;;  %v12319_v55 = vld [vmem:[#allocation5 + $0x228] sm:$0xff]  }
 0x1d6   :  { %v11014_v4 = vpop.f32.mrf.mxu0  ;;  %11301 = vmatmul.mubr.bf16.vlgmr.msra.gmra.mxu0 %v19914_v31  ;;  %v19920_v2 = vld [vmem:[#allocation119_spill] sm:$0xff] }
 0x1d7   :  { %19913 = vst [vmem:[#allocation68_spill] sm:$0xff] %v13935_v44  ;;  %v1993_v8 = vadd.f32 %v11014_v4, %v19915_v60  ;;  %v13939_v46 = vadd.f32 %v2237_v49, %v1988_v6  ;;  %11445 = vmatpush3.bf16.msra.mxu0 %v13722_v41  ;;  %v11094_v29 = vpop.f32.mrf.mxu1  ;;  %11381 = vmatmul.mubr.bf16.vlgmr.msra.gmra.mxu1 %v19917_v38  ;;  %v19921_v6 = vld [vmem:[#allocation120_spill] sm:$0xff]  ;;  %v12320_v44 = vld [vmem:[#allocation5 + $0x220] sm:$0xff]  }
 0x1d8   :  { %v1832_v19 = vpop.f32.mrf.mxu0  ;;  %11304 = vmatprep.mubr.bf16.mxu0 %v19918_v20  ;;  %11384 = vmatprep.mubr.bf16.mxu1 %v19919_v15 }
 0x1d9   :  { %19916 = vst [vmem:[#allocation110_spill] sm:$0xff] %v13939_v46  ;;  %v1991_v62 = vadd.f32 %v1832_v19, %v19920_v2  ;;  %v13946_v47 = vadd.f32 %v11094_v29, %v1993_v8  ;;  %v2250_v31 = vpop.f32.mrf.mxu1  ;;  %11446 = vmatprep.subr.bf16.mxu0 %v12318_v13  ;;  %v19924_v8 = vld [vmem:[#allocation25_spill] sm:$0xff] }
 0x1da   :  { %v11015_v4 = vpop.f32.mrf.mxu0 }
 0x1db   :  { %v1994_v49 = vadd.f32 %v11015_v4, %v19921_v6  ;;  %v13949_v60 = vadd.f32 %v2250_v31, %v1991_v62  ;;  %v11095_v41 = vpop.f32.mrf.mxu1  ;;  %11447 = vmatpush3.bf16.msra.mxu0 %v12318_v13  ;;  %v19926_v62 = vld [vmem:[#allocation24_spill] sm:$0xff]  ;;  %v19927_v31 = vld [vmem:[#allocation27_spill] sm:$0xff] }
 0x1dc   :  { %v1835_v38 = vpop.f32.mrf.mxu0  ;;  %11448 = vmatprep.subr.bf16.mxu0 %v12319_v55 }
 0x1dd   :  { %v1992_v20 = vadd.f32 %v1835_v38, %v19922_v9  ;;  %v13952_v46 = vadd.f32 %v11095_v41, %v1994_v49  ;;  %v2253_v15 = vpop.f32.mrf.mxu1  ;;  %v19928_v9 = vld [vmem:[#allocation122_spill] sm:$0xff] }
 0x1de   :  { %v11018_v19 = vpop.f32.mrf.mxu0  ;;  %11305 = vmatmul.mubr.bf16.gmra.mxu0 %v19924_v8  ;;  %v12321_v38 = vld [vmem:[#allocation5 + $0x218] sm:$0xff]  }
 0x1df   :  { %19923 = vst [vmem:[#allocation111_spill] sm:$0xff] %v13952_v46  ;;  %v1997_v29 = vadd.f32 %v11018_v19, %v13695_v1  ;;  %v13956_v2 = vadd.f32 %v2253_v15, %v1992_v20  ;;  %v11098_v4 = vpop.f32.mrf.mxu1  ;;  %11385 = vmatmul.mubr.bf16.gmra.mxu1 %v19926_v62  ;;  %11308 = vmatprep.mubr.bf16.mxu0 %v19927_v31  ;;  %v19929_v1 = vld [vmem:[#allocation123_spill] sm:$0xff]  ;;  %v19930_v31 = vld [vmem:[#allocation124_spill] sm:$0xff] }
 0x1e0   :  { %v1848_v13 = vpop.f32.mrf.mxu0  ;;  %11388 = vmatprep.mubr.bf16.mxu1 %v19841_v35  ;;  %11449 = vmatpush3.bf16.msra.mxu0 %v12319_v55  ;;  %v12322_v55 = vld [vmem:[#allocation5 + $0x210] sm:$0xff]  }
 0x1e1   :  { %19925 = vst [vmem:[#allocation71_spill] sm:$0xff] %v13956_v2  ;;  %v1995_v6 = vadd.f32 %v1848_v13, %v19928_v9  ;;  %v13962_v49 = vadd.f32 %v11098_v4, %v1997_v29  ;;  %v2266_v41 = vpop.f32.mrf.mxu1  ;;  %11450 = vmatprep.subr.bf16.mxu0 %v12320_v44  ;;  %v19931_v4 = vld [vmem:[#allocation29_spill] sm:$0xff] }
 0x1e2   :  { %v11019_v8 = vpop.f32.mrf.mxu0 }
 0x1e3   :  { %v1998_v20 = vadd.f32 %v11019_v8, %v19929_v1  ;;  %v13965_v15 = vadd.f32 %v2266_v41, %v1995_v6  ;;  %v11099_v19 = vpop.f32.mrf.mxu1  ;;  %v19933_v6 = vld [vmem:[#allocation28_spill] sm:$0xff]  ;;  %v19934_v41 = vld [vmem:[#allocation31_spill] sm:$0xff] }
 0x1e4   :  { %v1851_v62 = vpop.f32.mrf.mxu0  ;;  %11451 = vmatpush3.bf16.msra.mxu0 %v12320_v44 }
 0x1e5   :  { %v1996_v2 = vadd.f32 %v1851_v62, %v19930_v31  ;;  %v13968_v46 = vadd.f32 %v11099_v19, %v1998_v20  ;;  %v2269_v35 = vpop.f32.mrf.mxu1  ;;  %11452 = vmatprep.subr.bf16.mxu0 %v12321_v38  ;;  %v12323_v62 = vld [vmem:[#allocation5 + $0x208] sm:$0xff]  }
 0x1e6   :  { %v11022_v29 = vpop.f32.mrf.mxu0  ;;  %11309 = vmatmul.mubr.bf16.gmra.mxu0 %v19931_v4 }
 0x1e7   :  { %v2001_v13 = vadd.f32 %v11022_v29, %v13707_v17  ;;  %v13972_v9 = vadd.f32 %v2269_v35, %v1996_v2  ;;  %v11102_v8 = vpop.f32.mrf.mxu1  ;;  %11389 = vmatmul.mubr.bf16.gmra.mxu1 %v19933_v6  ;;  %11312 = vmatprep.mubr.bf16.mxu0 %v19934_v41  ;;  %v19935_v17 = vld [vmem:[#allocation26_spill] sm:$0xff]  ;;  %v19936_v6 = vld [vmem:[#allocation125_spill] sm:$0xff] }
 0x1e8   :  { %v1864_v44 = vpop.f32.mrf.mxu0  ;;  %11392 = vmatprep.mubr.bf16.mxu1 %v19845_v42  ;;  %11453 = vmatpush3.bf16.msra.mxu0 %v12321_v38 }
 0x1e9   :  { %19932 = vst [vmem:[#allocation114_spill] sm:$0xff] %v13972_v9  ;;  %v1999_v1 = vadd.f32 %v1864_v44, %v13710_v18  ;;  %v13978_v20 = vadd.f32 %v11102_v8, %v2001_v13  ;;  %v2282_v19 = vpop.f32.mrf.mxu1  ;;  %11454 = vmatprep.subr.bf16.mxu0 %v12322_v55  ;;  %v12324_v18 = vld [vmem:[#allocation5 + $0x200] sm:$0xff]   ;;  %v19938_v13 = vld [vmem:[#allocation33_spill] sm:$0xff] }
 0x1ea   :  { %v11023_v31 = vpop.f32.mrf.mxu0 }
 0x1eb   :  { %v2002_v2 = vadd.f32 %v11023_v31, %v19935_v17  ;;  %v13981_v35 = vadd.f32 %v2282_v19, %v1999_v1  ;;  %v11103_v29 = vpop.f32.mrf.mxu1  ;;  %v19940_v1 = vld [vmem:[#allocation35_spill] sm:$0xff]  ;;  %v19941_v19 = vld [vmem:[#allocation34_spill] sm:$0xff] }
 0x1ec   :  { %v1867_v4 = vpop.f32.mrf.mxu0  ;;  %11455 = vmatpush3.bf16.msra.mxu0 %v12322_v55  ;;  %v19942_v17 = vld [vmem:[#allocation30_spill] sm:$0xff] }
 0x1ed   :  { %v2000_v41 = vadd.f32 %v1867_v4, %v19936_v6  ;;  %v13984_v9 = vadd.f32 %v11103_v29, %v2002_v2  ;;  %v2285_v42 = vpop.f32.mrf.mxu1  ;;  %11456 = vmatprep.subr.bf16.mxu0 %v12323_v62 }
 0x1ee   :  { %v11026_v38 = vpop.f32.mrf.mxu0  ;;  %11313 = vmatmul.mubr.bf16.gmra.mxu0 %v19938_v13  ;;  %v19943_v13 = vld [vmem:[#allocation32_spill] sm:$0xff] }
 0x1ef   :  { %19937 = vst [vmem:[#allocation115_spill] sm:$0xff] %v13984_v9  ;;  %v2005_v8 = vadd.f32 %v11026_v38, %v13719_v10  ;;  %v13988_v44 = vadd.f32 %v2285_v42, %v2000_v41  ;;  %v11106_v31 = vpop.f32.mrf.mxu1  ;;  %11393 = vmatmul.mubr.bf16.gmra.mxu1 %v19846_v50  ;;  %11316 = vmatprep.mubr.bf16.mxu0 %v19940_v1  ;;  %v19944_v50 = vld [vmem:[#allocation126_spill] sm:$0xff]  ;;  %v19946_v9 = vld [vmem:[#allocation37_spill] sm:$0xff] }
 0x1f0   :  { %v1880_v55 = vpop.f32.mrf.mxu0  ;;  %11396 = vmatprep.mubr.bf16.mxu1 %v19941_v19  ;;  %11457 = vmatpush3.bf16.msra.mxu0 %v12323_v62 }
 0x1f1   :  { %19939 = vst [vmem:[#allocation77_spill] sm:$0xff] %v13988_v44  ;;  %v2003_v2 = vadd.f32 %v1880_v55, %v19942_v17  ;;  %v13994_v29 = vadd.f32 %v11106_v31, %v2005_v8  ;;  %v2298_v4 = vpop.f32.mrf.mxu1  ;;  %11458 = vmatprep.subr.bf16.mxu0 %v12324_v18  ;;  %v19948_v17 = vld [vmem:[#allocation36_spill] sm:$0xff] }
 0x1f2   :  { %v11027_v6 = vpop.f32.mrf.mxu0 }
 0x1f3   :  { %v2006_v10 = vadd.f32 %v11027_v6, %v19943_v13  ;;  %v13997_v41 = vadd.f32 %v2298_v4, %v2003_v2  ;;  %v11107_v42 = vpop.f32.mrf.mxu1  ;;  %v19949_v2 = vld [vmem:[#allocation39_spill] sm:$0xff] }
 0x1f4   :  { %v1883_v38 = vpop.f32.mrf.mxu0  ;;  %11459 = vmatpush3.bf16.msra.mxu0 %v12324_v18  ;;  %v19950_v18 = vld [vmem:[#allocation127_spill] sm:$0xff] }
 0x1f5   :  { %v2004_v1 = vadd.f32 %v1883_v38, %v19944_v50  ;;  %v14000_v44 = vadd.f32 %v11107_v42, %v2006_v10  ;;  %v2301_v19 = vpop.f32.mrf.mxu1  ;;  %v19952_v38 = vld [vmem:[#allocation128_spill] sm:$0xff] }
 0x1f6   :  { %v11030_v62 = vpop.f32.mrf.mxu0  ;;  %11317 = vmatmul.mubr.bf16.gmra.mxu0 %v19946_v9 }
 0x1f7   :  { %19945 = vst [vmem:[#allocation79_spill] sm:$0xff] %v14000_v44  ;;  %v2009_v8 = vadd.f32 %v11030_v62, %v13734_v25  ;;  %v14004_v31 = vadd.f32 %v2301_v19, %v2004_v1  ;;  %v11110_v55 = vpop.f32.mrf.mxu1  ;;  %11397 = vmatmul.mubr.bf16.gmra.mxu1 %v19948_v17  ;;  %11320 = vmatprep.mubr.bf16.mxu0 %v19949_v2  ;;  %v19954_v19 = vld [vmem:[#allocation129_spill] sm:$0xff] }
 0x1f8   :  { %v1896_v4 = vpop.f32.mrf.mxu0  ;;  %11400 = vmatprep.mubr.bf16.mxu1 %v19855_v34  ;;  %v19956_v44 = vld [vmem:[#allocation41_spill] sm:$0xff]  ;;  %v19957_v34 = vld [vmem:[#allocation38_spill] sm:$0xff] }
 0x1f9   :  { %19947 = vst [vmem:[#allocation118_spill] sm:$0xff] %v14004_v31  ;;  %v2007_v6 = vadd.f32 %v1896_v4, %v19950_v18  ;;  %v14010_v13 = vadd.f32 %v11110_v55, %v2009_v8  ;;  %v2314_v10 = vpop.f32.mrf.mxu1  ;;  %v19959_v18 = vld [vmem:[#allocation40_spill] sm:$0xff] }
 0x1fa   :  { %v11031_v42 = vpop.f32.mrf.mxu0 }
 0x1fb   :  { %19951 = vst [vmem:[#allocation18_spill] sm:$0xff] %v14010_v13  ;;  %v2010_v9 = vadd.f32 %v11031_v42, %v19952_v38  ;;  %v14013_v50 = vadd.f32 %v2314_v10, %v2007_v6  ;;  %v11111_v25 = vpop.f32.mrf.mxu1  ;;  %v19960_v42 = vld [vmem:[#allocation43_spill] sm:$0xff]  ;;  %v19961_v10 = vld [vmem:[#allocation42_spill] sm:$0xff]  ;;  %v19965_v13 = vld [vmem:[#allocation45_spill] sm:$0xff] }
 0x1fc   :  { %v1899_v1 = vpop.f32.mrf.mxu0  ;;  %v19962_v38 = vld [vmem:[#allocation130_spill] sm:$0xff] }
 0x1fd   :  { %19953 = vst [vmem:[#allocation19_spill] sm:$0xff] %v14013_v50  ;;  %v2008_v62 = vadd.f32 %v1899_v1, %v19954_v19  ;;  %v14016_v17 = vadd.f32 %v11111_v25, %v2010_v9  ;;  %v2317_v2 = vpop.f32.mrf.mxu1 }
 0x1fe   :  { %v11034_v31 = vpop.f32.mrf.mxu0  ;;  %11321 = vmatmul.mubr.bf16.gmra.mxu0 %v19956_v44 }
 0x1ff   :  { %19955 = vst [vmem:[#allocation82_spill] sm:$0xff] %v14016_v17  ;;  %v2013_v4 = vadd.f32 %v11034_v31, %v19957_v34  ;;  %v14020_v8 = vadd.f32 %v2317_v2, %v2008_v62  ;;  %v11114_v55 = vpop.f32.mrf.mxu1  ;;  %11401 = vmatmul.mubr.bf16.gmra.mxu1 %v19959_v18  ;;  %11324 = vmatprep.mubr.bf16.mxu0 %v19960_v42  ;;  %v19963_v17 = vld [vmem:[#allocation131_spill] sm:$0xff]  ;;  %v19964_v2 = vld [vmem:[#allocation132_spill] sm:$0xff] }
 0x200   :  { %v1912_v6 = vpop.f32.mrf.mxu0  ;;  %11404 = vmatprep.mubr.bf16.mxu1 %v19961_v10  ;;  %v19966_v10 = vld [vmem:[#allocation133_spill] sm:$0xff] }
 0x201   :  { %19958 = vst [vmem:[#allocation21_spill] sm:$0xff] %v14020_v8  ;;  %v2011_v1 = vadd.f32 %v1912_v6, %v19962_v38  ;;  %v14026_v9 = vadd.f32 %v11114_v55, %v2013_v4  ;;  %v2330_v25 = vpop.f32.mrf.mxu1  ;;  %v19968_v38 = vld [vmem:[#allocation44_spill] sm:$0xff] }
 0x202   :  { %v11035_v19 = vpop.f32.mrf.mxu0 }
 0x203   :  { %v2014_v44 = vadd.f32 %v11035_v19, %v19963_v17  ;;  %v14029_v50 = vadd.f32 %v2330_v25, %v2011_v1  ;;  %v11115_v31 = vpop.f32.mrf.mxu1  ;;  %v19969_v17 = vld [vmem:[#allocation96_spill] sm:$0xff] }
 0x204   :  { %v1915_v62 = vpop.f32.mrf.mxu0 }
 0x205   :  { %v2012_v34 = vadd.f32 %v1915_v62, %v19964_v2  ;;  %v14032_v18 = vadd.f32 %v11115_v31, %v2014_v44  ;;  %v2333_v42 = vpop.f32.mrf.mxu1 }
 0x206   :  { %v11038_v8 = vpop.f32.mrf.mxu0  ;;  %11325 = vmatmul.mubr.bf16.gmra.mxu0 %v19965_v13 }
 0x207   :  { %v2017_v6 = vadd.f32 %v11038_v8, %v19966_v10  ;;  %v14036_v4 = vadd.f32 %v2333_v42, %v2012_v34  ;;  %v11118_v55 = vpop.f32.mrf.mxu1  ;;  %11405 = vmatmul.mubr.bf16.gmra.mxu1 %v19968_v38  ;;  %11328 = vmatprep.mubr.bf16.mxu0 %v19969_v17 }
 0x208   :  { %v1928_v1 = vpop.f32.mrf.mxu0  ;;  %11408 = vmatprep.mubr.bf16.mxu1 %v13775_v33 }
 0x209   :  { %19967 = vst [vmem:[#allocation17_spill] sm:$0xff] %v14036_v4  ;;  %v2015_v25 = vadd.f32 %v1928_v1, %v13771_v61  ;;  %v14042_v19 = vadd.f32 %v11118_v55, %v2017_v6  ;;  %v2346_v44 = vpop.f32.mrf.mxu1  ;;  %v19972_v1 = vld [vmem:[#allocation48_spill] sm:$0xff] }
 0x20a   :  { %v11039_v31 = vpop.f32.mrf.mxu0 }
 0x20b   :  { %v2018_v62 = vadd.f32 %v11039_v31, %v13779_v22  ;;  %v14045_v2 = vadd.f32 %v2346_v44, %v2015_v25  ;;  %v11119_v8 = vpop.f32.mrf.mxu1  ;;  %v19971_v22 = vld [vmem:[#allocation47_spill] sm:$0xff] }
 0x20c   :  { %v1931_v34 = vpop.f32.mrf.mxu0 }
 0x20d   :  { %v2016_v42 = vadd.f32 %v1931_v34, %v13781_v54  ;;  %v14048_v10 = vadd.f32 %v11119_v8, %v2018_v62  ;;  %v2349_v17 = vpop.f32.mrf.mxu1  ;;  %v19973_v62 = vld [vmem:[#allocation135_spill] sm:$0xff]  ;;  %v19974_v34 = vld [vmem:[#allocation136_spill] sm:$0xff] }
 0x20e   :  { %v11042_v4 = vpop.f32.mrf.mxu0  ;;  %11329 = vmatmul.mubr.bf16.gmra.mxu0 %v19965_v13 }
 0x20f   :  { %v2021_v61 = vadd.f32 %v11042_v4, %v13786_v12  ;;  %v14052_v33 = vadd.f32 %v2349_v17, %v2016_v42  ;;  %v11122_v6 = vpop.f32.mrf.mxu1  ;;  %11409 = vmatmul.mubr.bf16.gmra.mxu1 %v19968_v38  ;;  %11332 = vmatprep.mubr.bf16.mxu0 %v19971_v22 }
 0x210   :  { %v1944_v55 = vpop.f32.mrf.mxu0  ;;  %11412 = vmatprep.mubr.bf16.mxu1 %v19870_v5 }
 0x211   :  { %19970 = vst [vmem:[#allocation20_spill] sm:$0xff] %v14052_v33  ;;  %v2019_v54 = vadd.f32 %v1944_v55, %v19972_v1  ;;  %v14058_v25 = vadd.f32 %v11122_v6, %v2021_v61  ;;  %v2362_v44 = vpop.f32.mrf.mxu1  ;;  %v19975_v33 = vld [vmem:[#allocation50_spill] sm:$0xff]  ;;  %v19976_v55 = vld [vmem:[#allocation49_spill] sm:$0xff]  ;;  %v19977_v1 = vld [vmem:[#allocation52_spill] sm:$0xff] }
 0x212   :  { %v11043_v31 = vpop.f32.mrf.mxu0 }
 0x213   :  { %v2022_v13 = vadd.f32 %v11043_v31, %v19973_v62  ;;  %v14061_v8 = vadd.f32 %v2362_v44, %v2019_v54  ;;  %v11123_v12 = vpop.f32.mrf.mxu1 }
 0x214   :  { %v1947_v4 = vpop.f32.mrf.mxu0 }
 0x215   :  { %v2020_v42 = vadd.f32 %v1947_v4, %v19974_v34  ;;  %v14064_v38 = vadd.f32 %v11123_v12, %v2022_v13  ;;  %v2365_v17 = vpop.f32.mrf.mxu1 }
 0x216   :  { %v11142_v22 = vpop.f32.mrf.mxu0  ;;  %11333 = vmatmul.mubr.bf16.gmra.mxu0 %v19975_v33 }
 0x217   :  { %v14067_v5 = vadd.f32 %v2365_v17, %v2020_v42  ;;  %v2797_v61 = vadd.f32 %v11142_v22, %v13801_v21  ;;  %v11222_v6 = vpop.f32.mrf.mxu1  ;;  %11413 = vmatmul.mubr.bf16.gmra.mxu1 %v19976_v55  ;;  %11336 = vmatprep.mubr.bf16.mxu0 %v19977_v1  ;;  %v19978_v55 = vld [vmem:[#allocation54_spill] sm:$0xff] }
 0x218   :  { %v2540_v54 = vpop.f32.mrf.mxu0  ;;  %11416 = vmatprep.mubr.bf16.mxu1 %v19872_v63 }
 0x219   :  { %v2795_v44 = vadd.f32 %v2540_v54, %v13804_v39  ;;  %v14074_v31 = vadd.f32 %v11222_v6, %v2797_v61  ;;  %v2958_v62 = vpop.f32.mrf.mxu1 }
 0x21a   :  { %v11143_v13 = vpop.f32.mrf.mxu0 }
 0x21b   :  { %v2798_v33 = vadd.f32 %v11143_v13, %v13807_v53  ;;  %v14077_v12 = vadd.f32 %v2958_v62, %v2795_v44  ;;  %v11223_v4 = vpop.f32.mrf.mxu1  ;;  %v19979_v53 = vld [vmem:[#allocation56_spill] sm:$0xff] }
 0x21c   :  { %v2543_v21 = vpop.f32.mrf.mxu0 }
 0x21d   :  { %v2796_v34 = vadd.f32 %v2543_v21, %v13811_v26  ;;  %v14080_v42 = vadd.f32 %v11223_v4, %v2798_v33  ;;  %v2961_v17 = vpop.f32.mrf.mxu1  ;;  %v19980_v4 = vld [vmem:[#allocation46_spill] sm:$0xff] }
 0x21e   :  { %v11146_v22 = vpop.f32.mrf.mxu0  ;;  %11337 = vmatmul.mubr.bf16.gmra.mxu0 %v19978_v55 }
 0x21f   :  { %v2801_v63 = vadd.f32 %v11146_v22, %v13817_v52  ;;  %v14084_v39 = vadd.f32 %v2961_v17, %v2796_v34  ;;  %v11226_v61 = vpop.f32.mrf.mxu1  ;;  %11417 = vmatmul.mubr.bf16.gmra.mxu1 %v19873_v58  ;;  %11340 = vmatprep.mubr.bf16.mxu0 %v19979_v53  ;;  %v19981_v22 = vld [vmem:[#allocation58_spill] sm:$0xff] }
 0x220   :  { %v2556_v6 = vpop.f32.mrf.mxu0  ;;  %11420 = vmatprep.mubr.bf16.mxu1 %v19874_v3 }
 0x221   :  { %v2799_v26 = vadd.f32 %v2556_v6, %v13820_v0  ;;  %v14090_v1 = vadd.f32 %v11226_v61, %v2801_v63  ;;  %v2974_v54 = vpop.f32.mrf.mxu1  ;;  %v19982_v63 = vld [vmem:[#allocation57_spill] sm:$0xff] }
 0x222   :  { %v11147_v44 = vpop.f32.mrf.mxu0 }
 0x223   :  { %v2802_v62 = vadd.f32 %v11147_v44, %v13823_v16  ;;  %v14093_v13 = vadd.f32 %v2974_v54, %v2799_v26  ;;  %v11227_v52 = vpop.f32.mrf.mxu1  ;;  %v19983_v16 = vld [vmem:[#allocation61_spill] sm:$0xff]  ;;  %v19984_v44 = vld [vmem:[#allocation51_spill] sm:$0xff] }
 0x224   :  { %v2559_v33 = vpop.f32.mrf.mxu0 }
 0x225   :  { %v2800_v21 = vadd.f32 %v2559_v33, %v19980_v4  ;;  %v14096_v58 = vadd.f32 %v11227_v52, %v2802_v62  ;;  %v2977_v34 = vpop.f32.mrf.mxu1  ;;  %v19986_v4 = vld [vmem:[#allocation53_spill] sm:$0xff] }
 0x226   :  { %v11150_v17 = vpop.f32.mrf.mxu0  ;;  %11341 = vmatmul.mubr.bf16.gmra.mxu0 %v19981_v22 }
 0x227   :  { %v2805_v3 = vadd.f32 %v11150_v17, %v13833_v56  ;;  %v14100_v0 = vadd.f32 %v2977_v34, %v2800_v21  ;;  %v11230_v55 = vpop.f32.mrf.mxu1  ;;  %11421 = vmatmul.mubr.bf16.gmra.mxu1 %v19982_v63  ;;  %11344 = vmatprep.mubr.bf16.mxu0 %v19983_v16  ;;  %v19988_v63 = vld [vmem:[#allocation65_spill] sm:$0xff]  ;;  %v19991_v16 = vld [vmem:[#allocation64_spill] sm:$0xff] }
 0x228   :  { %v2572_v61 = vpop.f32.mrf.mxu0  ;;  %11424 = vmatprep.mubr.bf16.mxu1 %v19880_v32  ;;  %v19989_v32 = vld [vmem:[#allocation55_spill] sm:$0xff] }
 0x229   :  { %v2803_v53 = vadd.f32 %v2572_v61, %v13836_v59  ;;  %v14106_v6 = vadd.f32 %v11230_v55, %v2805_v3  ;;  %v2990_v26 = vpop.f32.mrf.mxu1  ;;  %v19992_v61 = vld [vmem:[#allocation67_spill] sm:$0xff] }
 0x22a   :  { %v11151_v54 = vpop.f32.mrf.mxu0 }
 0x22b   :  { %v2806_v62 = vadd.f32 %v11151_v54, %v19984_v44  ;;  %v14109_v52 = vadd.f32 %v2990_v26, %v2803_v53  ;;  %v11231_v56 = vpop.f32.mrf.mxu1  ;;  %v19993_v26 = vld [vmem:[#allocation66_spill] sm:$0xff]  ;;  %v19994_v54 = vld [vmem:[#allocation104_spill] sm:$0xff] }
 0x22c   :  { %v2575_v33 = vpop.f32.mrf.mxu0 }
 0x22d   :  { %19985 = vst [vmem:[#allocation23_spill] sm:$0xff] %v14109_v52  ;;  %v2804_v21 = vadd.f32 %v2575_v33, %v19986_v4  ;;  %v14112_v34 = vadd.f32 %v11231_v56, %v2806_v62  ;;  %v2993_v17 = vpop.f32.mrf.mxu1  ;;  %v19995_v4 = vld [vmem:[#allocation105_spill] sm:$0xff]  ;;  %v19997_v52 = vld [vmem:[#allocation70_spill] sm:$0xff] }
 0x22e   :  { %v11154_v22 = vpop.f32.mrf.mxu0  ;;  %11345 = vmatmul.mubr.bf16.gmra.mxu0 %v19988_v63 }
 0x22f   :  { %19987 = vst [vmem:[#allocation22_spill] sm:$0xff] %v14112_v34  ;;  %v2809_v59 = vadd.f32 %v11154_v22, %v19989_v32  ;;  %v14116_v3 = vadd.f32 %v2993_v17, %v2804_v21  ;;  %v11234_v55 = vpop.f32.mrf.mxu1  ;;  %11425 = vmatmul.mubr.bf16.gmra.mxu1 %v19991_v16  ;;  %11348 = vmatprep.mubr.bf16.mxu0 %v19992_v61  ;;  %v19996_v22 = vld [vmem:[#allocation59_spill] sm:$0xff] }
 0x230   :  { %v2588_v53 = vpop.f32.mrf.mxu0  ;;  %11428 = vmatprep.mubr.bf16.mxu1 %v19993_v26  ;;  %v19998_v26 = vld [vmem:[#allocation69_spill] sm:$0xff] }
 0x231   :  { %19990 = vst [vmem:[#allocation119_spill] sm:$0xff] %v14116_v3  ;;  %v2807_v44 = vadd.f32 %v2588_v53, %v19994_v54  ;;  %v14122_v62 = vadd.f32 %v11234_v55, %v2809_v59  ;;  %v3006_v56 = vpop.f32.mrf.mxu1  ;;  %v19999_v54 = vld [vmem:[#allocation72_spill] sm:$0xff] }
 0x232   :  { %v11155_v33 = vpop.f32.mrf.mxu0 }
 0x233   :  { %v2810_v63 = vadd.f32 %v11155_v33, %v19995_v4  ;;  %v14125_v34 = vadd.f32 %v3006_v56, %v2807_v44  ;;  %v11235_v21 = vpop.f32.mrf.mxu1 }
 0x234   :  { %v2591_v17 = vpop.f32.mrf.mxu0 }
 0x235   :  { %v2808_v32 = vadd.f32 %v2591_v17, %v19996_v22  ;;  %v14128_v16 = vadd.f32 %v11235_v21, %v2810_v63  ;;  %v3009_v61 = vpop.f32.mrf.mxu1 }
 0x236   :  { %v11158_v3 = vpop.f32.mrf.mxu0  ;;  %11349 = vmatmul.mubr.bf16.gmra.mxu0 %v19997_v52 }
 0x237   :  { %v2813_v53 = vadd.f32 %v11158_v3, %v13865_v27  ;;  %v14132_v59 = vadd.f32 %v3009_v61, %v2808_v32  ;;  %v11238_v55 = vpop.f32.mrf.mxu1  ;;  %11429 = vmatmul.mubr.bf16.gmra.mxu1 %v19998_v26  ;;  %11352 = vmatprep.mubr.bf16.mxu0 %v19999_v54  ;;  %v20002_v61 = vld [vmem:[#allocation76_spill] sm:$0xff]  ;;  %v20004_v26 = vld [vmem:[#allocation75_spill] sm:$0xff] }
 0x238   :  { %v2604_v44 = vpop.f32.mrf.mxu0  ;;  %11432 = vmatprep.mubr.bf16.mxu1 %v19898_v37 }
 0x239   :  { %v2811_v56 = vadd.f32 %v2604_v44, %v13868_v24  ;;  %v14138_v33 = vadd.f32 %v11238_v55, %v2813_v53  ;;  %v3022_v4 = vpop.f32.mrf.mxu1  ;;  %v20003_v24 = vld [vmem:[#allocation63_spill] sm:$0xff]  ;;  %v20006_v44 = vld [vmem:[#allocation106_spill] sm:$0xff] }
 0x23a   :  { %v11159_v63 = vpop.f32.mrf.mxu0 }
 0x23b   :  { %v2814_v52 = vadd.f32 %v11159_v63, %v13871_v57  ;;  %v14141_v21 = vadd.f32 %v3022_v4, %v2811_v56  ;;  %v11239_v27 = vpop.f32.mrf.mxu1  ;;  %v20005_v57 = vld [vmem:[#allocation78_spill] sm:$0xff] }
 0x23c   :  { %v2607_v3 = vpop.f32.mrf.mxu0 }
 0x23d   :  { %v14144_v17 = vadd.f32 %v2607_v3, %v13875_v48  ;;  %v14146_v22 = vadd.f32 %v11239_v27, %v2814_v52  ;;  %v14148_v32 = vpop.f32.mrf.mxu1 }
 0x23e   :  { %20001 = vst [vmem:[#allocation121_spill] sm:$0xff] %v14148_v32  ;;  %v11162_v37 = vpop.f32.mrf.mxu0  ;;  %11353 = vmatmul.mubr.bf16.gmra.mxu0 %v20002_v61  ;;  %v20043_v32 = vld [vmem:[#allocation91_spill] sm:$0xff] }
 0x23f   :  { %20000 = vst [vmem:[#allocation120_spill] sm:$0xff] %v14144_v17  ;;  %v2817_v53 = vadd.f32 %v11162_v37, %v20003_v24  ;;  %v11242_v55 = vpop.f32.mrf.mxu1  ;;  %11433 = vmatmul.mubr.bf16.gmra.mxu1 %v20004_v26  ;;  %11356 = vmatprep.mubr.bf16.mxu0 %v20005_v57  ;;  %v20009_v57 = vld [vmem:[#allocation80_spill] sm:$0xff] }
 0x240   :  { %v2620_v54 = vpop.f32.mrf.mxu0  ;;  %11436 = vmatprep.mubr.bf16.mxu1 %v19905_v11 }
 0x241   :  { %v2815_v48 = vadd.f32 %v2620_v54, %v20006_v44  ;;  %v14156_v56 = vadd.f32 %v11242_v55, %v2817_v53  ;;  %v3038_v4 = vpop.f32.mrf.mxu1 }
 0x242   :  { %v11163_v63 = vpop.f32.mrf.mxu0 }
 0x243   :  { %v2818_v52 = vadd.f32 %v11163_v63, %v13891_v7  ;;  %v14159_v27 = vadd.f32 %v3038_v4, %v2815_v48  ;;  %v11243_v3 = vpop.f32.mrf.mxu1  ;;  %v20010_v7 = vld [vmem:[#allocation117_spill] sm:$0xff] }
 0x244   :  { %v2623_v37 = vpop.f32.mrf.mxu0 }
 0x245   :  { %v14162_v61 = vadd.f32 %v2623_v37, %v13897_v14  ;;  %v14164_v24 = vadd.f32 %v11243_v3, %v2818_v52  ;;  %v14166_v26 = vpop.f32.mrf.mxu1 }
 0x246   :  { %20008 = vst [vmem:[#allocation24_spill] sm:$0xff] %v14166_v26  ;;  %v11166_v11 = vpop.f32.mrf.mxu0  ;;  %11357 = vmatmul.mubr.bf16.gmra.mxu0 %v20009_v57  ;;  %v20024_v26 = vld [vmem:[#allocation85_spill] sm:$0xff] }
 0x247   :  { %20007 = vst [vmem:[#allocation25_spill] sm:$0xff] %v14162_v61  ;;  %v2821_v53 = vadd.f32 %v11166_v11, %v13907_v28  ;;  %v11246_v55 = vpop.f32.mrf.mxu1  ;;  %11437 = vmatmul.mubr.bf16.gmra.mxu1 %v19907_v51  ;;  %11360 = vmatprep.mubr.bf16.mxu0 %v20010_v7  ;;  %v20035_v61 = vld [vmem:[#allocation89_spill] sm:$0xff] }
 0x248   :  { %v2636_v54 = vpop.f32.mrf.mxu0  ;;  %11440 = vmatprep.mubr.bf16.mxu1 %v13911_v40 }
 0x249   :  { %v2819_v14 = vadd.f32 %v2636_v54, %v13914_v45  ;;  %v14174_v44 = vadd.f32 %v11246_v55, %v2821_v53  ;;  %v3054_v48 = vpop.f32.mrf.mxu1 }
 0x24a   :  { %v11167_v4 = vpop.f32.mrf.mxu0 }
 0x24b   :  { %v2822_v63 = vadd.f32 %v11167_v4, %v13919_v23  ;;  %v14177_v52 = vadd.f32 %v3054_v48, %v2819_v14  ;;  %v11247_v3 = vpop.f32.mrf.mxu1  ;;  %v20013_v23 = vld [vmem:[#allocation81_spill] sm:$0xff]  ;;  %v20014_v4 = vld [vmem:[#allocation68_spill] sm:$0xff] }
 0x24c   :  { %v2639_v28 = vpop.f32.mrf.mxu0 }
 0x24d   :  { %v14180_v37 = vadd.f32 %v2639_v28, %v13923_v30  ;;  %v14182_v11 = vadd.f32 %v11247_v3, %v2822_v63  ;;  %v14184_v7 = vpop.f32.mrf.mxu1 }
 0x24e   :  { %20012 = vst [vmem:[#allocation122_spill] sm:$0xff] %v14184_v7  ;;  %v11170_v40 = vpop.f32.mrf.mxu0  ;;  %11361 = vmatmul.mubr.bf16.gmra.mxu0 %v20009_v57  ;;  %v20015_v7 = vld [vmem:[#allocation110_spill] sm:$0xff] }
 0x24f   :  { %20011 = vst [vmem:[#allocation27_spill] sm:$0xff] %v14180_v37  ;;  %v2825_v45 = vadd.f32 %v11170_v40, %v13929_v36  ;;  %v11250_v53 = vpop.f32.mrf.mxu1  ;;  %11441 = vmatmul.mubr.bf16.gmra.mxu1 %v19907_v51  ;;  %11460 = vmatprep.mubr.bf16.mxu0 %v20013_v23  ;;  %v20018_v37 = vld [vmem:[#allocation83_spill] sm:$0xff] }
 0x250   :  { %v2652_v55 = vpop.f32.mrf.mxu0 }
 0x251   :  { %v2823_v54 = vadd.f32 %v2652_v55, %v13932_v43  ;;  %v14191_v14 = vadd.f32 %v11250_v53, %v2825_v45  ;;  %v3070_v30 = vpop.f32.mrf.mxu1  ;;  %v20019_v53 = vld [vmem:[#allocation84_spill] sm:$0xff] }
 0x252   :  { %v11171_v48 = vpop.f32.mrf.mxu0 }
 0x253   :  { %v2826_v63 = vadd.f32 %v11171_v48, %v20014_v4  ;;  %v14194_v3 = vadd.f32 %v3070_v30, %v2823_v54  ;;  %v11251_v28 = vpop.f32.mrf.mxu1  ;;  %v20020_v4 = vld [vmem:[#allocation111_spill] sm:$0xff] }
 0x254   :  { %v2655_v57 = vpop.f32.mrf.mxu0 }
 0x255   :  { %v14197_v36 = vadd.f32 %v2655_v57, %v20015_v7  ;;  %v14199_v40 = vadd.f32 %v11251_v28, %v2826_v63  ;;  %v14201_v51 = vpop.f32.mrf.mxu1 }
 0x256   :  { %20017 = vst [vmem:[#allocation124_spill] sm:$0xff] %v14201_v51  ;;  %v11174_v23 = vpop.f32.mrf.mxu0  ;;  %11461 = vmatmul.mubr.bf16.vlgmr.msra.gmra.mxu0 %v20018_v37 }
 0x257   :  { %20016 = vst [vmem:[#allocation123_spill] sm:$0xff] %v14197_v36  ;;  %v2829_v43 = vadd.f32 %v11174_v23, %v13946_v47  ;;  %v11254_v45 = vpop.f32.mrf.mxu1  ;;  %11464 = vmatprep.mubr.bf16.mxu0 %v20019_v53  ;;  %v20021_v36 = vld [vmem:[#allocation71_spill] sm:$0xff] }
 0x258   :  { %v2668_v55 = vpop.f32.mrf.mxu0 }
 0x259   :  { %v2827_v54 = vadd.f32 %v2668_v55, %v13949_v60  ;;  %v14207_v30 = vadd.f32 %v11254_v45, %v2829_v43  ;;  %v3086_v48 = vpop.f32.mrf.mxu1  ;;  %v20025_v45 = vld [vmem:[#allocation86_spill] sm:$0xff] }
 0x25a   :  { %v11175_v7 = vpop.f32.mrf.mxu0 }
 0x25b   :  { %v2830_v63 = vadd.f32 %v11175_v7, %v20020_v4  ;;  %v14210_v28 = vadd.f32 %v3086_v48, %v2827_v54  ;;  %v11255_v57 = vpop.f32.mrf.mxu1 }
 0x25c   :  { %v2671_v51 = vpop.f32.mrf.mxu0 }
 0x25d   :  { %v14213_v37 = vadd.f32 %v2671_v51, %v20021_v36  ;;  %v14215_v47 = vadd.f32 %v11255_v57, %v2830_v63  ;;  %v14217_v23 = vpop.f32.mrf.mxu1 }
 0x25e   :  { %20023 = vst [vmem:[#allocation28_spill] sm:$0xff] %v14217_v23  ;;  %v11178_v53 = vpop.f32.mrf.mxu0  ;;  %11465 = vmatmul.mubr.bf16.gmra.mxu0 %v20024_v26  ;;  %v20026_v23 = vld [vmem:[#allocation114_spill] sm:$0xff] }
 0x25f   :  { %20022 = vst [vmem:[#allocation29_spill] sm:$0xff] %v14213_v37  ;;  %v2833_v60 = vadd.f32 %v11178_v53, %v13962_v49  ;;  %v11258_v43 = vpop.f32.mrf.mxu1  ;;  %11468 = vmatprep.mubr.bf16.mxu0 %v20025_v45  ;;  %v20029_v37 = vld [vmem:[#allocation87_spill] sm:$0xff] }
 0x260   :  { %v2684_v55 = vpop.f32.mrf.mxu0 }
 0x261   :  { %v2831_v54 = vadd.f32 %v2684_v55, %v13965_v15  ;;  %v14223_v48 = vadd.f32 %v11258_v43, %v2833_v60  ;;  %v3102_v7 = vpop.f32.mrf.mxu1  ;;  %v20030_v43 = vld [vmem:[#allocation88_spill] sm:$0xff] }
 0x262   :  { %v11179_v36 = vpop.f32.mrf.mxu0 }
 0x263   :  { %v2834_v51 = vadd.f32 %v11179_v36, %v13968_v46  ;;  %v14226_v4 = vadd.f32 %v3102_v7, %v2831_v54  ;;  %v11259_v63 = vpop.f32.mrf.mxu1  ;;  %v20031_v36 = vld [vmem:[#allocation115_spill] sm:$0xff] }
 0x264   :  { %v2687_v57 = vpop.f32.mrf.mxu0 }
 0x265   :  { %v14229_v26 = vadd.f32 %v2687_v57, %v20026_v23  ;;  %v14231_v49 = vadd.f32 %v11259_v63, %v2834_v51  ;;  %v14233_v53 = vpop.f32.mrf.mxu1 }
 0x266   :  { %20028 = vst [vmem:[#allocation26_spill] sm:$0xff] %v14233_v53  ;;  %v11182_v45 = vpop.f32.mrf.mxu0  ;;  %11469 = vmatmul.mubr.bf16.gmra.mxu0 %v20029_v37 }
 0x267   :  { %20027 = vst [vmem:[#allocation31_spill] sm:$0xff] %v14229_v26  ;;  %v2837_v15 = vadd.f32 %v11182_v45, %v13978_v20  ;;  %v11262_v60 = vpop.f32.mrf.mxu1  ;;  %11472 = vmatprep.mubr.bf16.mxu0 %v20030_v43  ;;  %v20032_v26 = vld [vmem:[#allocation77_spill] sm:$0xff] }
 0x268   :  { %v2700_v46 = vpop.f32.mrf.mxu0 }
 0x269   :  { %v2835_v55 = vadd.f32 %v2700_v46, %v13981_v35  ;;  %v14239_v54 = vadd.f32 %v11262_v60, %v2837_v15  ;;  %v3118_v7 = vpop.f32.mrf.mxu1  ;;  %v20036_v60 = vld [vmem:[#allocation90_spill] sm:$0xff] }
 0x26a   :  { %v11183_v23 = vpop.f32.mrf.mxu0 }
 0x26b   :  { %v2838_v51 = vadd.f32 %v11183_v23, %v20031_v36  ;;  %v14242_v63 = vadd.f32 %v3118_v7, %v2835_v55  ;;  %v11263_v57 = vpop.f32.mrf.mxu1 }
 0x26c   :  { %v2703_v53 = vpop.f32.mrf.mxu0 }
 0x26d   :  { %v14245_v37 = vadd.f32 %v2703_v53, %v20032_v26  ;;  %v14247_v20 = vadd.f32 %v11263_v57, %v2838_v51  ;;  %v14249_v45 = vpop.f32.mrf.mxu1  ;;  %v20037_v53 = vld [vmem:[#allocation79_spill] sm:$0xff] }
 0x26e   :  { %20034 = vst [vmem:[#allocation33_spill] sm:$0xff] %v14249_v45  ;;  %v11186_v43 = vpop.f32.mrf.mxu0  ;;  %11473 = vmatmul.mubr.bf16.gmra.mxu0 %v20035_v61 }
 0x26f   :  { %20033 = vst [vmem:[#allocation125_spill] sm:$0xff] %v14245_v37  ;;  %v2841_v35 = vadd.f32 %v11186_v43, %v13994_v29  ;;  %v11266_v15 = vpop.f32.mrf.mxu1  ;;  %11476 = vmatprep.mubr.bf16.mxu0 %v20036_v60  ;;  %v20039_v37 = vld [vmem:[#allocation118_spill] sm:$0xff] }
 0x270   :  { %v2716_v46 = vpop.f32.mrf.mxu0 }
 0x271   :  { %v2839_v55 = vadd.f32 %v2716_v46, %v13997_v41  ;;  %v14255_v7 = vadd.f32 %v11266_v15, %v2841_v35  ;;  %v3134_v23 = vpop.f32.mrf.mxu1  ;;  %v20044_v41 = vld [vmem:[#allocation18_spill] sm:$0xff]  ;;  %v20045_v46 = vld [vmem:[#allocation92_spill] sm:$0xff] }
 0x272   :  { %v11187_v26 = vpop.f32.mrf.mxu0 }
 0x273   :  { %v2842_v36 = vadd.f32 %v11187_v26, %v20037_v53  ;;  %v14258_v51 = vadd.f32 %v3134_v23, %v2839_v55  ;;  %v11267_v57 = vpop.f32.mrf.mxu1  ;;  %v20046_v55 = vld [vmem:[#allocation19_spill] sm:$0xff] }
 0x274   :  { %v2719_v45 = vpop.f32.mrf.mxu0 }
 0x275   :  { %20038 = vst [vmem:[#allocation35_spill] sm:$0xff] %v14258_v51  ;;  %v14261_v61 = vadd.f32 %v2719_v45, %v20039_v37  ;;  %v14263_v29 = vadd.f32 %v11267_v57, %v2842_v36  ;;  %v14265_v43 = vpop.f32.mrf.mxu1  ;;  %v20047_v45 = vld [vmem:[#allocation82_spill] sm:$0xff]  ;;  %v20051_v51 = vld [vmem:[#allocation93_spill] sm:$0xff] }
 0x276   :  { %20042 = vst [vmem:[#allocation32_spill] sm:$0xff] %v14265_v43  ;;  %v11190_v60 = vpop.f32.mrf.mxu0  ;;  %11477 = vmatmul.mubr.bf16.gmra.mxu0 %v20043_v32 }
 0x277   :  { %20040 = vst [vmem:[#allocation34_spill] sm:$0xff] %v14261_v61  ;;  %20041 = vst [vmem:[#allocation30_spill] sm:$0xff] %v14263_v29  ;;  %v2845_v35 = vadd.f32 %v11190_v60, %v20044_v41  ;;  %v11270_v15 = vpop.f32.mrf.mxu1  ;;  %11480 = vmatprep.mubr.bf16.mxu0 %v20045_v46  ;;  %v20048_v29 = vld [vmem:[#allocation21_spill] sm:$0xff] }
 0x278   :  { %v2732_v26 = vpop.f32.mrf.mxu0 }
 0x279   :  { %v2843_v23 = vadd.f32 %v2732_v26, %v20046_v55  ;;  %v14271_v53 = vadd.f32 %v11270_v15, %v2845_v35  ;;  %v3150_v17 = vpop.f32.mrf.mxu1  ;;  %v20052_v26 = vld [vmem:[#allocation94_spill] sm:$0xff] }
 0x27a   :  { %v11191_v37 = vpop.f32.mrf.mxu0 }
 0x27b   :  { %v2846_v36 = vadd.f32 %v11191_v37, %v20047_v45  ;;  %v14274_v57 = vadd.f32 %v3150_v17, %v2843_v23  ;;  %v11271_v43 = vpop.f32.mrf.mxu1 }
 0x27c   :  { %v2735_v61 = vpop.f32.mrf.mxu0 }
 0x27d   :  { %v14277_v32 = vadd.f32 %v2735_v61, %v20048_v29  ;;  %v14279_v60 = vadd.f32 %v11271_v43, %v2846_v36  ;;  %v14281_v41 = vpop.f32.mrf.mxu1 }
 0x27e   :  { %20050 = vst [vmem:[#allocation37_spill] sm:$0xff] %v14281_v41  ;;  %v11194_v46 = vpop.f32.mrf.mxu0  ;;  %11481 = vmatmul.mubr.bf16.gmra.mxu0 %v20051_v51  ;;  %v20053_v41 = vld [vmem:[#allocation17_spill] sm:$0xff] }
 0x27f   :  { %20049 = vst [vmem:[#allocation126_spill] sm:$0xff] %v14277_v32  ;;  %v2849_v35 = vadd.f32 %v11194_v46, %v14026_v9  ;;  %v11274_v15 = vpop.f32.mrf.mxu1  ;;  %11484 = vmatprep.mubr.bf16.mxu0 %v20052_v26  ;;  %v20056_v32 = vld [vmem:[#allocation95_spill] sm:$0xff] }
 0x280   :  { %v2748_v55 = vpop.f32.mrf.mxu0 }
 0x281   :  { %v2847_v17 = vadd.f32 %v2748_v55, %v14029_v50  ;;  %v14287_v23 = vadd.f32 %v11274_v15, %v2849_v35  ;;  %v3166_v37 = vpop.f32.mrf.mxu1  ;;  %v20057_v15 = vld [vmem:[#allocation134_spill] sm:$0xff] }
 0x282   :  { %v11195_v61 = vpop.f32.mrf.mxu0 }
 0x283   :  { %v2850_v29 = vadd.f32 %v11195_v61, %v14032_v18  ;;  %v14290_v43 = vadd.f32 %v3166_v37, %v2847_v17  ;;  %v11275_v45 = vpop.f32.mrf.mxu1 }
 0x284   :  { %v2751_v36 = vpop.f32.mrf.mxu0 }
 0x285   :  { %v14293_v51 = vadd.f32 %v2751_v36, %v20053_v41  ;;  %v14295_v9 = vadd.f32 %v11275_v45, %v2850_v29  ;;  %v14297_v46 = vpop.f32.mrf.mxu1 }
 0x286   :  { %20055 = vst [vmem:[#allocation39_spill] sm:$0xff] %v14297_v46  ;;  %v11198_v26 = vpop.f32.mrf.mxu0  ;;  %11485 = vmatmul.mubr.bf16.gmra.mxu0 %v20056_v32  ;;  %v20058_v46 = vld [vmem:[#allocation20_spill] sm:$0xff] }
 0x287   :  { %20054 = vst [vmem:[#allocation36_spill] sm:$0xff] %v14293_v51  ;;  %v2853_v50 = vadd.f32 %v11198_v26, %v14042_v19  ;;  %v11278_v35 = vpop.f32.mrf.mxu1  ;;  %11488 = vmatprep.mubr.bf16.mxu0 %v20057_v15 }
 0x288   :  { %v2764_v18 = vpop.f32.mrf.mxu0 }
 0x289   :  { %v2851_v55 = vadd.f32 %v2764_v18, %v14045_v2  ;;  %v14303_v17 = vadd.f32 %v11278_v35, %v2853_v50  ;;  %v3182_v37 = vpop.f32.mrf.mxu1  ;;  %v20061_v35 = vld [vmem:[#allocation97_spill] sm:$0xff] }
 0x28a   :  { %v11199_v41 = vpop.f32.mrf.mxu0 }
 0x28b   :  { %v2854_v61 = vadd.f32 %v11199_v41, %v14048_v10  ;;  %v14306_v29 = vadd.f32 %v3182_v37, %v2851_v55  ;;  %v11279_v45 = vpop.f32.mrf.mxu1 }
 0x28c   :  { %v2767_v36 = vpop.f32.mrf.mxu0 }
 0x28d   :  { %v14309_v51 = vadd.f32 %v2767_v36, %v20058_v46  ;;  %v14311_v19 = vadd.f32 %v11279_v45, %v2854_v61  ;;  %v14313_v26 = vpop.f32.mrf.mxu1 }
 0x28e   :  { %20060 = vst [vmem:[#allocation128_spill] sm:$0xff] %v14313_v26  ;;  %v11202_v15 = vpop.f32.mrf.mxu0  ;;  %11489 = vmatmul.mubr.bf16.gmra.mxu0 %v20056_v32  ;;  %v20064_v26 = vld [vmem:[#allocation98_spill] sm:$0xff] }
 0x28f   :  { %20059 = vst [vmem:[#allocation127_spill] sm:$0xff] %v14309_v51  ;;  %v2857_v2 = vadd.f32 %v11202_v15, %v14058_v25  ;;  %v11282_v50 = vpop.f32.mrf.mxu1  ;;  %11492 = vmatprep.mubr.bf16.mxu0 %v20061_v35  ;;  %v20074_v51 = vld [vmem:[#allocation22_spill] sm:$0xff] }
 0x290   :  { %v2780_v10 = vpop.f32.mrf.mxu0 }
 0x291   :  { %v2855_v18 = vadd.f32 %v2780_v10, %v14061_v8  ;;  %v14319_v55 = vadd.f32 %v11282_v50, %v2857_v2  ;;  %v3198_v37 = vpop.f32.mrf.mxu1 }
 0x292   :  { %v11203_v46 = vpop.f32.mrf.mxu0 }
 0x293   :  { %v2858_v41 = vadd.f32 %v11203_v46, %v14064_v38  ;;  %v14322_v61 = vadd.f32 %v3198_v37, %v2855_v18  ;;  %v11283_v45 = vpop.f32.mrf.mxu1  ;;  %v20065_v38 = vld [vmem:[#allocation99_spill] sm:$0xff] }
 0x294   :  { %v2783_v36 = vpop.f32.mrf.mxu0 }
 0x295   :  { %v14325_v32 = vadd.f32 %v2783_v36, %v14067_v5  ;;  %v14327_v25 = vadd.f32 %v11283_v45, %v2858_v41  ;;  %v14329_v15 = vpop.f32.mrf.mxu1  ;;  %v20066_v45 = vld [vmem:[#allocation100_spill] sm:$0xff] }
 0x296   :  { %20063 = vst [vmem:[#allocation41_spill] sm:$0xff] %v14329_v15  ;;  %v11302_v35 = vpop.f32.mrf.mxu0  ;;  %11493 = vmatmul.mubr.bf16.gmra.mxu0 %v20064_v26  ;;  %v20072_v15 = vld [vmem:[#allocation103_spill] sm:$0xff] }
 0x297   :  { %20062 = vst [vmem:[#allocation129_spill] sm:$0xff] %v14325_v32  ;;  %v14333_v8 = vadd.f32 %v11302_v35, %v14074_v31  ;;  %v14335_v2 = vpop.f32.mrf.mxu1  ;;  %11496 = vmatprep.mubr.bf16.mxu0 %v20065_v38  ;;  %v20073_v32 = vld [vmem:[#allocation23_spill] sm:$0xff] }
 0x298   :  { %v3376_v50 = vpop.f32.mrf.mxu0 }
 0x299   :  { %v14339_v10 = vadd.f32 %v3376_v50, %v14077_v12  ;;  %v14341_v5 = vpop.f32.mrf.mxu1  ;;  %v20067_v12 = vld [vmem:[#allocation101_spill] sm:$0xff] }
 0x29a   :  { %v11303_v18 = vpop.f32.mrf.mxu0 }
 0x29b   :  { %v14344_v37 = vadd.f32 %v11303_v18, %v14080_v42  ;;  %v14346_v41 = vpop.f32.mrf.mxu1 }
 0x29c   :  { %v3379_v46 = vpop.f32.mrf.mxu0 }
 0x29d   :  { %v14349_v31 = vadd.f32 %v3379_v46, %v14084_v39  ;;  %v14356_v35 = vpop.f32.mrf.mxu1 }
 0x29e   :  { %v11306_v26 = vpop.f32.mrf.mxu0  ;;  %11497 = vmatmul.mubr.bf16.gmra.mxu0 %v20066_v45 }
 0x29f   :  { %v14353_v36 = vadd.f32 %v11306_v26, %v14090_v1  ;;  %11500 = vmatprep.mubr.bf16.mxu0 %v20067_v12  ;;  %v14364_v39 = vpop.f32.mrf.mxu1  ;;  %v20070_v26 = vld [vmem:[#allocation102_spill] sm:$0xff] }
 0x2a0   :  { %v3392_v38 = vpop.f32.mrf.mxu0  ;;  %20069 = vst [vmem:[#allocation40_spill] sm:$0xff] %v14364_v39  ;;  %v20076_v39 = vld [vmem:[#allocation119_spill] sm:$0xff] }
 0x2a1   :  { %v14359_v42 = vadd.f32 %v3392_v38, %v14093_v13  ;;  %v14374_v13 = vpop.f32.mrf.mxu1 }
 0x2a2   :  { %v11307_v50 = vpop.f32.mrf.mxu0 }
 0x2a3   :  { %v14362_v18 = vadd.f32 %v11307_v50, %v14096_v58 }
 0x2a4   :  { %v3395_v46 = vpop.f32.mrf.mxu0 }
 0x2a5   :  { %20068 = vst [vmem:[#allocation38_spill] sm:$0xff] %v14362_v18  ;;  %v14367_v45 = vadd.f32 %v3395_v46, %v14100_v0  ;;  %v14382_v0 = vpop.f32.mrf.mxu1 }
 0x2a6   :  { %v11310_v1 = vpop.f32.mrf.mxu0  ;;  %11501 = vmatmul.mubr.bf16.gmra.mxu0 %v20070_v26 }
 0x2a7   :  { %v14371_v12 = vadd.f32 %v11310_v1, %v14106_v6  ;;  %11504 = vmatprep.mubr.bf16.mxu0 %v20072_v15  ;;  %v20077_v1 = vld [vmem:[#allocation60_spill] sm:$0xff] }
 0x2a8   :  { %v3408_v38 = vpop.f32.mrf.mxu0 }
 0x2a9   :  { %20071 = vst [vmem:[#allocation43_spill] sm:$0xff] %v14371_v12  ;;  %v14377_v58 = vadd.f32 %v3408_v38, %v20073_v32  ;;  %v20079_v12 = vld [vmem:[#allocation62_spill] sm:$0xff]  ;;  %v14392_v32 = vpop.f32.mrf.mxu1 }
 0x2aa   :  { %v11311_v50 = vpop.f32.mrf.mxu0 }
 0x2ab   :  { %v14380_v18 = vadd.f32 %v11311_v50, %v20074_v51 }
 0x2ac   :  { %v3411_v46 = vpop.f32.mrf.mxu0 }
 0x2ad   :  { %20075 = vst [vmem:[#allocation42_spill] sm:$0xff] %v14380_v18  ;;  %v14385_v26 = vadd.f32 %v3411_v46, %v20076_v39  ;;  %v14400_v39 = vpop.f32.mrf.mxu1 }
 0x2ae   :  { %v11314_v6 = vpop.f32.mrf.mxu0  ;;  %11505 = vmatmul.mubr.bf16.gmra.mxu0 %v20077_v1 }
 0x2af   :  { %v14389_v15 = vadd.f32 %v11314_v6, %v14122_v62  ;;  %11508 = vmatprep.mubr.bf16.mxu0 %v20079_v12  ;;  %v20082_v6 = vld [vmem:[#allocation108_spill] sm:$0xff] }
 0x2b0   :  { %v3424_v38 = vpop.f32.mrf.mxu0 }
 0x2b1   :  { %20078 = vst [vmem:[#allocation130_spill] sm:$0xff] %v14389_v15  ;;  %v14395_v51 = vadd.f32 %v3424_v38, %v14125_v34  ;;  %v20084_v15 = vld [vmem:[#allocation109_spill] sm:$0xff]  ;;  %v14410_v34 = vpop.f32.mrf.mxu1 }
 0x2b2   :  { %v11315_v50 = vpop.f32.mrf.mxu0 }
 0x2b3   :  { %v14398_v18 = vadd.f32 %v11315_v50, %v14128_v16 }
 0x2b4   :  { %v3427_v46 = vpop.f32.mrf.mxu0 }
 0x2b5   :  { %20080 = vst [vmem:[#allocation131_spill] sm:$0xff] %v14398_v18  ;;  %v14403_v1 = vadd.f32 %v3427_v46, %v14132_v59  ;;  %v14418_v59 = vpop.f32.mrf.mxu1 }
 0x2b6   :  { %v11318_v62 = vpop.f32.mrf.mxu0  ;;  %11509 = vmatmul.mubr.bf16.gmra.mxu0 %v20082_v6 }
 0x2b7   :  { %20081 = vst [vmem:[#allocation132_spill] sm:$0xff] %v14403_v1  ;;  %v14407_v12 = vadd.f32 %v11318_v62, %v14138_v33  ;;  %11512 = vmatprep.mubr.bf16.mxu0 %v20084_v15  ;;  %v20087_v1 = vld [vmem:[#allocation112_spill] sm:$0xff]  ;;  %v20089_v15 = vld [vmem:[#allocation113_spill] sm:$0xff]  ;;  %v14427_v62 = vpop.f32.mrf.mxu1 }
 0x2b8   :  { %v3440_v38 = vpop.f32.mrf.mxu0 }
 0x2b9   :  { %20083 = vst [vmem:[#allocation45_spill] sm:$0xff] %v14407_v12  ;;  %v14413_v16 = vadd.f32 %v3440_v38, %v14141_v21 }
 0x2ba   :  { %v11319_v50 = vpop.f32.mrf.mxu0 }
 0x2bb   :  { %20085 = vst [vmem:[#allocation133_spill] sm:$0xff] %v14413_v16  ;;  %v14416_v18 = vadd.f32 %v11319_v50, %v14146_v22  ;;  %v20092_v16 = vld [vmem:[#allocation116_spill] sm:$0xff] }
 0x2bc   :  { %v14420_v46 = vpop.f32.mrf.mxu0 }
 0x2bd   :  { %20086 = vst [vmem:[#allocation44_spill] sm:$0xff] %v14416_v18  ;;  %v14435_v18 = vpop.f32.mrf.mxu1 }
 0x2be   :  { %v11322_v6 = vpop.f32.mrf.mxu0  ;;  %11513 = vmatmul.mubr.bf16.gmra.mxu0 %v20087_v1 }
 0x2bf   :  { %v14424_v33 = vadd.f32 %v11322_v6, %v14156_v56  ;;  %11516 = vmatprep.mubr.bf16.mxu0 %v20089_v15  ;;  %v20094_v6 = vld [vmem:[#allocation107_spill] sm:$0xff]  ;;  %v14444_v15 = vpop.f32.mrf.mxu1 }
 0x2c0   :  { %v3456_v21 = vpop.f32.mrf.mxu0 }
 0x2c1   :  { %20088 = vst [vmem:[#allocation96_spill] sm:$0xff] %v14424_v33  ;;  %v14430_v38 = vadd.f32 %v3456_v21, %v14159_v27 }
 0x2c2   :  { %v11323_v22 = vpop.f32.mrf.mxu0 }
 0x2c3   :  { %20090 = vst [vmem:[#allocation47_spill] sm:$0xff] %v14430_v38  ;;  %v14433_v50 = vadd.f32 %v11323_v22, %v14164_v24 }
 0x2c4   :  { %v14437_v12 = vpop.f32.mrf.mxu0 }
 0x2c5   :  { %20091 = vst [vmem:[#allocation48_spill] sm:$0xff] %v14433_v50  ;;  %v14452_v50 = vpop.f32.mrf.mxu1 }
 0x2c6   :  { %v11326_v1 = vpop.f32.mrf.mxu0  ;;  %11517 = vmatmul.mubr.bf16.gmra.mxu0 %v20092_v16 }
 0x2c7   :  { %v14441_v56 = vadd.f32 %v11326_v1, %v14174_v44  ;;  %11520 = vmatprep.mubr.bf16.mxu0 %v20094_v6  ;;  %v14460_v1 = vpop.f32.mrf.mxu1 }
 0x2c8   :  { %v3472_v27 = vpop.f32.mrf.mxu0 }
 0x2c9   :  { %20093 = vst [vmem:[#allocation135_spill] sm:$0xff] %v14441_v56  ;;  %v14447_v21 = vadd.f32 %v3472_v27, %v14177_v52 }
 0x2ca   :  { %v11327_v24 = vpop.f32.mrf.mxu0 }
 0x2cb   :  { %v14450_v22 = vadd.f32 %v11327_v24, %v14182_v11  ;;  %v14468_v24 = vpop.f32.mrf.mxu1 }
 0x2cc   :  { %v14454_v33 = vpop.f32.mrf.mxu0 }
 0x2cd   :  { %20095 = vst [vmem:[#allocation136_spill] sm:$0xff] %v14450_v22 }
 0x2ce   :  { %v11330_v38 = vpop.f32.mrf.mxu0  ;;  %11521 = vmatmul.mubr.bf16.gmra.mxu0 %v20092_v16 }
 0x2cf   :  { %v14458_v44 = vadd.f32 %v11330_v38, %v14191_v14  ;;  %v14475_v14 = vpop.f32.mrf.mxu1 }
 0x2d0   :  { %v3488_v6 = vpop.f32.mrf.mxu0 }
 0x2d1   :  { %20096 = vst [vmem:[#allocation50_spill] sm:$0xff] %v14458_v44  ;;  %v14463_v52 = vadd.f32 %v3488_v6, %v14194_v3 }
 0x2d2   :  { %v11331_v27 = vpop.f32.mrf.mxu0 }
 0x2d3   :  { %20097 = vst [vmem:[#allocation49_spill] sm:$0xff] %v14463_v52  ;;  %v14466_v11 = vadd.f32 %v11331_v27, %v14199_v40  ;;  %v14483_v40 = vpop.f32.mrf.mxu1 }
 0x2d4   :  { %v14470_v22 = vpop.f32.mrf.mxu0 }
 0x2d5   :  { %20098 = vst [vmem:[#allocation52_spill] sm:$0xff] %v14466_v11 }
 0x2d6   :  { %v11334_v56 = vpop.f32.mrf.mxu0 }
 0x2d7   :  { %v14473_v16 = vadd.f32 %v11334_v56, %v14207_v30  ;;  %v14490_v30 = vpop.f32.mrf.mxu1 }
 0x2d8   :  { %v3504_v38 = vpop.f32.mrf.mxu0 }
 0x2d9   :  { %20099 = vst [vmem:[#allocation54_spill] sm:$0xff] %v14473_v16  ;;  %v14478_v44 = vadd.f32 %v3504_v38, %v14210_v28 }
 0x2da   :  { %v11335_v3 = vpop.f32.mrf.mxu0 }
 0x2db   :  { %20100 = vst [vmem:[#allocation56_spill] sm:$0xff] %v14478_v44  ;;  %v14481_v6 = vadd.f32 %v11335_v3, %v14215_v47  ;;  %v14498_v47 = vpop.f32.mrf.mxu1 }
 0x2dc   :  { %v14485_v27 = vpop.f32.mrf.mxu0 }
 0x2dd   :  { %20101 = vst [vmem:[#allocation46_spill] sm:$0xff] %v14481_v6 }
 0x2de   :  { %v11338_v11 = vpop.f32.mrf.mxu0 }
 0x2df   :  { %v14488_v52 = vadd.f32 %v11338_v11, %v14223_v48  ;;  %v14505_v48 = vpop.f32.mrf.mxu1 }
 0x2e0   :  { %v3520_v56 = vpop.f32.mrf.mxu0 }
 0x2e1   :  { %20102 = vst [vmem:[#allocation58_spill] sm:$0xff] %v14488_v52  ;;  %v14493_v16 = vadd.f32 %v3520_v56, %v14226_v4 }
 0x2e2   :  { %v11339_v28 = vpop.f32.mrf.mxu0 }
 0x2e3   :  { %20103 = vst [vmem:[#allocation57_spill] sm:$0xff] %v14493_v16  ;;  %v14496_v38 = vadd.f32 %v11339_v28, %v14231_v49  ;;  %v14513_v49 = vpop.f32.mrf.mxu1 }
 0x2e4   :  { %v14500_v3 = vpop.f32.mrf.mxu0 }
 0x2e5   :  { %20104 = vst [vmem:[#allocation61_spill] sm:$0xff] %v14496_v38  ;;  %20105 = vst [vmem:[#allocation51_spill] sm:$0xff] %v14500_v3 }
 0x2e6   :  { %v11342_v6 = vpop.f32.mrf.mxu0 }
 0x2e7   :  { %v14503_v44 = vadd.f32 %v11342_v6, %v14239_v54  ;;  %v14520_v54 = vpop.f32.mrf.mxu1 }
 0x2e8   :  { %v3536_v11 = vpop.f32.mrf.mxu0 }
 0x2e9   :  { %20106 = vst [vmem:[#allocation53_spill] sm:$0xff] %v14503_v44  ;;  %v14508_v52 = vadd.f32 %v3536_v11, %v14242_v63  ;;  %v20111_v44 = vld [vmem:[#allocation35_spill] sm:$0xff]  ;;  %v20113_v11 = vld [vmem:[#allocation30_spill] sm:$0xff] }
 0x2ea   :  { %v11343_v4 = vpop.f32.mrf.mxu0 }
 0x2eb   :  { %20107 = vst [vmem:[#allocation65_spill] sm:$0xff] %v14508_v52  ;;  %v14511_v56 = vadd.f32 %v11343_v4, %v14247_v20  ;;  %v14528_v20 = vpop.f32.mrf.mxu1 }
 0x2ec   :  { %v14515_v28 = vpop.f32.mrf.mxu0 }
 0x2ed   :  { %20108 = vst [vmem:[#allocation55_spill] sm:$0xff] %v14511_v56  ;;  %20109 = vst [vmem:[#allocation64_spill] sm:$0xff] %v14515_v28 }
 0x2ee   :  { %v11346_v38 = vpop.f32.mrf.mxu0 }
 0x2ef   :  { %v14518_v16 = vadd.f32 %v11346_v38, %v14255_v7  ;;  %v14535_v7 = vpop.f32.mrf.mxu1 }
 0x2f0   :  { %v3552_v6 = vpop.f32.mrf.mxu0 }
 0x2f1   :  { %20110 = vst [vmem:[#allocation67_spill] sm:$0xff] %v14518_v16  ;;  %v14523_v3 = vadd.f32 %v3552_v6, %v20111_v44 }
 0x2f2   :  { %v11347_v63 = vpop.f32.mrf.mxu0 }
 0x2f3   :  { %20112 = vst [vmem:[#allocation66_spill] sm:$0xff] %v14523_v3  ;;  %v14526_v52 = vadd.f32 %v11347_v63, %v20113_v11  ;;  %v14543_v63 = vpop.f32.mrf.mxu1 }
 0x2f4   :  { %v14530_v4 = vpop.f32.mrf.mxu0 }
 0x2f5   :  { %20114 = vst [vmem:[#allocation104_spill] sm:$0xff] %v14526_v52 }
 0x2f6   :  { %v11350_v56 = vpop.f32.mrf.mxu0 }
 0x2f7   :  { %v14533_v28 = vadd.f32 %v11350_v56, %v14271_v53  ;;  %v14550_v53 = vpop.f32.mrf.mxu1 }
 0x2f8   :  { %v3568_v38 = vpop.f32.mrf.mxu0 }
 0x2f9   :  { %20115 = vst [vmem:[#allocation105_spill] sm:$0xff] %v14533_v28  ;;  %v14538_v16 = vadd.f32 %v3568_v38, %v14274_v57 }
 0x2fa   :  { %v11351_v44 = vpop.f32.mrf.mxu0 }
 0x2fb   :  { %20116 = vst [vmem:[#allocation59_spill] sm:$0xff] %v14538_v16  ;;  %v14541_v6 = vadd.f32 %v11351_v44, %v14279_v60  ;;  %v14558_v60 = vpop.f32.mrf.mxu1 }
 0x2fc   :  { %v14545_v11 = vpop.f32.mrf.mxu0 }
 0x2fd   :  { %20117 = vst [vmem:[#allocation70_spill] sm:$0xff] %v14541_v6 }
 0x2fe   :  { %v11354_v52 = vpop.f32.mrf.mxu0 }
 0x2ff   :  { %v14548_v3 = vadd.f32 %v11354_v52, %v14287_v23  ;;  %v14565_v23 = vpop.f32.mrf.mxu1 }
 0x300   :  { %v3584_v56 = vpop.f32.mrf.mxu0 }
 0x301   :  { %20118 = vst [vmem:[#allocation69_spill] sm:$0xff] %v14548_v3  ;;  %v14553_v28 = vadd.f32 %v3584_v56, %v14290_v43 }
 0x302   :  { %v11355_v57 = vpop.f32.mrf.mxu0 }
 0x303   :  { %20119 = vst [vmem:[#allocation72_spill] sm:$0xff] %v14553_v28  ;;  %v14556_v38 = vadd.f32 %v11355_v57, %v14295_v9  ;;  %v14573_v9 = vpop.f32.mrf.mxu1 }
 0x304   :  { %v14560_v44 = vpop.f32.mrf.mxu0 }
 0x305   :  { %20120 = vst [vmem:[#allocation76_spill] sm:$0xff] %v14556_v38  ;;  %20121 = vst [vmem:[#allocation63_spill] sm:$0xff] %v14560_v44 }
 0x306   :  { %v11358_v6 = vpop.f32.mrf.mxu0 }
 0x307   :  { %v14563_v16 = vadd.f32 %v11358_v6, %v14303_v17  ;;  %v14580_v17 = vpop.f32.mrf.mxu1 }
 0x308   :  { %v3600_v52 = vpop.f32.mrf.mxu0 }
 0x309   :  { %20122 = vst [vmem:[#allocation75_spill] sm:$0xff] %v14563_v16  ;;  %v14568_v3 = vadd.f32 %v3600_v52, %v14306_v29 }
 0x30a   :  { %v11359_v43 = vpop.f32.mrf.mxu0 }
 0x30b   :  { %20123 = vst [vmem:[#allocation78_spill] sm:$0xff] %v14568_v3  ;;  %v14571_v56 = vadd.f32 %v11359_v43, %v14311_v19  ;;  %v14588_v19 = vpop.f32.mrf.mxu1 }
 0x30c   :  { %v14575_v57 = vpop.f32.mrf.mxu0 }
 0x30d   :  { %20124 = vst [vmem:[#allocation106_spill] sm:$0xff] %v14571_v56  ;;  %20125 = vst [vmem:[#allocation80_spill] sm:$0xff] %v14575_v57  ;;  %v14592_v3 = vpop.f32.mrf.mxu1 }
 0x30e   :  { %v11362_v38 = vpop.f32.mrf.mxu0 }
 0x30f   :  { %v14578_v28 = vadd.f32 %v11362_v38, %v14319_v55  ;;  %v4049_v38 = vadd.f32 %v14341_v5, %v14339_v10 }
 0x310   :  { %v3616_v6 = vpop.f32.mrf.mxu0 }
 0x311   :  { %20126 = vst [vmem:[#allocation117_spill] sm:$0xff] %v14578_v28  ;;  %v14583_v16 = vadd.f32 %v3616_v6, %v14322_v61  ;;  %v4050_v61 = vadd.f32 %v14356_v35, %v14349_v31  ;;  %v14598_v6 = vpop.f32.mrf.mxu1  ;;  %v4053_v35 = vadd.f32 %v14374_v13, %v14359_v42 }
 0x312   :  { %v11363_v29 = vpop.f32.mrf.mxu0 }
 0x313   :  { %20127 = vst [vmem:[#allocation81_spill] sm:$0xff] %v14583_v16  ;;  %v14586_v52 = vadd.f32 %v11363_v29, %v14327_v25  ;;  %v4051_v25 = vadd.f32 %v14335_v2, %v14333_v8  ;;  %v14612_v5 = vpop.f32.mrf.mxu1 }
 0x314   :  { %v14590_v43 = vpop.f32.mrf.mxu0 }
 0x315   :  { %20128 = vst [vmem:[#allocation68_spill] sm:$0xff] %v14586_v52  ;;  %20129 = vst [vmem:[#allocation110_spill] sm:$0xff] %v14590_v43  ;;  %v4052_v43 = vadd.f32 %v14346_v41, %v14344_v37 }
 0x316   :  { %v11462_v56 = vpop.f32.mrf.mxu0 }
 0x317   :  { %v14608_v44 = vadd.f32 %v11462_v56, %v4051_v25  ;;  %v14624_v56 = vpop.f32.mrf.mxu1 }
 0x318   :  { %v4212_v57 = vpop.f32.mrf.mxu0 }
 0x319   :  { %v14602_v29 = vadd.f32 %v4212_v57, %v4049_v38  ;;  %20130 = vst [vmem:[#allocation83_spill] sm:$0xff] %v14608_v44  ;;  %v4054_v57 = vadd.f32 %v14392_v32, %v14367_v45  ;;  %v14636_v32 = vpop.f32.mrf.mxu1 }
 0x31a   :  { %v11463_v55 = vpop.f32.mrf.mxu0 }
 0x31b   :  { %v14616_v8 = vadd.f32 %v11463_v55, %v4052_v43  ;;  %v20132_v55 = vld [vmem:[#allocation38_spill] sm:$0xff] }
 0x31c   :  { %v4215_v28 = vpop.f32.mrf.mxu0 }
 0x31d   :  { %v14604_v52 = vadd.f32 %v4215_v28, %v4050_v61  ;;  %v20131_v61 = vld [vmem:[#allocation40_spill] sm:$0xff] }
 0x31e   :  { %v11466_v16 = vpop.f32.mrf.mxu0  ;;  %v4055_v25 = vadd.f32 %v20131_v61, %v14353_v36 }
 0x31f   :  { %v4533_v10 = vadd.f32 %v14604_v52, %v14602_v29 }
 0x320   :  { %v4228_v31 = vpop.f32.mrf.mxu0 }
 0x321   :  { %v4534_v2 = vadd.f32 %v4533_v10, %v14608_v44  ;;  %v14621_v37 = vadd.f32 %v4228_v31, %v4053_v35  ;;  %v4056_v10 = vadd.f32 %v14382_v0, %v20132_v55  ;;  %v14633_v44 = vadd.f32 %v11466_v16, %v4055_v25  ;;  %v14648_v16 = vpop.f32.mrf.mxu1  ;;  %v20134_v25 = vld [vmem:[#allocation43_spill] sm:$0xff]  ;;  %v20136_v55 = vld [vmem:[#allocation42_spill] sm:$0xff] }
 0x322   :  { %v11467_v28 = vpop.f32.mrf.mxu0  ;;  %v4057_v35 = vadd.f32 %v14410_v34, %v14377_v58 }
 0x323   :  { %v4535_v41 = vadd.f32 %v4534_v2, %v14616_v8  ;;  %v14640_v2 = vadd.f32 %v11467_v28, %v4056_v10  ;;  %v4060_v10 = vadd.f32 %v14418_v59, %v20136_v55  ;;  %v20139_v55 = vld [vmem:[#allocation121_spill] sm:$0xff] }
 0x324   :  { %v4231_v38 = vpop.f32.mrf.mxu0 }
 0x325   :  { %v4536_v42 = vadd.f32 %v4535_v41, %v14621_v37  ;;  %v14629_v13 = vadd.f32 %v4231_v38, %v4054_v57  ;;  %v4058_v41 = vadd.f32 %v14427_v62, %v14385_v26  ;;  %v14660_v62 = vpop.f32.mrf.mxu1 }
 0x326   :  { %v11470_v43 = vpop.f32.mrf.mxu0 }
 0x327   :  { %v4537_v45 = vadd.f32 %v4536_v42, %v14629_v13  ;;  %v4059_v42 = vadd.f32 %v14400_v39, %v20134_v25 }
 0x328   :  { %v4244_v31 = vpop.f32.mrf.mxu0 }
 0x329   :  { %v4538_v36 = vadd.f32 %v4537_v45, %v14633_v44  ;;  %v14645_v38 = vadd.f32 %v4244_v31, %v4057_v35  ;;  %v14657_v45 = vadd.f32 %v11470_v43, %v4059_v42  ;;  %v4061_v35 = vadd.f32 %v14444_v15, %v14395_v51  ;;  %v14672_v43 = vpop.f32.mrf.mxu1 }
 0x32a   :  { %v11471_v57 = vpop.f32.mrf.mxu0 }
 0x32b   :  { %20133 = vst [vmem:[#allocation84_spill] sm:$0xff] %v14645_v38  ;;  %v4539_v0 = vadd.f32 %v4538_v36, %v14640_v2  ;;  %v14664_v36 = vadd.f32 %v11471_v57, %v4060_v10 }
 0x32c   :  { %v4247_v61 = vpop.f32.mrf.mxu0 }
 0x32d   :  { %v4540_v58 = vadd.f32 %v4539_v0, %v14645_v38  ;;  %v14653_v34 = vadd.f32 %v4247_v61, %v4058_v41  ;;  %v20137_v0 = vld [vmem:[#allocation132_spill] sm:$0xff]  ;;  %v20140_v38 = vld [vmem:[#allocation130_spill] sm:$0xff] }
 0x32e   :  { %v11474_v28 = vpop.f32.mrf.mxu0  ;;  %v4062_v61 = vadd.f32 %v14460_v1, %v20137_v0  ;;  %v4063_v51 = vadd.f32 %v14435_v18, %v20140_v38  ;;  %v14687_v0 = vpop.f32.mrf.mxu1 }
 0x32f   :  { %20135 = vst [vmem:[#allocation111_spill] sm:$0xff] %v14653_v34  ;;  %v4541_v26 = vadd.f32 %v4540_v58, %v14653_v34  ;;  %v20138_v58 = vld [vmem:[#allocation120_spill] sm:$0xff] }
 0x330   :  { %v4260_v31 = vpop.f32.mrf.mxu0  ;;  %v3230_v34 = vadd.f32 %v20139_v55, %v20138_v58  ;;  %v20143_v55 = vld [vmem:[#allocation133_spill] sm:$0xff] }
 0x331   :  { %v4542_v39 = vadd.f32 %v4541_v26, %v14657_v45  ;;  %v14669_v25 = vadd.f32 %v4260_v31, %v4061_v35  ;;  %v20142_v26 = vld [vmem:[#allocation131_spill] sm:$0xff]  ;;  %v14684_v35 = vadd.f32 %v11474_v28, %v4063_v51  ;;  %v4065_v18 = vadd.f32 %v14475_v14, %v20143_v55  ;;  %v20144_v51 = vld [vmem:[#allocation25_spill] sm:$0xff]  ;;  %v20148_v55 = vld [vmem:[#allocation44_spill] sm:$0xff] }
 0x332   :  { %v11475_v41 = vpop.f32.mrf.mxu0  ;;  %v4064_v1 = vadd.f32 %v14452_v50, %v20142_v26  ;;  %v3648_v31 = vadd.f32 %v14420_v46, %v3230_v34  ;;  %v14698_v34 = vpop.f32.mrf.mxu1 }
 0x333   :  { %v4543_v59 = vadd.f32 %v4542_v39, %v14664_v36 }
 0x334   :  { %v4263_v42 = vpop.f32.mrf.mxu0  ;;  %v14691_v38 = vadd.f32 %v11475_v41, %v4064_v1 }
 0x335   :  { %v4544_v15 = vadd.f32 %v4543_v59, %v14669_v25  ;;  %v14679_v57 = vadd.f32 %v4263_v42, %v4062_v61  ;;  %v4066_v42 = vadd.f32 %v14490_v30, %v3648_v31  ;;  %v4068_v30 = vadd.f32 %v14483_v40, %v20148_v55 }
 0x336   :  { %v11478_v10 = vpop.f32.mrf.mxu0 }
 0x337   :  { %20141 = vst [vmem:[#allocation71_spill] sm:$0xff] %v14679_v57  ;;  %v4545_v39 = vadd.f32 %v4544_v15, %v14679_v57  ;;  %v20145_v15 = vld [vmem:[#allocation24_spill] sm:$0xff]  ;;  %v20146_v57 = vld [vmem:[#allocation45_spill] sm:$0xff] }
 0x338   :  { %v4276_v58 = vpop.f32.mrf.mxu0  ;;  %v3234_v26 = vadd.f32 %v20145_v15, %v20144_v51  ;;  %v4067_v14 = vadd.f32 %v14468_v24, %v20146_v57  ;;  %v20149_v15 = vld [vmem:[#allocation47_spill] sm:$0xff] }
 0x339   :  { %v4546_v61 = vadd.f32 %v4545_v39, %v14684_v35  ;;  %v14695_v50 = vadd.f32 %v4276_v58, %v4065_v18  ;;  %v4069_v24 = vadd.f32 %v14505_v48, %v20149_v15  ;;  %v20153_v15 = vld [vmem:[#allocation48_spill] sm:$0xff] }
 0x33a   :  { %v11479_v59 = vpop.f32.mrf.mxu0  ;;  %v3652_v31 = vadd.f32 %v14437_v12, %v3234_v26  ;;  %v14710_v58 = vadd.f32 %v11478_v10, %v4067_v14  ;;  %v20150_v14 = vld [vmem:[#allocation27_spill] sm:$0xff] }
 0x33b   :  { %v4547_v46 = vadd.f32 %v4546_v61, %v14691_v38  ;;  %v14713_v61 = vpop.f32.mrf.mxu1  ;;  %v14717_v57 = vadd.f32 %v11479_v59, %v4068_v30 }
 0x33c   :  { %v4279_v28 = vpop.f32.mrf.mxu0 }
 0x33d   :  { %v4548_v41 = vadd.f32 %v4547_v46, %v14695_v50  ;;  %v14705_v1 = vadd.f32 %v4279_v28, %v4066_v42  ;;  %v4070_v28 = vadd.f32 %v14520_v54, %v3652_v31  ;;  %v14724_v10 = vpop.f32.mrf.mxu1  ;;  %v4072_v54 = vadd.f32 %v14513_v49, %v20153_v15  ;;  %v20157_v15 = vld [vmem:[#allocation135_spill] sm:$0xff] }
 0x33e   :  { %v11482_v39 = vpop.f32.mrf.mxu0 }
 0x33f   :  { %20147 = vst [vmem:[#allocation85_spill] sm:$0xff] %v14705_v1  ;;  %v4549_v18 = vadd.f32 %v4548_v41, %v14705_v1  ;;  %v20151_v41 = vld [vmem:[#allocation122_spill] sm:$0xff]  ;;  %v20152_v1 = vld [vmem:[#allocation96_spill] sm:$0xff] }
 0x340   :  { %v4292_v51 = vpop.f32.mrf.mxu0  ;;  %v3238_v55 = vadd.f32 %v20151_v41, %v20150_v14  ;;  %v4071_v48 = vadd.f32 %v14498_v47, %v20152_v1  ;;  %v4073_v47 = vadd.f32 %v14535_v7, %v14447_v21  ;;  %v4075_v21 = vadd.f32 %v14528_v20, %v20157_v15 }
 0x341   :  { %v4550_v42 = vadd.f32 %v4549_v18, %v14710_v58  ;;  %v14721_v40 = vadd.f32 %v4292_v51, %v4069_v24 }
 0x342   :  { %v11483_v46 = vpop.f32.mrf.mxu0  ;;  %v3656_v31 = vadd.f32 %v14454_v33, %v3238_v55  ;;  %v14736_v51 = vadd.f32 %v11482_v39, %v4071_v48  ;;  %v20155_v55 = vld [vmem:[#allocation123_spill] sm:$0xff]  ;;  %v20156_v48 = vld [vmem:[#allocation124_spill] sm:$0xff] }
 0x343   :  { %v4551_v12 = vadd.f32 %v4550_v42, %v14717_v57  ;;  %v14739_v42 = vpop.f32.mrf.mxu1  ;;  %v14743_v1 = vadd.f32 %v11483_v46, %v4072_v54 }
 0x344   :  { %v4295_v26 = vpop.f32.mrf.mxu0 }
 0x345   :  { %v4552_v59 = vadd.f32 %v4551_v12, %v14721_v40  ;;  %v14731_v30 = vadd.f32 %v4295_v26, %v4070_v28  ;;  %v4074_v26 = vadd.f32 %v14550_v53, %v3656_v31  ;;  %v14750_v39 = vpop.f32.mrf.mxu1 }
 0x346   :  { %v11486_v18 = vpop.f32.mrf.mxu0 }
 0x347   :  { %v4553_v24 = vadd.f32 %v4552_v59, %v14731_v30  ;;  %v3242_v59 = vadd.f32 %v20156_v48, %v20155_v55  ;;  %v20161_v48 = vld [vmem:[#allocation49_spill] sm:$0xff] }
 0x348   :  { %v4308_v14 = vpop.f32.mrf.mxu0  ;;  %v4077_v20 = vadd.f32 %v14565_v23, %v20161_v48  ;;  %v20168_v48 = vld [vmem:[#allocation52_spill] sm:$0xff] }
 0x349   :  { %v4554_v28 = vadd.f32 %v4553_v24, %v14736_v51  ;;  %v14747_v49 = vadd.f32 %v4308_v14, %v4073_v47  ;;  %v20159_v24 = vld [vmem:[#allocation136_spill] sm:$0xff]  ;;  %v3660_v31 = vadd.f32 %v14470_v22, %v3242_v59  ;;  %v14762_v14 = vadd.f32 %v11486_v18, %v4075_v21  ;;  %v20164_v21 = vld [vmem:[#allocation29_spill] sm:$0xff] }
 0x34a   :  { %v11487_v12 = vpop.f32.mrf.mxu0  ;;  %v4076_v53 = vadd.f32 %v14543_v63, %v20159_v24 }
 0x34b   :  { %20154 = vst [vmem:[#allocation86_spill] sm:$0xff] %v14747_v49  ;;  %v4555_v33 = vadd.f32 %v4554_v28, %v14743_v1  ;;  %20160 = vst [vmem:[#allocation87_spill] sm:$0xff] %v14762_v14  ;;  %v14765_v28 = vpop.f32.mrf.mxu1 }
 0x34c   :  { %v4311_v41 = vpop.f32.mrf.mxu0  ;;  %v14769_v15 = vadd.f32 %v11487_v12, %v4076_v53 }
 0x34d   :  { %v4556_v7 = vadd.f32 %v4555_v33, %v14747_v49  ;;  %v14757_v46 = vadd.f32 %v4311_v41, %v4074_v26  ;;  %v4078_v41 = vadd.f32 %v14580_v17, %v3660_v31  ;;  %v14776_v18 = vpop.f32.mrf.mxu1  ;;  %v4080_v17 = vadd.f32 %v14573_v9, %v20168_v48 }
 0x34e   :  { %v11490_v54 = vpop.f32.mrf.mxu0  ;;  %20162 = vst [vmem:[#allocation88_spill] sm:$0xff] %v14769_v15 }
 0x34f   :  { %20158 = vst [vmem:[#allocation114_spill] sm:$0xff] %v14757_v46  ;;  %v4557_v47 = vadd.f32 %v4556_v7, %v14757_v46  ;;  %v20165_v7 = vld [vmem:[#allocation28_spill] sm:$0xff]  ;;  %v20166_v46 = vld [vmem:[#allocation50_spill] sm:$0xff] }
 0x350   :  { %v4324_v55 = vpop.f32.mrf.mxu0  ;;  %v3246_v24 = vadd.f32 %v20165_v7, %v20164_v21  ;;  %v4079_v23 = vadd.f32 %v14558_v60, %v20166_v46  ;;  %v20170_v7 = vld [vmem:[#allocation56_spill] sm:$0xff] }
 0x351   :  { %v4558_v26 = vadd.f32 %v4557_v47, %v14762_v14  ;;  %v14773_v63 = vadd.f32 %v4324_v55, %v4077_v20  ;;  %v4081_v60 = vadd.f32 %v14592_v3, %v20170_v7  ;;  %v20177_v7 = vld [vmem:[#allocation46_spill] sm:$0xff] }
 0x352   :  { %v11491_v33 = vpop.f32.mrf.mxu0  ;;  %v3664_v31 = vadd.f32 %v14485_v27, %v3246_v24  ;;  %v14788_v55 = vadd.f32 %v11490_v54, %v4079_v23  ;;  %v20173_v23 = vld [vmem:[#allocation31_spill] sm:$0xff] }
 0x353   :  { %20163 = vst [vmem:[#allocation115_spill] sm:$0xff] %v14773_v63  ;;  %v4559_v22 = vadd.f32 %v4558_v26, %v14769_v15  ;;  %v14791_v26 = vpop.f32.mrf.mxu1  ;;  %v14795_v46 = vadd.f32 %v11491_v33, %v4080_v17 }
 0x354   :  { %v4327_v59 = vpop.f32.mrf.mxu0  ;;  %20169 = vst [vmem:[#allocation89_spill] sm:$0xff] %v14788_v55 }
 0x355   :  { %v4560_v12 = vadd.f32 %v4559_v22, %v14773_v63  ;;  %v14783_v53 = vadd.f32 %v4327_v59, %v4078_v41  ;;  %20171 = vst [vmem:[#allocation90_spill] sm:$0xff] %v14795_v46  ;;  %v4082_v59 = vadd.f32 %v14612_v5, %v3664_v31  ;;  %v14802_v54 = vpop.f32.mrf.mxu1  ;;  %v4084_v5 = vadd.f32 %v14598_v6, %v20177_v7  ;;  %v20178_v31 = vld [vmem:[#allocation51_spill] sm:$0xff]  ;;  %v20184_v7 = vld [vmem:[#allocation33_spill] sm:$0xff] }
 0x356   :  { %v11494_v47 = vpop.f32.mrf.mxu0 }
 0x357   :  { %20167 = vst [vmem:[#allocation77_spill] sm:$0xff] %v14783_v53  ;;  %v4561_v20 = vadd.f32 %v4560_v12, %v14783_v53  ;;  %v20174_v12 = vld [vmem:[#allocation26_spill] sm:$0xff] }
 0x358   :  { %v4340_v21 = vpop.f32.mrf.mxu0  ;;  %v3250_v48 = vadd.f32 %v20174_v12, %v20173_v23  ;;  %v20175_v53 = vld [vmem:[#allocation54_spill] sm:$0xff]  ;;  %v20180_v12 = vld [vmem:[#allocation57_spill] sm:$0xff] }
 0x359   :  { %v4562_v41 = vadd.f32 %v4561_v20, %v14788_v55  ;;  %v14799_v9 = vadd.f32 %v4340_v21, %v4081_v60  ;;  %v4083_v3 = vadd.f32 %v14588_v19, %v20175_v53  ;;  %v4085_v19 = vadd.f32 %v14636_v32, %v20180_v12  ;;  %v20187_v12 = vld [vmem:[#allocation61_spill] sm:$0xff] }
 0x35a   :  { %v11495_v22 = vpop.f32.mrf.mxu0  ;;  %v3668_v21 = vadd.f32 %v20178_v31, %v3250_v48  ;;  %v20220_v55 = vld [vmem:[#allocation41_spill] sm:$0xff] }
 0x35b   :  { %20172 = vst [vmem:[#allocation79_spill] sm:$0xff] %v14799_v9  ;;  %v4563_v27 = vadd.f32 %v4562_v41, %v14795_v46  ;;  %v14814_v60 = vadd.f32 %v11494_v47, %v4083_v3  ;;  %v14817_v46 = vpop.f32.mrf.mxu1  ;;  %v14821_v53 = vadd.f32 %v11495_v22, %v4084_v5 }
 0x35c   :  { %v4343_v24 = vpop.f32.mrf.mxu0 }
 0x35d   :  { %v4564_v33 = vadd.f32 %v4563_v27, %v14799_v9  ;;  %v14809_v17 = vadd.f32 %v4343_v24, %v4082_v59  ;;  %20179 = vst [vmem:[#allocation91_spill] sm:$0xff] %v14814_v60  ;;  %20181 = vst [vmem:[#allocation18_spill] sm:$0xff] %v14821_v53  ;;  %v4086_v24 = vadd.f32 %v14660_v62, %v3668_v21  ;;  %v14828_v48 = vpop.f32.mrf.mxu1  ;;  %v20188_v21 = vld [vmem:[#allocation64_spill] sm:$0xff] }
 0x35e   :  { %v11498_v20 = vpop.f32.mrf.mxu0  ;;  %v4088_v62 = vadd.f32 %v14648_v16, %v20187_v12 }
 0x35f   :  { %20176 = vst [vmem:[#allocation118_spill] sm:$0xff] %v14809_v17  ;;  %v4565_v41 = vadd.f32 %v4564_v33, %v14809_v17  ;;  %v20183_v33 = vld [vmem:[#allocation125_spill] sm:$0xff]  ;;  %v20185_v17 = vld [vmem:[#allocation58_spill] sm:$0xff] }
 0x360   :  { %v4356_v23 = vpop.f32.mrf.mxu0  ;;  %v3254_v31 = vadd.f32 %v20184_v7, %v20183_v33  ;;  %v4087_v32 = vadd.f32 %v14624_v56, %v20185_v17  ;;  %v20190_v33 = vld [vmem:[#allocation65_spill] sm:$0xff] }
 0x361   :  { %v4566_v59 = vadd.f32 %v4565_v41, %v14814_v60  ;;  %v14825_v6 = vadd.f32 %v4356_v23, %v4085_v19  ;;  %v4089_v7 = vadd.f32 %v14687_v0, %v20190_v33  ;;  %v20197_v33 = vld [vmem:[#allocation55_spill] sm:$0xff] }
 0x362   :  { %v11499_v27 = vpop.f32.mrf.mxu0  ;;  %v3672_v23 = vadd.f32 %v20188_v21, %v3254_v31  ;;  %v14840_v19 = vadd.f32 %v11498_v20, %v4087_v32  ;;  %v20193_v32 = vld [vmem:[#allocation34_spill] sm:$0xff]  ;;  %v20195_v21 = vld [vmem:[#allocation53_spill] sm:$0xff] }
 0x363   :  { %20182 = vst [vmem:[#allocation92_spill] sm:$0xff] %v14825_v6  ;;  %v4567_v47 = vadd.f32 %v4566_v59, %v14821_v53  ;;  %v4002_v53 = vpop.f32.mrf.mxu1  ;;  %v14845_v56 = vadd.f32 %v11499_v27, %v4088_v62  ;;  %v4091_v0 = vadd.f32 %v14672_v43, %v20195_v21 }
 0x364   :  { %v4359_v3 = vpop.f32.mrf.mxu0  ;;  %20189 = vst [vmem:[#allocation82_spill] sm:$0xff] %v14840_v19 }
 0x365   :  { %v4568_v22 = vadd.f32 %v4567_v47, %v14825_v6  ;;  %v14835_v5 = vadd.f32 %v4359_v3, %v4086_v24  ;;  %20191 = vst [vmem:[#allocation21_spill] sm:$0xff] %v14845_v56  ;;  %v4090_v47 = vadd.f32 %v14713_v61, %v3672_v23  ;;  %v14852_v20 = vpop.f32.mrf.mxu1  ;;  %v4092_v61 = vadd.f32 %v14698_v34, %v20197_v33  ;;  %v20204_v33 = vld [vmem:[#allocation67_spill] sm:$0xff] }
 0x366   :  { %v11502_v41 = vpop.f32.mrf.mxu0 }
 0x367   :  { %20186 = vst [vmem:[#allocation19_spill] sm:$0xff] %v14835_v5  ;;  %v4569_v59 = vadd.f32 %v4568_v22, %v14835_v5  ;;  %v20194_v22 = vld [vmem:[#allocation32_spill] sm:$0xff]  ;;  %v14864_v23 = vadd.f32 %v11502_v41, %v4091_v0  ;;  %v20203_v0 = vld [vmem:[#allocation37_spill] sm:$0xff] }
 0x368   :  { %v4372_v60 = vpop.f32.mrf.mxu0  ;;  %v3258_v12 = vadd.f32 %v20194_v22, %v20193_v32  ;;  %v20199_v32 = vld [vmem:[#allocation66_spill] sm:$0xff] }
 0x369   :  { %v4570_v17 = vadd.f32 %v4569_v59, %v14840_v19  ;;  %v14849_v3 = vadd.f32 %v4372_v60, %v4089_v7  ;;  %20198 = vst [vmem:[#allocation17_spill] sm:$0xff] %v14864_v23  ;;  %v4093_v22 = vadd.f32 %v14739_v42, %v20199_v32  ;;  %v4095_v42 = vadd.f32 %v14724_v10, %v20204_v33  ;;  %v20205_v32 = vld [vmem:[#allocation104_spill] sm:$0xff]  ;;  %v20218_v19 = vld [vmem:[#allocation78_spill] sm:$0xff] }
 0x36a   :  { %v11503_v24 = vpop.f32.mrf.mxu0  ;;  %v3676_v60 = vadd.f32 %v14530_v4, %v3258_v12  ;;  %v20202_v12 = vld [vmem:[#allocation126_spill] sm:$0xff] }
 0x36b   :  { %20192 = vst [vmem:[#allocation93_spill] sm:$0xff] %v14849_v3  ;;  %v4571_v16 = vadd.f32 %v4570_v17, %v14845_v56  ;;  %v4005_v17 = vpop.f32.mrf.mxu1  ;;  %v14869_v43 = vadd.f32 %v11503_v24, %v4092_v61 }
 0x36c   :  { %v4375_v31 = vpop.f32.mrf.mxu0 }
 0x36d   :  { %v4572_v27 = vadd.f32 %v4571_v16, %v14849_v3  ;;  %v14859_v62 = vadd.f32 %v4375_v31, %v4090_v47  ;;  %20200 = vst [vmem:[#allocation95_spill] sm:$0xff] %v14869_v43  ;;  %v4094_v31 = vadd.f32 %v14765_v28, %v3676_v60  ;;  %v14876_v34 = vpop.f32.mrf.mxu1  ;;  %v4096_v28 = vadd.f32 %v14750_v39, %v20205_v32  ;;  %v20209_v32 = vld [vmem:[#allocation105_spill] sm:$0xff] }
 0x36e   :  { %v11506_v59 = vpop.f32.mrf.mxu0 }
 0x36f   :  { %20196 = vst [vmem:[#allocation94_spill] sm:$0xff] %v14859_v62  ;;  %v4573_v7 = vadd.f32 %v4572_v27, %v14859_v62  ;;  %v3262_v27 = vadd.f32 %v20203_v0, %v20202_v12  ;;  %v14888_v60 = vadd.f32 %v11506_v59, %v4095_v42  ;;  %v20206_v12 = vld [vmem:[#allocation59_spill] sm:$0xff] }
 0x370   :  { %v4388_v56 = vpop.f32.mrf.mxu0  ;;  %v4097_v0 = vadd.f32 %v14791_v26, %v20206_v12  ;;  %v20208_v42 = vld [vmem:[#allocation39_spill] sm:$0xff] }
 0x371   :  { %v4574_v47 = vadd.f32 %v4573_v7, %v14864_v23  ;;  %v14873_v21 = vadd.f32 %v4388_v56, %v4093_v22  ;;  %v3680_v56 = vadd.f32 %v14545_v11, %v3262_v27  ;;  %v20207_v27 = vld [vmem:[#allocation36_spill] sm:$0xff] }
 0x372   :  { %v11507_v16 = vpop.f32.mrf.mxu0 }
 0x373   :  { %20201 = vst [vmem:[#allocation134_spill] sm:$0xff] %v14873_v21  ;;  %v4575_v4 = vadd.f32 %v4574_v47, %v14869_v43  ;;  %v4018_v47 = vpop.f32.mrf.mxu1  ;;  %v14893_v10 = vadd.f32 %v11507_v16, %v4096_v28 }
 0x374   :  { %v4391_v41 = vpop.f32.mrf.mxu0  ;;  %v4105_v5 = vadd.f32 %v4018_v47, %v20218_v19  ;;  %v20223_v19 = vld [vmem:[#allocation110_spill] sm:$0xff] }
 0x375   :  { %v4576_v24 = vadd.f32 %v4575_v4, %v14873_v21  ;;  %v14883_v61 = vadd.f32 %v4391_v41, %v4094_v31  ;;  %v4098_v41 = vadd.f32 %v14817_v46, %v3680_v56  ;;  %v11439_v39 = vpop.f32.mrf.mxu1  ;;  %v4099_v21 = vadd.f32 %v14776_v18, %v20209_v32 }
 0x376   :  { %v11510_v7 = vpop.f32.mrf.mxu0 }
 0x377   :  { %v4577_v22 = vadd.f32 %v4576_v24, %v14883_v61  ;;  %v3266_v24 = vadd.f32 %v20208_v42, %v20207_v27  ;;  %v14910_v12 = vadd.f32 %v11510_v7, %v4099_v21  ;;  %v20212_v27 = vld [vmem:[#allocation72_spill] sm:$0xff]  ;;  %v20213_v21 = vld [vmem:[#allocation127_spill] sm:$0xff] }
 0x378   :  { %v4404_v43 = vpop.f32.mrf.mxu0  ;;  %v4101_v42 = vadd.f32 %v4002_v53, %v20212_v27  ;;  %v20214_v7 = vld [vmem:[#allocation128_spill] sm:$0xff] }
 0x379   :  { %v4578_v31 = vadd.f32 %v4577_v22, %v14888_v60  ;;  %v14897_v33 = vadd.f32 %v4404_v43, %v4097_v0  ;;  %v20210_v22 = vld [vmem:[#allocation70_spill] sm:$0xff]  ;;  %v20211_v43 = vld [vmem:[#allocation63_spill] sm:$0xff]  ;;  %v20216_v27 = vld [vmem:[#allocation76_spill] sm:$0xff] }
 0x37a   :  { %v11511_v4 = vpop.f32.mrf.mxu0  ;;  %v4100_v46 = vadd.f32 %v14802_v54, %v20210_v22  ;;  %v3684_v56 = vadd.f32 %v20211_v43, %v3266_v24  ;;  %v3270_v22 = vadd.f32 %v20214_v7, %v20213_v21 }
 0x37b   :  { %v4579_v11 = vadd.f32 %v4578_v31, %v14893_v10  ;;  %v4021_v31 = vpop.f32.mrf.mxu1 }
 0x37c   :  { %v4407_v59 = vpop.f32.mrf.mxu0  ;;  %v14914_v62 = vadd.f32 %v11511_v4, %v4100_v46 }
 0x37d   :  { %v4580_v26 = vadd.f32 %v4579_v11, %v14897_v33  ;;  %v14905_v16 = vadd.f32 %v4407_v59, %v4098_v41  ;;  %v4102_v11 = vadd.f32 %v4005_v17, %v3684_v56  ;;  %v11442_v32 = vpop.f32.mrf.mxu1  ;;  %v20217_v17 = vld [vmem:[#allocation80_spill] sm:$0xff] }
 0x37e   :  { %v11514_v28 = vpop.f32.mrf.mxu0 }
 0x37f   :  { %v4581_v0 = vadd.f32 %v4580_v26, %v14905_v16  ;;  %v20215_v26 = vld [vmem:[#allocation69_spill] sm:$0xff] }
 0x380   :  { %v4420_v23 = vpop.f32.mrf.mxu0  ;;  %v4103_v43 = vadd.f32 %v14828_v48, %v20215_v26 }
 0x381   :  { %v4582_v18 = vadd.f32 %v4581_v0, %v14910_v12  ;;  %v14917_v59 = vadd.f32 %v4420_v23, %v4101_v42  ;;  %v4104_v0 = vadd.f32 %v14852_v20, %v20216_v27  ;;  %v3688_v23 = vadd.f32 %v20217_v17, %v3270_v22  ;;  %v20221_v20 = vld [vmem:[#allocation75_spill] sm:$0xff]  ;;  %v20222_v27 = vld [vmem:[#allocation106_spill] sm:$0xff] }
 0x382   :  { %v11515_v41 = vpop.f32.mrf.mxu0  ;;  %v4521_v56 = vadd.f32 %v11514_v28, %v4103_v43  ;;  %v4107_v22 = vadd.f32 %v14876_v34, %v20221_v20  ;;  %v4108_v17 = vadd.f32 %v11439_v39, %v20222_v27  ;;  %v20226_v39 = vld [vmem:[#allocation68_spill] sm:$0xff] }
 0x383   :  { %v4583_v54 = vadd.f32 %v4582_v18, %v14914_v62  ;;  %v4034_v18 = vpop.f32.mrf.mxu1  ;;  %v4522_v6 = vadd.f32 %v11515_v41, %v4104_v0  ;;  %v4106_v9 = vadd.f32 %v4021_v31, %v3688_v23 }
 0x384   :  { %v4423_v24 = vpop.f32.mrf.mxu0 }
 0x385   :  { %v4584_v53 = vadd.f32 %v4583_v54, %v14917_v59  ;;  %v4520_v4 = vadd.f32 %v4423_v24, %v4102_v11  ;;  %v11443_v54 = vpop.f32.mrf.mxu1  ;;  %v20219_v24 = vld [vmem:[#allocation129_spill] sm:$0xff] }
 0x386   :  { %v11518_v46 = vpop.f32.mrf.mxu0  ;;  %v3274_v63 = vadd.f32 %v20220_v55, %v20219_v24  ;;  %v4112_v27 = vadd.f32 %v11443_v54, %v20226_v39 }
 0x387   :  { %v4585_v42 = vadd.f32 %v4584_v53, %v4520_v4  ;;  %v4525_v41 = vadd.f32 %v11518_v46, %v4107_v22  ;;  %v4037_v31 = vpop.f32.mrf.mxu1 }
 0x388   :  { %v4436_v3 = vpop.f32.mrf.mxu0  ;;  %v3692_v47 = vadd.f32 %v20223_v19, %v3274_v63 }
 0x389   :  { %v4586_v21 = vadd.f32 %v4585_v42, %v4521_v56  ;;  %v4523_v48 = vadd.f32 %v4436_v3, %v4105_v5  ;;  %v20224_v3 = vld [vmem:[#allocation81_spill] sm:$0xff] }
 0x38a   :  { %v11519_v7 = vpop.f32.mrf.mxu0  ;;  %v4109_v23 = vadd.f32 %v4034_v18, %v20224_v3  ;;  %v4110_v55 = vadd.f32 %v4037_v31, %v3692_v47  ;;  %v20232_v3 = vld [vmem:[#allocation83_spill] sm:$0xff] }
 0x38b   :  { %v4587_v26 = vadd.f32 %v4586_v21, %v4522_v6  ;;  %v4526_v42 = vadd.f32 %v11519_v7, %v4108_v17 }
 0x38c   :  { %v4439_v11 = vpop.f32.mrf.mxu0 }
 0x38d   :  { %v4588_v28 = vadd.f32 %v4587_v26, %v4523_v48  ;;  %v4524_v43 = vadd.f32 %v4439_v11, %v4106_v9  ;;  %v20225_v26 = vld [vmem:[#allocation117_spill] sm:$0xff] }
 0x38e   :  { %v11522_v53 = vpop.f32.mrf.mxu0  ;;  %v4111_v9 = vadd.f32 %v11442_v32, %v20225_v26 }
 0x38f   :  { %v4589_v0 = vadd.f32 %v4588_v28, %v4524_v43 }
 0x390   :  { %v4452_v5 = vpop.f32.mrf.mxu0  ;;  %v4529_v63 = vadd.f32 %v11522_v53, %v4111_v9 }
 0x391   :  { %v4590_v21 = vadd.f32 %v4589_v0, %v4525_v41  ;;  %v4527_v24 = vadd.f32 %v4452_v5, %v4109_v23 }
 0x392   :  { %v11523_v15 = vpop.f32.mrf.mxu0 }
 0x393   :  { %v4591_v14 = vadd.f32 %v4590_v21, %v4526_v42  ;;  %v4530_v22 = vadd.f32 %v11523_v15, %v4112_v27  ;;  %v20233_v27 = vld [vmem:[#allocation84_spill] sm:$0xff] }
 0x394   :  { %v4455_v34 = vpop.f32.mrf.mxu0 }
 0x395   :  { %v4592_v11 = vadd.f32 %v4591_v14, %v4527_v24  ;;  %v4528_v20 = vadd.f32 %v4455_v34, %v4110_v55 }
 0x397   :  { %v4593_v46 = vadd.f32 %v4592_v11, %v4528_v20 }
 0x399   :  { %v4594_v28 = vadd.f32 %v4593_v46, %v4529_v63 }
 0x39b   :  { %v4595_v19 = vadd.f32 %v4594_v28, %v4530_v22 }
 0x39d   :  { %v4596_v49 = vrot.slane %v4595_v19, 4 }
 0x39f   :  { %v4597_v18 = vadd.f32 %v4596_v49, %v4595_v19 }
 0x3a1   :  { %v4598_v7 = vrot.slane %v4597_v18, 2 }
 0x3a3   :  { %v4599_v17 = vadd.f32 %v4598_v7, %v4597_v18 }
 0x3a5   :  { %v4600_v0 = vrot.slane %v4599_v17, 1 }
 0x3a7   :  { %v4601_v47 = vadd.f32 %v4600_v0, %v4599_v17 }
 0x3a9   :  { %v14938_v31 = vmul.f32 0.001953125, %v4601_v47 }
 0x3ab   :  { %v14942_v32 = vsub.f32 %v14883_v61, %v14938_v31  ;;  %v14946_v14 = vsub.f32 %v14888_v60, %v14938_v31  ;;  %v14950_v15 = vsub.f32 %v14893_v10, %v14938_v31  ;;  %v14954_v49 = vsub.f32 %v14897_v33, %v14938_v31 }
 0x3ac   :  { %v14958_v54 = vsub.f32 %v14905_v16, %v14938_v31  ;;  %v14962_v61 = vsub.f32 %v14910_v12, %v14938_v31  ;;  %v14966_v60 = vsub.f32 %v14914_v62, %v14938_v31  ;;  %v14970_v10 = vsub.f32 %v14917_v59, %v14938_v31 }
 0x3ad   :  { %v14973_v53 = vsub.f32 %v4520_v4, %v14938_v31  ;;  %v14976_v33 = vsub.f32 %v4521_v56, %v14938_v31  ;;  %v14979_v16 = vsub.f32 %v4522_v6, %v14938_v31  ;;  %v14982_v12 = vsub.f32 %v4523_v48, %v14938_v31 }
 0x3ae   :  { %v14985_v5 = vsub.f32 %v4524_v43, %v14938_v31  ;;  %v14988_v62 = vsub.f32 %v4525_v41, %v14938_v31  ;;  %v14991_v59 = vsub.f32 %v4526_v42, %v14938_v31  ;;  %v14994_v4 = vsub.f32 %v4527_v24, %v14938_v31 }
 0x3af   :  { %v14997_v56 = vsub.f32 %v4528_v20, %v14938_v31  ;;  %v15000_v6 = vsub.f32 %v4529_v63, %v14938_v31  ;;  %v15003_v48 = vsub.f32 %v4530_v22, %v14938_v31  ;;  %v15007_v43 = vsub.f32 %v14602_v29, %v14938_v31  ;;  %v20234_v22 = vld [vmem:[#allocation111_spill] sm:$0xff] }
 0x3b0   :  { %20227 = vst [vmem:[#allocation20_spill] sm:$0xff] %v14985_v5  ;;  %20228 = vst [vmem:[#allocation97_spill] sm:$0xff] %v14988_v62  ;;  %v15011_v41 = vsub.f32 %v14604_v52, %v14938_v31  ;;  %v15015_v23 = vsub.f32 %v20232_v3, %v14938_v31  ;;  %v15023_v55 = vsub.f32 %v14616_v8, %v14938_v31 }
 0x3b1   :  { %20229 = vst [vmem:[#allocation98_spill] sm:$0xff] %v14991_v59  ;;  %20230 = vst [vmem:[#allocation99_spill] sm:$0xff] %v14994_v4  ;;  %v4668_v42 = vmul.f32 %v15007_v43, %v15007_v43  ;;  %v15027_v29 = vsub.f32 %v14621_v37, %v14938_v31  ;;  %v15033_v34 = vsub.f32 %v14629_v13, %v14938_v31 }
 0x3b2   :  { %20231 = vst [vmem:[#allocation100_spill] sm:$0xff] %v15000_v6  ;;  %v4669_v21 = vmul.f32 %v15011_v41, %v15011_v41  ;;  %v4670_v52 = vmul.f32 %v15015_v23, %v15015_v23  ;;  %v4671_v26 = vmul.f32 %v15023_v55, %v15023_v55  ;;  %v15039_v8 = vsub.f32 %v14633_v44, %v14938_v31 }
 0x3b3   :  { %v4672_v37 = vmul.f32 %v15027_v29, %v15027_v29  ;;  %v15045_v20 = vsub.f32 %v14640_v2, %v14938_v31  ;;  %v4673_v13 = vmul.f32 %v15033_v34, %v15033_v34  ;;  %v15051_v63 = vsub.f32 %v20233_v27, %v14938_v31 }
 0x3b4   :  { %v4732_v24 = vadd.f32 %v4669_v21, %v4668_v42  ;;  %v4674_v44 = vmul.f32 %v15039_v8, %v15039_v8  ;;  %v15057_v28 = vsub.f32 %v20234_v22, %v14938_v31  ;;  %v15063_v18 = vsub.f32 %v14657_v45, %v14938_v31 }
 0x3b5   :  { %v4675_v2 = vmul.f32 %v15045_v20, %v15045_v20  ;;  %v4676_v7 = vmul.f32 %v15051_v63, %v15051_v63  ;;  %v15069_v0 = vsub.f32 %v14664_v36, %v14938_v31  ;;  %v15075_v42 = vsub.f32 %v14669_v25, %v14938_v31 }
 0x3b6   :  { %v4733_v9 = vadd.f32 %v4732_v24, %v4670_v52  ;;  %v4677_v47 = vmul.f32 %v15057_v28, %v15057_v28  ;;  %v4678_v45 = vmul.f32 %v15063_v18, %v15063_v18  ;;  %v20235_v52 = vld [vmem:[#allocation71_spill] sm:$0xff]  ;;  %v15099_v27 = vsub.f32 %v14695_v50, %v14938_v31 }
 0x3b7   :  { %v15081_v24 = vsub.f32 %v20235_v52, %v14938_v31  ;;  %v4679_v36 = vmul.f32 %v15069_v0, %v15069_v0  ;;  %v4680_v25 = vmul.f32 %v15075_v42, %v15075_v42  ;;  %v15129_v52 = vsub.f32 %v14731_v30, %v14938_v31 }
 0x3b8   :  { %v4734_v11 = vadd.f32 %v4733_v9, %v4671_v26  ;;  %v15087_v9 = vsub.f32 %v14684_v35, %v14938_v31  ;;  %v4684_v50 = vmul.f32 %v15099_v27, %v15099_v27 }
 0x3b9   :  { %v4689_v30 = vmul.f32 %v15129_v52, %v15129_v52 }
 0x3ba   :  { %v4735_v39 = vadd.f32 %v4734_v11, %v4672_v37  ;;  %v15093_v11 = vsub.f32 %v14691_v38, %v14938_v31  ;;  %v4682_v35 = vmul.f32 %v15087_v9, %v15087_v9 }
 0x3bc   :  { %v4736_v46 = vadd.f32 %v4735_v39, %v4673_v13  ;;  %v4681_v13 = vmul.f32 %v15081_v24, %v15081_v24  ;;  %v4683_v38 = vmul.f32 %v15093_v11, %v15093_v11 }
 0x3be   :  { %v4737_v19 = vadd.f32 %v4736_v46, %v4674_v44  ;;  %v20236_v46 = vld [vmem:[#allocation85_spill] sm:$0xff] }
 0x3bf   :  { %v15105_v22 = vsub.f32 %v20236_v46, %v14938_v31  ;;  %v20238_v46 = vld [vmem:[#allocation114_spill] sm:$0xff] }
 0x3c0   :  { %v4738_v17 = vadd.f32 %v4737_v19, %v4675_v2  ;;  %v15111_v19 = vsub.f32 %v14710_v58, %v14938_v31 }
 0x3c2   :  { %v4739_v3 = vadd.f32 %v4738_v17, %v4676_v7  ;;  %v15117_v17 = vsub.f32 %v14717_v57, %v14938_v31  ;;  %v4686_v58 = vmul.f32 %v15111_v19, %v15111_v19 }
 0x3c4   :  { %v4740_v21 = vadd.f32 %v4739_v3, %v4677_v47  ;;  %v4685_v47 = vmul.f32 %v15105_v22, %v15105_v22  ;;  %v4687_v57 = vmul.f32 %v15117_v17, %v15117_v17 }
 0x3c6   :  { %v4741_v26 = vadd.f32 %v4740_v21, %v4678_v45  ;;  %v15123_v45 = vsub.f32 %v14721_v40, %v14938_v31 }
 0x3c8   :  { %v4742_v37 = vadd.f32 %v4741_v26, %v4679_v36  ;;  %v15135_v26 = vsub.f32 %v14736_v51, %v14938_v31  ;;  %v4688_v40 = vmul.f32 %v15123_v45, %v15123_v45 }
 0x3ca   :  { %v4743_v39 = vadd.f32 %v4742_v37, %v4680_v25  ;;  %v15141_v37 = vsub.f32 %v14743_v1, %v14938_v31  ;;  %v4690_v51 = vmul.f32 %v15135_v26, %v15135_v26 }
 0x3cc   :  { %v4744_v44 = vadd.f32 %v4743_v39, %v4681_v13  ;;  %v20237_v39 = vld [vmem:[#allocation86_spill] sm:$0xff]  ;;  %v4691_v1 = vmul.f32 %v15141_v37, %v15141_v37 }
 0x3ce   :  { %v4745_v2 = vadd.f32 %v4744_v44, %v4682_v35  ;;  %v15147_v35 = vsub.f32 %v20237_v39, %v14938_v31  ;;  %v20244_v39 = vld [vmem:[#allocation77_spill] sm:$0xff] }
 0x3d0   :  { %v4746_v7 = vadd.f32 %v4745_v2, %v4683_v38  ;;  %v15153_v38 = vsub.f32 %v20238_v46, %v14938_v31 }
 0x3d2   :  { %v4747_v3 = vadd.f32 %v4746_v7, %v4684_v50  ;;  %v20239_v50 = vld [vmem:[#allocation87_spill] sm:$0xff] }
 0x3d3   :  { %v15159_v7 = vsub.f32 %v20239_v50, %v14938_v31 }
 0x3d4   :  { %v4748_v21 = vadd.f32 %v4747_v3, %v4685_v47  ;;  %v4692_v47 = vmul.f32 %v15147_v35, %v15147_v35 }
 0x3d6   :  { %v4749_v36 = vadd.f32 %v4748_v21, %v4686_v58  ;;  %v20240_v58 = vld [vmem:[#allocation88_spill] sm:$0xff] }
 0x3d7   :  { %v15165_v21 = vsub.f32 %v20240_v58, %v14938_v31  ;;  %v20248_v58 = vld [vmem:[#allocation90_spill] sm:$0xff] }
 0x3d8   :  { %v4750_v25 = vadd.f32 %v4749_v36, %v4687_v57  ;;  %v4693_v57 = vmul.f32 %v15153_v38, %v15153_v38 }
 0x3d9   :  { %20241 = vst [vmem:[#allocation101_spill] sm:$0xff] %v15165_v21 }
 0x3da   :  { %v4751_v13 = vadd.f32 %v4750_v25, %v4688_v40  ;;  %v20242_v40 = vld [vmem:[#allocation115_spill] sm:$0xff] }
 0x3db   :  { %v15171_v25 = vsub.f32 %v20242_v40, %v14938_v31 }
 0x3dc   :  { %v4752_v44 = vadd.f32 %v4751_v13, %v4689_v30  ;;  %v4694_v30 = vmul.f32 %v15159_v7, %v15159_v7 }
 0x3dd   :  { %20243 = vst [vmem:[#allocation102_spill] sm:$0xff] %v15171_v25 }
 0x3de   :  { %v4753_v2 = vadd.f32 %v4752_v44, %v4690_v51  ;;  %v15177_v51 = vsub.f32 %v20244_v39, %v14938_v31  ;;  %v4695_v44 = vmul.f32 %v15165_v21, %v15165_v21  ;;  %v20250_v39 = vld [vmem:[#allocation79_spill] sm:$0xff] }
 0x3e0   :  { %v4754_v3 = vadd.f32 %v4753_v2, %v4691_v1  ;;  %20245 = vst [vmem:[#allocation103_spill] sm:$0xff] %v15177_v51  ;;  %v12325_v1 = vld [vmem:[#allocation8 + $0x78] sm:$0xff]   ;;  %v20246_v2 = vld [vmem:[#allocation89_spill] sm:$0xff] }
 0x3e1   :  { %v15183_v50 = vsub.f32 %v20246_v2, %v14938_v31  ;;  %11524 = vmatprep.subr.bf16.mxu1 %v12325_v1  ;;  %v15195_v2 = vsub.f32 %v20250_v39, %v14938_v31  ;;  %v20254_v39 = vld [vmem:[#allocation91_spill] sm:$0xff] }
 0x3e2   :  { %v4755_v36 = vadd.f32 %v4754_v3, %v4692_v47  ;;  %v4696_v47 = vmul.f32 %v15171_v25, %v15171_v25  ;;  %11525 = vmatpush3.bf16.msra.mxu1 %v12325_v1  ;;  %v15207_v21 = vsub.f32 %v20254_v39, %v14938_v31  ;;  %v20258_v39 = vld [vmem:[#allocation92_spill] sm:$0xff] }
 0x3e3   :  { %20247 = vst [vmem:[#allocation23_spill] sm:$0xff] %v15183_v50  ;;  %20251 = vst [vmem:[#allocation119_spill] sm:$0xff] %v15195_v2  ;;  %v4698_v25 = vmul.f32 %v15183_v50, %v15183_v50  ;;  %v15219_v50 = vsub.f32 %v20258_v39, %v14938_v31  ;;  %v20262_v39 = vld [vmem:[#allocation82_spill] sm:$0xff] }
 0x3e4   :  { %v4756_v13 = vadd.f32 %v4755_v36, %v4693_v57  ;;  %v15189_v57 = vsub.f32 %v20248_v58, %v14938_v31  ;;  %v4697_v36 = vmul.f32 %v15177_v51, %v15177_v51  ;;  %v12327_v58 = vld [vmem:[#allocation8 + $0x68] sm:$0xff]   ;;  %v12333_v51 = vld [vmem:[#allocation8 + $0x30] sm:$0xff]   ;;  %20255 = vst [vmem:[#allocation62_spill] sm:$0xff] %v15207_v21 }
 0x3e5   :  { %20259 = vst [vmem:[#allocation109_spill] sm:$0xff] %v15219_v50 }
 0x3e6   :  { %v4757_v46 = vadd.f32 %v4756_v13, %v4694_v30  ;;  %20249 = vst [vmem:[#allocation22_spill] sm:$0xff] %v15189_v57  ;;  %v12326_v30 = vld [vmem:[#allocation8 + $0x70] sm:$0xff]   ;;  %v12332_v13 = vld [vmem:[#allocation8 + $0x38] sm:$0xff]  }
 0x3e7   :  { %11526 = vmatprep.subr.bf16.mxu1 %v12326_v30  ;;  %11604 = vmatprep.subr.bf16.mxu0 %v12332_v13 }
 0x3e8   :  { %v4758_v3 = vadd.f32 %v4757_v46, %v4695_v44  ;;  %11527 = vmatpush3.bf16.msra.mxu1 %v12326_v30  ;;  %11605 = vmatpush3.bf16.msra.mxu0 %v12332_v13  ;;  %v20252_v46 = vld [vmem:[#allocation118_spill] sm:$0xff] }
 0x3e9   :  { %v15201_v1 = vsub.f32 %v20252_v46, %v14938_v31  ;;  %11528 = vmatprep.subr.bf16.mxu1 %v12327_v58  ;;  %11606 = vmatprep.subr.bf16.mxu0 %v12333_v51  ;;  %v20256_v30 = vld [vmem:[#allocation18_spill] sm:$0xff]  ;;  %v12328_v46 = vld [vmem:[#allocation8 + $0x60] sm:$0xff]  }
 0x3ea   :  { %v4759_v40 = vadd.f32 %v4758_v3, %v4696_v47  ;;  %v4699_v47 = vmul.f32 %v15189_v57, %v15189_v57  ;;  %v15213_v13 = vsub.f32 %v20256_v30, %v14938_v31  ;;  %v12334_v57 = vld [vmem:[#allocation8 + $0x28] sm:$0xff]   ;;  %v12329_v30 = vld [vmem:[#allocation8 + $0x58] sm:$0xff]  }
 0x3eb   :  { %20253 = vst [vmem:[#allocation60_spill] sm:$0xff] %v15201_v1 }
 0x3ec   :  { %v4760_v44 = vadd.f32 %v4759_v40, %v4697_v36  ;;  %v4700_v36 = vmul.f32 %v15195_v2, %v15195_v2  ;;  %11529 = vmatpush3.bf16.msra.mxu1 %v12327_v58  ;;  %11607 = vmatpush3.bf16.msra.mxu0 %v12333_v51  ;;  %20257 = vst [vmem:[#allocation108_spill] sm:$0xff] %v15213_v13  ;;  %v20260_v51 = vld [vmem:[#allocation19_spill] sm:$0xff] }
 0x3ed   :  { %11530 = vmatprep.subr.bf16.mxu1 %v12328_v46  ;;  %11608 = vmatprep.subr.bf16.mxu0 %v12334_v57  ;;  %v15225_v58 = vsub.f32 %v20260_v51, %v14938_v31  ;;  %v15231_v2 = vsub.f32 %v20262_v39, %v14938_v31  ;;  %v12330_v51 = vld [vmem:[#allocation8 + $0x50] sm:$0xff]  }
 0x3ee   :  { %v4761_v3 = vadd.f32 %v4760_v44, %v4698_v25  ;;  %v4701_v25 = vmul.f32 %v15201_v1, %v15201_v1  ;;  %v12336_v1 = vld [vmem:[#allocation8 + $0x20] sm:$0xff]   ;;  %v20266_v39 = vld [vmem:[#allocation93_spill] sm:$0xff] }
 0x3ef   :  { %20261 = vst [vmem:[#allocation112_spill] sm:$0xff] %v15225_v58  ;;  %20263 = vst [vmem:[#allocation113_spill] sm:$0xff] %v15231_v2 }
 0x3f0   :  { %v4762_v40 = vadd.f32 %v4761_v3, %v4699_v47  ;;  %v4702_v47 = vmul.f32 %v15207_v21, %v15207_v21  ;;  %11531 = vmatpush3.bf16.msra.mxu1 %v12328_v46  ;;  %11609 = vmatpush3.bf16.msra.mxu0 %v12334_v57  ;;  %v20264_v57 = vld [vmem:[#allocation21_spill] sm:$0xff]  ;;  %v15243_v21 = vsub.f32 %v20266_v39, %v14938_v31 }
 0x3f1   :  { %11532 = vmatprep.subr.bf16.mxu1 %v12329_v30  ;;  %11610 = vmatprep.subr.bf16.mxu0 %v12336_v1  ;;  %v15237_v46 = vsub.f32 %v20264_v57, %v14938_v31  ;;  %v12331_v57 = vld [vmem:[#allocation8 + $0x48] sm:$0xff]   ;;  %v20268_v39 = vld [vmem:[#allocation17_spill] sm:$0xff] }
 0x3f2   :  { %v4763_v44 = vadd.f32 %v4762_v40, %v4700_v36  ;;  %v4703_v36 = vmul.f32 %v15213_v13, %v15213_v13  ;;  %v12337_v13 = vld [vmem:[#allocation8 + $0x18] sm:$0xff]  }
 0x3f3   :  { %20265 = vst [vmem:[#allocation116_spill] sm:$0xff] %v15237_v46 }
 0x3f4   :  { %v4764_v3 = vadd.f32 %v4763_v44, %v4701_v25  ;;  %v4704_v25 = vmul.f32 %v15219_v50, %v15219_v50  ;;  %11533 = vmatpush3.bf16.msra.mxu1 %v12329_v30  ;;  %11611 = vmatpush3.bf16.msra.mxu0 %v12336_v1  ;;  %v20267_v1 = vld [vmem:[#allocation94_spill] sm:$0xff]  ;;  %v15255_v50 = vsub.f32 %v20268_v39, %v14938_v31 }
 0x3f5   :  { %11534 = vmatprep.subr.bf16.mxu1 %v12330_v51  ;;  %11612 = vmatprep.subr.bf16.mxu0 %v12337_v13  ;;  %v15249_v30 = vsub.f32 %v20267_v1, %v14938_v31  ;;  %v12335_v1 = vld [vmem:[#allocation8 + $0x40] sm:$0xff]   ;;  %v20270_v39 = vld [vmem:[#allocation134_spill] sm:$0xff] }
 0x3f6   :  { %v4765_v40 = vadd.f32 %v4764_v3, %v4702_v47  ;;  %v4705_v47 = vmul.f32 %v15225_v58, %v15225_v58  ;;  %v12338_v58 = vld [vmem:[#allocation8 + $0x10] sm:$0xff]  }
 0x3f8   :  { %v4766_v44 = vadd.f32 %v4765_v40, %v4703_v36  ;;  %v4706_v36 = vmul.f32 %v15231_v2, %v15231_v2  ;;  %11535 = vmatpush3.bf16.msra.mxu1 %v12330_v51  ;;  %11613 = vmatpush3.bf16.msra.mxu0 %v12337_v13  ;;  %v20269_v13 = vld [vmem:[#allocation95_spill] sm:$0xff]  ;;  %v15267_v2 = vsub.f32 %v20270_v39, %v14938_v31 }
 0x3f9   :  { %11536 = vmatprep.subr.bf16.mxu1 %v12331_v57  ;;  %11614 = vmatprep.subr.bf16.mxu0 %v12338_v58  ;;  %v15261_v51 = vsub.f32 %v20269_v13, %v14938_v31  ;;  %v12340_v13 = vld [vmem:[#allocation8] sm:$0xff]   ;;  %v15275_v31 = vld [vmem:[#allocation8 + $0xb8] sm:$0xff]   ;;  %v4715_v39 = vmul.f32 %v14950_v15, %v14950_v15 }
 0x3fa   :  { %v4767_v3 = vadd.f32 %v4766_v44, %v4704_v25  ;;  %v4707_v25 = vmul.f32 %v15237_v46, %v15237_v46  ;;  %v12339_v46 = vld [vmem:[#allocation8 + $0x8] sm:$0xff]   ;;  %20271 = vst [vmem:[#allocation107_spill] sm:$0xff] %v15275_v31 }
 0x3fc   :  { %v4768_v40 = vadd.f32 %v4767_v3, %v4705_v47  ;;  %v4708_v47 = vmul.f32 %v15243_v21, %v15243_v21  ;;  %11537 = vmatpush3.bf16.msra.mxu1 %v12331_v57  ;;  %11615 = vmatpush3.bf16.msra.mxu0 %v12338_v58  ;;  %v4711_v58 = vmul.f32 %v15261_v51, %v15261_v51 }
 0x3fd   :  { %11538 = vmatprep.subr.bf16.mxu1 %v12335_v1  ;;  %11616 = vmatprep.subr.bf16.mxu0 %v12339_v46 }
 0x3fe   :  { %v4769_v44 = vadd.f32 %v4768_v40, %v4706_v36  ;;  %v4709_v36 = vmul.f32 %v15249_v30, %v15249_v30 }
 0x400   :  { %v4770_v3 = vadd.f32 %v4769_v44, %v4707_v25  ;;  %v4710_v25 = vmul.f32 %v15255_v50, %v15255_v50  ;;  %11539 = vmatpush3.bf16.msra.mxu1 %v12335_v1  ;;  %11617 = vmatpush3.bf16.msra.mxu0 %v12339_v46  ;;  %v4714_v46 = vmul.f32 %v14946_v14, %v14946_v14 }
 0x401   :  { %11618 = vmatprep.subr.bf16.mxu0 %v12340_v13  ;;  %11684 = vmatprep.subr.bf16.mxu1 %v15275_v31  ;;  %v4719_v31 = vmul.f32 %v14966_v60, %v14966_v60 }
 0x402   :  { %v4771_v40 = vadd.f32 %v4770_v3, %v4708_v47  ;;  %v4712_v47 = vmul.f32 %v15267_v2, %v15267_v2 }
 0x404   :  { %v4772_v44 = vadd.f32 %v4771_v40, %v4709_v36  ;;  %11619 = vmatpush3.bf16.msra.mxu0 %v12340_v13  ;;  %v4713_v36 = vmul.f32 %v14942_v32, %v14942_v32 }
 0x406   :  { %v4773_v57 = vadd.f32 %v4772_v44, %v4710_v25  ;;  %v4716_v44 = vmul.f32 %v14954_v49, %v14954_v49 }
 0x408   :  { %v4774_v3 = vadd.f32 %v4773_v57, %v4711_v58  ;;  %v4717_v57 = vmul.f32 %v14958_v54, %v14958_v54 }
 0x40a   :  { %v4775_v40 = vadd.f32 %v4774_v3, %v4712_v47  ;;  %v4718_v47 = vmul.f32 %v14962_v61, %v14962_v61 }
 0x40c   :  { %v4776_v1 = vadd.f32 %v4775_v40, %v4713_v36  ;;  %v4720_v40 = vmul.f32 %v14970_v10, %v14970_v10 }
 0x40e   :  { %v4777_v25 = vadd.f32 %v4776_v1, %v4714_v46  ;;  %v4721_v1 = vmul.f32 %v14973_v53, %v14973_v53 }
 0x410   :  { %v4778_v58 = vadd.f32 %v4777_v25, %v4715_v39  ;;  %v4722_v25 = vmul.f32 %v14976_v33, %v14976_v33 }
 0x412   :  { %v4779_v13 = vadd.f32 %v4778_v58, %v4716_v44  ;;  %v4723_v58 = vmul.f32 %v14979_v16, %v14979_v16 }
 0x414   :  { %v4780_v3 = vadd.f32 %v4779_v13, %v4717_v57  ;;  %v4724_v13 = vmul.f32 %v14982_v12, %v14982_v12 }
 0x416   :  { %v4781_v36 = vadd.f32 %v4780_v3, %v4718_v47  ;;  %v4725_v3 = vmul.f32 %v14985_v5, %v14985_v5 }
 0x418   :  { %v4782_v46 = vadd.f32 %v4781_v36, %v4719_v31  ;;  %v4726_v36 = vmul.f32 %v14988_v62, %v14988_v62 }
 0x41a   :  { %v4783_v39 = vadd.f32 %v4782_v46, %v4720_v40  ;;  %v4727_v46 = vmul.f32 %v14991_v59, %v14991_v59 }
 0x41c   :  { %v4784_v44 = vadd.f32 %v4783_v39, %v4721_v1  ;;  %v4728_v39 = vmul.f32 %v14994_v4, %v14994_v4 }
 0x41e   :  { %v4785_v57 = vadd.f32 %v4784_v44, %v4722_v25  ;;  %v4729_v44 = vmul.f32 %v14997_v56, %v14997_v56 }
 0x420   :  { %v4786_v47 = vadd.f32 %v4785_v57, %v4723_v58  ;;  %v4730_v57 = vmul.f32 %v15000_v6, %v15000_v6 }
 0x422   :  { %v4787_v31 = vadd.f32 %v4786_v47, %v4724_v13  ;;  %v4731_v47 = vmul.f32 %v15003_v48, %v15003_v48 }
 0x424   :  { %v4788_v40 = vadd.f32 %v4787_v31, %v4725_v3 }
 0x426   :  { %v4789_v1 = vadd.f32 %v4788_v40, %v4726_v36 }
 0x428   :  { %v4790_v25 = vadd.f32 %v4789_v1, %v4727_v46 }
 0x42a   :  { %v4791_v58 = vadd.f32 %v4790_v25, %v4728_v39  ;;  %v4531_v39 = vld [vmem:[%s19240_s2] sm:$0x1]  ;;  %v20272_v25 = vld [vmem:[#allocation15_spill] sm:$0xff] }
 0x42c   :  { %v4792_v13 = vadd.f32 %v4791_v58, %v4729_v44  ;;  %v19443_v44 = vsub.s32 0, %v20272_v25  ;;  %v20286_v25 = vld [vmem:[#allocation113_spill] sm:$0xff] }
 0x42e   :  { %v4793_v3 = vadd.f32 %v4792_v13, %v4730_v57 }
 0x430   :  { %v4794_v31 = vadd.f32 %v4793_v3, %v4731_v47 }
 0x432   :  { %v4795_v62 = vrot.slane %v4794_v31, 4 }
 0x434   :  { %v4796_v59 = vadd.f32 %v4795_v62, %v4794_v31  ;;  %v15324_v62 = vld [vmem:[#allocation7] ss:$0 sm:$0xff]  ;;  %v20274_v31 = vld [vmem:[#allocation101_spill] sm:$0xff] }
 0x436   :  { %v4797_v36 = vrot.slane %v4796_v59, 2 }
 0x438   :  { %v4798_v40 = vadd.f32 %v4797_v36, %v4796_v59  ;;  %v20275_v36 = vld [vmem:[#allocation102_spill] sm:$0xff] }
 0x43a   :  { %v4799_v5 = vrot.slane %v4798_v40, 1 }
 0x43c   :  { %v4800_v4 = vadd.f32 %v4799_v5, %v4798_v40  ;;  %v20276_v40 = vld [vmem:[#allocation103_spill] sm:$0xff] }
 0x43e   :  { %v4801_v46 = vmul.f32 0.001953125, %v4800_v4 }
 0x440   :  { %v4802_v1 = vadd.f32 1e-05, %v4801_v46  ;;  %v20277_v46 = vld [vmem:[#allocation23_spill] sm:$0xff] }
 0x442   :  { %12397 = vrsqrt.f32 %v4802_v1  ;;  %v20278_v1 = vld [vmem:[#allocation22_spill] sm:$0xff] }
 0x44f   :  { %v12398_v58 = vpop.eup %12397 }
 0x450   :  { %v4804_v6 = vmul.f32 %v12398_v58, %v4531_v39  ;;  %v20279_v39 = vld [vmem:[#allocation119_spill] sm:$0xff] }
 0x452   :  { %v15322_v57 = vrot.slane %v4804_v6, %v19443_v44  ;;  %v20284_v44 = vld [vmem:[#allocation109_spill] sm:$0xff] }
 0x454   :  { %v4872_v5 = vmul.f32 %v15322_v57, %v14997_v56  ;;  %v15330_v59 = vmul.f32 %v15322_v57, %v15007_v43  ;;  %v15334_v4 = vmul.f32 %v15322_v57, %v15011_v41  ;;  %v15338_v13 = vmul.f32 %v15322_v57, %v15015_v23 }
 0x455   :  { %v15342_v6 = vmul.f32 %v15322_v57, %v15023_v55  ;;  %v15346_v47 = vmul.f32 %v15322_v57, %v15027_v29  ;;  %v15350_v56 = vmul.f32 %v15322_v57, %v15033_v34  ;;  %v15354_v43 = vmul.f32 %v15322_v57, %v15039_v8 }
 0x456   :  { %v4942_v41 = vadd.f32 %v15324_v62, %v4872_v5  ;;  %v15359_v23 = vmul.f32 %v15322_v57, %v15045_v20  ;;  %v15363_v55 = vmul.f32 %v15322_v57, %v15051_v63  ;;  %v15367_v29 = vmul.f32 %v15322_v57, %v15057_v28  ;;  %v20280_v5 = vld [vmem:[#allocation60_spill] sm:$0xff] }
 0x457   :  { %v15371_v34 = vmul.f32 %v15322_v57, %v15063_v18  ;;  %v15375_v8 = vmul.f32 %v15322_v57, %v15069_v0  ;;  %v15379_v20 = vmul.f32 %v15322_v57, %v15075_v42  ;;  %v15383_v63 = vmul.f32 %v15322_v57, %v15081_v24 }
 0x458   :  { %v15385_v3 = vmax.f32 %v4942_v41, 0.0  ;;  %v15389_v28 = vmul.f32 %v15322_v57, %v15087_v9  ;;  %v15393_v18 = vmul.f32 %v15322_v57, %v15093_v11  ;;  %v15397_v0 = vmul.f32 %v15322_v57, %v15099_v27 }
 0x459   :  { %v15401_v42 = vmul.f32 %v15322_v57, %v15105_v22  ;;  %v15405_v24 = vmul.f32 %v15322_v57, %v15111_v19  ;;  %v15409_v9 = vmul.f32 %v15322_v57, %v15117_v17  ;;  %v15413_v11 = vmul.f32 %v15322_v57, %v15123_v45 }
 0x45a   :  { %20273 = vst [vmem:[#allocation35_spill] sm:$0xff] %v15385_v3  ;;  %v15417_v27 = vmul.f32 %v15322_v57, %v15129_v52  ;;  %v15421_v22 = vmul.f32 %v15322_v57, %v15135_v26  ;;  %v15425_v19 = vmul.f32 %v15322_v57, %v15141_v37  ;;  %v15429_v17 = vmul.f32 %v15322_v57, %v15147_v35  ;;  %v20285_v3 = vld [vmem:[#allocation112_spill] sm:$0xff] }
 0x45b   :  { %v15433_v45 = vmul.f32 %v15322_v57, %v15153_v38  ;;  %v15437_v52 = vmul.f32 %v15322_v57, %v15159_v7  ;;  %v15441_v26 = vmul.f32 %v15322_v57, %v20274_v31  ;;  %v15445_v37 = vmul.f32 %v15322_v57, %v20275_v36  ;;  %v20282_v31 = vld [vmem:[#allocation62_spill] sm:$0xff] }
 0x45c   :  { %v15449_v35 = vmul.f32 %v15322_v57, %v20276_v40  ;;  %v15453_v38 = vmul.f32 %v15322_v57, %v20277_v46  ;;  %v15457_v7 = vmul.f32 %v15322_v57, %v20278_v1  ;;  %v15461_v58 = vmul.f32 %v15322_v57, %v20279_v39  ;;  %v20283_v40 = vld [vmem:[#allocation108_spill] sm:$0xff] }
 0x45d   :  { %v15465_v41 = vmul.f32 %v15322_v57, %v20280_v5  ;;  %v15469_v36 = vmul.f32 %v15322_v57, %v20282_v31  ;;  %v15473_v46 = vmul.f32 %v15322_v57, %v20283_v40  ;;  %v15477_v1 = vmul.f32 %v15322_v57, %v20284_v44 }
 0x45e   :  { %v15481_v39 = vmul.f32 %v15322_v57, %v20285_v3  ;;  %v15485_v5 = vmul.f32 %v15322_v57, %v20286_v25  ;;  %v15493_v40 = vmul.f32 %v15322_v57, %v15243_v21  ;;  %v15497_v44 = vmul.f32 %v15322_v57, %v15249_v30 }
 0x45f   :  { %20281 = vst [vmem:[#allocation30_spill] sm:$0xff] %v15465_v41  ;;  %v20287_v41 = vld [vmem:[#allocation116_spill] sm:$0xff]  ;;  %v15501_v3 = vmul.f32 %v15322_v57, %v15255_v50  ;;  %v15505_v25 = vmul.f32 %v15322_v57, %v15261_v51  ;;  %v15513_v21 = vmul.f32 %v15322_v57, %v14942_v32  ;;  %v15517_v30 = vmul.f32 %v15322_v57, %v14946_v14 }
 0x460   :  { %v15489_v31 = vmul.f32 %v15322_v57, %v20287_v41  ;;  %v15509_v41 = vmul.f32 %v15322_v57, %v15267_v2  ;;  %v15521_v50 = vmul.f32 %v15322_v57, %v14950_v15  ;;  %v15525_v51 = vmul.f32 %v15322_v57, %v14954_v49 }
 0x461   :  { %v15529_v2 = vmul.f32 %v15322_v57, %v14958_v54  ;;  %v15533_v32 = vmul.f32 %v15322_v57, %v14962_v61  ;;  %v15537_v14 = vmul.f32 %v15322_v57, %v14966_v60  ;;  %v15541_v15 = vmul.f32 %v15322_v57, %v14970_v10 }
 0x462   :  { %v15545_v49 = vmul.f32 %v15322_v57, %v14973_v53  ;;  %v15549_v54 = vmul.f32 %v15322_v57, %v14976_v33  ;;  %v15553_v61 = vmul.f32 %v15322_v57, %v14979_v16  ;;  %v15557_v60 = vmul.f32 %v15322_v57, %v14982_v12 }
 0x463   :  { %20288 = vst [vmem:[#allocation40_spill] sm:$0xff] %v15537_v14  ;;  %20289 = vst [vmem:[#allocation38_spill] sm:$0xff] %v15541_v15  ;;  %v20293_v14 = vld [vmem:[#allocation20_spill] sm:$0xff]  ;;  %v20294_v15 = vld [vmem:[#allocation97_spill] sm:$0xff] }
 0x464   :  { %20290 = vst [vmem:[#allocation43_spill] sm:$0xff] %v15545_v49  ;;  %20291 = vst [vmem:[#allocation42_spill] sm:$0xff] %v15549_v54  ;;  %v15561_v10 = vmul.f32 %v15322_v57, %v20293_v14  ;;  %v15565_v53 = vmul.f32 %v15322_v57, %v20294_v15  ;;  %v20295_v49 = vld [vmem:[#allocation98_spill] sm:$0xff]  ;;  %v20296_v54 = vld [vmem:[#allocation99_spill] sm:$0xff]  ;;  %v15581_v14 = vmul.f32 %v15322_v57, %v15003_v48 }
 0x465   :  { %20292 = vst [vmem:[#allocation132_spill] sm:$0xff] %v15553_v61  ;;  %v15569_v33 = vmul.f32 %v15322_v57, %v20295_v49  ;;  %v15573_v16 = vmul.f32 %v15322_v57, %v20296_v54  ;;  %v20297_v61 = vld [vmem:[#allocation100_spill] sm:$0xff]  ;;  %v15585_v15 = vadd.f32 %v15324_v62, %v15330_v59  ;;  %v15589_v49 = vadd.f32 %v15324_v62, %v15334_v4 }
 0x466   :  { %v15577_v12 = vmul.f32 %v15322_v57, %v20297_v61  ;;  %v15593_v54 = vadd.f32 %v15324_v62, %v15338_v13  ;;  %v15597_v61 = vadd.f32 %v15324_v62, %v15342_v6  ;;  %v15601_v48 = vadd.f32 %v15324_v62, %v15346_v47 }
 0x467   :  { %v15605_v57 = vadd.f32 %v15324_v62, %v15350_v56  ;;  %v15609_v59 = vadd.f32 %v15324_v62, %v15354_v43  ;;  %v15613_v4 = vadd.f32 %v15324_v62, %v15359_v23  ;;  %v15617_v13 = vadd.f32 %v15324_v62, %v15363_v55 }
 0x468   :  { %v15621_v6 = vadd.f32 %v15324_v62, %v15367_v29  ;;  %v15625_v47 = vadd.f32 %v15324_v62, %v15371_v34  ;;  %v15629_v56 = vadd.f32 %v15324_v62, %v15375_v8  ;;  %v15633_v43 = vadd.f32 %v15324_v62, %v15379_v20 }
 0x469   :  { %v15637_v23 = vadd.f32 %v15324_v62, %v15383_v63  ;;  %v15641_v55 = vadd.f32 %v15324_v62, %v15389_v28  ;;  %v15645_v29 = vadd.f32 %v15324_v62, %v15393_v18  ;;  %v15649_v34 = vadd.f32 %v15324_v62, %v15397_v0 }
 0x46a   :  { %v15653_v8 = vadd.f32 %v15324_v62, %v15401_v42  ;;  %v15657_v20 = vadd.f32 %v15324_v62, %v15405_v24  ;;  %v15661_v63 = vadd.f32 %v15324_v62, %v15409_v9  ;;  %v15665_v28 = vadd.f32 %v15324_v62, %v15413_v11 }
 0x46b   :  { %v15669_v18 = vadd.f32 %v15324_v62, %v15417_v27  ;;  %v15673_v0 = vadd.f32 %v15324_v62, %v15421_v22  ;;  %v15677_v42 = vadd.f32 %v15324_v62, %v15425_v19  ;;  %v15681_v24 = vadd.f32 %v15324_v62, %v15429_v17 }
 0x46c   :  { %v15685_v9 = vadd.f32 %v15324_v62, %v15433_v45  ;;  %v15689_v11 = vadd.f32 %v15324_v62, %v15437_v52  ;;  %v15693_v27 = vadd.f32 %v15324_v62, %v15441_v26  ;;  %v15697_v22 = vadd.f32 %v15324_v62, %v15445_v37  ;;  %v20299_v26 = vld [vmem:[#allocation30_spill] sm:$0xff] }
 0x46d   :  { %v15701_v19 = vadd.f32 %v15324_v62, %v15449_v35  ;;  %v15705_v17 = vadd.f32 %v15324_v62, %v15453_v38  ;;  %v15709_v45 = vadd.f32 %v15324_v62, %v15457_v7  ;;  %v15713_v52 = vadd.f32 %v15324_v62, %v15461_v58 }
 0x46e   :  { %v15717_v37 = vadd.f32 %v15324_v62, %v20299_v26  ;;  %v15721_v35 = vadd.f32 %v15324_v62, %v15469_v36  ;;  %v15725_v38 = vadd.f32 %v15324_v62, %v15473_v46  ;;  %v15729_v7 = vadd.f32 %v15324_v62, %v15477_v1 }
 0x46f   :  { %20298 = vst [vmem:[#allocation120_spill] sm:$0xff] %v15713_v52  ;;  %v15733_v58 = vadd.f32 %v15324_v62, %v15481_v39  ;;  %v15735_v52 = vld [vmem:[#allocation8 + $0xf8] sm:$0xff]   ;;  %v15739_v26 = vadd.f32 %v15324_v62, %v15485_v5  ;;  %v15743_v36 = vadd.f32 %v15324_v62, %v15489_v31  ;;  %v15747_v46 = vadd.f32 %v15324_v62, %v15493_v40 }
 0x470   :  { %20300 = vst [vmem:[#allocation121_spill] sm:$0xff] %v15735_v52  ;;  %v15751_v1 = vadd.f32 %v15324_v62, %v15497_v44  ;;  %v15755_v39 = vadd.f32 %v15324_v62, %v15501_v3  ;;  %v15759_v5 = vadd.f32 %v15324_v62, %v15505_v25  ;;  %v15763_v31 = vadd.f32 %v15324_v62, %v15509_v41 }
 0x471   :  { %20301 = vst [vmem:[#allocation130_spill] sm:$0xff] %v15747_v46  ;;  %v15767_v40 = vadd.f32 %v15324_v62, %v15513_v21  ;;  %11764 = vmatprep.subr.bf16.mxu0 %v15735_v52  ;;  %v4927_v44 = vadd.f32 %v15324_v62, %v15517_v30  ;;  %v4928_v3 = vadd.f32 %v15324_v62, %v15521_v50  ;;  %v20311_v46 = vld [vmem:[#allocation132_spill] sm:$0xff] }
 0x472   :  { %20302 = vst [vmem:[#allocation131_spill] sm:$0xff] %v15751_v1  ;;  %20303 = vst [vmem:[#allocation133_spill] sm:$0xff] %v15755_v39  ;;  %v4929_v25 = vadd.f32 %v15324_v62, %v15525_v51  ;;  %v4931_v41 = vadd.f32 %v15324_v62, %v15533_v32  ;;  %v20309_v39 = vld [vmem:[#allocation43_spill] sm:$0xff]  ;;  %v20310_v1 = vld [vmem:[#allocation42_spill] sm:$0xff]  ;;  %v4936_v51 = vadd.f32 %v15324_v62, %v20311_v46 }
 0x473   :  { %20304 = vst [vmem:[#allocation25_spill] sm:$0xff] %v15759_v5  ;;  %20305 = vst [vmem:[#allocation24_spill] sm:$0xff] %v15763_v31  ;;  %v4930_v5 = vadd.f32 %v15324_v62, %v15529_v2  ;;  %v20307_v31 = vld [vmem:[#allocation40_spill] sm:$0xff]  ;;  %v4934_v30 = vadd.f32 %v15324_v62, %v20309_v39  ;;  %v4935_v50 = vadd.f32 %v15324_v62, %v20310_v1 }
 0x474   :  { %20306 = vst [vmem:[#allocation45_spill] sm:$0xff] %v15767_v40  ;;  %v4932_v21 = vadd.f32 %v15324_v62, %v20307_v31  ;;  %v20308_v40 = vld [vmem:[#allocation38_spill] sm:$0xff]  ;;  %v4937_v2 = vadd.f32 %v15324_v62, %v15557_v60  ;;  %v4938_v32 = vadd.f32 %v15324_v62, %v15561_v10  ;;  %v4939_v31 = vadd.f32 %v15324_v62, %v15565_v53 }
 0x475   :  { %v4933_v52 = vadd.f32 %v15324_v62, %v20308_v40  ;;  %v4940_v40 = vadd.f32 %v15324_v62, %v15569_v33  ;;  %v4941_v39 = vadd.f32 %v15324_v62, %v15573_v16  ;;  %v4943_v1 = vadd.f32 %v15324_v62, %v15577_v12 }
 0x476   :  { %v4944_v46 = vadd.f32 %v15324_v62, %v15581_v14  ;;  %v15805_v60 = vmax.f32 %v15585_v15, 0.0  ;;  %v15808_v10 = vmax.f32 %v15589_v49, 0.0  ;;  %v15811_v53 = vmax.f32 %v15593_v54, 0.0 }
 0x477   :  { %v15814_v33 = vmax.f32 %v15597_v61, 0.0  ;;  %v15817_v16 = vmax.f32 %v15601_v48, 0.0  ;;  %v15820_v12 = vmax.f32 %v15605_v57, 0.0  ;;  %v15823_v62 = vmax.f32 %v15609_v59, 0.0 }
 0x478   :  { %20312 = vst [vmem:[#allocation44_spill] sm:$0xff] %v15805_v60  ;;  %20313 = vst [vmem:[#allocation47_spill] sm:$0xff] %v15808_v10  ;;  %v15826_v14 = vmax.f32 %v15613_v4, 0.0  ;;  %v15829_v15 = vmax.f32 %v15617_v13, 0.0  ;;  %v15832_v49 = vmax.f32 %v15621_v6, 0.0  ;;  %v15835_v54 = vmax.f32 %v15625_v47, 0.0 }
 0x479   :  { %20314 = vst [vmem:[#allocation27_spill] sm:$0xff] %v15811_v53  ;;  %20315 = vst [vmem:[#allocation122_spill] sm:$0xff] %v15814_v33  ;;  %v15838_v61 = vmax.f32 %v15629_v56, 0.0  ;;  %v15841_v48 = vmax.f32 %v15633_v43, 0.0  ;;  %v15844_v57 = vmax.f32 %v15637_v23, 0.0  ;;  %v15847_v59 = vmax.f32 %v15641_v55, 0.0 }
 0x47a   :  { %20316 = vst [vmem:[#allocation96_spill] sm:$0xff] %v15826_v14  ;;  %20317 = vst [vmem:[#allocation48_spill] sm:$0xff] %v15829_v15  ;;  %v15850_v4 = vmax.f32 %v15645_v29, 0.0  ;;  %v15853_v13 = vmax.f32 %v15649_v34, 0.0  ;;  %v15856_v6 = vmax.f32 %v15653_v8, 0.0  ;;  %v15859_v47 = vmax.f32 %v15657_v20, 0.0 }
 0x47b   :  { %20318 = vst [vmem:[#allocation123_spill] sm:$0xff] %v15832_v49  ;;  %20319 = vst [vmem:[#allocation124_spill] sm:$0xff] %v15835_v54  ;;  %v15862_v56 = vmax.f32 %v15661_v63, 0.0  ;;  %v15865_v43 = vmax.f32 %v15665_v28, 0.0  ;;  %v15868_v23 = vmax.f32 %v15669_v18, 0.0  ;;  %v15871_v55 = vmax.f32 %v15673_v0, 0.0 }
 0x47c   :  { %20320 = vst [vmem:[#allocation135_spill] sm:$0xff] %v15838_v61  ;;  %20321 = vst [vmem:[#allocation136_spill] sm:$0xff] %v15850_v4  ;;  %v15874_v29 = vmax.f32 %v15677_v42, 0.0  ;;  %v15877_v34 = vmax.f32 %v15681_v24, 0.0  ;;  %v15880_v8 = vmax.f32 %v15685_v9, 0.0  ;;  %v15883_v20 = vmax.f32 %v15689_v11, 0.0 }
 0x47d   :  { %20322 = vst [vmem:[#allocation49_spill] sm:$0xff] %v15856_v6  ;;  %20323 = vst [vmem:[#allocation29_spill] sm:$0xff] %v15859_v47  ;;  %v15886_v63 = vmax.f32 %v15693_v27, 0.0  ;;  %v15889_v28 = vmax.f32 %v15697_v22, 0.0  ;;  %v15892_v18 = vmax.f32 %v15701_v19, 0.0  ;;  %v15895_v0 = vmax.f32 %v15705_v17, 0.0 }
 0x47e   :  { %20324 = vst [vmem:[#allocation28_spill] sm:$0xff] %v15862_v56  ;;  %20325 = vst [vmem:[#allocation50_spill] sm:$0xff] %v15874_v29  ;;  %v15898_v42 = vmax.f32 %v15709_v45, 0.0  ;;  %v20334_v24 = vld [vmem:[#allocation120_spill] sm:$0xff]  ;;  %v15904_v11 = vmax.f32 %v15717_v37, 0.0  ;;  %v15907_v27 = vmax.f32 %v15721_v35, 0.0 }
 0x47f   :  { %20326 = vst [vmem:[#allocation52_spill] sm:$0xff] %v15877_v34  ;;  %20327 = vst [vmem:[#allocation56_spill] sm:$0xff] %v15880_v8  ;;  %v15901_v9 = vmax.f32 %v20334_v24, 0.0  ;;  %v15910_v22 = vmax.f32 %v15725_v38, 0.0  ;;  %v15913_v19 = vmax.f32 %v15729_v7, 0.0  ;;  %v15916_v17 = vmax.f32 %v15733_v58, 0.0 }
 0x480   :  { %20328 = vst [vmem:[#allocation31_spill] sm:$0xff] %v15883_v20  ;;  %20329 = vst [vmem:[#allocation26_spill] sm:$0xff] %v15886_v63  ;;  %v15919_v45 = vmax.f32 %v15739_v26, 0.0  ;;  %v15922_v24 = vmax.f32 %v15743_v36, 0.0  ;;  %v20343_v37 = vld [vmem:[#allocation130_spill] sm:$0xff]  ;;  %v20344_v35 = vld [vmem:[#allocation131_spill] sm:$0xff] }
 0x481   :  { %20330 = vst [vmem:[#allocation54_spill] sm:$0xff] %v15889_v28  ;;  %20331 = vst [vmem:[#allocation46_spill] sm:$0xff] %v15892_v18  ;;  %v20346_v38 = vld [vmem:[#allocation133_spill] sm:$0xff]  ;;  %v20349_v58 = vld [vmem:[#allocation24_spill] sm:$0xff]  ;;  %v15942_v36 = vmax.f32 %v4927_v44, 0.0  ;;  %v15962_v44 = vmax.f32 %v4937_v2, 0.0 }
 0x482   :  { %20332 = vst [vmem:[#allocation51_spill] sm:$0xff] %v15895_v0  ;;  %20333 = vst [vmem:[#allocation57_spill] sm:$0xff] %v15898_v42  ;;  %v15925_v42 = vmax.f32 %v20343_v37, 0.0  ;;  %v15928_v0 = vmax.f32 %v20344_v35, 0.0  ;;  %v20347_v7 = vld [vmem:[#allocation25_spill] sm:$0xff]  ;;  %v15946_v37 = vmax.f32 %v4929_v25, 0.0 }
 0x483   :  { %20335 = vst [vmem:[#allocation125_spill] sm:$0xff] %v15901_v9  ;;  %20336 = vst [vmem:[#allocation33_spill] sm:$0xff] %v15904_v11  ;;  %v15931_v11 = vmax.f32 %v20346_v38, 0.0  ;;  %v20350_v26 = vld [vmem:[#allocation45_spill] sm:$0xff]  ;;  %v15948_v35 = vmax.f32 %v4930_v5, 0.0  ;;  %v15952_v38 = vmax.f32 %v4932_v21, 0.0 }
 0x484   :  { %20337 = vst [vmem:[#allocation58_spill] sm:$0xff] %v15907_v27  ;;  %20338 = vst [vmem:[#allocation61_spill] sm:$0xff] %v15910_v22  ;;  %v15966_v25 = vmax.f32 %v4939_v31, 0.0  ;;  %v15968_v5 = vmax.f32 %v4940_v40, 0.0  ;;  %v15972_v21 = vmax.f32 %v4943_v1, 0.0  ;;  %v15990_v1 = vpack.c.bf16 %v15814_v33, %v15811_v53 }
 0x485   :  { %20339 = vst [vmem:[#allocation64_spill] sm:$0xff] %v15913_v19  ;;  %20340 = vst [vmem:[#allocation65_spill] sm:$0xff] %v15916_v17  ;;  %v15934_v19 = vmax.f32 %v20347_v7, 0.0  ;;  %v15937_v17 = vmax.f32 %v20349_v58, 0.0  ;;  %v15954_v7 = vmax.f32 %v4933_v52, 0.0  ;;  %v15958_v58 = vmax.f32 %v4935_v50, 0.0 }
 0x486   :  { %20341 = vst [vmem:[#allocation34_spill] sm:$0xff] %v15919_v45  ;;  %20342 = vst [vmem:[#allocation32_spill] sm:$0xff] %v15922_v24  ;;  %v15940_v45 = vmax.f32 %v20350_v26, 0.0  ;;  %v15944_v24 = vmax.f32 %v4928_v3, 0.0  ;;  %v15960_v26 = vmax.f32 %v4936_v51, 0.0  ;;  %v15964_v3 = vmax.f32 %v4938_v32, 0.0  ;;  %11540 = vmatprep.mubr.bf16.mxu1 %v15990_v1 }
 0x487   :  { %20345 = vst [vmem:[#allocation53_spill] sm:$0xff] %v15928_v0  ;;  %20348 = vst [vmem:[#allocation55_spill] sm:$0xff] %v15934_v19  ;;  %v15950_v0 = vmax.f32 %v4931_v41, 0.0  ;;  %v15956_v19 = vmax.f32 %v4934_v30, 0.0  ;;  %v15970_v41 = vmax.f32 %v4941_v39, 0.0  ;;  %v15974_v52 = vmax.f32 %v4944_v46, 0.0 }
 0x488   :  { %20351 = vst [vmem:[#allocation66_spill] sm:$0xff] %v15942_v36  ;;  %20352 = vst [vmem:[#allocation126_spill] sm:$0xff] %v15944_v24  ;;  %v5010_v30 = vrot.slane %v15805_v60, 7  ;;  %v5042_v50 = vrot.slane %v15808_v10, 7  ;;  %v20363_v32 = vld [vmem:[#allocation16_spill] sm:$0xff]  ;;  %v15986_v39 = vpack.c.bf16 %v15808_v10, %v15805_v60  ;;  %v5009_v46 = vrot.slane %v15811_v53, 7 }
 0x489   :  { %20353 = vst [vmem:[#allocation37_spill] sm:$0xff] %v15956_v19  ;;  %20354 = vst [vmem:[#allocation67_spill] sm:$0xff] %v15958_v58  ;;  %v5272_v31 = vrot.slane %v15805_v60, %v20363_v32  ;;  %v5041_v51 = vrot.slane %v15814_v33, 7  ;;  %v5268_v2 = vrot.slane %v15811_v53, %v20363_v32  ;;  %v16003_v60 = vpack.c.bf16 %v15820_v12, %v15817_v16 }
 0x48a   :  { %20355 = vst [vmem:[#allocation104_spill] sm:$0xff] %v15960_v26  ;;  %20356 = vst [vmem:[#allocation59_spill] sm:$0xff] %v15962_v44  ;;  %v5106_v40 = vsel %vm212_vm0, %v5042_v50, %v5010_v30  ;;  %v16007_v10 = vpack.c.bf16 %v15826_v14, %v15823_v62  ;;  %11541 = vmatmul.mubr.bf16.vlgmr.msra.gmra.mxu1 %v15986_v39  ;;  %v5012_v26 = vrot.slane %v15823_v62, 7 }
 0x48b   :  { %20357 = vst [vmem:[#allocation36_spill] sm:$0xff] %v15964_v3  ;;  %20358 = vst [vmem:[#allocation39_spill] sm:$0xff] %v15966_v25  ;;  %v5011_v25 = vrot.slane %v15817_v16, 7  ;;  %v5073_v33 = vsel %vm212_vm0, %v5009_v46, %v5041_v51  ;;  %v5105_v53 = vsel %vm212_vm0, %v5041_v51, %v5009_v46  ;;  %11544 = vmatprep.mubr.bf16.mxu1 %v15990_v1  ;;  %v12343_v46 = vld [vmem:[#allocation8 + $0xa8] sm:$0xff]  }
 0x48c   :  { %20359 = vst [vmem:[#allocation105_spill] sm:$0xff] %v15968_v5  ;;  %20360 = vst [vmem:[#allocation70_spill] sm:$0xff] %v15970_v41  ;;  %v12342_v41 = vld [vmem:[#allocation8 + $0xb0] sm:$0xff]   ;;  %v20370_v5 = vld [vmem:[#allocation107_spill] sm:$0xff]  ;;  %v5393_v3 = vsel %vm406_vm1, %v5268_v2, %v5105_v53 }
 0x48d   :  { %20361 = vst [vmem:[#allocation63_spill] sm:$0xff] %v15972_v21  ;;  %20362 = vst [vmem:[#allocation72_spill] sm:$0xff] %v15974_v52  ;;  %v5074_v21 = vsel %vm212_vm0, %v5010_v30, %v5042_v50  ;;  %v5395_v30 = vsel %vm406_vm1, %v5272_v31, %v5106_v40  ;;  %v5043_v50 = vrot.slane %v15820_v12, 7  ;;  %11685 = vmatpush3.bf16.msra.mxu1 %v20370_v5  ;;  %v5044_v5 = vrot.slane %v15826_v14, 7  ;;  %v12367_v52 = vld [vmem:[#allocation8 + $0x100] sm:$0xff]  }
 0x48e   :  { %20365 = vst [vmem:[#allocation127_spill] sm:$0xff] %v15986_v39  ;;  %20366 = vst [vmem:[#allocation128_spill] sm:$0xff] %v15990_v1  ;;  %v16022_v44 = vpack.c.bf16 %v5074_v21, %v5395_v30  ;;  %v5276_v39 = vrot.slane %v15817_v16, %v20363_v32  ;;  %v16027_v51 = vpack.c.bf16 %v5073_v33, %v5393_v3  ;;  %11686 = vmatprep.subr.bf16.mxu1 %v12342_v41 }
 0x48f   :  { %20368 = vst [vmem:[#allocation69_spill] sm:$0xff] %v16003_v60  ;;  %20369 = vst [vmem:[#allocation76_spill] sm:$0xff] %v16007_v10  ;;  %v5075_v31 = vsel %vm212_vm0, %v5011_v25, %v5043_v50  ;;  %v5107_v40 = vsel %vm212_vm0, %v5043_v50, %v5011_v25  ;;  %v5280_v21 = vrot.slane %v15823_v62, %v20363_v32  ;;  %v5013_v30 = vrot.slane %v15829_v15, 7  ;;  %v12349_v50 = vld [vmem:[#allocation8 + $0xf0] sm:$0xff]  }
 0x490   :  { %20371 = vst [vmem:[#allocation80_spill] sm:$0xff] %v16022_v44  ;;  %20372 = vst [vmem:[#allocation78_spill] sm:$0xff] %v16027_v51  ;;  %v5397_v53 = vsel %vm406_vm1, %v5276_v39, %v5107_v40  ;;  %v16040_v33 = vpack.c.bf16 %v15832_v49, %v15829_v15  ;;  %v16044_v3 = vpack.c.bf16 %v15838_v61, %v15835_v54  ;;  %11620 = vmatprep.mubr.bf16.mxu0 %v16027_v51 }
 0x491   :  { %v16047_v25 = vpack.c.bf16 %v5075_v31, %v5397_v53  ;;  %v5076_v2 = vsel %vm212_vm0, %v5012_v26, %v5044_v5  ;;  %v5108_v39 = vsel %vm212_vm0, %v5044_v5, %v5012_v26  ;;  %11621 = vmatmul.mubr.bf16.vlgmr.msra.gmra.mxu0 %v16022_v44  ;;  %11687 = vmatpush3.bf16.msra.mxu1 %v12342_v41  ;;  %v5045_v1 = vrot.slane %v15832_v49, 7  ;;  %v12344_v41 = vld [vmem:[#allocation8 + $0xa0] sm:$0xff]  }
 0x492   :  { %20373 = vst [vmem:[#allocation129_spill] sm:$0xff] %v16040_v33  ;;  %20374 = vst [vmem:[#allocation41_spill] sm:$0xff] %v16044_v3  ;;  %v5399_v40 = vsel %vm406_vm1, %v5280_v21, %v5108_v39  ;;  %v5284_v31 = vrot.slane %v15829_v15, %v20363_v32  ;;  %v5014_v53 = vrot.slane %v15835_v54, 7  ;;  %11624 = vmatprep.mubr.bf16.mxu0 %v16027_v51  ;;  %v5046_v26 = vrot.slane %v15838_v61, 7  ;;  %v20379_v51 = vld [vmem:[#allocation121_spill] sm:$0xff] }
 0x493   :  { %20375 = vst [vmem:[#allocation75_spill] sm:$0xff] %v16047_v25  ;;  %v16062_v14 = vpack.c.bf16 %v5076_v2, %v5399_v40  ;;  %v5288_v5 = vrot.slane %v15835_v54, %v20363_v32  ;;  %v16069_v21 = vpack.c.bf16 %v15844_v57, %v15841_v48  ;;  %11688 = vmatprep.subr.bf16.mxu1 %v12343_v46  ;;  %v5015_v40 = vrot.slane %v15841_v48, 7 }
 0x494   :  { %v5077_v39 = vsel %vm212_vm0, %v5013_v30, %v5045_v1  ;;  %v5109_v44 = vsel %vm212_vm0, %v5045_v1, %v5013_v30  ;;  %v16077_v2 = vpack.c.bf16 %v15850_v4, %v15847_v59  ;;  %11765 = vmatpush3.bf16.msra.mxu0 %v20379_v51  ;;  %11545 = vmatmul.mubr.bf16.gmra.mxu1 %v16003_v60  ;;  %v5047_v1 = vrot.slane %v15844_v57, 7  ;;  %v12350_v30 = vld [vmem:[#allocation8 + $0xe8] sm:$0xff]  }
 0x495   :  { %20376 = vst [vmem:[#allocation106_spill] sm:$0xff] %v16062_v14  ;;  %20377 = vst [vmem:[#allocation110_spill] sm:$0xff] %v16069_v21  ;;  %v5401_v61 = vsel %vm406_vm1, %v5284_v31, %v5109_v44  ;;  %v5078_v54 = vsel %vm212_vm0, %v5014_v53, %v5046_v26  ;;  %v5110_v49 = vsel %vm212_vm0, %v5046_v26, %v5014_v53  ;;  %11766 = vmatprep.subr.bf16.mxu0 %v12349_v50 }
 0x496   :  { %20378 = vst [vmem:[#allocation81_spill] sm:$0xff] %v16077_v2  ;;  %11548 = vmatprep.mubr.bf16.mxu1 %v16007_v10  ;;  %v16090_v15 = vpack.c.bf16 %v5077_v39, %v5401_v61  ;;  %v5403_v51 = vsel %vm406_vm1, %v5288_v5, %v5110_v49  ;;  %v5292_v44 = vrot.slane %v15841_v48, %v20363_v32  ;;  %v5016_v31 = vrot.slane %v15847_v59, 7  ;;  %v12345_v39 = vld [vmem:[#allocation8 + $0x98] sm:$0xff]  }
 0x497   :  { %11689 = vmatpush3.bf16.msra.mxu1 %v12343_v46  ;;  %v16097_v60 = vpack.c.bf16 %v5078_v54, %v5403_v51  ;;  %v5079_v53 = vsel %vm212_vm0, %v5015_v40, %v5047_v1  ;;  %v5111_v26 = vsel %vm212_vm0, %v5047_v1, %v5015_v40  ;;  %v5048_v61 = vrot.slane %v15850_v4, 7 }
 0x498   :  { %20380 = vst [vmem:[#allocation117_spill] sm:$0xff] %v16090_v15  ;;  %11690 = vmatprep.subr.bf16.mxu1 %v12344_v41  ;;  %v5405_v49 = vsel %vm406_vm1, %v5292_v44, %v5111_v26  ;;  %v5296_v5 = vrot.slane %v15847_v59, %v20363_v32  ;;  %v16110_v54 = vpack.c.bf16 %v15856_v6, %v15853_v13  ;;  %v5017_v44 = vrot.slane %v15853_v13, 7  ;;  %v12352_v26 = vld [vmem:[#allocation8 + $0xe0] sm:$0xff]  }
 0x499   :  { %20381 = vst [vmem:[#allocation68_spill] sm:$0xff] %v16097_v60  ;;  %v16114_v46 = vpack.c.bf16 %v15862_v56, %v15859_v47  ;;  %11767 = vmatpush3.bf16.msra.mxu0 %v12349_v50  ;;  %v16116_v40 = vpack.c.bf16 %v5079_v53, %v5405_v49  ;;  %v5080_v1 = vsel %vm212_vm0, %v5016_v31, %v5048_v61  ;;  %v5049_v4 = vrot.slane %v15856_v6, 7 }
 0x49a   :  { %20382 = vst [vmem:[#allocation83_spill] sm:$0xff] %v16110_v54  ;;  %v5112_v51 = vsel %vm212_vm0, %v5048_v61, %v5016_v31  ;;  %11768 = vmatprep.subr.bf16.mxu0 %v12350_v30  ;;  %11625 = vmatmul.mubr.bf16.gmra.mxu0 %v16047_v25  ;;  %v5300_v50 = vrot.slane %v15853_v13, %v20363_v32  ;;  %v5018_v53 = vrot.slane %v15859_v47, 7  ;;  %v5050_v61 = vrot.slane %v15862_v56, 7 }
 0x49b   :  { %20383 = vst [vmem:[#allocation84_spill] sm:$0xff] %v16114_v46  ;;  %20384 = vst [vmem:[#allocation111_spill] sm:$0xff] %v16116_v40  ;;  %v5407_v10 = vsel %vm406_vm1, %v5296_v5, %v5112_v51  ;;  %11691 = vmatpush3.bf16.msra.mxu1 %v12344_v41  ;;  %11628 = vmatprep.mubr.bf16.mxu0 %v16062_v14  ;;  %v5304_v49 = vrot.slane %v15859_v47, %v20363_v32  ;;  %v12346_v51 = vld [vmem:[#allocation8 + $0x90] sm:$0xff]  }
 0x49c   :  { %v16131_v31 = vpack.c.bf16 %v5080_v1, %v5407_v10  ;;  %v16138_v5 = vpack.c.bf16 %v15868_v23, %v15865_v43  ;;  %11692 = vmatprep.subr.bf16.mxu1 %v12345_v39  ;;  %v5081_v25 = vsel %vm212_vm0, %v5017_v44, %v5049_v4  ;;  %v5113_v41 = vsel %vm212_vm0, %v5049_v4, %v5017_v44  ;;  %v12353_v44 = vld [vmem:[#allocation8 + $0xd8] sm:$0xff]  }
 0x49d   :  { %v16146_v10 = vpack.c.bf16 %v15874_v29, %v15871_v55  ;;  %v5019_v1 = vrot.slane %v15865_v43, 7  ;;  %11769 = vmatpush3.bf16.msra.mxu0 %v12350_v30  ;;  %11549 = vmatmul.mubr.bf16.gmra.mxu1 %v16040_v33  ;;  %v5409_v14 = vsel %vm406_vm1, %v5300_v50, %v5113_v41  ;;  %v5082_v56 = vsel %vm212_vm0, %v5018_v53, %v5050_v61 }
 0x49e   :  { %20385 = vst [vmem:[#allocation71_spill] sm:$0xff] %v16131_v31  ;;  %20386 = vst [vmem:[#allocation85_spill] sm:$0xff] %v16138_v5  ;;  %v5114_v47 = vsel %vm212_vm0, %v5050_v61, %v5018_v53  ;;  %v5051_v4 = vrot.slane %v15868_v23, 7  ;;  %11770 = vmatprep.subr.bf16.mxu0 %v12352_v26  ;;  %11552 = vmatprep.mubr.bf16.mxu1 %v16044_v3  ;;  %v16158_v6 = vpack.c.bf16 %v5081_v25, %v5409_v14  ;;  %v12347_v25 = vld [vmem:[#allocation8 + $0x88] sm:$0xff]  }
 0x49f   :  { %20387 = vst [vmem:[#allocation86_spill] sm:$0xff] %v16146_v10  ;;  %v5411_v30 = vsel %vm406_vm1, %v5304_v49, %v5114_v47  ;;  %v5308_v50 = vrot.slane %v15865_v43, %v20363_v32  ;;  %v5020_v41 = vrot.slane %v15871_v55, 7  ;;  %11693 = vmatpush3.bf16.msra.mxu1 %v12345_v39  ;;  %v5052_v14 = vrot.slane %v15874_v29, 7 }
 0x4a0   :  { %20388 = vst [vmem:[#allocation114_spill] sm:$0xff] %v16158_v6  ;;  %v16165_v33 = vpack.c.bf16 %v5082_v56, %v5411_v30  ;;  %v5083_v53 = vsel %vm212_vm0, %v5019_v1, %v5051_v4  ;;  %v5115_v61 = vsel %vm212_vm0, %v5051_v4, %v5019_v1  ;;  %11694 = vmatprep.subr.bf16.mxu1 %v12346_v51  ;;  %v5053_v29 = vrot.slane %v15880_v8, 7 }
 0x4a1   :  { %v5413_v47 = vsel %vm406_vm1, %v5308_v50, %v5115_v61  ;;  %v5312_v49 = vrot.slane %v15871_v55, %v20363_v32  ;;  %v16178_v56 = vpack.c.bf16 %v15880_v8, %v15877_v34  ;;  %v16182_v39 = vpack.c.bf16 %v15886_v63, %v15883_v20  ;;  %11771 = vmatpush3.bf16.msra.mxu0 %v12352_v26  ;;  %v12354_v61 = vld [vmem:[#allocation8 + $0xd0] sm:$0xff]  }
 0x4a2   :  { %20389 = vst [vmem:[#allocation87_spill] sm:$0xff] %v16165_v33  ;;  %v16184_v1 = vpack.c.bf16 %v5083_v53, %v5413_v47  ;;  %v5084_v4 = vsel %vm212_vm0, %v5020_v41, %v5052_v14  ;;  %v5116_v30 = vsel %vm212_vm0, %v5052_v14, %v5020_v41  ;;  %v5021_v50 = vrot.slane %v15877_v34, 7  ;;  %11772 = vmatprep.subr.bf16.mxu0 %v12353_v44 }
 0x4a3   :  { %20390 = vst [vmem:[#allocation88_spill] sm:$0xff] %v16178_v56  ;;  %20391 = vst [vmem:[#allocation115_spill] sm:$0xff] %v16182_v39  ;;  %11629 = vmatmul.mubr.bf16.gmra.mxu0 %v16090_v15  ;;  %v5415_v3 = vsel %vm406_vm1, %v5312_v49, %v5116_v30  ;;  %v5316_v26 = vrot.slane %v15877_v34, %v20363_v32  ;;  %v5022_v53 = vrot.slane %v15883_v20, 7  ;;  %11695 = vmatpush3.bf16.msra.mxu1 %v12346_v51  ;;  %v12351_v30 = vld [vmem:[#allocation8 + $0x80] sm:$0xff]  }
 0x4a4   :  { %20392 = vst [vmem:[#allocation77_spill] sm:$0xff] %v16184_v1  ;;  %11632 = vmatprep.mubr.bf16.mxu0 %v16097_v60  ;;  %v16199_v41 = vpack.c.bf16 %v5084_v4, %v5415_v3  ;;  %v5054_v14 = vrot.slane %v15886_v63, 7  ;;  %v5320_v47 = vrot.slane %v15883_v20, %v20363_v32  ;;  %v16206_v49 = vpack.c.bf16 %v15892_v18, %v15889_v28 }
 0x4a5   :  { %11696 = vmatprep.subr.bf16.mxu1 %v12347_v25  ;;  %v5085_v15 = vsel %vm212_vm0, %v5021_v50, %v5053_v29  ;;  %v5117_v51 = vsel %vm212_vm0, %v5053_v29, %v5021_v50  ;;  %v16214_v3 = vpack.c.bf16 %v15910_v22, %v15907_v27  ;;  %v5023_v4 = vrot.slane %v15889_v28, 7  ;;  %11773 = vmatpush3.bf16.msra.mxu0 %v12353_v44  ;;  %v12355_v50 = vld [vmem:[#allocation8 + $0xc8] sm:$0xff]  }
 0x4a6   :  { %20393 = vst [vmem:[#allocation89_spill] sm:$0xff] %v16199_v41  ;;  %20394 = vst [vmem:[#allocation90_spill] sm:$0xff] %v16206_v49  ;;  %11553 = vmatmul.mubr.bf16.gmra.mxu1 %v16069_v21  ;;  %v5417_v60 = vsel %vm406_vm1, %v5316_v26, %v5117_v51  ;;  %v5086_v63 = vsel %vm212_vm0, %v5022_v53, %v5054_v14  ;;  %v5118_v20 = vsel %vm212_vm0, %v5054_v14, %v5022_v53 }
 0x4a7   :  { %20395 = vst [vmem:[#allocation79_spill] sm:$0xff] %v16214_v3  ;;  %v5055_v29 = vrot.slane %v15892_v18, 7  ;;  %11774 = vmatprep.subr.bf16.mxu0 %v12354_v61  ;;  %11556 = vmatprep.mubr.bf16.mxu1 %v16077_v2  ;;  %v16226_v8 = vpack.c.bf16 %v5085_v15, %v5417_v60  ;;  %v5419_v44 = vsel %vm406_vm1, %v5320_v47, %v5118_v20  ;;  %v5025_v51 = vrot.slane %v15907_v27, 7  ;;  %v20398_v47 = vld [vmem:[#allocation33_spill] sm:$0xff]  ;;  %v20405_v18 = vld [vmem:[#allocation34_spill] sm:$0xff] }
 0x4a8   :  { %v5324_v26 = vrot.slane %v15889_v28, %v20363_v32  ;;  %11697 = vmatpush3.bf16.msra.mxu1 %v12347_v25  ;;  %v16233_v21 = vpack.c.bf16 %v5086_v63, %v5419_v44  ;;  %v5057_v60 = vrot.slane %v15910_v22, 7  ;;  %v5332_v20 = vrot.slane %v15907_v27, %v20363_v32  ;;  %v16249_v44 = vld [vmem:[#allocation8 + $0x138] sm:$0xff]   ;;  %v20406_v28 = vld [vmem:[#allocation32_spill] sm:$0xff] }
 0x4a9   :  { %20396 = vst [vmem:[#allocation118_spill] sm:$0xff] %v16226_v8  ;;  %v5087_v53 = vsel %vm212_vm0, %v5023_v4, %v5055_v29  ;;  %v5119_v14 = vsel %vm212_vm0, %v5055_v29, %v5023_v4  ;;  %11698 = vmatprep.subr.bf16.mxu1 %v12351_v30  ;;  %v16246_v25 = vpack.c.bf16 %v20398_v47, %v15901_v9  ;;  %v5026_v63 = vrot.slane %v15901_v9, 7 }
 0x4aa   :  { %20397 = vst [vmem:[#allocation91_spill] sm:$0xff] %v16233_v21  ;;  %v5421_v15 = vsel %vm406_vm1, %v5324_v26, %v5119_v14  ;;  %11775 = vmatpush3.bf16.msra.mxu0 %v12354_v61  ;;  %20400 = vst [vmem:[#allocation92_spill] sm:$0xff] %v16249_v44  ;;  %v5089_v4 = vsel %vm212_vm0, %v5025_v51, %v5057_v60  ;;  %v5121_v29 = vsel %vm212_vm0, %v5057_v60, %v5025_v51  ;;  %v12356_v14 = vld [vmem:[#allocation8 + $0xc0] sm:$0xff]  }
 0x4ab   :  { %20399 = vst [vmem:[#allocation18_spill] sm:$0xff] %v16246_v25  ;;  %v16251_v2 = vpack.c.bf16 %v5087_v53, %v5421_v15  ;;  %v5058_v26 = vrot.slane %v20398_v47, 7  ;;  %11776 = vmatprep.subr.bf16.mxu0 %v12355_v50  ;;  %11633 = vmatmul.mubr.bf16.gmra.mxu0 %v16116_v40  ;;  %v5425_v22 = vsel %vm406_vm1, %v5332_v20, %v5121_v29  ;;  %v20402_v53 = vld [vmem:[#allocation64_spill] sm:$0xff]  ;;  %v20403_v15 = vld [vmem:[#allocation65_spill] sm:$0xff] }
 0x4ac   :  { %v5336_v61 = vrot.slane %v15901_v9, %v20363_v32  ;;  %v16265_v27 = vpack.c.bf16 %v20403_v15, %v20402_v53  ;;  %v16269_v34 = vpack.c.bf16 %v20406_v28, %v20405_v18  ;;  %11636 = vmatprep.mubr.bf16.mxu0 %v16131_v31  ;;  %v16272_v51 = vpack.c.bf16 %v5089_v4, %v5425_v22 }
 0x4ad   :  { %20401 = vst [vmem:[#allocation19_spill] sm:$0xff] %v16251_v2  ;;  %v5090_v60 = vsel %vm212_vm0, %v5026_v63, %v5058_v26  ;;  %v5122_v20 = vsel %vm212_vm0, %v5058_v26, %v5026_v63  ;;  %v5027_v29 = vrot.slane %v20402_v53, 7  ;;  %11699 = vmatpush3.bf16.msra.mxu1 %v12351_v30  ;;  %v5059_v47 = vrot.slane %v20403_v15, 7  ;;  %v20409_v26 = vld [vmem:[#allocation53_spill] sm:$0xff] }
 0x4ae   :  { %20404 = vst [vmem:[#allocation82_spill] sm:$0xff] %v16265_v27  ;;  %20407 = vst [vmem:[#allocation21_spill] sm:$0xff] %v16269_v34  ;;  %v5427_v40 = vsel %vm406_vm1, %v5336_v61, %v5122_v20  ;;  %v5340_v9 = vrot.slane %v20402_v53, %v20363_v32  ;;  %v5028_v22 = vrot.slane %v20405_v18, 7  ;;  %11777 = vmatpush3.bf16.msra.mxu0 %v12355_v50  ;;  %11844 = vmatprep.subr.bf16.mxu1 %v16249_v44 }
 0x4af   :  { %20408 = vst [vmem:[#allocation93_spill] sm:$0xff] %v16272_v51  ;;  %11557 = vmatmul.mubr.bf16.gmra.mxu1 %v16110_v54  ;;  %v16287_v4 = vpack.c.bf16 %v5090_v60, %v5427_v40  ;;  %v5060_v63 = vrot.slane %v20406_v28, 7  ;;  %v5344_v30 = vrot.slane %v20405_v18, %v20363_v32  ;;  %v16294_v61 = vpack.c.bf16 %v20409_v26, %v15925_v42  ;;  %v20411_v40 = vld [vmem:[#allocation55_spill] sm:$0xff] }
 0x4b0   :  { %11778 = vmatprep.subr.bf16.mxu0 %v12356_v14  ;;  %11560 = vmatprep.mubr.bf16.mxu1 %v16114_v46  ;;  %v5091_v50 = vsel %vm212_vm0, %v5027_v29, %v5059_v47  ;;  %v5123_v20 = vsel %vm212_vm0, %v5059_v47, %v5027_v29  ;;  %v16303_v60 = vpack.c.bf16 %v20411_v40, %v15931_v11  ;;  %v5029_v54 = vrot.slane %v15925_v42, 7 }
 0x4b1   :  { %20410 = vst [vmem:[#allocation94_spill] sm:$0xff] %v16294_v61  ;;  %v5429_v31 = vsel %vm406_vm1, %v5340_v9, %v5123_v20  ;;  %v5092_v44 = vsel %vm212_vm0, %v5028_v22, %v5060_v63  ;;  %v5124_v46 = vsel %vm212_vm0, %v5060_v63, %v5028_v22  ;;  %v5061_v28 = vrot.slane %v20409_v26, 7 }
 0x4b2   :  { %20412 = vst [vmem:[#allocation17_spill] sm:$0xff] %v16303_v60  ;;  %v16313_v18 = vpack.c.bf16 %v5091_v50, %v5429_v31  ;;  %v5431_v47 = vsel %vm406_vm1, %v5344_v30, %v5124_v46  ;;  %v5348_v29 = vrot.slane %v15925_v42, %v20363_v32  ;;  %v5030_v15 = vrot.slane %v15931_v11, 7  ;;  %11779 = vmatpush3.bf16.msra.mxu0 %v12356_v14 }
 0x4b3   :  { %v16320_v9 = vpack.c.bf16 %v5092_v44, %v5431_v47  ;;  %v5093_v20 = vsel %vm212_vm0, %v5029_v54, %v5061_v28  ;;  %v5125_v22 = vsel %vm212_vm0, %v5061_v28, %v5029_v54  ;;  %v5062_v31 = vrot.slane %v20411_v40, 7  ;;  %11637 = vmatmul.mubr.bf16.gmra.mxu0 %v16158_v6 }
 0x4b4   :  { %20413 = vst [vmem:[#allocation95_spill] sm:$0xff] %v16313_v18  ;;  %v5433_v46 = vsel %vm406_vm1, %v5348_v29, %v5125_v22  ;;  %v5352_v63 = vrot.slane %v15931_v11, %v20363_v32  ;;  %v16334_v44 = vpack.c.bf16 %v15940_v45, %v15937_v17  ;;  %v16338_v14 = vpack.c.bf16 %v15944_v24, %v15942_v36 }
 0x4b5   :  { %20414 = vst [vmem:[#allocation134_spill] sm:$0xff] %v16320_v9  ;;  %11640 = vmatprep.mubr.bf16.mxu0 %v16165_v33  ;;  %v16341_v28 = vpack.c.bf16 %v5093_v20, %v5433_v46  ;;  %v5094_v54 = vsel %vm212_vm0, %v5030_v15, %v5062_v31  ;;  %v5126_v30 = vsel %vm212_vm0, %v5062_v31, %v5030_v15  ;;  %v5031_v50 = vrot.slane %v15937_v17, 7 }
 0x4b6   :  { %20415 = vst [vmem:[#allocation101_spill] sm:$0xff] %v16334_v44  ;;  %20416 = vst [vmem:[#allocation102_spill] sm:$0xff] %v16338_v14  ;;  %v5435_v47 = vsel %vm406_vm1, %v5352_v63, %v5126_v30  ;;  %v5063_v29 = vrot.slane %v15940_v45, 7  ;;  %v5356_v22 = vrot.slane %v15937_v17, %v20363_v32  ;;  %v5032_v33 = vrot.slane %v15942_v36, 7 }
 0x4b7   :  { %20417 = vst [vmem:[#allocation103_spill] sm:$0xff] %v16341_v28  ;;  %11561 = vmatmul.mubr.bf16.gmra.mxu1 %v16138_v5  ;;  %v16355_v20 = vpack.c.bf16 %v5094_v54, %v5435_v47  ;;  %v5064_v46 = vrot.slane %v15944_v24, 7  ;;  %v5360_v15 = vrot.slane %v15942_v36, %v20363_v32  ;;  %v16362_v31 = vpack.c.bf16 %v15948_v35, %v15946_v37 }
 0x4b8   :  { %11564 = vmatprep.mubr.bf16.mxu1 %v16146_v10  ;;  %v5095_v63 = vsel %vm212_vm0, %v5031_v50, %v5063_v29  ;;  %v5127_v30 = vsel %vm212_vm0, %v5063_v29, %v5031_v50  ;;  %v16371_v54 = vpack.c.bf16 %v15952_v38, %v15950_v0  ;;  %v5033_v47 = vrot.slane %v15946_v37, 7 }
 0x4b9   :  { %20418 = vst [vmem:[#allocation23_spill] sm:$0xff] %v16355_v20  ;;  %20419 = vst [vmem:[#allocation22_spill] sm:$0xff] %v16362_v31  ;;  %v5437_v5 = vsel %vm406_vm1, %v5356_v22, %v5127_v30  ;;  %v5096_v6 = vsel %vm212_vm0, %v5032_v33, %v5064_v46  ;;  %v5128_v10 = vsel %vm212_vm0, %v5064_v46, %v5032_v33  ;;  %v5065_v31 = vrot.slane %v15948_v35, 7 }
 0x4ba   :  { %20420 = vst [vmem:[#allocation119_spill] sm:$0xff] %v16371_v54  ;;  %v16381_v24 = vpack.c.bf16 %v5095_v63, %v5437_v5  ;;  %v5439_v50 = vsel %vm406_vm1, %v5360_v15, %v5128_v10  ;;  %v5364_v29 = vrot.slane %v15946_v37, %v20363_v32  ;;  %v5034_v54 = vrot.slane %v15950_v0, 7  ;;  %v20424_v15 = vld [vmem:[#allocation104_spill] sm:$0xff] }
 0x4bb   :  { %v16388_v36 = vpack.c.bf16 %v5096_v6, %v5439_v50  ;;  %v5097_v22 = vsel %vm212_vm0, %v5033_v47, %v5065_v31  ;;  %v5129_v33 = vsel %vm212_vm0, %v5065_v31, %v5033_v47  ;;  %v5066_v46 = vrot.slane %v15952_v38, 7  ;;  %11641 = vmatmul.mubr.bf16.gmra.mxu0 %v16184_v1 }
 0x4bc   :  { %20421 = vst [vmem:[#allocation60_spill] sm:$0xff] %v16381_v24  ;;  %v5441_v5 = vsel %vm406_vm1, %v5364_v29, %v5129_v33  ;;  %v5368_v10 = vrot.slane %v15950_v0, %v20363_v32  ;;  %v16402_v6 = vpack.c.bf16 %v15956_v19, %v15954_v7  ;;  %v16406_v63 = vpack.c.bf16 %v20424_v15, %v15958_v58 }
 0x4bd   :  { %20422 = vst [vmem:[#allocation62_spill] sm:$0xff] %v16388_v36  ;;  %11644 = vmatprep.mubr.bf16.mxu0 %v16199_v41  ;;  %v16409_v31 = vpack.c.bf16 %v5097_v22, %v5441_v5  ;;  %v5098_v30 = vsel %vm212_vm0, %v5034_v54, %v5066_v46  ;;  %v5130_v47 = vsel %vm212_vm0, %v5066_v46, %v5034_v54  ;;  %v5035_v50 = vrot.slane %v15954_v7, 7  ;;  %v20428_v46 = vld [vmem:[#allocation59_spill] sm:$0xff] }
 0x4be   :  { %20423 = vst [vmem:[#allocation108_spill] sm:$0xff] %v16402_v6  ;;  %20425 = vst [vmem:[#allocation109_spill] sm:$0xff] %v16406_v63  ;;  %v5443_v29 = vsel %vm406_vm1, %v5368_v10, %v5130_v47  ;;  %v5067_v33 = vrot.slane %v15956_v19, 7  ;;  %v5372_v1 = vrot.slane %v15954_v7, %v20363_v32  ;;  %v5036_v41 = vrot.slane %v15958_v58, 7  ;;  %v20429_v63 = vld [vmem:[#allocation36_spill] sm:$0xff] }
 0x4bf   :  { %20426 = vst [vmem:[#allocation112_spill] sm:$0xff] %v16409_v31  ;;  %11565 = vmatmul.mubr.bf16.gmra.mxu1 %v16178_v56  ;;  %v16423_v22 = vpack.c.bf16 %v5098_v30, %v5443_v29  ;;  %v5068_v5 = vrot.slane %v20424_v15, 7  ;;  %v5376_v54 = vrot.slane %v15958_v58, %v20363_v32  ;;  %v16430_v6 = vpack.c.bf16 %v20429_v63, %v20428_v46  ;;  %v20431_v56 = vld [vmem:[#allocation39_spill] sm:$0xff]  ;;  %v20432_v30 = vld [vmem:[#allocation105_spill] sm:$0xff] }
 0x4c0   :  { %11568 = vmatprep.mubr.bf16.mxu1 %v16182_v39  ;;  %v5099_v10 = vsel %vm212_vm0, %v5035_v50, %v5067_v33  ;;  %v5131_v47 = vsel %vm212_vm0, %v5067_v33, %v5035_v50  ;;  %v16439_v29 = vpack.c.bf16 %v20432_v30, %v20431_v56  ;;  %v5037_v15 = vrot.slane %v20428_v46, 7 }
 0x4c1   :  { %20427 = vst [vmem:[#allocation113_spill] sm:$0xff] %v16423_v22  ;;  %20430 = vst [vmem:[#allocation116_spill] sm:$0xff] %v16430_v6  ;;  %v5445_v58 = vsel %vm406_vm1, %v5372_v1, %v5131_v47  ;;  %v5100_v6 = vsel %vm212_vm0, %v5036_v41, %v5068_v5  ;;  %v5132_v39 = vsel %vm212_vm0, %v5068_v5, %v5036_v41  ;;  %v5069_v22 = vrot.slane %v20429_v63, 7  ;;  %v20439_v47 = vld [vmem:[#allocation27_spill] sm:$0xff] }
 0x4c2   :  { %20433 = vst [vmem:[#allocation20_spill] sm:$0xff] %v16439_v29  ;;  %v16449_v19 = vpack.c.bf16 %v5099_v10, %v5445_v58  ;;  %v5447_v50 = vsel %vm406_vm1, %v5376_v54, %v5132_v39  ;;  %v5380_v33 = vrot.slane %v20428_v46, %v20363_v32  ;;  %v5038_v29 = vrot.slane %v20431_v56, 7  ;;  %v20436_v54 = vld [vmem:[#allocation70_spill] sm:$0xff]  ;;  %v20437_v10 = vld [vmem:[#allocation35_spill] sm:$0xff] }
 0x4c3   :  { %v16456_v31 = vpack.c.bf16 %v5100_v6, %v5447_v50  ;;  %v5101_v1 = vsel %vm212_vm0, %v5037_v15, %v5069_v22  ;;  %v5133_v41 = vsel %vm212_vm0, %v5069_v22, %v5037_v15  ;;  %v5070_v5 = vrot.slane %v20432_v30, 7  ;;  %11645 = vmatmul.mubr.bf16.gmra.mxu0 %v16226_v8 }
 0x4c4   :  { %20434 = vst [vmem:[#allocation97_spill] sm:$0xff] %v16449_v19  ;;  %v5449_v58 = vsel %vm406_vm1, %v5380_v33, %v5133_v41  ;;  %v5384_v39 = vrot.slane %v20431_v56, %v20363_v32  ;;  %v16470_v6 = vpack.c.bf16 %v20437_v10, %v20436_v54  ;;  %v5137_v50 = vrot.slane %v20439_v47, 1  ;;  %11648 = vmatprep.mubr.bf16.mxu0 %v16233_v21  ;;  %v20441_v33 = vld [vmem:[#allocation122_spill] sm:$0xff]  ;;  %v20442_v19 = vld [vmem:[#allocation73_spill] sm:$0xff] }
 0x4c5   :  { %20435 = vst [vmem:[#allocation98_spill] sm:$0xff] %v16456_v31  ;;  %v16474_v31 = vpack.c.bf16 %v5101_v1, %v5449_v58  ;;  %v5102_v15 = vsel %vm212_vm0, %v5038_v29, %v5070_v5  ;;  %v5134_v22 = vsel %vm212_vm0, %v5070_v5, %v5038_v29  ;;  %v5169_v41 = vrot.slane %v20441_v33, 1 }
 0x4c6   :  { %20438 = vst [vmem:[#allocation99_spill] sm:$0xff] %v16470_v6  ;;  %v5451_v8 = vsel %vm406_vm1, %v5384_v39, %v5134_v22  ;;  %v5460_v6 = vrot.slane %v20441_v33, %v20442_v19  ;;  %v5039_v47 = vrot.slane %v20436_v54, 7  ;;  %v5071_v21 = vrot.slane %v20437_v10, 7  ;;  %v20536_v39 = vld [vmem:[#allocation92_spill] sm:$0xff] }
 0x4c7   :  { %20440 = vst [vmem:[#allocation100_spill] sm:$0xff] %v16474_v31  ;;  %11569 = vmatmul.mubr.bf16.gmra.mxu1 %v16206_v49  ;;  %v16488_v1 = vpack.c.bf16 %v5102_v15, %v5451_v8  ;;  %v5201_v58 = vsel %vm341_vm2, %v5137_v50, %v5169_v41  ;;  %v5233_v29 = vsel %vm341_vm2, %v5169_v41, %v5137_v50  ;;  %v20445_v15 = vld [vmem:[#allocation47_spill] sm:$0xff] }
 0x4c8   :  { %v5388_v5 = vrot.slane %v20436_v54, %v20363_v32  ;;  %11572 = vmatprep.mubr.bf16.mxu1 %v16214_v3  ;;  %v5586_v22 = vsel %vm605_vm3, %v5460_v6, %v5233_v29  ;;  %v5103_v33 = vsel %vm212_vm0, %v5039_v47, %v5071_v21  ;;  %v5135_v8 = vsel %vm212_vm0, %v5071_v21, %v5039_v47 }
 0x4c9   :  { %20443 = vst [vmem:[#allocation30_spill] sm:$0xff] %v16488_v1  ;;  %v20446_v49 = vrot.slane %v20445_v15, 1  ;;  %v20447_v1 = vld [vmem:[#allocation44_spill] sm:$0xff]  ;;  %v16509_v41 = vpack.c.bf16 %v5586_v22, %v5201_v58  ;;  %v5139_v21 = vrot.slane %v15817_v16, 1  ;;  %v20453_v30 = vrot.slane %v20445_v15, %v20442_v19 }
 0x4ca   :  { %v20448_v31 = vrot.slane %v20447_v1, 1  ;;  %v5453_v10 = vsel %vm406_vm1, %v5388_v5, %v5135_v8  ;;  %v5468_v1 = vrot.slane %v15820_v12, %v20442_v19  ;;  %v5140_v5 = vrot.slane %v15823_v62, 1  ;;  %v20454_v22 = vld [vmem:[#allocation96_spill] sm:$0xff] }
 0x4cb   :  { %20449 = vst [vmem:[#allocation40_spill] sm:$0xff] %v16509_v41  ;;  %v20451_v29 = vmov %v20446_v49  ;;  %v16520_v47 = vpack.c.bf16 %v5103_v33, %v5453_v10  ;;  %v5172_v8 = vrot.slane %v20454_v22, 1  ;;  %v5472_v16 = vrot.slane %v20454_v22, %v20442_v19  ;;  %11649 = vmatmul.mubr.bf16.gmra.mxu0 %v16251_v2 }
 0x4cc   :  { %v5202_v50 = vsel %vm341_vm2, %v20448_v31, %v20446_v49  ;;  %v20450_v6 = vmov %v20448_v31  ;;  %v5171_v31 = vrot.slane %v15820_v12, 1  ;;  %v20456_v12 = vld [vmem:[#allocation123_spill] sm:$0xff]  ;;  %11652 = vmatprep.mubr.bf16.mxu0 %v16272_v51 }
 0x4cd   :  { %v5234_v54 = vsel %vm341_vm2, %v20451_v29, %v20450_v6  ;;  %20452 = vst [vmem:[#allocation38_spill] sm:$0xff] %v16520_v47  ;;  %v5173_v15 = vrot.slane %v20456_v12, 1  ;;  %v5236_v6 = vsel %vm341_vm2, %v5172_v8, %v5140_v5  ;;  %v5476_v29 = vrot.slane %v20456_v12, %v20442_v19 }
 0x4ce   :  { %v5588_v49 = vsel %vm605_vm3, %v20453_v30, %v5234_v54  ;;  %v5203_v10 = vsel %vm341_vm2, %v5139_v21, %v5171_v31  ;;  %v5235_v30 = vsel %vm341_vm2, %v5171_v31, %v5139_v21  ;;  %v20455_v54 = vld [vmem:[#allocation48_spill] sm:$0xff]  ;;  %v5592_v21 = vsel %vm605_vm3, %v5472_v16, %v5236_v6 }
 0x4cf   :  { %v16530_v58 = vpack.c.bf16 %v5588_v49, %v5202_v50  ;;  %v5141_v33 = vrot.slane %v20455_v54, 1  ;;  %v5590_v62 = vsel %vm605_vm3, %v5468_v1, %v5235_v30  ;;  %v5204_v50 = vsel %vm341_vm2, %v5140_v5, %v5172_v8  ;;  %11573 = vmatmul.mubr.bf16.gmra.mxu1 %v16246_v25  ;;  %v20459_v8 = vld [vmem:[#allocation124_spill] sm:$0xff] }
 0x4d0   :  { %v16552_v49 = vpack.c.bf16 %v5590_v62, %v5203_v10  ;;  %v16561_v22 = vpack.c.bf16 %v5592_v21, %v5204_v50  ;;  %v5142_v30 = vrot.slane %v20459_v8, 1  ;;  %v20460_v10 = vld [vmem:[#allocation135_spill] sm:$0xff]  ;;  %11576 = vmatprep.mubr.bf16.mxu1 %v16214_v3  ;;  %v5484_v6 = vrot.slane %v15844_v57, %v20442_v19 }
 0x4d1   :  { %v5205_v31 = vsel %vm341_vm2, %v5141_v33, %v5173_v15  ;;  %v5237_v1 = vsel %vm341_vm2, %v5173_v15, %v5141_v33  ;;  %v5174_v54 = vrot.slane %v20460_v10, 1  ;;  %v5480_v12 = vrot.slane %v20460_v10, %v20442_v19 }
 0x4d2   :  { %20457 = vst [vmem:[#allocation43_spill] sm:$0xff] %v16552_v49  ;;  %20458 = vst [vmem:[#allocation42_spill] sm:$0xff] %v16561_v22  ;;  %v5594_v5 = vsel %vm605_vm3, %v5476_v29, %v5237_v1  ;;  %v5143_v33 = vrot.slane %v15841_v48, 1  ;;  %v5175_v15 = vrot.slane %v15844_v57, 1  ;;  %v5144_v29 = vrot.slane %v15847_v59, 1  ;;  %v20462_v1 = vld [vmem:[#allocation136_spill] sm:$0xff] }
 0x4d3   :  { %v16568_v16 = vpack.c.bf16 %v5594_v5, %v5205_v31  ;;  %v5206_v62 = vsel %vm341_vm2, %v5142_v30, %v5174_v54  ;;  %v5238_v50 = vsel %vm341_vm2, %v5174_v54, %v5142_v30  ;;  %v5176_v5 = vrot.slane %v20462_v1, 1  ;;  %11653 = vmatmul.mubr.bf16.gmra.mxu0 %v16287_v4 }
 0x4d4   :  { %v5596_v21 = vsel %vm605_vm3, %v5480_v12, %v5238_v50  ;;  %v5207_v31 = vsel %vm341_vm2, %v5143_v33, %v5175_v15  ;;  %v5239_v48 = vsel %vm341_vm2, %v5175_v15, %v5143_v33  ;;  %v5488_v57 = vrot.slane %v20462_v1, %v20442_v19  ;;  %v20465_v33 = vld [vmem:[#allocation49_spill] sm:$0xff]  ;;  %11656 = vmatprep.mubr.bf16.mxu0 %v16272_v51 }
 0x4d5   :  { %20461 = vst [vmem:[#allocation132_spill] sm:$0xff] %v16568_v16  ;;  %v16588_v8 = vpack.c.bf16 %v5596_v21, %v5206_v62  ;;  %v5598_v30 = vsel %vm605_vm3, %v5484_v6, %v5239_v48  ;;  %v5145_v59 = vrot.slane %v15853_v13, 1  ;;  %v5208_v54 = vsel %vm341_vm2, %v5144_v29, %v5176_v5  ;;  %v20466_v50 = vld [vmem:[#allocation29_spill] sm:$0xff]  ;;  %v20467_v21 = vld [vmem:[#allocation28_spill] sm:$0xff] }
 0x4d6   :  { %v16596_v10 = vpack.c.bf16 %v5598_v30, %v5207_v31  ;;  %v5240_v12 = vsel %vm341_vm2, %v5176_v5, %v5144_v29  ;;  %v5177_v15 = vrot.slane %v20465_v33, 1  ;;  %v5492_v13 = vrot.slane %v20465_v33, %v20442_v19 }
 0x4d7   :  { %20463 = vst [vmem:[#allocation120_spill] sm:$0xff] %v16588_v8  ;;  %v5600_v62 = vsel %vm605_vm3, %v5488_v57, %v5240_v12  ;;  %v5146_v6 = vrot.slane %v20466_v50, 1  ;;  %v5178_v31 = vrot.slane %v20467_v21, 1  ;;  %v5496_v5 = vrot.slane %v20467_v21, %v20442_v19  ;;  %11577 = vmatmul.mubr.bf16.gmra.mxu1 %v16265_v27  ;;  %v20471_v21 = vld [vmem:[#allocation50_spill] sm:$0xff] }
 0x4d8   :  { %20464 = vst [vmem:[#allocation130_spill] sm:$0xff] %v16596_v10  ;;  %v16610_v48 = vpack.c.bf16 %v5600_v62, %v5208_v54  ;;  %v5209_v1 = vsel %vm341_vm2, %v5145_v59, %v5177_v15  ;;  %v5241_v29 = vsel %vm341_vm2, %v5177_v15, %v5145_v59  ;;  %v5147_v12 = vrot.slane %v15865_v43, 1  ;;  %11580 = vmatprep.mubr.bf16.mxu1 %v16269_v34  ;;  %v20480_v27 = vld [vmem:[#allocation46_spill] sm:$0xff] }
 0x4d9   :  { %v5602_v30 = vsel %vm605_vm3, %v5492_v13, %v5241_v29  ;;  %v5210_v57 = vsel %vm341_vm2, %v5146_v6, %v5178_v31  ;;  %v5242_v54 = vsel %vm341_vm2, %v5178_v31, %v5146_v6  ;;  %v5179_v15 = vrot.slane %v15868_v23, 1  ;;  %v20472_v29 = vld [vmem:[#allocation52_spill] sm:$0xff] }
 0x4da   :  { %20468 = vst [vmem:[#allocation131_spill] sm:$0xff] %v16610_v48  ;;  %v16627_v33 = vpack.c.bf16 %v5602_v30, %v5209_v1  ;;  %v5604_v59 = vsel %vm605_vm3, %v5496_v5, %v5242_v54  ;;  %v5500_v62 = vrot.slane %v15868_v23, %v20442_v19  ;;  %v5148_v50 = vrot.slane %v15871_v55, 1  ;;  %v20473_v30 = vld [vmem:[#allocation56_spill] sm:$0xff] }
 0x4db   :  { %v16634_v13 = vpack.c.bf16 %v5604_v59, %v5210_v57  ;;  %v5180_v6 = vrot.slane %v20471_v21, 1  ;;  %v5504_v43 = vrot.slane %v20471_v21, %v20442_v19  ;;  %v5211_v31 = vsel %vm341_vm2, %v5147_v12, %v5179_v15  ;;  %11657 = vmatmul.mubr.bf16.gmra.mxu0 %v16313_v18 }
 0x4dc   :  { %20469 = vst [vmem:[#allocation133_spill] sm:$0xff] %v16627_v33  ;;  %v5243_v1 = vsel %vm341_vm2, %v5179_v15, %v5147_v12  ;;  %v5149_v5 = vrot.slane %v20472_v29, 1  ;;  %v5181_v54 = vrot.slane %v20473_v30, 1  ;;  %v5508_v59 = vrot.slane %v20473_v30, %v20442_v19  ;;  %11660 = vmatprep.mubr.bf16.mxu0 %v16320_v9 }
 0x4dd   :  { %20470 = vst [vmem:[#allocation25_spill] sm:$0xff] %v16634_v13  ;;  %v5606_v23 = vsel %vm605_vm3, %v5500_v62, %v5243_v1  ;;  %v5212_v55 = vsel %vm341_vm2, %v5148_v50, %v5180_v6  ;;  %v5244_v57 = vsel %vm341_vm2, %v5180_v6, %v5148_v50  ;;  %v20476_v6 = vld [vmem:[#allocation31_spill] sm:$0xff] }
 0x4de   :  { %v16655_v21 = vpack.c.bf16 %v5606_v23, %v5211_v31  ;;  %v5608_v12 = vsel %vm605_vm3, %v5504_v43, %v5244_v57  ;;  %v5213_v15 = vsel %vm341_vm2, %v5149_v5, %v5181_v54  ;;  %v5245_v62 = vsel %vm341_vm2, %v5181_v54, %v5149_v5  ;;  %v20477_v31 = vld [vmem:[#allocation26_spill] sm:$0xff] }
 0x4df   :  { %v16664_v1 = vpack.c.bf16 %v5608_v12, %v5212_v55  ;;  %v5610_v50 = vsel %vm605_vm3, %v5508_v59, %v5245_v62  ;;  %v5150_v29 = vrot.slane %v20476_v6, 1  ;;  %v5182_v30 = vrot.slane %v20477_v31, 1  ;;  %v20479_v57 = vld [vmem:[#allocation54_spill] sm:$0xff]  ;;  %11581 = vmatmul.mubr.bf16.gmra.mxu1 %v16294_v61 }
 0x4e0   :  { %20474 = vst [vmem:[#allocation24_spill] sm:$0xff] %v16655_v21  ;;  %v16670_v23 = vpack.c.bf16 %v5610_v50, %v5213_v15  ;;  %v5512_v43 = vrot.slane %v20477_v31, %v20442_v19  ;;  %v5151_v34 = vrot.slane %v20479_v57, 1  ;;  %v5183_v5 = vrot.slane %v20480_v27, 1  ;;  %v20481_v12 = vld [vmem:[#allocation58_spill] sm:$0xff]  ;;  %11584 = vmatprep.mubr.bf16.mxu1 %v16303_v60  ;;  %v20482_v31 = vld [vmem:[#allocation61_spill] sm:$0xff] }
 0x4e1   :  { %20475 = vst [vmem:[#allocation45_spill] sm:$0xff] %v16664_v1  ;;  %v5214_v54 = vsel %vm341_vm2, %v5150_v29, %v5182_v30  ;;  %v5246_v55 = vsel %vm341_vm2, %v5182_v30, %v5150_v29  ;;  %v5516_v59 = vrot.slane %v20480_v27, %v20442_v19  ;;  %v5153_v15 = vrot.slane %v20481_v12, 1  ;;  %v20484_v30 = vld [vmem:[#allocation51_spill] sm:$0xff] }
 0x4e2   :  { %20478 = vst [vmem:[#allocation16_spill] sm:$0xff] %v16670_v23  ;;  %v5612_v62 = vsel %vm605_vm3, %v5512_v43, %v5246_v55  ;;  %v5215_v50 = vsel %vm341_vm2, %v5151_v34, %v5183_v5  ;;  %v5247_v6 = vsel %vm341_vm2, %v5183_v5, %v5151_v34  ;;  %v5185_v57 = vrot.slane %v20482_v31, 1  ;;  %v20486_v5 = vld [vmem:[#allocation57_spill] sm:$0xff] }
 0x4e3   :  { %v16692_v61 = vpack.c.bf16 %v5612_v62, %v5214_v54  ;;  %v5614_v27 = vsel %vm605_vm3, %v5516_v59, %v5247_v6  ;;  %v5524_v29 = vrot.slane %v20482_v31, %v20442_v19  ;;  %v5024_v12 = vrot.slane %v20484_v30, 7  ;;  %v20487_v62 = vld [vmem:[#allocation125_spill] sm:$0xff]  ;;  %11661 = vmatmul.mubr.bf16.gmra.mxu0 %v16341_v28  ;;  %v20493_v28 = vld [vmem:[#allocation32_spill] sm:$0xff] }
 0x4e4   :  { %v16699_v60 = vpack.c.bf16 %v5614_v27, %v5215_v50  ;;  %v5217_v43 = vsel %vm341_vm2, %v5153_v15, %v5185_v57  ;;  %v5249_v34 = vsel %vm341_vm2, %v5185_v57, %v5153_v15  ;;  %v5056_v55 = vrot.slane %v20486_v5, 7  ;;  %v20488_v31 = vld [vmem:[#allocation33_spill] sm:$0xff]  ;;  %11664 = vmatprep.mubr.bf16.mxu0 %v16355_v20 }
 0x4e5   :  { %20483 = vst [vmem:[#allocation107_spill] sm:$0xff] %v16692_v61  ;;  %v5618_v54 = vsel %vm605_vm3, %v5524_v29, %v5249_v34  ;;  %v5328_v59 = vrot.slane %v20484_v30, %v20363_v32  ;;  %v5154_v6 = vrot.slane %v20487_v62, 1  ;;  %v5186_v3 = vrot.slane %v20488_v31, 1 }
 0x4e6   :  { %20485 = vst [vmem:[#allocation121_spill] sm:$0xff] %v16699_v60  ;;  %v16713_v50 = vpack.c.bf16 %v5618_v54, %v5217_v43  ;;  %v5088_v27 = vsel %vm212_vm0, %v5024_v12, %v5056_v55  ;;  %v5120_v15 = vsel %vm212_vm0, %v5056_v55, %v5024_v12  ;;  %v5528_v57 = vrot.slane %v20488_v31, %v20442_v19  ;;  %v20491_v55 = vld [vmem:[#allocation65_spill] sm:$0xff] }
 0x4e7   :  { %v5423_v29 = vsel %vm406_vm1, %v5328_v59, %v5120_v15  ;;  %v5218_v34 = vsel %vm341_vm2, %v5154_v6, %v5186_v3  ;;  %v5250_v43 = vsel %vm341_vm2, %v5186_v3, %v5154_v6  ;;  %v5155_v54 = vrot.slane %v20402_v53, 1  ;;  %11585 = vmatmul.mubr.bf16.gmra.mxu1 %v16334_v44  ;;  %v20492_v15 = vld [vmem:[#allocation34_spill] sm:$0xff] }
 0x4e8   :  { %20489 = vst [vmem:[#allocation64_spill] sm:$0xff] %v16713_v50  ;;  %v16729_v62 = vpack.c.bf16 %v5088_v27, %v5423_v29  ;;  %v5620_v12 = vsel %vm605_vm3, %v5528_v57, %v5250_v43  ;;  %v5187_v31 = vrot.slane %v20491_v55, 1  ;;  %v5532_v25 = vrot.slane %v20491_v55, %v20442_v19  ;;  %11588 = vmatprep.mubr.bf16.mxu1 %v16338_v14  ;;  %v20518_v14 = vld [vmem:[#allocation63_spill] sm:$0xff] }
 0x4e9   :  { %v16737_v59 = vpack.c.bf16 %v5620_v12, %v5218_v34  ;;  %v5156_v20 = vrot.slane %v20492_v15, 1  ;;  %v5188_v3 = vrot.slane %v20493_v28, 1  ;;  %v5536_v53 = vrot.slane %v20493_v28, %v20442_v19 }
 0x4ea   :  { %20490 = vst [vmem:[#allocation53_spill] sm:$0xff] %v16729_v62  ;;  %v5219_v6 = vsel %vm341_vm2, %v5155_v54, %v5187_v31  ;;  %v5251_v27 = vsel %vm341_vm2, %v5187_v31, %v5155_v54  ;;  %v5157_v57 = vrot.slane %v15925_v42, 1  ;;  %v5189_v29 = vrot.slane %v20409_v26, 1 }
 0x4eb   :  { %v5622_v34 = vsel %vm605_vm3, %v5532_v25, %v5251_v27  ;;  %v5220_v43 = vsel %vm341_vm2, %v5156_v20, %v5188_v3  ;;  %v5252_v28 = vsel %vm341_vm2, %v5188_v3, %v5156_v20  ;;  %v5540_v12 = vrot.slane %v20409_v26, %v20442_v19  ;;  %11665 = vmatmul.mubr.bf16.gmra.mxu0 %v16381_v24 }
 0x4ec   :  { %v16758_v55 = vpack.c.bf16 %v5622_v34, %v5219_v6  ;;  %v5624_v54 = vsel %vm605_vm3, %v5536_v53, %v5252_v28  ;;  %v5221_v42 = vsel %vm341_vm2, %v5157_v57, %v5189_v29  ;;  %v5253_v25 = vsel %vm341_vm2, %v5189_v29, %v5157_v57  ;;  %11668 = vmatprep.mubr.bf16.mxu0 %v16388_v36  ;;  %v20497_v34 = vld [vmem:[#allocation66_spill] sm:$0xff] }
 0x4ed   :  { %v16766_v31 = vpack.c.bf16 %v5624_v54, %v5220_v43  ;;  %v5626_v15 = vsel %vm605_vm3, %v5540_v12, %v5253_v25  ;;  %v5158_v20 = vrot.slane %v15931_v11, 1  ;;  %v5190_v26 = vrot.slane %v20411_v40, 1  ;;  %v20498_v12 = vld [vmem:[#allocation126_spill] sm:$0xff] }
 0x4ee   :  { %20494 = vst [vmem:[#allocation55_spill] sm:$0xff] %v16758_v55  ;;  %v16773_v3 = vpack.c.bf16 %v5626_v15, %v5221_v42  ;;  %v5544_v53 = vrot.slane %v20411_v40, %v20442_v19  ;;  %v5159_v6 = vrot.slane %v15937_v17, 1  ;;  %v5191_v27 = vrot.slane %v15940_v45, 1  ;;  %v20499_v42 = vld [vmem:[#allocation22_spill] sm:$0xff] }
 0x4ef   :  { %20495 = vst [vmem:[#allocation59_spill] sm:$0xff] %v16766_v31  ;;  %v5222_v57 = vsel %vm341_vm2, %v5158_v20, %v5190_v26  ;;  %v5254_v11 = vsel %vm341_vm2, %v5190_v26, %v5158_v20  ;;  %v5548_v29 = vrot.slane %v15940_v45, %v20442_v19  ;;  %v5160_v43 = vrot.slane %v20497_v34, 1  ;;  %11589 = vmatmul.mubr.bf16.gmra.mxu1 %v20499_v42  ;;  %v20501_v26 = vld [vmem:[#allocation119_spill] sm:$0xff] }
 0x4f0   :  { %20496 = vst [vmem:[#allocation36_spill] sm:$0xff] %v16773_v3  ;;  %v5628_v40 = vsel %vm605_vm3, %v5544_v53, %v5254_v11  ;;  %v5223_v17 = vsel %vm341_vm2, %v5159_v6, %v5191_v27  ;;  %v5255_v28 = vsel %vm341_vm2, %v5191_v27, %v5159_v6  ;;  %v5192_v54 = vrot.slane %v20498_v12, 1  ;;  %11592 = vmatprep.mubr.bf16.mxu1 %v20501_v26  ;;  %v20517_v42 = vld [vmem:[#allocation35_spill] sm:$0xff] }
 0x4f1   :  { %v16795_v25 = vpack.c.bf16 %v5628_v40, %v5222_v57  ;;  %v5630_v45 = vsel %vm605_vm3, %v5548_v29, %v5255_v28  ;;  %v5552_v15 = vrot.slane %v20498_v12, %v20442_v19  ;;  %v5161_v20 = vrot.slane %v15946_v37, 1 }
 0x4f2   :  { %v16803_v53 = vpack.c.bf16 %v5630_v45, %v5223_v17  ;;  %v5224_v6 = vsel %vm341_vm2, %v5160_v43, %v5192_v54  ;;  %v5256_v27 = vsel %vm341_vm2, %v5192_v54, %v5160_v43  ;;  %v5193_v57 = vrot.slane %v15948_v35, 1  ;;  %v20504_v45 = vld [vmem:[#allocation112_spill] sm:$0xff] }
 0x4f3   :  { %20500 = vst [vmem:[#allocation39_spill] sm:$0xff] %v16795_v25  ;;  %v5632_v11 = vsel %vm605_vm3, %v5552_v15, %v5256_v27  ;;  %v5556_v29 = vrot.slane %v15948_v35, %v20442_v19  ;;  %v5162_v37 = vrot.slane %v15950_v0, 1  ;;  %v5194_v34 = vrot.slane %v15952_v38, 1  ;;  %11669 = vmatmul.mubr.bf16.gmra.mxu0 %v20504_v45 }
 0x4f4   :  { %20502 = vst [vmem:[#allocation27_spill] sm:$0xff] %v16803_v53  ;;  %v16816_v40 = vpack.c.bf16 %v5632_v11, %v5224_v6  ;;  %v5225_v17 = vsel %vm341_vm2, %v5161_v20, %v5193_v57  ;;  %v5257_v43 = vsel %vm341_vm2, %v5193_v57, %v5161_v20  ;;  %v5560_v28 = vrot.slane %v15952_v38, %v20442_v19  ;;  %v20506_v6 = vld [vmem:[#allocation37_spill] sm:$0xff] }
 0x4f5   :  { %v5634_v12 = vsel %vm605_vm3, %v5556_v29, %v5257_v43  ;;  %v5226_v35 = vsel %vm341_vm2, %v5162_v37, %v5194_v34  ;;  %v5258_v0 = vsel %vm341_vm2, %v5194_v34, %v5162_v37  ;;  %v5163_v54 = vrot.slane %v15954_v7, 1  ;;  %v20507_v57 = vld [vmem:[#allocation113_spill] sm:$0xff]  ;;  %v16842_v29 = vld [vmem:[#allocation8 + $0x178] sm:$0xff]   ;;  %v20509_v37 = vld [vmem:[#allocation67_spill] sm:$0xff] }
 0x4f6   :  { %20503 = vst [vmem:[#allocation122_spill] sm:$0xff] %v16816_v40  ;;  %v16832_v15 = vpack.c.bf16 %v5634_v12, %v5225_v17  ;;  %v5636_v20 = vsel %vm605_vm3, %v5560_v28, %v5258_v0  ;;  %v5195_v38 = vrot.slane %v20506_v6, 1  ;;  %v5564_v27 = vrot.slane %v20506_v6, %v20442_v19  ;;  %11672 = vmatprep.mubr.bf16.mxu0 %v20507_v57  ;;  %v20510_v34 = vld [vmem:[#allocation104_spill] sm:$0xff] }
 0x4f7   :  { %v16840_v11 = vpack.c.bf16 %v5636_v20, %v5226_v35  ;;  %v5164_v7 = vrot.slane %v20509_v37, 1  ;;  %v5196_v43 = vrot.slane %v20510_v34, 1  ;;  %v5568_v17 = vrot.slane %v20510_v34, %v20442_v19  ;;  %v20511_v20 = vld [vmem:[#allocation108_spill] sm:$0xff]  ;;  %11924 = vmatprep.subr.bf16.mxu0 %v16842_v29 }
 0x4f8   :  { %20505 = vst [vmem:[#allocation73_spill] sm:$0xff] %v16832_v15  ;;  %v5227_v28 = vsel %vm341_vm2, %v5163_v54, %v5195_v38  ;;  %v5259_v12 = vsel %vm341_vm2, %v5195_v38, %v5163_v54  ;;  %v5165_v0 = vrot.slane %v20428_v46, 1  ;;  %v5197_v35 = vrot.slane %v20429_v63, 1  ;;  %11593 = vmatmul.mubr.bf16.gmra.mxu1 %v20511_v20  ;;  %v20512_v54 = vld [vmem:[#allocation109_spill] sm:$0xff] }
 0x4f9   :  { %20508 = vst [vmem:[#allocation74_spill] sm:$0xff] %v16840_v11  ;;  %v5638_v6 = vsel %vm605_vm3, %v5564_v27, %v5259_v12  ;;  %v5228_v37 = vsel %vm341_vm2, %v5164_v7, %v5196_v43  ;;  %v5260_v34 = vsel %vm341_vm2, %v5196_v43, %v5164_v7  ;;  %v5166_v26 = vrot.slane %v20431_v56, 1  ;;  %11596 = vmatprep.mubr.bf16.mxu1 %v20512_v54  ;;  %v20515_v43 = vld [vmem:[#allocation105_spill] sm:$0xff] }
 0x4fa   :  { %v16864_v46 = vpack.c.bf16 %v5638_v6, %v5227_v28  ;;  %v5640_v38 = vsel %vm605_vm3, %v5568_v17, %v5260_v34  ;;  %v5229_v20 = vsel %vm341_vm2, %v5165_v0, %v5197_v35  ;;  %v5261_v27 = vsel %vm341_vm2, %v5197_v35, %v5165_v0  ;;  %v20516_v6 = vld [vmem:[#allocation70_spill] sm:$0xff] }
 0x4fb   :  { %v16872_v12 = vpack.c.bf16 %v5640_v38, %v5228_v37  ;;  %v5572_v7 = vrot.slane %v20429_v63, %v20442_v19  ;;  %v5198_v56 = vrot.slane %v20515_v43, 1  ;;  %v5576_v28 = vrot.slane %v20515_v43, %v20442_v19  ;;  %v20519_v37 = vld [vmem:[#allocation72_spill] sm:$0xff]  ;;  %v20520_v43 = vld [vmem:[#allocation97_spill] sm:$0xff] }
 0x4fc   :  { %20513 = vst [vmem:[#allocation47_spill] sm:$0xff] %v16864_v46  ;;  %v5167_v54 = vrot.slane %v20516_v6, 1  ;;  %v5199_v17 = vrot.slane %v20517_v42, 1  ;;  %v5580_v34 = vrot.slane %v20517_v42, %v20442_v19  ;;  %v5040_v44 = vrot.slane %v20518_v14, 7  ;;  %11673 = vmatmul.mubr.bf16.gmra.mxu0 %v20520_v43 }
 0x4fd   :  { %20514 = vst [vmem:[#allocation44_spill] sm:$0xff] %v16872_v12  ;;  %v5642_v0 = vsel %vm605_vm3, %v5572_v7, %v5261_v27  ;;  %v5230_v63 = vsel %vm341_vm2, %v5166_v26, %v5198_v56  ;;  %v5262_v35 = vsel %vm341_vm2, %v5198_v56, %v5166_v26  ;;  %v5072_v38 = vrot.slane %v20519_v37, 7  ;;  %v20522_v7 = vld [vmem:[#allocation98_spill] sm:$0xff] }
 0x4fe   :  { %v16892_v6 = vpack.c.bf16 %v5642_v0, %v5229_v20  ;;  %v5644_v42 = vsel %vm605_vm3, %v5576_v28, %v5262_v35  ;;  %v5231_v12 = vsel %vm341_vm2, %v5167_v54, %v5199_v17  ;;  %v5263_v27 = vsel %vm341_vm2, %v5199_v17, %v5167_v54  ;;  %11676 = vmatprep.mubr.bf16.mxu0 %v20522_v7 }
 0x4ff   :  { %v16901_v46 = vpack.c.bf16 %v5644_v42, %v5230_v63  ;;  %v5646_v26 = vsel %vm605_vm3, %v5580_v34, %v5263_v27  ;;  %v5104_v20 = vsel %vm212_vm0, %v5040_v44, %v5072_v38  ;;  %v5136_v56 = vsel %vm212_vm0, %v5072_v38, %v5040_v44  ;;  %v20526_v63 = vld [vmem:[#allocation116_spill] sm:$0xff] }
 0x500   :  { %20521 = vst [vmem:[#allocation96_spill] sm:$0xff] %v16892_v6  ;;  %v16909_v28 = vpack.c.bf16 %v5646_v26, %v5231_v12  ;;  %v5392_v0 = vrot.slane %v20518_v14, %v20363_v32  ;;  %v16915_v54 = vpack.c.bf16 %v20486_v5, %v20484_v30  ;;  %v5152_v17 = vrot.slane %v20484_v30, 1  ;;  %11597 = vmatmul.mubr.bf16.gmra.mxu1 %v20526_v63  ;;  %v20528_v32 = vld [vmem:[#allocation20_spill] sm:$0xff] }
 0x501   :  { %20523 = vst [vmem:[#allocation48_spill] sm:$0xff] %v16901_v46  ;;  %v5184_v34 = vrot.slane %v20486_v5, 1  ;;  %v5520_v35 = vrot.slane %v20486_v5, %v20442_v19  ;;  %v16924_v44 = vpack.c.bf16 %v20519_v37, %v20518_v14  ;;  %v5168_v12 = vrot.slane %v20518_v14, 1  ;;  %11600 = vmatprep.mubr.bf16.mxu1 %v20528_v32 }
 0x502   :  { %20524 = vst [vmem:[#allocation123_spill] sm:$0xff] %v16909_v28  ;;  %20525 = vst [vmem:[#allocation124_spill] sm:$0xff] %v16915_v54  ;;  %v5455_v38 = vsel %vm406_vm1, %v5392_v0, %v5136_v56  ;;  %v5200_v30 = vrot.slane %v20519_v37, 1  ;;  %v5584_v42 = vrot.slane %v20519_v37, %v20442_v19  ;;  %v20531_v37 = vld [vmem:[#allocation100_spill] sm:$0xff] }
 0x503   :  { %20527 = vst [vmem:[#allocation135_spill] sm:$0xff] %v16924_v44  ;;  %v16933_v27 = vpack.c.bf16 %v5104_v20, %v5455_v38  ;;  %v5216_v5 = vsel %vm341_vm2, %v5152_v17, %v5184_v34  ;;  %v5248_v26 = vsel %vm341_vm2, %v5184_v34, %v5152_v17  ;;  %v20533_v38 = vld [vmem:[#allocation30_spill] sm:$0xff]  ;;  %v20534_v17 = vld [vmem:[#allocation99_spill] sm:$0xff]  ;;  %v20535_v34 = vld [vmem:[#allocation80_spill] sm:$0xff] }
 0x504   :  { %v5616_v14 = vsel %vm605_vm3, %v5520_v35, %v5248_v26  ;;  %v5232_v44 = vsel %vm341_vm2, %v5168_v12, %v5200_v30  ;;  %v5264_v56 = vsel %vm341_vm2, %v5200_v30, %v5168_v12  ;;  %11677 = vmatmul.mubr.bf16.gmra.mxu0 %v20531_v37  ;;  %v12358_v35 = vld [vmem:[#allocation8 + $0x130] sm:$0xff]   ;;  %v20537_v30 = vld [vmem:[#allocation78_spill] sm:$0xff]  ;;  %v12366_v26 = vld [vmem:[#allocation8 + $0x168] sm:$0xff]  }
 0x505   :  { %20529 = vst [vmem:[#allocation136_spill] sm:$0xff] %v16933_v27  ;;  %v16945_v0 = vpack.c.bf16 %v5616_v14, %v5216_v5  ;;  %v5648_v19 = vsel %vm605_vm3, %v5584_v42, %v5264_v56  ;;  %11680 = vmatprep.mubr.bf16.mxu0 %v20533_v38  ;;  %v12365_v12 = vld [vmem:[#allocation8 + $0x170] sm:$0xff]   ;;  %v20538_v42 = vld [vmem:[#allocation75_spill] sm:$0xff]  ;;  %v12361_v14 = vld [vmem:[#allocation8 + $0x118] sm:$0xff]  }
 0x506   :  { %v16950_v20 = vpack.c.bf16 %v5648_v19, %v5232_v44  ;;  %v12359_v44 = vld [vmem:[#allocation8 + $0x128] sm:$0xff]   ;;  %v12360_v5 = vld [vmem:[#allocation8 + $0x120] sm:$0xff]   ;;  %v20539_v19 = vld [vmem:[#allocation106_spill] sm:$0xff] }
 0x507   :  { %20530 = vst [vmem:[#allocation49_spill] sm:$0xff] %v16945_v0  ;;  %v12368_v56 = vld [vmem:[#allocation8 + $0x160] sm:$0xff]  }
 0x508   :  { %20532 = vst [vmem:[#allocation29_spill] sm:$0xff] %v16950_v20  ;;  %11601 = vmatmul.mubr.bf16.gmra.mxu1 %v20534_v17 }
 0x509   :  { %11700 = vmatprep.mubr.bf16.mxu1 %v16509_v41 }
 0x50c   :  { %11681 = vmatmul.mubr.bf16.gmra.mxu0 %v16520_v47 }
 0x50d   :  { %11780 = vmatprep.mubr.bf16.mxu0 %v20535_v34  ;;  %v20540_v34 = vld [vmem:[#allocation117_spill] sm:$0xff] }
 0x510   :  { %11701 = vmatmul.mubr.bf16.vlgmr.msra.gmra.mxu1 %v16530_v58 }
 0x511   :  { %11704 = vmatprep.mubr.bf16.mxu1 %v16509_v41  ;;  %11845 = vmatpush3.bf16.msra.mxu1 %v20536_v39  ;;  %v12363_v39 = vld [vmem:[#allocation8 + $0x108] sm:$0xff]  }
 0x512   :  { %11846 = vmatprep.subr.bf16.mxu1 %v12358_v35 }
 0x514   :  { %11781 = vmatmul.mubr.bf16.vlgmr.msra.gmra.mxu0 %v20537_v30 }
 0x515   :  { %11847 = vmatpush3.bf16.msra.mxu1 %v12358_v35  ;;  %11784 = vmatprep.mubr.bf16.mxu0 %v20538_v42  ;;  %v12362_v35 = vld [vmem:[#allocation8 + $0x110] sm:$0xff]  }
 0x516   :  { %11848 = vmatprep.subr.bf16.mxu1 %v12359_v44  ;;  %11925 = vmatpush3.bf16.msra.mxu0 %v16842_v29  ;;  %v12369_v29 = vld [vmem:[#allocation8 + $0x158] sm:$0xff]  }
 0x517   :  { %11926 = vmatprep.subr.bf16.mxu0 %v12365_v12 }
 0x518   :  { %11705 = vmatmul.mubr.bf16.gmra.mxu1 %v16552_v49 }
 0x519   :  { %11708 = vmatprep.mubr.bf16.mxu1 %v16561_v22  ;;  %11849 = vmatpush3.bf16.msra.mxu1 %v12359_v44  ;;  %v12370_v44 = vld [vmem:[#allocation8 + $0x150] sm:$0xff]  }
 0x51a   :  { %11850 = vmatprep.subr.bf16.mxu1 %v12360_v5  ;;  %11927 = vmatpush3.bf16.msra.mxu0 %v12365_v12  ;;  %v20541_v12 = vld [vmem:[#allocation68_spill] sm:$0xff] }
 0x51b   :  { %11928 = vmatprep.subr.bf16.mxu0 %v12366_v26 }
 0x51c   :  { %11785 = vmatmul.mubr.bf16.gmra.mxu0 %v20539_v19 }
 0x51d   :  { %11851 = vmatpush3.bf16.msra.mxu1 %v12360_v5  ;;  %11788 = vmatprep.mubr.bf16.mxu0 %v20540_v34  ;;  %v20542_v5 = vld [vmem:[#allocation111_spill] sm:$0xff] }
 0x51e   :  { %11852 = vmatprep.subr.bf16.mxu1 %v12361_v14  ;;  %11929 = vmatpush3.bf16.msra.mxu0 %v12366_v26  ;;  %v12371_v26 = vld [vmem:[#allocation8 + $0x148] sm:$0xff]  }
 0x51f   :  { %11930 = vmatprep.subr.bf16.mxu0 %v12368_v56 }
 0x520   :  { %11709 = vmatmul.mubr.bf16.gmra.mxu1 %v16568_v16 }
 0x521   :  { %11712 = vmatprep.mubr.bf16.mxu1 %v16588_v8  ;;  %11853 = vmatpush3.bf16.msra.mxu1 %v12361_v14  ;;  %v16973_v14 = vld [vmem:[#allocation8 + $0x1b8] sm:$0xff]  }
 0x522   :  { %11854 = vmatprep.subr.bf16.mxu1 %v12362_v35  ;;  %11931 = vmatpush3.bf16.msra.mxu0 %v12368_v56  ;;  %v12372_v56 = vld [vmem:[#allocation8 + $0x140] sm:$0xff]  }
 0x523   :  { %11932 = vmatprep.subr.bf16.mxu0 %v12369_v29 }
 0x524   :  { %11789 = vmatmul.mubr.bf16.gmra.mxu0 %v20541_v12  ;;  %v20543_v12 = vld [vmem:[#allocation71_spill] sm:$0xff] }
 0x525   :  { %11855 = vmatpush3.bf16.msra.mxu1 %v12362_v35  ;;  %11792 = vmatprep.mubr.bf16.mxu0 %v20542_v5  ;;  %v20544_v35 = vld [vmem:[#allocation114_spill] sm:$0xff] }
 0x526   :  { %11856 = vmatprep.subr.bf16.mxu1 %v12363_v39  ;;  %11933 = vmatpush3.bf16.msra.mxu0 %v12369_v29  ;;  %v20545_v29 = vld [vmem:[#allocation87_spill] sm:$0xff] }
 0x527   :  { %11934 = vmatprep.subr.bf16.mxu0 %v12370_v44 }
 0x528   :  { %11713 = vmatmul.mubr.bf16.gmra.mxu1 %v16596_v10 }
 0x529   :  { %11716 = vmatprep.mubr.bf16.mxu1 %v16610_v48  ;;  %11857 = vmatpush3.bf16.msra.mxu1 %v12363_v39  ;;  %v20546_v39 = vld [vmem:[#allocation77_spill] sm:$0xff] }
 0x52a   :  { %11858 = vmatprep.subr.bf16.mxu1 %v12367_v52  ;;  %11935 = vmatpush3.bf16.msra.mxu0 %v12370_v44  ;;  %v20548_v44 = vld [vmem:[#allocation118_spill] sm:$0xff] }
 0x52b   :  { %11936 = vmatprep.subr.bf16.mxu0 %v12371_v26 }
 0x52c   :  { %11793 = vmatmul.mubr.bf16.gmra.mxu0 %v20543_v12 }
 0x52d   :  { %11859 = vmatpush3.bf16.msra.mxu1 %v12367_v52  ;;  %11796 = vmatprep.mubr.bf16.mxu0 %v20544_v35  ;;  %v20547_v52 = vld [vmem:[#allocation89_spill] sm:$0xff] }
 0x52e   :  { %12004 = vmatprep.subr.bf16.mxu1 %v16973_v14  ;;  %11937 = vmatpush3.bf16.msra.mxu0 %v12371_v26  ;;  %v20549_v26 = vld [vmem:[#allocation91_spill] sm:$0xff] }
 0x52f   :  { %11938 = vmatprep.subr.bf16.mxu0 %v12372_v56 }
 0x530   :  { %11717 = vmatmul.mubr.bf16.gmra.mxu1 %v16627_v33 }
 0x531   :  { %11720 = vmatprep.mubr.bf16.mxu1 %v16634_v13 }
 0x532   :  { %11939 = vmatpush3.bf16.msra.mxu0 %v12372_v56 }
 0x534   :  { %11797 = vmatmul.mubr.bf16.gmra.mxu0 %v20545_v29 }
 0x535   :  { %11800 = vmatprep.mubr.bf16.mxu0 %v20546_v39 }
 0x538   :  { %11721 = vmatmul.mubr.bf16.gmra.mxu1 %v16655_v21 }
 0x539   :  { %11724 = vmatprep.mubr.bf16.mxu1 %v16664_v1 }
 0x53c   :  { %11801 = vmatmul.mubr.bf16.gmra.mxu0 %v20547_v52 }
 0x53d   :  { %11804 = vmatprep.mubr.bf16.mxu0 %v20548_v44 }
 0x540   :  { %11725 = vmatmul.mubr.bf16.gmra.mxu1 %v16670_v23 }
 0x541   :  { %11728 = vmatprep.mubr.bf16.mxu1 %v16692_v61 }
 0x544   :  { %11805 = vmatmul.mubr.bf16.gmra.mxu0 %v20549_v26 }
 0x545   :  { %11808 = vmatprep.mubr.bf16.mxu0 %v16251_v2 }
 0x548   :  { %11729 = vmatmul.mubr.bf16.gmra.mxu1 %v16699_v60 }
 0x549   :  { %11732 = vmatprep.mubr.bf16.mxu1 %v16713_v50 }
 0x54a   :  { %v11542_v56 = vpop.f32.mrf.mxu1 }
 0x54c   :  { %11809 = vmatmul.mubr.bf16.gmra.mxu0 %v16729_v62  ;;  %v5860_v44 = vpop.f32.mrf.mxu1 }
 0x54d   :  { %11812 = vmatprep.mubr.bf16.mxu0 %v16287_v4 }
 0x54e   :  { %v11543_v52 = vpop.f32.mrf.mxu1 }
 0x550   :  { %11733 = vmatmul.mubr.bf16.gmra.mxu1 %v16737_v59  ;;  %v5863_v2 = vpop.f32.mrf.mxu1 }
 0x551   :  { %11736 = vmatprep.mubr.bf16.mxu1 %v16713_v50  ;;  %v11622_v39 = vpop.f32.mrf.mxu0 }
 0x552   :  { %v16997_v26 = vadd.f32 %v11622_v39, %v11542_v56 }
 0x553   :  { %v6197_v29 = vpop.f32.mrf.mxu0 }
 0x554   :  { %11813 = vmatmul.mubr.bf16.gmra.mxu0 %v16272_v51  ;;  %v17000_v35 = vadd.f32 %v6197_v29, %v5860_v44  ;;  %v11546_v62 = vpop.f32.mrf.mxu1  ;;  %v20550_v29 = vld [vmem:[#allocation103_spill] sm:$0xff] }
 0x555   :  { %11816 = vmatprep.mubr.bf16.mxu0 %v16313_v18  ;;  %v11623_v4 = vpop.f32.mrf.mxu0 }
 0x556   :  { %v17004_v12 = vadd.f32 %v11623_v4, %v11543_v52  ;;  %v5876_v5 = vpop.f32.mrf.mxu1 }
 0x557   :  { %v6200_v34 = vpop.f32.mrf.mxu0 }
 0x558   :  { %11737 = vmatmul.mubr.bf16.gmra.mxu1 %v16758_v55  ;;  %v17006_v19 = vadd.f32 %v6200_v34, %v5863_v2  ;;  %v11547_v39 = vpop.f32.mrf.mxu1 }
 0x559   :  { %11740 = vmatprep.mubr.bf16.mxu1 %v16766_v31 }
 0x55a   :  { %v11626_v56 = vpop.f32.mrf.mxu0  ;;  %v5879_v44 = vpop.f32.mrf.mxu1 }
 0x55b   :  { %v17009_v18 = vadd.f32 %v11626_v56, %v11546_v62 }
 0x55c   :  { %11817 = vmatmul.mubr.bf16.gmra.mxu0 %v16320_v9  ;;  %v6213_v51 = vpop.f32.mrf.mxu0  ;;  %v20551_v9 = vld [vmem:[#allocation23_spill] sm:$0xff] }
 0x55d   :  { %11820 = vmatprep.mubr.bf16.mxu0 %v20550_v29  ;;  %v17012_v42 = vadd.f32 %v6213_v51, %v5876_v5  ;;  %v11550_v20 = vpop.f32.mrf.mxu1 }
 0x55e   :  { %v11627_v52 = vpop.f32.mrf.mxu0 }
 0x55f   :  { %v17016_v2 = vadd.f32 %v11627_v52, %v11547_v39  ;;  %v5892_v34 = vpop.f32.mrf.mxu1 }
 0x560   :  { %11741 = vmatmul.mubr.bf16.gmra.mxu1 %v16773_v3  ;;  %v6216_v4 = vpop.f32.mrf.mxu0 }
 0x561   :  { %11744 = vmatprep.mubr.bf16.mxu1 %v16795_v25  ;;  %v17018_v30 = vadd.f32 %v6216_v4, %v5879_v44  ;;  %v11551_v62 = vpop.f32.mrf.mxu1 }
 0x563   :  { %v11630_v56 = vpop.f32.mrf.mxu0  ;;  %v5895_v51 = vpop.f32.mrf.mxu1 }
 0x564   :  { %11821 = vmatmul.mubr.bf16.gmra.mxu0 %v20551_v9  ;;  %v17021_v29 = vadd.f32 %v11630_v56, %v11550_v20 }
 0x565   :  { %11824 = vmatprep.mubr.bf16.mxu0 %v16381_v24  ;;  %v6229_v5 = vpop.f32.mrf.mxu0 }
 0x566   :  { %v17024_v17 = vadd.f32 %v6229_v5, %v5892_v34  ;;  %v11554_v32 = vpop.f32.mrf.mxu1 }
 0x567   :  { %v11631_v39 = vpop.f32.mrf.mxu0 }
 0x568   :  { %11745 = vmatmul.mubr.bf16.gmra.mxu1 %v16803_v53  ;;  %v17028_v44 = vadd.f32 %v11631_v39, %v11551_v62  ;;  %v5908_v52 = vpop.f32.mrf.mxu1 }
 0x569   :  { %11748 = vmatprep.mubr.bf16.mxu1 %v16816_v40  ;;  %v6232_v4 = vpop.f32.mrf.mxu0 }
 0x56a   :  { %v17030_v63 = vadd.f32 %v6232_v4, %v5895_v51  ;;  %v11555_v20 = vpop.f32.mrf.mxu1 }
 0x56b   :  { %v11634_v56 = vpop.f32.mrf.mxu0 }
 0x56c   :  { %11825 = vmatmul.mubr.bf16.gmra.mxu0 %v16388_v36  ;;  %v17033_v24 = vadd.f32 %v11634_v56, %v11554_v32  ;;  %v5911_v34 = vpop.f32.mrf.mxu1 }
 0x56d   :  { %11828 = vmatprep.mubr.bf16.mxu0 %v20504_v45  ;;  %v6245_v5 = vpop.f32.mrf.mxu0 }
 0x56e   :  { %v17036_v9 = vadd.f32 %v6245_v5, %v5908_v52  ;;  %v17048_v5 = vld [vmem:[#allocation8 + $0x1f8] sm:$0xff]  }
 0x56f   :  { %v11558_v53 = vpop.f32.mrf.mxu1  ;;  %v11635_v62 = vpop.f32.mrf.mxu0  ;;  %12084 = vmatprep.subr.bf16.mxu0 %v17048_v5 }
 0x570   :  { %11749 = vmatmul.mubr.bf16.gmra.mxu1 %v16832_v15  ;;  %v17040_v51 = vadd.f32 %v11635_v62, %v11555_v20  ;;  %v20555_v62 = vld [vmem:[#allocation47_spill] sm:$0xff] }
 0x571   :  { %11752 = vmatprep.mubr.bf16.mxu1 %v16840_v11  ;;  %v5924_v39 = vpop.f32.mrf.mxu1  ;;  %v6248_v4 = vpop.f32.mrf.mxu0 }
 0x572   :  { %v17042_v40 = vadd.f32 %v6248_v4, %v5911_v34  ;;  %v20556_v4 = vld [vmem:[#allocation44_spill] sm:$0xff] }
 0x573   :  { %v11559_v32 = vpop.f32.mrf.mxu1  ;;  %v11638_v56 = vpop.f32.mrf.mxu0 }
 0x574   :  { %20552 = vst [vmem:[#allocation28_spill] sm:$0xff] %v17042_v40  ;;  %11829 = vmatmul.mubr.bf16.gmra.mxu0 %v20507_v57  ;;  %v17045_v45 = vadd.f32 %v11638_v56, %v11558_v53 }
 0x575   :  { %11832 = vmatprep.mubr.bf16.mxu0 %v20520_v43  ;;  %v5927_v52 = vpop.f32.mrf.mxu1  ;;  %v6261_v36 = vpop.f32.mrf.mxu0 }
 0x576   :  { %20553 = vst [vmem:[#allocation50_spill] sm:$0xff] %v17045_v45  ;;  %v17050_v15 = vadd.f32 %v6261_v36, %v5924_v39 }
 0x577   :  { %v11562_v20 = vpop.f32.mrf.mxu1  ;;  %v11639_v34 = vpop.f32.mrf.mxu0 }
 0x578   :  { %20554 = vst [vmem:[#allocation52_spill] sm:$0xff] %v17050_v15  ;;  %11753 = vmatmul.mubr.bf16.gmra.mxu1 %v20555_v62  ;;  %v17055_v11 = vadd.f32 %v11639_v34, %v11559_v32 }
 0x579   :  { %11756 = vmatprep.mubr.bf16.mxu1 %v20556_v4  ;;  %v5940_v53 = vpop.f32.mrf.mxu1  ;;  %v6264_v56 = vpop.f32.mrf.mxu0 }
 0x57a   :  { %v17057_v57 = vadd.f32 %v6264_v56, %v5927_v52 }
 0x57b   :  { %v11563_v43 = vpop.f32.mrf.mxu1  ;;  %v11642_v45 = vpop.f32.mrf.mxu0 }
 0x57c   :  { %11833 = vmatmul.mubr.bf16.gmra.mxu0 %v20522_v7  ;;  %v17060_v36 = vadd.f32 %v11642_v45, %v11562_v20 }
 0x57d   :  { %11836 = vmatprep.mubr.bf16.mxu0 %v20531_v37  ;;  %v5943_v39 = vpop.f32.mrf.mxu1  ;;  %v6277_v62 = vpop.f32.mrf.mxu0 }
 0x57e   :  { %v17063_v15 = vadd.f32 %v6277_v62, %v5940_v53 }
 0x57f   :  { %v11566_v40 = vpop.f32.mrf.mxu1  ;;  %v11643_v32 = vpop.f32.mrf.mxu0 }
 0x580   :  { %11757 = vmatmul.mubr.bf16.gmra.mxu1 %v16892_v6  ;;  %v17067_v52 = vadd.f32 %v11643_v32, %v11563_v43  ;;  %v20558_v32 = vld [vmem:[#allocation127_spill] sm:$0xff] }
 0x581   :  { %11760 = vmatprep.mubr.bf16.mxu1 %v16901_v46  ;;  %v5956_v34 = vpop.f32.mrf.mxu1  ;;  %v6280_v56 = vpop.f32.mrf.mxu0 }
 0x582   :  { %v17069_v4 = vadd.f32 %v6280_v56, %v5943_v39 }
 0x583   :  { %v11567_v45 = vpop.f32.mrf.mxu1  ;;  %v11646_v20 = vpop.f32.mrf.mxu0 }
 0x584   :  { %20557 = vst [vmem:[#allocation56_spill] sm:$0xff] %v17069_v4  ;;  %11837 = vmatmul.mubr.bf16.gmra.mxu0 %v20533_v38  ;;  %v17072_v37 = vadd.f32 %v11646_v20, %v11566_v40 }
 0x585   :  { %11840 = vmatprep.mubr.bf16.mxu0 %v16520_v47  ;;  %v5959_v62 = vpop.f32.mrf.mxu1  ;;  %v6293_v53 = vpop.f32.mrf.mxu0 }
 0x586   :  { %v17075_v7 = vadd.f32 %v6293_v53, %v5956_v34  ;;  %v12374_v53 = vld [vmem:[#allocation8 + $0x1b0] sm:$0xff]  }
 0x587   :  { %v11570_v6 = vpop.f32.mrf.mxu1  ;;  %v11647_v43 = vpop.f32.mrf.mxu0 }
 0x588   :  { %11761 = vmatmul.mubr.bf16.gmra.mxu1 %v16909_v28  ;;  %v17079_v39 = vadd.f32 %v11647_v43, %v11567_v45  ;;  %v20561_v45 = vld [vmem:[#allocation128_spill] sm:$0xff] }
 0x589   :  { %11860 = vmatprep.mubr.bf16.mxu1 %v20558_v32  ;;  %v5972_v56 = vpop.f32.mrf.mxu1  ;;  %v6296_v46 = vpop.f32.mrf.mxu0 }
 0x58a   :  { %20559 = vst [vmem:[#allocation31_spill] sm:$0xff] %v17079_v39  ;;  %v17081_v4 = vadd.f32 %v6296_v46, %v5959_v62  ;;  %v20562_v39 = vld [vmem:[#allocation69_spill] sm:$0xff] }
 0x58b   :  { %v11571_v40 = vpop.f32.mrf.mxu1  ;;  %v11650_v20 = vpop.f32.mrf.mxu0 }
 0x58c   :  { %11841 = vmatmul.mubr.bf16.gmra.mxu0 %v16933_v27  ;;  %v17084_v47 = vadd.f32 %v11650_v20, %v11570_v6  ;;  %v12375_v6 = vld [vmem:[#allocation8 + $0x1a8] sm:$0xff]  }
 0x58d   :  { %11940 = vmatprep.mubr.bf16.mxu0 %v16530_v58  ;;  %v5975_v34 = vpop.f32.mrf.mxu1  ;;  %v6309_v38 = vpop.f32.mrf.mxu0 }
 0x58e   :  { %20560 = vst [vmem:[#allocation26_spill] sm:$0xff] %v17084_v47  ;;  %v17087_v28 = vadd.f32 %v6309_v38, %v5972_v56  ;;  %v12381_v47 = vld [vmem:[#allocation8 + $0x1f0] sm:$0xff]  }
 0x58f   :  { %v11574_v32 = vpop.f32.mrf.mxu1  ;;  %v11651_v43 = vpop.f32.mrf.mxu0 }
 0x590   :  { %11861 = vmatmul.mubr.bf16.vlgmr.msra.gmra.mxu1 %v20561_v45  ;;  %v17092_v46 = vadd.f32 %v11651_v43, %v11571_v40 }
 0x591   :  { %11864 = vmatprep.mubr.bf16.mxu1 %v20562_v39  ;;  %12005 = vmatpush3.bf16.msra.mxu1 %v16973_v14  ;;  %v5988_v62 = vpop.f32.mrf.mxu1  ;;  %v6312_v20 = vpop.f32.mrf.mxu0  ;;  %v12376_v14 = vld [vmem:[#allocation8 + $0x1a0] sm:$0xff]  }
 0x592   :  { %12006 = vmatprep.subr.bf16.mxu1 %v12374_v53  ;;  %v17094_v58 = vadd.f32 %v6312_v20, %v5975_v34  ;;  %v20565_v20 = vld [vmem:[#allocation76_spill] sm:$0xff] }
 0x593   :  { %v11575_v27 = vpop.f32.mrf.mxu1  ;;  %v11654_v38 = vpop.f32.mrf.mxu0 }
 0x594   :  { %20563 = vst [vmem:[#allocation54_spill] sm:$0xff] %v17094_v58  ;;  %11941 = vmatmul.mubr.bf16.vlgmr.msra.gmra.mxu0 %v16509_v41  ;;  %v17097_v56 = vadd.f32 %v11654_v38, %v11574_v32  ;;  %v12382_v58 = vld [vmem:[#allocation8 + $0x1e8] sm:$0xff]   ;;  %v20566_v41 = vld [vmem:[#allocation129_spill] sm:$0xff]  ;;  %v12377_v38 = vld [vmem:[#allocation8 + $0x198] sm:$0xff]  }
 0x595   :  { %12007 = vmatpush3.bf16.msra.mxu1 %v12374_v53  ;;  %11944 = vmatprep.mubr.bf16.mxu0 %v16552_v49  ;;  %v5991_v39 = vpop.f32.mrf.mxu1  ;;  %v6325_v40 = vpop.f32.mrf.mxu0 }
 0x596   :  { %20564 = vst [vmem:[#allocation46_spill] sm:$0xff] %v17097_v56  ;;  %12008 = vmatprep.subr.bf16.mxu1 %v12375_v6  ;;  %12085 = vmatpush3.bf16.msra.mxu0 %v17048_v5  ;;  %v17101_v43 = vadd.f32 %v6325_v40, %v5988_v62  ;;  %v12384_v62 = vld [vmem:[#allocation8 + $0x1e0] sm:$0xff]  }
 0x597   :  { %v11578_v34 = vpop.f32.mrf.mxu1  ;;  %12086 = vmatprep.subr.bf16.mxu0 %v12381_v47  ;;  %v11655_v45 = vpop.f32.mrf.mxu0 }
 0x598   :  { %11865 = vmatmul.mubr.bf16.gmra.mxu1 %v20565_v20  ;;  %v17105_v53 = vadd.f32 %v11655_v45, %v11575_v27  ;;  %v12378_v45 = vld [vmem:[#allocation8 + $0x190] sm:$0xff]  }
 0x599   :  { %11868 = vmatprep.mubr.bf16.mxu1 %v20566_v41  ;;  %12009 = vmatpush3.bf16.msra.mxu1 %v12375_v6  ;;  %v6004_v32 = vpop.f32.mrf.mxu1  ;;  %v6328_v49 = vpop.f32.mrf.mxu0 }
 0x59a   :  { %20567 = vst [vmem:[#allocation58_spill] sm:$0xff] %v17105_v53  ;;  %12010 = vmatprep.subr.bf16.mxu1 %v12376_v14  ;;  %12087 = vmatpush3.bf16.msra.mxu0 %v12381_v47  ;;  %v17107_v56 = vadd.f32 %v6328_v49, %v5991_v39  ;;  %v20569_v49 = vld [vmem:[#allocation41_spill] sm:$0xff]  ;;  %v12385_v39 = vld [vmem:[#allocation8 + $0x1d8] sm:$0xff]  }
 0x59b   :  { %v11579_v5 = vpop.f32.mrf.mxu1  ;;  %12088 = vmatprep.subr.bf16.mxu0 %v12382_v58  ;;  %v11658_v40 = vpop.f32.mrf.mxu0  ;;  %v20570_v53 = vld [vmem:[#allocation110_spill] sm:$0xff] }
 0x59c   :  { %20568 = vst [vmem:[#allocation61_spill] sm:$0xff] %v17107_v56  ;;  %11945 = vmatmul.mubr.bf16.gmra.mxu0 %v16561_v22  ;;  %v17110_v20 = vadd.f32 %v11658_v40, %v11578_v34  ;;  %v12379_v40 = vld [vmem:[#allocation8 + $0x188] sm:$0xff]  }
 0x59d   :  { %12011 = vmatpush3.bf16.msra.mxu1 %v12376_v14  ;;  %11948 = vmatprep.mubr.bf16.mxu0 %v16568_v16  ;;  %v6007_v27 = vpop.f32.mrf.mxu1  ;;  %v6341_v6 = vpop.f32.mrf.mxu0 }
 0x59e   :  { %12012 = vmatprep.subr.bf16.mxu1 %v12377_v38  ;;  %12089 = vmatpush3.bf16.msra.mxu0 %v12382_v58  ;;  %v17113_v41 = vadd.f32 %v6341_v6, %v6004_v32  ;;  %v12386_v32 = vld [vmem:[#allocation8 + $0x1d0] sm:$0xff]  }
 0x59f   :  { %v11582_v47 = vpop.f32.mrf.mxu1  ;;  %12090 = vmatprep.subr.bf16.mxu0 %v12384_v62  ;;  %v11659_v56 = vpop.f32.mrf.mxu0 }
 0x5a0   :  { %11869 = vmatmul.mubr.bf16.gmra.mxu1 %v20569_v49  ;;  %v17117_v14 = vadd.f32 %v11659_v56, %v11579_v5 }
 0x5a1   :  { %11872 = vmatprep.mubr.bf16.mxu1 %v20570_v53  ;;  %12013 = vmatpush3.bf16.msra.mxu1 %v12377_v38  ;;  %v6020_v34 = vpop.f32.mrf.mxu1  ;;  %v6344_v16 = vpop.f32.mrf.mxu0  ;;  %v12383_v38 = vld [vmem:[#allocation8 + $0x180] sm:$0xff]  }
 0x5a2   :  { %20571 = vst [vmem:[#allocation51_spill] sm:$0xff] %v17117_v14  ;;  %12014 = vmatprep.subr.bf16.mxu1 %v12378_v45  ;;  %12091 = vmatpush3.bf16.msra.mxu0 %v12384_v62  ;;  %v17119_v22 = vadd.f32 %v6344_v16, %v6007_v27  ;;  %v20573_v62 = vld [vmem:[#allocation81_spill] sm:$0xff]  ;;  %v12387_v27 = vld [vmem:[#allocation8 + $0x1c8] sm:$0xff]   ;;  %v20574_v14 = vld [vmem:[#allocation83_spill] sm:$0xff] }
 0x5a3   :  { %v11583_v58 = vpop.f32.mrf.mxu1  ;;  %12092 = vmatprep.subr.bf16.mxu0 %v12385_v39  ;;  %v11662_v6 = vpop.f32.mrf.mxu0 }
 0x5a4   :  { %20572 = vst [vmem:[#allocation57_spill] sm:$0xff] %v17119_v22  ;;  %11949 = vmatmul.mubr.bf16.gmra.mxu0 %v16588_v8  ;;  %v17122_v49 = vadd.f32 %v11662_v6, %v11582_v47  ;;  %v17131_v6 = vld [vmem:[#allocation8 + $0x238] sm:$0xff]  }
 0x5a5   :  { %12015 = vmatpush3.bf16.msra.mxu1 %v12378_v45  ;;  %11952 = vmatprep.mubr.bf16.mxu0 %v16596_v10  ;;  %v6023_v56 = vpop.f32.mrf.mxu1  ;;  %v6357_v5 = vpop.f32.mrf.mxu0 }
 0x5a6   :  { %12016 = vmatprep.subr.bf16.mxu1 %v12379_v40  ;;  %12093 = vmatpush3.bf16.msra.mxu0 %v12385_v39  ;;  %v17125_v53 = vadd.f32 %v6357_v5, %v6020_v34  ;;  %v12388_v5 = vld [vmem:[#allocation8 + $0x1c0] sm:$0xff]  }
 0x5a7   :  { %v11586_v16 = vpop.f32.mrf.mxu1  ;;  %12094 = vmatprep.subr.bf16.mxu0 %v12386_v32  ;;  %v11663_v22 = vpop.f32.mrf.mxu0 }
 0x5a8   :  { %11873 = vmatmul.mubr.bf16.gmra.mxu1 %v20573_v62  ;;  %v17129_v45 = vadd.f32 %v11663_v22, %v11583_v58 }
 0x5a9   :  { %11876 = vmatprep.mubr.bf16.mxu1 %v20574_v14  ;;  %12017 = vmatpush3.bf16.msra.mxu1 %v12379_v40  ;;  %v6036_v47 = vpop.f32.mrf.mxu1  ;;  %v6360_v10 = vpop.f32.mrf.mxu0  ;;  %v20577_v14 = vld [vmem:[#allocation85_spill] sm:$0xff] }
 0x5aa   :  { %12018 = vmatprep.subr.bf16.mxu1 %v12383_v38  ;;  %12095 = vmatpush3.bf16.msra.mxu0 %v12386_v32  ;;  %v17133_v39 = vadd.f32 %v6360_v10, %v6023_v56  ;;  %v20576_v32 = vld [vmem:[#allocation84_spill] sm:$0xff] }
 0x5ab   :  { %v11587_v34 = vpop.f32.mrf.mxu1  ;;  %12096 = vmatprep.subr.bf16.mxu0 %v12387_v27  ;;  %v11666_v8 = vpop.f32.mrf.mxu0 }
 0x5ac   :  { %11953 = vmatmul.mubr.bf16.gmra.mxu0 %v16610_v48  ;;  %v17136_v62 = vadd.f32 %v11666_v8, %v11586_v16 }
 0x5ad   :  { %12019 = vmatpush3.bf16.msra.mxu1 %v12383_v38  ;;  %11956 = vmatprep.mubr.bf16.mxu0 %v16627_v33  ;;  %v6039_v22 = vpop.f32.mrf.mxu1  ;;  %v6373_v40 = vpop.f32.mrf.mxu0 }
 0x5ae   :  { %20575 = vst [vmem:[#allocation125_spill] sm:$0xff] %v17136_v62  ;;  %12164 = vmatprep.subr.bf16.mxu1 %v17131_v6  ;;  %12097 = vmatpush3.bf16.msra.mxu0 %v12387_v27  ;;  %v17140_v58 = vadd.f32 %v6373_v40, %v6036_v47 }
 0x5af   :  { %v11590_v10 = vpop.f32.mrf.mxu1  ;;  %12098 = vmatprep.subr.bf16.mxu0 %v12388_v5  ;;  %v11667_v56 = vpop.f32.mrf.mxu0 }
 0x5b0   :  { %11877 = vmatmul.mubr.bf16.gmra.mxu1 %v20576_v32  ;;  %v17144_v48 = vadd.f32 %v11667_v56, %v11587_v34  ;;  %v20580_v34 = vld [vmem:[#allocation86_spill] sm:$0xff] }
 0x5b1   :  { %11880 = vmatprep.mubr.bf16.mxu1 %v20577_v14  ;;  %v6052_v8 = vpop.f32.mrf.mxu1  ;;  %v6376_v38 = vpop.f32.mrf.mxu0 }
 0x5b2   :  { %20578 = vst [vmem:[#allocation33_spill] sm:$0xff] %v17144_v48  ;;  %12099 = vmatpush3.bf16.msra.mxu0 %v12388_v5  ;;  %v17146_v16 = vadd.f32 %v6376_v38, %v6039_v22  ;;  %v20581_v48 = vld [vmem:[#allocation88_spill] sm:$0xff] }
 0x5b3   :  { %v11591_v33 = vpop.f32.mrf.mxu1  ;;  %v11670_v62 = vpop.f32.mrf.mxu0 }
 0x5b4   :  { %20579 = vst [vmem:[#allocation65_spill] sm:$0xff] %v17146_v16  ;;  %11957 = vmatmul.mubr.bf16.gmra.mxu0 %v16634_v13  ;;  %v17149_v27 = vadd.f32 %v11670_v62, %v11590_v10 }
 0x5b5   :  { %11960 = vmatprep.mubr.bf16.mxu0 %v16655_v21  ;;  %v6055_v47 = vpop.f32.mrf.mxu1  ;;  %v6389_v40 = vpop.f32.mrf.mxu0 }
 0x5b6   :  { %v17152_v32 = vadd.f32 %v6389_v40, %v6052_v8 }
 0x5b7   :  { %v11671_v56 = vpop.f32.mrf.mxu0 }
 0x5b8   :  { %v11594_v14 = vpop.f32.mrf.mxu1  ;;  %11881 = vmatmul.mubr.bf16.gmra.mxu1 %v20580_v34  ;;  %v17156_v5 = vadd.f32 %v11671_v56, %v11591_v33  ;;  %v20585_v56 = vld [vmem:[#allocation90_spill] sm:$0xff] }
 0x5b9   :  { %11884 = vmatprep.mubr.bf16.mxu1 %v20581_v48  ;;  %v6392_v38 = vpop.f32.mrf.mxu0  ;;  %v20584_v48 = vld [vmem:[#allocation115_spill] sm:$0xff] }
 0x5ba   :  { %20582 = vst [vmem:[#allocation34_spill] sm:$0xff] %v17156_v5  ;;  %v6068_v22 = vpop.f32.mrf.mxu1  ;;  %v17158_v16 = vadd.f32 %v6392_v38, %v6055_v47 }
 0x5bc   :  { %20583 = vst [vmem:[#allocation32_spill] sm:$0xff] %v17158_v16  ;;  %v11595_v62 = vpop.f32.mrf.mxu1  ;;  %v11674_v10 = vpop.f32.mrf.mxu0  ;;  %11961 = vmatmul.mubr.bf16.gmra.mxu0 %v16664_v1 }
 0x5bd   :  { %v17161_v21 = vadd.f32 %v11674_v10, %v11594_v14  ;;  %11964 = vmatprep.mubr.bf16.mxu0 %v16670_v23 }
 0x5be   :  { %v6071_v8 = vpop.f32.mrf.mxu1  ;;  %v6405_v40 = vpop.f32.mrf.mxu0 }
 0x5bf   :  { %v17164_v13 = vadd.f32 %v6405_v40, %v6068_v22 }
 0x5c0   :  { %v11598_v34 = vpop.f32.mrf.mxu1  ;;  %11885 = vmatmul.mubr.bf16.gmra.mxu1 %v20584_v48  ;;  %v11675_v33 = vpop.f32.mrf.mxu0 }
 0x5c1   :  { %11888 = vmatprep.mubr.bf16.mxu1 %v20585_v56  ;;  %v17168_v47 = vadd.f32 %v11675_v33, %v11595_v62  ;;  %v20587_v33 = vld [vmem:[#allocation18_spill] sm:$0xff] }
 0x5c2   :  { %v6084_v38 = vpop.f32.mrf.mxu1  ;;  %v6408_v16 = vpop.f32.mrf.mxu0 }
 0x5c3   :  { %v17170_v5 = vadd.f32 %v6408_v16, %v6071_v8 }
 0x5c4   :  { %v11599_v14 = vpop.f32.mrf.mxu1  ;;  %v11678_v10 = vpop.f32.mrf.mxu0  ;;  %11965 = vmatmul.mubr.bf16.gmra.mxu0 %v16692_v61 }
 0x5c5   :  { %20586 = vst [vmem:[#allocation66_spill] sm:$0xff] %v17170_v5  ;;  %v17173_v23 = vadd.f32 %v11678_v10, %v11598_v34  ;;  %11968 = vmatprep.mubr.bf16.mxu0 %v16699_v60 }
 0x5c6   :  { %v6087_v22 = vpop.f32.mrf.mxu1  ;;  %v6421_v40 = vpop.f32.mrf.mxu0 }
 0x5c7   :  { %v17176_v1 = vadd.f32 %v6421_v40, %v6084_v38 }
 0x5c8   :  { %v11602_v48 = vpop.f32.mrf.mxu1  ;;  %11889 = vmatmul.mubr.bf16.gmra.mxu1 %v16915_v54  ;;  %v11679_v62 = vpop.f32.mrf.mxu0 }
 0x5c9   :  { %11892 = vmatprep.mubr.bf16.mxu1 %v20587_v33  ;;  %v17180_v16 = vadd.f32 %v11679_v62, %v11599_v14  ;;  %v20589_v33 = vld [vmem:[#allocation79_spill] sm:$0xff] }
 0x5ca   :  { %v6100_v8 = vpop.f32.mrf.mxu1  ;;  %v6424_v56 = vpop.f32.mrf.mxu0 }
 0x5cb   :  { %v17182_v5 = vadd.f32 %v6424_v56, %v6087_v22  ;;  %v20590_v56 = vld [vmem:[#allocation82_spill] sm:$0xff] }
 0x5cc   :  { %v11603_v34 = vpop.f32.mrf.mxu1  ;;  %v11682_v10 = vpop.f32.mrf.mxu0  ;;  %11969 = vmatmul.mubr.bf16.gmra.mxu0 %v16945_v0 }
 0x5cd   :  { %20588 = vst [vmem:[#allocation126_spill] sm:$0xff] %v17182_v5  ;;  %v17185_v60 = vadd.f32 %v11682_v10, %v11602_v48  ;;  %11972 = vmatprep.mubr.bf16.mxu0 %v16737_v59 }
 0x5ce   :  { %v6103_v38 = vpop.f32.mrf.mxu1  ;;  %v6437_v40 = vpop.f32.mrf.mxu0 }
 0x5cf   :  { %v17188_v61 = vadd.f32 %v6437_v40, %v6100_v8 }
 0x5d0   :  { %v11702_v54 = vpop.f32.mrf.mxu1  ;;  %11893 = vmatmul.mubr.bf16.gmra.mxu1 %v20589_v33  ;;  %v11683_v14 = vpop.f32.mrf.mxu0 }
 0x5d1   :  { %v6808_v62 = vadd.f32 %v11702_v54, %v16997_v26  ;;  %11896 = vmatprep.mubr.bf16.mxu1 %v20590_v56  ;;  %v17193_v22 = vadd.f32 %v11683_v14, %v11603_v34 }
 0x5d2   :  { %v6551_v5 = vpop.f32.mrf.mxu1  ;;  %v6440_v0 = vpop.f32.mrf.mxu0 }
 0x5d3   :  { %v6806_v48 = vadd.f32 %v6551_v5, %v17000_v35  ;;  %v17196_v10 = vadd.f32 %v6440_v0, %v6103_v38  ;;  %v20591_v35 = vld [vmem:[#allocation21_spill] sm:$0xff] }
 0x5d4   :  { %v11703_v59 = vpop.f32.mrf.mxu1  ;;  %v11782_v40 = vpop.f32.mrf.mxu0  ;;  %11973 = vmatmul.mubr.bf16.gmra.mxu0 %v16713_v50 }
 0x5d5   :  { %v6809_v8 = vadd.f32 %v11703_v59, %v17004_v12  ;;  %v17200_v33 = vadd.f32 %v11782_v40, %v6808_v62  ;;  %11976 = vmatprep.mubr.bf16.mxu0 %v16758_v55  ;;  %v20592_v12 = vld [vmem:[#allocation94_spill] sm:$0xff] }
 0x5d6   :  { %v6554_v54 = vpop.f32.mrf.mxu1  ;;  %v6969_v34 = vpop.f32.mrf.mxu0 }
 0x5d7   :  { %v6807_v26 = vadd.f32 %v6554_v54, %v17006_v19  ;;  %v17204_v14 = vadd.f32 %v6969_v34, %v6806_v48 }
 0x5d8   :  { %v11706_v56 = vpop.f32.mrf.mxu1  ;;  %11897 = vmatmul.mubr.bf16.gmra.mxu1 %v20591_v35  ;;  %v11783_v5 = vpop.f32.mrf.mxu0 }
 0x5d9   :  { %v6812_v0 = vadd.f32 %v11706_v56, %v17009_v18  ;;  %11900 = vmatprep.mubr.bf16.mxu1 %v20592_v12  ;;  %v17209_v38 = vadd.f32 %v11783_v5, %v6809_v8 }
 0x5da   :  { %v6567_v62 = vpop.f32.mrf.mxu1  ;;  %v6972_v40 = vpop.f32.mrf.mxu0 }
 0x5db   :  { %v6810_v59 = vadd.f32 %v6567_v62, %v17012_v42  ;;  %v17212_v55 = vadd.f32 %v6972_v40, %v6807_v26  ;;  %v20593_v62 = vld [vmem:[#allocation17_spill] sm:$0xff] }
 0x5dc   :  { %v11707_v19 = vpop.f32.mrf.mxu1  ;;  %v11786_v54 = vpop.f32.mrf.mxu0  ;;  %11977 = vmatmul.mubr.bf16.gmra.mxu0 %v16766_v31 }
 0x5dd   :  { %v6813_v48 = vadd.f32 %v11707_v19, %v17016_v2  ;;  %v17216_v34 = vadd.f32 %v11786_v54, %v6812_v0  ;;  %11980 = vmatprep.mubr.bf16.mxu0 %v16773_v3  ;;  %v20594_v2 = vld [vmem:[#allocation101_spill] sm:$0xff] }
 0x5de   :  { %v6570_v18 = vpop.f32.mrf.mxu1  ;;  %v6985_v8 = vpop.f32.mrf.mxu0 }
 0x5df   :  { %v6811_v56 = vadd.f32 %v6570_v18, %v17018_v30  ;;  %v17220_v5 = vadd.f32 %v6985_v8, %v6810_v59 }
 0x5e0   :  { %v11710_v42 = vpop.f32.mrf.mxu1  ;;  %11901 = vmatmul.mubr.bf16.gmra.mxu1 %v20593_v62  ;;  %v11787_v40 = vpop.f32.mrf.mxu0 }
 0x5e1   :  { %v6816_v26 = vadd.f32 %v11710_v42, %v17021_v29  ;;  %11904 = vmatprep.mubr.bf16.mxu1 %v20594_v2  ;;  %v17225_v19 = vadd.f32 %v11787_v40, %v6813_v48  ;;  %v20595_v29 = vld [vmem:[#allocation27_spill] sm:$0xff] }
 0x5e2   :  { %v6583_v0 = vpop.f32.mrf.mxu1  ;;  %v6988_v3 = vpop.f32.mrf.mxu0 }
 0x5e3   :  { %v6814_v54 = vadd.f32 %v6583_v0, %v17024_v17  ;;  %v17228_v31 = vadd.f32 %v6988_v3, %v6811_v56  ;;  %v20596_v0 = vld [vmem:[#allocation102_spill] sm:$0xff] }
 0x5e4   :  { %v11711_v30 = vpop.f32.mrf.mxu1  ;;  %v11790_v18 = vpop.f32.mrf.mxu0  ;;  %11981 = vmatmul.mubr.bf16.gmra.mxu0 %v16795_v25 }
 0x5e5   :  { %v6817_v59 = vadd.f32 %v11711_v30, %v17028_v44  ;;  %v17232_v8 = vadd.f32 %v11790_v18, %v6816_v26  ;;  %11984 = vmatprep.mubr.bf16.mxu0 %v20595_v29  ;;  %v20597_v44 = vld [vmem:[#allocation22_spill] sm:$0xff] }
 0x5e6   :  { %v6586_v42 = vpop.f32.mrf.mxu1  ;;  %v7001_v40 = vpop.f32.mrf.mxu0 }
 0x5e7   :  { %v6815_v48 = vadd.f32 %v6586_v42, %v17030_v63  ;;  %v17236_v50 = vadd.f32 %v7001_v40, %v6814_v54  ;;  %v20599_v40 = vld [vmem:[#allocation122_spill] sm:$0xff] }
 0x5e8   :  { %v11714_v17 = vpop.f32.mrf.mxu1  ;;  %11905 = vmatmul.mubr.bf16.gmra.mxu1 %v20596_v0  ;;  %v11791_v56 = vpop.f32.mrf.mxu0 }
 0x5e9   :  { %v6820_v3 = vadd.f32 %v11714_v17, %v17033_v24  ;;  %11908 = vmatprep.mubr.bf16.mxu1 %v20597_v44  ;;  %v17241_v30 = vadd.f32 %v11791_v56, %v6817_v59  ;;  %v20601_v24 = vld [vmem:[#allocation73_spill] sm:$0xff]  ;;  %v20602_v44 = vld [vmem:[#allocation28_spill] sm:$0xff] }
 0x5ea   :  { %v6599_v26 = vpop.f32.mrf.mxu1  ;;  %v7004_v29 = vpop.f32.mrf.mxu0 }
 0x5eb   :  { %v6818_v18 = vadd.f32 %v6599_v26, %v17036_v9  ;;  %v17244_v25 = vadd.f32 %v7004_v29, %v6815_v48  ;;  %v20603_v26 = vld [vmem:[#allocation119_spill] sm:$0xff]  ;;  %v20604_v29 = vld [vmem:[#allocation50_spill] sm:$0xff] }
 0x5ec   :  { %v11715_v63 = vpop.f32.mrf.mxu1  ;;  %v11794_v42 = vpop.f32.mrf.mxu0  ;;  %11985 = vmatmul.mubr.bf16.gmra.mxu0 %v20599_v40 }
 0x5ed   :  { %20598 = vst [vmem:[#allocation37_spill] sm:$0xff] %v17244_v25  ;;  %v6821_v54 = vadd.f32 %v11715_v63, %v17040_v51  ;;  %v17248_v0 = vadd.f32 %v11794_v42, %v6820_v3  ;;  %11988 = vmatprep.mubr.bf16.mxu0 %v20601_v24  ;;  %v20605_v51 = vld [vmem:[#allocation108_spill] sm:$0xff] }
 0x5ee   :  { %v6602_v17 = vpop.f32.mrf.mxu1  ;;  %v7017_v56 = vpop.f32.mrf.mxu0  ;;  %v20606_v42 = vld [vmem:[#allocation52_spill] sm:$0xff] }
 0x5ef   :  { %20600 = vst [vmem:[#allocation67_spill] sm:$0xff] %v17248_v0  ;;  %v6819_v59 = vadd.f32 %v6602_v17, %v20602_v44  ;;  %v17252_v2 = vadd.f32 %v7017_v56, %v6818_v18  ;;  %v20607_v56 = vld [vmem:[#allocation74_spill] sm:$0xff] }
 0x5f0   :  { %v11718_v9 = vpop.f32.mrf.mxu1  ;;  %11909 = vmatmul.mubr.bf16.gmra.mxu1 %v20603_v26  ;;  %v11795_v25 = vpop.f32.mrf.mxu0 }
 0x5f1   :  { %v6824_v48 = vadd.f32 %v11718_v9, %v20604_v29  ;;  %11912 = vmatprep.mubr.bf16.mxu1 %v20605_v51  ;;  %v17257_v63 = vadd.f32 %v11795_v25, %v6821_v54  ;;  %v20608_v9 = vld [vmem:[#allocation47_spill] sm:$0xff] }
 0x5f2   :  { %v6615_v3 = vpop.f32.mrf.mxu1  ;;  %v7020_v24 = vpop.f32.mrf.mxu0 }
 0x5f3   :  { %v6822_v40 = vadd.f32 %v6615_v3, %v20606_v42  ;;  %v17260_v0 = vadd.f32 %v7020_v24, %v6819_v59  ;;  %v20609_v42 = vld [vmem:[#allocation109_spill] sm:$0xff] }
 0x5f4   :  { %v11719_v44 = vpop.f32.mrf.mxu1  ;;  %v11798_v17 = vpop.f32.mrf.mxu0  ;;  %11989 = vmatmul.mubr.bf16.gmra.mxu0 %v20607_v56 }
 0x5f5   :  { %v6825_v18 = vadd.f32 %v11719_v44, %v17055_v11  ;;  %v17264_v26 = vadd.f32 %v11798_v17, %v6824_v48  ;;  %11992 = vmatprep.mubr.bf16.mxu0 %v20608_v9  ;;  %v20610_v11 = vld [vmem:[#allocation116_spill] sm:$0xff] }
 0x5f6   :  { %v6618_v29 = vpop.f32.mrf.mxu1  ;;  %v7033_v54 = vpop.f32.mrf.mxu0 }
 0x5f7   :  { %v6823_v25 = vadd.f32 %v6618_v29, %v17057_v57  ;;  %v17268_v51 = vadd.f32 %v7033_v54, %v6822_v40  ;;  %v20612_v54 = vld [vmem:[#allocation44_spill] sm:$0xff] }
 0x5f8   :  { %v11722_v3 = vpop.f32.mrf.mxu1  ;;  %11913 = vmatmul.mubr.bf16.gmra.mxu1 %v20609_v42  ;;  %v11799_v59 = vpop.f32.mrf.mxu0 }
 0x5f9   :  { %v6828_v24 = vadd.f32 %v11722_v3, %v17060_v36  ;;  %11916 = vmatprep.mubr.bf16.mxu1 %v20610_v11  ;;  %v17273_v44 = vadd.f32 %v11799_v59, %v6825_v18  ;;  %v20613_v36 = vld [vmem:[#allocation96_spill] sm:$0xff] }
 0x5fa   :  { %v6631_v48 = vpop.f32.mrf.mxu1  ;;  %v7036_v9 = vpop.f32.mrf.mxu0  ;;  %v20614_v11 = vld [vmem:[#allocation56_spill] sm:$0xff] }
 0x5fb   :  { %20611 = vst [vmem:[#allocation104_spill] sm:$0xff] %v17273_v44  ;;  %v6826_v17 = vadd.f32 %v6631_v48, %v17063_v15  ;;  %v17276_v56 = vadd.f32 %v7036_v9, %v6823_v25  ;;  %v20616_v48 = vld [vmem:[#allocation20_spill] sm:$0xff] }
 0x5fc   :  { %v11723_v57 = vpop.f32.mrf.mxu1  ;;  %v11802_v29 = vpop.f32.mrf.mxu0  ;;  %11993 = vmatmul.mubr.bf16.gmra.mxu0 %v20612_v54 }
 0x5fd   :  { %v6829_v40 = vadd.f32 %v11723_v57, %v17067_v52  ;;  %v17280_v42 = vadd.f32 %v11802_v29, %v6828_v24  ;;  %11996 = vmatprep.mubr.bf16.mxu0 %v20613_v36  ;;  %v20617_v52 = vld [vmem:[#allocation99_spill] sm:$0xff] }
 0x5fe   :  { %v6634_v3 = vpop.f32.mrf.mxu1  ;;  %v7049_v59 = vpop.f32.mrf.mxu0 }
 0x5ff   :  { %v6827_v18 = vadd.f32 %v6634_v3, %v20614_v11  ;;  %v17284_v44 = vadd.f32 %v7049_v59, %v6826_v17  ;;  %v20619_v3 = vld [vmem:[#allocation31_spill] sm:$0xff] }
 0x600   :  { %v11726_v15 = vpop.f32.mrf.mxu1  ;;  %11917 = vmatmul.mubr.bf16.gmra.mxu1 %v20616_v48  ;;  %v11803_v25 = vpop.f32.mrf.mxu0 }
 0x601   :  { %20615 = vst [vmem:[#allocation105_spill] sm:$0xff] %v17284_v44  ;;  %v6832_v9 = vadd.f32 %v11726_v15, %v17072_v37  ;;  %11920 = vmatprep.mubr.bf16.mxu1 %v20617_v52  ;;  %v17289_v57 = vadd.f32 %v11803_v25, %v6829_v40  ;;  %v20620_v44 = vld [vmem:[#allocation48_spill] sm:$0xff]  ;;  %v20621_v37 = vld [vmem:[#allocation123_spill] sm:$0xff] }
 0x602   :  { %v6647_v24 = vpop.f32.mrf.mxu1  ;;  %v7052_v36 = vpop.f32.mrf.mxu0 }
 0x603   :  { %v6830_v29 = vadd.f32 %v6647_v24, %v17075_v7  ;;  %v17292_v54 = vadd.f32 %v7052_v36, %v6827_v18  ;;  %v20623_v24 = vld [vmem:[#allocation135_spill] sm:$0xff]  ;;  %v20624_v36 = vld [vmem:[#allocation26_spill] sm:$0xff] }
 0x604   :  { %v11727_v11 = vpop.f32.mrf.mxu1  ;;  %v11806_v59 = vpop.f32.mrf.mxu0  ;;  %11997 = vmatmul.mubr.bf16.gmra.mxu0 %v20620_v44 }
 0x605   :  { %20618 = vst [vmem:[#allocation70_spill] sm:$0xff] %v17292_v54  ;;  %v6833_v17 = vadd.f32 %v11727_v11, %v20619_v3  ;;  %v17296_v48 = vadd.f32 %v11806_v59, %v6832_v9  ;;  %12000 = vmatprep.mubr.bf16.mxu0 %v20621_v37  ;;  %v20625_v11 = vld [vmem:[#allocation78_spill] sm:$0xff] }
 0x606   :  { %v6650_v15 = vpop.f32.mrf.mxu1  ;;  %v7065_v25 = vpop.f32.mrf.mxu0 }
 0x607   :  { %v6831_v40 = vadd.f32 %v6650_v15, %v17081_v4  ;;  %v17300_v52 = vadd.f32 %v7065_v25, %v6830_v29  ;;  %v20627_v25 = vld [vmem:[#allocation29_spill] sm:$0xff] }
 0x608   :  { %v11730_v7 = vpop.f32.mrf.mxu1  ;;  %11921 = vmatmul.mubr.bf16.gmra.mxu1 %v20623_v24  ;;  %v11807_v54 = vpop.f32.mrf.mxu0 }
 0x609   :  { %20622 = vst [vmem:[#allocation35_spill] sm:$0xff] %v17300_v52  ;;  %v6836_v18 = vadd.f32 %v11730_v7, %v20624_v36  ;;  %12020 = vmatprep.mubr.bf16.mxu1 %v20625_v11  ;;  %v17305_v3 = vadd.f32 %v11807_v54, %v6833_v17  ;;  %v20628_v7 = vld [vmem:[#allocation128_spill] sm:$0xff]  ;;  %v12390_v11 = vld [vmem:[#allocation8 + $0x230] sm:$0xff]   ;;  %v20629_v54 = vld [vmem:[#allocation54_spill] sm:$0xff] }
 0x60a   :  { %v6663_v9 = vpop.f32.mrf.mxu1  ;;  %v7068_v37 = vpop.f32.mrf.mxu0 }
 0x60b   :  { %20626 = vst [vmem:[#allocation63_spill] sm:$0xff] %v17305_v3  ;;  %v6834_v59 = vadd.f32 %v6663_v9, %v17087_v28  ;;  %v17308_v44 = vadd.f32 %v7068_v37, %v6831_v40  ;;  %v20631_v37 = vld [vmem:[#allocation75_spill] sm:$0xff]  ;;  %v20632_v40 = vld [vmem:[#allocation46_spill] sm:$0xff] }
 0x60c   :  { %v11731_v4 = vpop.f32.mrf.mxu1  ;;  %v11810_v15 = vpop.f32.mrf.mxu0  ;;  %12001 = vmatmul.mubr.bf16.gmra.mxu0 %v20627_v25  ;;  %v20635_v25 = vld [vmem:[#allocation58_spill] sm:$0xff] }
 0x60d   :  { %v6837_v29 = vadd.f32 %v11731_v4, %v17092_v46  ;;  %v17312_v24 = vadd.f32 %v11810_v15, %v6836_v18  ;;  %12100 = vmatprep.mubr.bf16.mxu0 %v20628_v7  ;;  %v20633_v4 = vld [vmem:[#allocation106_spill] sm:$0xff]  ;;  %v12391_v7 = vld [vmem:[#allocation8 + $0x228] sm:$0xff]  }
 0x60e   :  { %v6666_v36 = vpop.f32.mrf.mxu1  ;;  %v7081_v3 = vpop.f32.mrf.mxu0 }
 0x60f   :  { %v6835_v17 = vadd.f32 %v6666_v36, %v20629_v54  ;;  %v17316_v52 = vadd.f32 %v7081_v3, %v6834_v59 }
 0x610   :  { %v11734_v28 = vpop.f32.mrf.mxu1  ;;  %12021 = vmatmul.mubr.bf16.vlgmr.msra.gmra.mxu1 %v20631_v37  ;;  %v11811_v46 = vpop.f32.mrf.mxu0 }
 0x611   :  { %20630 = vst [vmem:[#allocation72_spill] sm:$0xff] %v17316_v52  ;;  %v6840_v9 = vadd.f32 %v11734_v28, %v20632_v40  ;;  %12024 = vmatprep.mubr.bf16.mxu1 %v20633_v4  ;;  %12165 = vmatpush3.bf16.msra.mxu1 %v17131_v6  ;;  %v17322_v18 = vadd.f32 %v11811_v46, %v6837_v29  ;;  %v20636_v28 = vld [vmem:[#allocation69_spill] sm:$0xff]  ;;  %v20638_v6 = vld [vmem:[#allocation76_spill] sm:$0xff]  ;;  %v12392_v46 = vld [vmem:[#allocation8 + $0x220] sm:$0xff]  }
 0x612   :  { %v6679_v15 = vpop.f32.mrf.mxu1  ;;  %12166 = vmatprep.subr.bf16.mxu1 %v12390_v11  ;;  %v7084_v54 = vpop.f32.mrf.mxu0  ;;  %v20639_v4 = vld [vmem:[#allocation61_spill] sm:$0xff] }
 0x613   :  { %20634 = vst [vmem:[#allocation80_spill] sm:$0xff] %v17322_v18  ;;  %v6838_v36 = vadd.f32 %v6679_v15, %v17101_v43  ;;  %v17325_v3 = vadd.f32 %v7084_v54, %v6835_v17  ;;  %v20641_v54 = vld [vmem:[#allocation117_spill] sm:$0xff] }
 0x614   :  { %v11735_v59 = vpop.f32.mrf.mxu1  ;;  %v11814_v52 = vpop.f32.mrf.mxu0  ;;  %12101 = vmatmul.mubr.bf16.vlgmr.msra.gmra.mxu0 %v20636_v28  ;;  %v20642_v28 = vld [vmem:[#allocation68_spill] sm:$0xff] }
 0x615   :  { %v6841_v37 = vadd.f32 %v11735_v59, %v20635_v25  ;;  %12167 = vmatpush3.bf16.msra.mxu1 %v12390_v11  ;;  %v17329_v40 = vadd.f32 %v11814_v52, %v6840_v9  ;;  %12104 = vmatprep.mubr.bf16.mxu0 %v20638_v6  ;;  %v12393_v9 = vld [vmem:[#allocation8 + $0x218] sm:$0xff]  }
 0x616   :  { %v6682_v29 = vpop.f32.mrf.mxu1  ;;  %12168 = vmatprep.subr.bf16.mxu1 %v12391_v7  ;;  %v7097_v43 = vpop.f32.mrf.mxu0 }
 0x617   :  { %20637 = vst [vmem:[#allocation92_spill] sm:$0xff] %v17329_v40  ;;  %v6839_v18 = vadd.f32 %v6682_v29, %v20639_v4  ;;  %v17333_v15 = vadd.f32 %v7097_v43, %v6838_v36  ;;  %v20643_v43 = vld [vmem:[#allocation51_spill] sm:$0xff]  ;;  %v20644_v40 = vld [vmem:[#allocation129_spill] sm:$0xff] }
 0x618   :  { %v11738_v17 = vpop.f32.mrf.mxu1  ;;  %12025 = vmatmul.mubr.bf16.gmra.mxu1 %v20641_v54  ;;  %v11815_v59 = vpop.f32.mrf.mxu0 }
 0x619   :  { %20640 = vst [vmem:[#allocation127_spill] sm:$0xff] %v17333_v15  ;;  %v6844_v25 = vadd.f32 %v11738_v17, %v17110_v20  ;;  %12028 = vmatprep.mubr.bf16.mxu1 %v20642_v28  ;;  %12169 = vmatpush3.bf16.msra.mxu1 %v12391_v7  ;;  %v17338_v52 = vadd.f32 %v11815_v59, %v6841_v37  ;;  %v20645_v7 = vld [vmem:[#allocation41_spill] sm:$0xff] }
 0x61a   :  { %v6695_v11 = vpop.f32.mrf.mxu1  ;;  %12170 = vmatprep.subr.bf16.mxu1 %v12392_v46  ;;  %v7100_v29 = vpop.f32.mrf.mxu0  ;;  %v12394_v17 = vld [vmem:[#allocation8 + $0x210] sm:$0xff]  }
 0x61b   :  { %v6842_v6 = vadd.f32 %v6695_v11, %v17113_v41  ;;  %v17341_v4 = vadd.f32 %v7100_v29, %v6839_v18  ;;  %v20646_v59 = vld [vmem:[#allocation57_spill] sm:$0xff]  ;;  %v20648_v29 = vld [vmem:[#allocation111_spill] sm:$0xff] }
 0x61c   :  { %v11739_v36 = vpop.f32.mrf.mxu1  ;;  %v11818_v54 = vpop.f32.mrf.mxu0  ;;  %12105 = vmatmul.mubr.bf16.gmra.mxu0 %v20644_v40  ;;  %v20649_v40 = vld [vmem:[#allocation71_spill] sm:$0xff] }
 0x61d   :  { %v6845_v15 = vadd.f32 %v11739_v36, %v20643_v43  ;;  %12171 = vmatpush3.bf16.msra.mxu1 %v12392_v46  ;;  %v17345_v20 = vadd.f32 %v11818_v54, %v6844_v25  ;;  %12108 = vmatprep.mubr.bf16.mxu0 %v20645_v7  ;;  %v12395_v54 = vld [vmem:[#allocation8 + $0x208] sm:$0xff]  }
 0x61e   :  { %v6698_v37 = vpop.f32.mrf.mxu1  ;;  %12172 = vmatprep.subr.bf16.mxu1 %v12393_v9  ;;  %v7113_v41 = vpop.f32.mrf.mxu0 }
 0x61f   :  { %v6843_v28 = vadd.f32 %v6698_v37, %v20646_v59  ;;  %v17349_v11 = vadd.f32 %v7113_v41, %v6842_v6 }
 0x620   :  { %v11742_v18 = vpop.f32.mrf.mxu1  ;;  %12029 = vmatmul.mubr.bf16.gmra.mxu1 %v20648_v29  ;;  %v11819_v43 = vpop.f32.mrf.mxu0 }
 0x621   :  { %20647 = vst [vmem:[#allocation18_spill] sm:$0xff] %v17349_v11  ;;  %v6848_v36 = vadd.f32 %v11742_v18, %v17122_v49  ;;  %12032 = vmatprep.mubr.bf16.mxu1 %v20649_v40  ;;  %12173 = vmatpush3.bf16.msra.mxu1 %v12393_v9  ;;  %v17354_v46 = vadd.f32 %v11819_v43, %v6845_v15  ;;  %v20650_v11 = vld [vmem:[#allocation110_spill] sm:$0xff]  ;;  %v20651_v9 = vld [vmem:[#allocation81_spill] sm:$0xff]  ;;  %v12396_v18 = vld [vmem:[#allocation8 + $0x200] sm:$0xff]  }
 0x622   :  { %v6711_v25 = vpop.f32.mrf.mxu1  ;;  %12174 = vmatprep.subr.bf16.mxu1 %v12394_v17  ;;  %v7116_v37 = vpop.f32.mrf.mxu0 }
 0x623   :  { %v6846_v7 = vadd.f32 %v6711_v25, %v17125_v53  ;;  %v17357_v59 = vadd.f32 %v7116_v37, %v6843_v28  ;;  %v20653_v25 = vld [vmem:[#allocation114_spill] sm:$0xff] }
 0x624   :  { %v11743_v6 = vpop.f32.mrf.mxu1  ;;  %v11822_v29 = vpop.f32.mrf.mxu0  ;;  %12109 = vmatmul.mubr.bf16.gmra.mxu0 %v20650_v11  ;;  %v20655_v11 = vld [vmem:[#allocation87_spill] sm:$0xff] }
 0x625   :  { %v6849_v41 = vadd.f32 %v11743_v6, %v17129_v45  ;;  %12175 = vmatpush3.bf16.msra.mxu1 %v12394_v17  ;;  %v17361_v49 = vadd.f32 %v11822_v29, %v6848_v36  ;;  %12112 = vmatprep.mubr.bf16.mxu0 %v20651_v9  ;;  %v20654_v45 = vld [vmem:[#allocation125_spill] sm:$0xff] }
 0x626   :  { %v6714_v15 = vpop.f32.mrf.mxu1  ;;  %12176 = vmatprep.subr.bf16.mxu1 %v12395_v54  ;;  %v7129_v53 = vpop.f32.mrf.mxu0 }
 0x627   :  { %v6847_v43 = vadd.f32 %v6714_v15, %v17133_v39  ;;  %v17365_v40 = vadd.f32 %v7129_v53, %v6846_v7  ;;  %v20657_v15 = vld [vmem:[#allocation33_spill] sm:$0xff] }
 0x628   :  { %v11746_v28 = vpop.f32.mrf.mxu1  ;;  %12033 = vmatmul.mubr.bf16.gmra.mxu1 %v20653_v25  ;;  %v11823_v6 = vpop.f32.mrf.mxu0  ;;  %v20658_v25 = vld [vmem:[#allocation83_spill] sm:$0xff] }
 0x629   :  { %20652 = vst [vmem:[#allocation21_spill] sm:$0xff] %v17365_v40  ;;  %v6852_v37 = vadd.f32 %v11746_v28, %v20654_v45  ;;  %12036 = vmatprep.mubr.bf16.mxu1 %v20655_v11  ;;  %12177 = vmatpush3.bf16.msra.mxu1 %v12395_v54  ;;  %v17370_v17 = vadd.f32 %v11823_v6, %v6849_v41  ;;  %v20659_v45 = vld [vmem:[#allocation84_spill] sm:$0xff]  ;;  %v20660_v41 = vld [vmem:[#allocation65_spill] sm:$0xff] }
 0x62a   :  { %v6727_v36 = vpop.f32.mrf.mxu1  ;;  %12178 = vmatprep.subr.bf16.mxu1 %v12396_v18  ;;  %v7132_v9 = vpop.f32.mrf.mxu0 }
 0x62b   :  { %20656 = vst [vmem:[#allocation94_spill] sm:$0xff] %v17370_v17  ;;  %v6850_v29 = vadd.f32 %v6727_v36, %v17140_v58  ;;  %v17373_v39 = vadd.f32 %v7132_v9, %v6847_v43  ;;  %v20661_v43 = vld [vmem:[#allocation77_spill] sm:$0xff] }
 0x62c   :  { %v11747_v7 = vpop.f32.mrf.mxu1  ;;  %v11826_v40 = vpop.f32.mrf.mxu0  ;;  %12113 = vmatmul.mubr.bf16.gmra.mxu0 %v20658_v25 }
 0x62d   :  { %v6853_v53 = vadd.f32 %v11747_v7, %v20657_v15  ;;  %12179 = vmatpush3.bf16.msra.mxu1 %v12396_v18  ;;  %v17377_v28 = vadd.f32 %v11826_v40, %v6852_v37  ;;  %12116 = vmatprep.mubr.bf16.mxu0 %v20659_v45  ;;  %v20662_v7 = vld [vmem:[#allocation89_spill] sm:$0xff] }
 0x62e   :  { %v6730_v54 = vpop.f32.mrf.mxu1  ;;  %v7145_v11 = vpop.f32.mrf.mxu0 }
 0x62f   :  { %v6851_v6 = vadd.f32 %v6730_v54, %v20660_v41  ;;  %v17381_v17 = vadd.f32 %v7145_v11, %v6850_v29  ;;  %v20664_v54 = vld [vmem:[#allocation34_spill] sm:$0xff]  ;;  %v20665_v11 = vld [vmem:[#allocation85_spill] sm:$0xff] }
 0x630   :  { %v11750_v58 = vpop.f32.mrf.mxu1  ;;  %12037 = vmatmul.mubr.bf16.gmra.mxu1 %v20661_v43  ;;  %v11827_v9 = vpop.f32.mrf.mxu0 }
 0x631   :  { %v6856_v36 = vadd.f32 %v11750_v58, %v17149_v27  ;;  %12040 = vmatprep.mubr.bf16.mxu1 %v20662_v7  ;;  %v17386_v15 = vadd.f32 %v11827_v9, %v6853_v53  ;;  %v20666_v27 = vld [vmem:[#allocation86_spill] sm:$0xff]  ;;  %v20667_v7 = vld [vmem:[#allocation32_spill] sm:$0xff] }
 0x632   :  { %v6743_v18 = vpop.f32.mrf.mxu1  ;;  %v7148_v37 = vpop.f32.mrf.mxu0 }
 0x633   :  { %20663 = vst [vmem:[#allocation17_spill] sm:$0xff] %v17386_v15  ;;  %v6854_v40 = vadd.f32 %v6743_v18, %v17152_v32  ;;  %v17389_v25 = vadd.f32 %v7148_v37, %v6851_v6  ;;  %v20668_v18 = vld [vmem:[#allocation118_spill] sm:$0xff] }
 0x634   :  { %v11751_v45 = vpop.f32.mrf.mxu1  ;;  %v11830_v41 = vpop.f32.mrf.mxu0  ;;  %12117 = vmatmul.mubr.bf16.gmra.mxu0 %v20665_v11 }
 0x635   :  { %v6857_v29 = vadd.f32 %v11751_v45, %v20664_v54  ;;  %v17393_v43 = vadd.f32 %v11830_v41, %v6856_v36  ;;  %12120 = vmatprep.mubr.bf16.mxu0 %v20666_v27  ;;  %v20669_v45 = vld [vmem:[#allocation91_spill] sm:$0xff] }
 0x636   :  { %v6746_v58 = vpop.f32.mrf.mxu1  ;;  %v7161_v9 = vpop.f32.mrf.mxu0 }
 0x637   :  { %v6855_v53 = vadd.f32 %v6746_v58, %v20667_v7  ;;  %v17397_v15 = vadd.f32 %v7161_v9, %v6854_v40  ;;  %v20671_v9 = vld [vmem:[#allocation88_spill] sm:$0xff] }
 0x638   :  { %v11754_v32 = vpop.f32.mrf.mxu1  ;;  %12041 = vmatmul.mubr.bf16.gmra.mxu1 %v20668_v18  ;;  %v11831_v37 = vpop.f32.mrf.mxu0 }
 0x639   :  { %v6860_v6 = vadd.f32 %v11754_v32, %v17161_v21  ;;  %12044 = vmatprep.mubr.bf16.mxu1 %v20669_v45  ;;  %v17402_v54 = vadd.f32 %v11831_v37, %v6857_v29  ;;  %v20672_v21 = vld [vmem:[#allocation115_spill] sm:$0xff]  ;;  %v20673_v45 = vld [vmem:[#allocation66_spill] sm:$0xff] }
 0x63a   :  { %v6759_v36 = vpop.f32.mrf.mxu1  ;;  %v7164_v11 = vpop.f32.mrf.mxu0 }
 0x63b   :  { %20670 = vst [vmem:[#allocation28_spill] sm:$0xff] %v17402_v54  ;;  %v6858_v41 = vadd.f32 %v6759_v36, %v17164_v13  ;;  %v17405_v27 = vadd.f32 %v7164_v11, %v6855_v53  ;;  %v20675_v36 = vld [vmem:[#allocation19_spill] sm:$0xff] }
 0x63c   :  { %v11755_v58 = vpop.f32.mrf.mxu1  ;;  %v11834_v7 = vpop.f32.mrf.mxu0  ;;  %12121 = vmatmul.mubr.bf16.gmra.mxu0 %v20671_v9 }
 0x63d   :  { %v6861_v40 = vadd.f32 %v11755_v58, %v17168_v47  ;;  %v17409_v18 = vadd.f32 %v11834_v7, %v6860_v6  ;;  %12124 = vmatprep.mubr.bf16.mxu0 %v20672_v21  ;;  %v20676_v47 = vld [vmem:[#allocation53_spill] sm:$0xff] }
 0x63e   :  { %v6762_v32 = vpop.f32.mrf.mxu1  ;;  %v7177_v37 = vpop.f32.mrf.mxu0 }
 0x63f   :  { %v6859_v29 = vadd.f32 %v6762_v32, %v20673_v45  ;;  %v17413_v54 = vadd.f32 %v7177_v37, %v6858_v41  ;;  %v20678_v37 = vld [vmem:[#allocation90_spill] sm:$0xff] }
 0x640   :  { %v11758_v13 = vpop.f32.mrf.mxu1  ;;  %12045 = vmatmul.mubr.bf16.gmra.mxu1 %v20675_v36  ;;  %v11835_v11 = vpop.f32.mrf.mxu0 }
 0x641   :  { %20674 = vst [vmem:[#allocation50_spill] sm:$0xff] %v17413_v54  ;;  %v6864_v53 = vadd.f32 %v11758_v13, %v17173_v23  ;;  %12048 = vmatprep.mubr.bf16.mxu1 %v20676_v47  ;;  %v17418_v58 = vadd.f32 %v11835_v11, %v6861_v40  ;;  %v20679_v23 = vld [vmem:[#allocation124_spill] sm:$0xff]  ;;  %v20680_v47 = vld [vmem:[#allocation126_spill] sm:$0xff] }
 0x642   :  { %v6775_v6 = vpop.f32.mrf.mxu1  ;;  %v7180_v9 = vpop.f32.mrf.mxu0 }
 0x643   :  { %20677 = vst [vmem:[#allocation52_spill] sm:$0xff] %v17418_v58  ;;  %v6862_v7 = vadd.f32 %v6775_v6, %v17176_v1  ;;  %v17421_v21 = vadd.f32 %v7180_v9, %v6859_v29 }
 0x644   :  { %v11759_v32 = vpop.f32.mrf.mxu1  ;;  %v11838_v45 = vpop.f32.mrf.mxu0  ;;  %12125 = vmatmul.mubr.bf16.gmra.mxu0 %v20678_v37 }
 0x645   :  { %v6865_v41 = vadd.f32 %v11759_v32, %v17180_v16  ;;  %v17425_v54 = vadd.f32 %v11838_v45, %v6864_v53  ;;  %12128 = vmatprep.mubr.bf16.mxu0 %v20679_v23  ;;  %v20681_v16 = vld [vmem:[#allocation93_spill] sm:$0xff] }
 0x646   :  { %v6778_v13 = vpop.f32.mrf.mxu1  ;;  %v7193_v11 = vpop.f32.mrf.mxu0 }
 0x647   :  { %v6863_v40 = vadd.f32 %v6778_v13, %v20680_v47  ;;  %v17429_v58 = vadd.f32 %v7193_v11, %v6862_v7 }
 0x648   :  { %v11762_v1 = vpop.f32.mrf.mxu1  ;;  %12049 = vmatmul.mubr.bf16.gmra.mxu1 %v20675_v36  ;;  %v11839_v6 = vpop.f32.mrf.mxu0 }
 0x649   :  { %v6868_v29 = vadd.f32 %v11762_v1, %v17185_v60  ;;  %12052 = vmatprep.mubr.bf16.mxu1 %v20681_v16  ;;  %v17434_v9 = vadd.f32 %v11839_v6, %v6865_v41  ;;  %v20682_v60 = vld [vmem:[#allocation79_spill] sm:$0xff] }
 0x64a   :  { %v6791_v53 = vpop.f32.mrf.mxu1  ;;  %v7196_v45 = vpop.f32.mrf.mxu0  ;;  %v20683_v16 = vld [vmem:[#allocation95_spill] sm:$0xff] }
 0x64b   :  { %v6866_v32 = vadd.f32 %v6791_v53, %v17188_v61  ;;  %v17437_v23 = vadd.f32 %v7196_v45, %v6863_v40 }
 0x64c   :  { %v11763_v13 = vpop.f32.mrf.mxu1  ;;  %v11842_v47 = vpop.f32.mrf.mxu0  ;;  %12129 = vmatmul.mubr.bf16.gmra.mxu0 %v20678_v37 }
 0x64d   :  { %v6869_v7 = vadd.f32 %v11763_v13, %v17193_v22  ;;  %v17441_v36 = vadd.f32 %v11842_v47, %v6868_v29  ;;  %12132 = vmatprep.mubr.bf16.mxu0 %v20682_v60  ;;  %v20684_v22 = vld [vmem:[#allocation134_spill] sm:$0xff] }
 0x64e   :  { %v6794_v11 = vpop.f32.mrf.mxu1  ;;  %v7209_v1 = vpop.f32.mrf.mxu0 }
 0x64f   :  { %v6867_v41 = vadd.f32 %v6794_v11, %v17196_v10  ;;  %v17445_v6 = vadd.f32 %v7209_v1, %v6866_v32  ;;  %v20685_v11 = vld [vmem:[#allocation82_spill] sm:$0xff] }
 0x650   :  { %v11862_v61 = vpop.f32.mrf.mxu1  ;;  %12053 = vmatmul.mubr.bf16.gmra.mxu1 %v20683_v16  ;;  %v11843_v40 = vpop.f32.mrf.mxu0 }
 0x651   :  { %v7644_v53 = vadd.f32 %v11862_v61, %v17200_v33  ;;  %12056 = vmatprep.mubr.bf16.mxu1 %v20684_v22  ;;  %v17450_v45 = vadd.f32 %v11843_v40, %v6869_v7 }
 0x652   :  { %v7387_v37 = vpop.f32.mrf.mxu1  ;;  %v7212_v29 = vpop.f32.mrf.mxu0 }
 0x653   :  { %v7642_v13 = vadd.f32 %v7387_v37, %v17204_v14  ;;  %v17453_v47 = vadd.f32 %v7212_v29, %v6867_v41  ;;  %v20686_v14 = vld [vmem:[#allocation103_spill] sm:$0xff] }
 0x654   :  { %v11863_v10 = vpop.f32.mrf.mxu1  ;;  %v11942_v60 = vpop.f32.mrf.mxu0  ;;  %12133 = vmatmul.mubr.bf16.gmra.mxu0 %v20685_v11 }
 0x655   :  { %v7645_v32 = vadd.f32 %v11863_v10, %v17209_v38  ;;  %v17457_v1 = vadd.f32 %v11942_v60, %v7644_v53  ;;  %12136 = vmatprep.mubr.bf16.mxu0 %v20591_v35  ;;  %v20687_v38 = vld [vmem:[#allocation23_spill] sm:$0xff] }
 0x656   :  { %v7390_v33 = vpop.f32.mrf.mxu1  ;;  %v7805_v61 = vpop.f32.mrf.mxu0 }
 0x657   :  { %v7643_v7 = vadd.f32 %v7390_v33, %v17212_v55  ;;  %v17461_v16 = vadd.f32 %v7805_v61, %v7642_v13 }
 0x658   :  { %v11866_v40 = vpop.f32.mrf.mxu1  ;;  %12057 = vmatmul.mubr.bf16.gmra.mxu1 %v20686_v14  ;;  %v11943_v22 = vpop.f32.mrf.mxu0 }
 0x659   :  { %v7648_v41 = vadd.f32 %v11866_v40, %v17216_v34  ;;  %12060 = vmatprep.mubr.bf16.mxu1 %v20687_v38  ;;  %v17466_v37 = vadd.f32 %v11943_v22, %v7645_v32  ;;  %v20688_v40 = vld [vmem:[#allocation60_spill] sm:$0xff] }
 0x65a   :  { %v7403_v53 = vpop.f32.mrf.mxu1  ;;  %v7808_v35 = vpop.f32.mrf.mxu0 }
 0x65b   :  { %v7646_v29 = vadd.f32 %v7403_v53, %v17220_v5  ;;  %v17469_v10 = vadd.f32 %v7808_v35, %v7643_v7  ;;  %v20690_v35 = vld [vmem:[#allocation101_spill] sm:$0xff] }
 0x65c   :  { %v11867_v55 = vpop.f32.mrf.mxu1  ;;  %v11946_v60 = vpop.f32.mrf.mxu0  ;;  %12137 = vmatmul.mubr.bf16.gmra.mxu0 %v20592_v12 }
 0x65d   :  { %v7649_v13 = vadd.f32 %v11867_v55, %v17225_v19  ;;  %v17473_v11 = vadd.f32 %v11946_v60, %v7648_v41  ;;  %12140 = vmatprep.mubr.bf16.mxu0 %v20593_v62  ;;  %v20689_v19 = vld [vmem:[#allocation62_spill] sm:$0xff] }
 0x65e   :  { %v7406_v34 = vpop.f32.mrf.mxu1  ;;  %v7821_v33 = vpop.f32.mrf.mxu0 }
 0x65f   :  { %v7647_v32 = vadd.f32 %v7406_v34, %v17228_v31  ;;  %v17477_v61 = vadd.f32 %v7821_v33, %v7646_v29  ;;  %v20692_v34 = vld [vmem:[#allocation37_spill] sm:$0xff] }
 0x660   :  { %v11870_v5 = vpop.f32.mrf.mxu1  ;;  %12061 = vmatmul.mubr.bf16.gmra.mxu1 %v20688_v40  ;;  %v11947_v14 = vpop.f32.mrf.mxu0  ;;  %v20693_v40 = vld [vmem:[#allocation112_spill] sm:$0xff] }
 0x661   :  { %v7652_v7 = vadd.f32 %v11870_v5, %v17232_v8  ;;  %12064 = vmatprep.mubr.bf16.mxu1 %v20689_v19  ;;  %v17482_v22 = vadd.f32 %v11947_v14, %v7649_v13  ;;  %v20691_v8 = vld [vmem:[#allocation102_spill] sm:$0xff] }
 0x662   :  { %v7419_v12 = vpop.f32.mrf.mxu1  ;;  %v7824_v62 = vpop.f32.mrf.mxu0 }
 0x663   :  { %v7650_v41 = vadd.f32 %v7419_v12, %v17236_v50  ;;  %v17485_v38 = vadd.f32 %v7824_v62, %v7647_v32  ;;  %v20694_v32 = vld [vmem:[#allocation67_spill] sm:$0xff] }
 0x664   :  { %v11871_v31 = vpop.f32.mrf.mxu1  ;;  %v11950_v29 = vpop.f32.mrf.mxu0  ;;  %12141 = vmatmul.mubr.bf16.gmra.mxu0 %v20690_v35 }
 0x665   :  { %v7653_v53 = vadd.f32 %v11871_v31, %v17241_v30  ;;  %v17489_v55 = vadd.f32 %v11950_v29, %v7652_v7  ;;  %12144 = vmatprep.mubr.bf16.mxu0 %v20691_v8  ;;  %v20695_v30 = vld [vmem:[#allocation113_spill] sm:$0xff] }
 0x666   :  { %v7422_v60 = vpop.f32.mrf.mxu1  ;;  %v7837_v33 = vpop.f32.mrf.mxu0 }
 0x667   :  { %v7651_v13 = vadd.f32 %v7422_v60, %v20692_v34  ;;  %v17493_v5 = vadd.f32 %v7837_v33, %v7650_v41  ;;  %v20696_v60 = vld [vmem:[#allocation22_spill] sm:$0xff]  ;;  %v20697_v33 = vld [vmem:[#allocation119_spill] sm:$0xff] }
 0x668   :  { %v11874_v50 = vpop.f32.mrf.mxu1  ;;  %12065 = vmatmul.mubr.bf16.gmra.mxu1 %v20693_v40  ;;  %v11951_v19 = vpop.f32.mrf.mxu0 }
 0x669   :  { %v7656_v14 = vadd.f32 %v11874_v50, %v20694_v32  ;;  %12068 = vmatprep.mubr.bf16.mxu1 %v20695_v30  ;;  %v17498_v12 = vadd.f32 %v11951_v19, %v7653_v53  ;;  %v20698_v19 = vld [vmem:[#allocation97_spill] sm:$0xff] }
 0x66a   :  { %v7435_v7 = vpop.f32.mrf.mxu1  ;;  %v7840_v31 = vpop.f32.mrf.mxu0 }
 0x66b   :  { %v7654_v62 = vadd.f32 %v7435_v7, %v17252_v2  ;;  %v17501_v29 = vadd.f32 %v7840_v31, %v7651_v13 }
 0x66c   :  { %v11875_v35 = vpop.f32.mrf.mxu1  ;;  %v11954_v8 = vpop.f32.mrf.mxu0  ;;  %12145 = vmatmul.mubr.bf16.gmra.mxu0 %v20696_v60  ;;  %v20700_v60 = vld [vmem:[#allocation104_spill] sm:$0xff] }
 0x66d   :  { %v7657_v41 = vadd.f32 %v11875_v35, %v17257_v63  ;;  %v17505_v34 = vadd.f32 %v11954_v8, %v7656_v14  ;;  %12148 = vmatprep.mubr.bf16.mxu0 %v20697_v33  ;;  %v20699_v63 = vld [vmem:[#allocation98_spill] sm:$0xff] }
 0x66e   :  { %v7438_v50 = vpop.f32.mrf.mxu1  ;;  %v7853_v40 = vpop.f32.mrf.mxu0 }
 0x66f   :  { %v7655_v53 = vadd.f32 %v7438_v50, %v17260_v0  ;;  %v17509_v32 = vadd.f32 %v7853_v40, %v7654_v62  ;;  %v20701_v50 = vld [vmem:[#allocation108_spill] sm:$0xff] }
 0x670   :  { %v11878_v2 = vpop.f32.mrf.mxu1  ;;  %12069 = vmatmul.mubr.bf16.gmra.mxu1 %v20698_v19  ;;  %v11955_v30 = vpop.f32.mrf.mxu0 }
 0x671   :  { %v7660_v13 = vadd.f32 %v11878_v2, %v17264_v26  ;;  %12072 = vmatprep.mubr.bf16.mxu1 %v20699_v63  ;;  %v17514_v7 = vadd.f32 %v11955_v30, %v7657_v41  ;;  %v20702_v26 = vld [vmem:[#allocation109_spill] sm:$0xff]  ;;  %v20703_v63 = vld [vmem:[#allocation100_spill] sm:$0xff] }
 0x672   :  { %v7451_v14 = vpop.f32.mrf.mxu1  ;;  %v7856_v35 = vpop.f32.mrf.mxu0 }
 0x673   :  { %v7658_v31 = vadd.f32 %v7451_v14, %v17268_v51  ;;  %v17517_v8 = vadd.f32 %v7856_v35, %v7655_v53  ;;  %v20704_v35 = vld [vmem:[#allocation30_spill] sm:$0xff] }
 0x674   :  { %v11879_v0 = vpop.f32.mrf.mxu1  ;;  %v11958_v33 = vpop.f32.mrf.mxu0  ;;  %12149 = vmatmul.mubr.bf16.gmra.mxu0 %v20701_v50 }
 0x675   :  { %v7661_v62 = vadd.f32 %v11879_v0, %v20700_v60  ;;  %v17521_v40 = vadd.f32 %v11958_v33, %v7660_v13  ;;  %12152 = vmatprep.mubr.bf16.mxu0 %v20702_v26  ;;  %v20706_v60 = vld [vmem:[#allocation105_spill] sm:$0xff] }
 0x676   :  { %v7454_v2 = vpop.f32.mrf.mxu1  ;;  %v7869_v19 = vpop.f32.mrf.mxu0 }
 0x677   :  { %v7659_v41 = vadd.f32 %v7454_v2, %v17276_v56  ;;  %v17525_v30 = vadd.f32 %v7869_v19, %v7658_v31  ;;  %v20708_v19 = vld [vmem:[#allocation116_spill] sm:$0xff] }
 0x678   :  { %v11882_v51 = vpop.f32.mrf.mxu1  ;;  %12073 = vmatmul.mubr.bf16.gmra.mxu1 %v20703_v63  ;;  %v11959_v14 = vpop.f32.mrf.mxu0 }
 0x679   :  { %v7664_v53 = vadd.f32 %v11882_v51, %v17280_v42  ;;  %12076 = vmatprep.mubr.bf16.mxu1 %v20704_v35  ;;  %v17530_v0 = vadd.f32 %v11959_v14, %v7661_v62  ;;  %v20710_v42 = vld [vmem:[#allocation20_spill] sm:$0xff]  ;;  %v20711_v35 = vld [vmem:[#allocation70_spill] sm:$0xff] }
 0x67a   :  { %v7467_v13 = vpop.f32.mrf.mxu1  ;;  %v7872_v50 = vpop.f32.mrf.mxu0 }
 0x67b   :  { %20705 = vst [vmem:[#allocation56_spill] sm:$0xff] %v17530_v0  ;;  %v7662_v33 = vadd.f32 %v7467_v13, %v20706_v60  ;;  %v17533_v26 = vadd.f32 %v7872_v50, %v7659_v41  ;;  %v20713_v60 = vld [vmem:[#allocation38_spill] sm:$0xff] }
 0x67c   :  { %v11883_v56 = vpop.f32.mrf.mxu1  ;;  %v11962_v2 = vpop.f32.mrf.mxu0  ;;  %12153 = vmatmul.mubr.bf16.gmra.mxu0 %v20708_v19 }
 0x67d   :  { %20707 = vst [vmem:[#allocation31_spill] sm:$0xff] %v17533_v26  ;;  %v7665_v31 = vadd.f32 %v11883_v56, %v17289_v57  ;;  %v17537_v63 = vadd.f32 %v11962_v2, %v7664_v53  ;;  %12156 = vmatprep.mubr.bf16.mxu0 %v20710_v42  ;;  %v20714_v57 = vld [vmem:[#allocation136_spill] sm:$0xff]  ;;  %v20715_v2 = vld [vmem:[#allocation35_spill] sm:$0xff] }
 0x67e   :  { %v7470_v51 = vpop.f32.mrf.mxu1  ;;  %v7885_v14 = vpop.f32.mrf.mxu0 }
 0x67f   :  { %20709 = vst [vmem:[#allocation26_spill] sm:$0xff] %v17537_v63  ;;  %v7663_v62 = vadd.f32 %v7470_v51, %v20711_v35  ;;  %v17541_v0 = vadd.f32 %v7885_v14, %v7662_v33  ;;  %v20716_v35 = vld [vmem:[#allocation63_spill] sm:$0xff] }
 0x680   :  { %v11886_v13 = vpop.f32.mrf.mxu1  ;;  %12077 = vmatmul.mubr.bf16.gmra.mxu1 %v20713_v60  ;;  %v11963_v50 = vpop.f32.mrf.mxu0 }
 0x681   :  { %20712 = vst [vmem:[#allocation78_spill] sm:$0xff] %v17541_v0  ;;  %v7668_v41 = vadd.f32 %v11886_v13, %v17296_v48  ;;  %12080 = vmatprep.mubr.bf16.mxu1 %v20714_v57  ;;  %v17546_v56 = vadd.f32 %v11963_v50, %v7665_v31  ;;  %v20717_v0 = vld [vmem:[#allocation99_spill] sm:$0xff] }
 0x682   :  { %v7483_v53 = vpop.f32.mrf.mxu1  ;;  %v7888_v42 = vpop.f32.mrf.mxu0  ;;  %v20719_v48 = vld [vmem:[#allocation135_spill] sm:$0xff] }
 0x683   :  { %v7666_v19 = vadd.f32 %v7483_v53, %v20715_v2  ;;  %v17549_v63 = vadd.f32 %v7888_v42, %v7663_v62  ;;  %v20720_v42 = vld [vmem:[#allocation40_spill] sm:$0xff] }
 0x684   :  { %v11887_v51 = vpop.f32.mrf.mxu1  ;;  %v11966_v14 = vpop.f32.mrf.mxu0  ;;  %12157 = vmatmul.mubr.bf16.gmra.mxu0 %v20717_v0 }
 0x685   :  { %v7669_v33 = vadd.f32 %v11887_v51, %v20716_v35  ;;  %v17553_v26 = vadd.f32 %v11966_v14, %v7668_v41  ;;  %12160 = vmatprep.mubr.bf16.mxu0 %v20719_v48  ;;  %v20722_v35 = vld [vmem:[#allocation72_spill] sm:$0xff] }
 0x686   :  { %v7486_v13 = vpop.f32.mrf.mxu1  ;;  %v7901_v50 = vpop.f32.mrf.mxu0 }
 0x687   :  { %20718 = vst [vmem:[#allocation128_spill] sm:$0xff] %v17553_v26  ;;  %v7667_v31 = vadd.f32 %v7486_v13, %v17308_v44  ;;  %v17557_v57 = vadd.f32 %v7901_v50, %v7666_v19  ;;  %v20723_v13 = vld [vmem:[#allocation80_spill] sm:$0xff] }
 0x688   :  { %v11890_v53 = vpop.f32.mrf.mxu1  ;;  %12081 = vmatmul.mubr.bf16.gmra.mxu1 %v20713_v60  ;;  %v11967_v2 = vpop.f32.mrf.mxu0 }
 0x689   :  { %v7672_v62 = vadd.f32 %v11890_v53, %v17312_v24  ;;  %12180 = vmatprep.mubr.bf16.mxu1 %v20720_v42  ;;  %v17562_v51 = vadd.f32 %v11967_v2, %v7669_v33 }
 0x68a   :  { %v7499_v41 = vpop.f32.mrf.mxu1  ;;  %v7904_v48 = vpop.f32.mrf.mxu0 }
 0x68b   :  { %20721 = vst [vmem:[#allocation54_spill] sm:$0xff] %v17562_v51  ;;  %v7670_v14 = vadd.f32 %v7499_v41, %v20722_v35  ;;  %v17565_v26 = vadd.f32 %v7904_v48, %v7667_v31  ;;  %v20726_v51 = vld [vmem:[#allocation43_spill] sm:$0xff]  ;;  %v20727_v41 = vld [vmem:[#allocation92_spill] sm:$0xff]  ;;  %v20728_v48 = vld [vmem:[#allocation42_spill] sm:$0xff] }
 0x68c   :  { %v11891_v44 = vpop.f32.mrf.mxu1  ;;  %v11970_v50 = vpop.f32.mrf.mxu0  ;;  %12161 = vmatmul.mubr.bf16.gmra.mxu0 %v20717_v0  ;;  %v20729_v0 = vld [vmem:[#allocation127_spill] sm:$0xff] }
 0x68d   :  { %v7673_v19 = vadd.f32 %v11891_v44, %v20723_v13  ;;  %v17569_v60 = vadd.f32 %v11970_v50, %v7672_v62 }
 0x68e   :  { %v7502_v24 = vpop.f32.mrf.mxu1  ;;  %v7917_v42 = vpop.f32.mrf.mxu0 }
 0x68f   :  { %20724 = vst [vmem:[#allocation75_spill] sm:$0xff] %v17569_v60  ;;  %v7671_v53 = vadd.f32 %v7502_v24, %v17325_v3  ;;  %v17572_v33 = vadd.f32 %v7917_v42, %v7670_v14 }
 0x690   :  { %v11894_v2 = vpop.f32.mrf.mxu1  ;;  %12181 = vmatmul.mubr.bf16.vlgmr.msra.gmra.mxu1 %v20726_v51  ;;  %v11971_v35 = vpop.f32.mrf.mxu0 }
 0x691   :  { %20725 = vst [vmem:[#allocation46_spill] sm:$0xff] %v17572_v33  ;;  %v7676_v31 = vadd.f32 %v11894_v2, %v20727_v41  ;;  %12184 = vmatprep.mubr.bf16.mxu1 %v20728_v48  ;;  %v17577_v44 = vadd.f32 %v11971_v35, %v7673_v19  ;;  %v20731_v35 = vld [vmem:[#allocation132_spill] sm:$0xff] }
 0x692   :  { %v7515_v13 = vpop.f32.mrf.mxu1  ;;  %v7920_v50 = vpop.f32.mrf.mxu0 }
 0x693   :  { %v7674_v62 = vadd.f32 %v7515_v13, %v20729_v0  ;;  %v17580_v60 = vadd.f32 %v7920_v50, %v7671_v53  ;;  %v20732_v53 = vld [vmem:[#allocation120_spill] sm:$0xff]  ;;  %v20733_v50 = vld [vmem:[#allocation18_spill] sm:$0xff] }
 0x694   :  { %v11895_v3 = vpop.f32.mrf.mxu1  ;;  %v11974_v24 = vpop.f32.mrf.mxu0 }
 0x695   :  { %v7677_v14 = vadd.f32 %v11895_v3, %v17338_v52  ;;  %v17583_v42 = vadd.f32 %v11974_v24, %v7676_v31 }
 0x696   :  { %v7518_v51 = vpop.f32.mrf.mxu1  ;;  %v7933_v41 = vpop.f32.mrf.mxu0 }
 0x697   :  { %v7675_v2 = vadd.f32 %v7518_v51, %v17341_v4  ;;  %v17586_v33 = vadd.f32 %v7933_v41, %v7674_v62 }
 0x698   :  { %v11898_v19 = vpop.f32.mrf.mxu1  ;;  %12185 = vmatmul.mubr.bf16.gmra.mxu1 %v20731_v35  ;;  %v11975_v13 = vpop.f32.mrf.mxu0 }
 0x699   :  { %20730 = vst [vmem:[#allocation106_spill] sm:$0xff] %v17586_v33  ;;  %v7680_v48 = vadd.f32 %v11898_v19, %v17345_v20  ;;  %12188 = vmatprep.mubr.bf16.mxu1 %v20732_v53  ;;  %v17591_v0 = vadd.f32 %v11975_v13, %v7677_v14  ;;  %v20736_v13 = vld [vmem:[#allocation130_spill] sm:$0xff] }
 0x69a   :  { %v7531_v52 = vpop.f32.mrf.mxu1  ;;  %v7936_v3 = vpop.f32.mrf.mxu0 }
 0x69b   :  { %v7678_v31 = vadd.f32 %v7531_v52, %v20733_v50  ;;  %v17594_v24 = vadd.f32 %v7936_v3, %v7675_v2  ;;  %v20737_v2 = vld [vmem:[#allocation131_spill] sm:$0xff]  ;;  %v20738_v3 = vld [vmem:[#allocation21_spill] sm:$0xff] }
 0x69c   :  { %v11899_v4 = vpop.f32.mrf.mxu1  ;;  %v11978_v51 = vpop.f32.mrf.mxu0 }
 0x69d   :  { %v7681_v62 = vadd.f32 %v11899_v4, %v17354_v46  ;;  %v17597_v41 = vadd.f32 %v11978_v51, %v7680_v48 }
 0x69e   :  { %v7534_v35 = vpop.f32.mrf.mxu1  ;;  %v7949_v19 = vpop.f32.mrf.mxu0 }
 0x69f   :  { %20734 = vst [vmem:[#allocation58_spill] sm:$0xff] %v17597_v41  ;;  %v7679_v20 = vadd.f32 %v7534_v35, %v17357_v59  ;;  %v17600_v33 = vadd.f32 %v7949_v19, %v7678_v31  ;;  %v20739_v35 = vld [vmem:[#allocation94_spill] sm:$0xff] }
 0x6a0   :  { %v11902_v14 = vpop.f32.mrf.mxu1  ;;  %12189 = vmatmul.mubr.bf16.gmra.mxu1 %v20736_v13  ;;  %v11979_v52 = vpop.f32.mrf.mxu0 }
 0x6a1   :  { %20735 = vst [vmem:[#allocation69_spill] sm:$0xff] %v17600_v33  ;;  %v7684_v53 = vadd.f32 %v11902_v14, %v17361_v49  ;;  %12192 = vmatprep.mubr.bf16.mxu1 %v20737_v2  ;;  %v17605_v50 = vadd.f32 %v11979_v52, %v7681_v62  ;;  %v20741_v52 = vld [vmem:[#allocation133_spill] sm:$0xff] }
 0x6a2   :  { %v7547_v46 = vpop.f32.mrf.mxu1  ;;  %v7952_v4 = vpop.f32.mrf.mxu0 }
 0x6a3   :  { %v7682_v48 = vadd.f32 %v7547_v46, %v20738_v3  ;;  %v17608_v51 = vadd.f32 %v7952_v4, %v7679_v20  ;;  %v20742_v20 = vld [vmem:[#allocation25_spill] sm:$0xff] }
 0x6a4   :  { %v11903_v59 = vpop.f32.mrf.mxu1  ;;  %v11982_v19 = vpop.f32.mrf.mxu0 }
 0x6a5   :  { %v7685_v31 = vadd.f32 %v11903_v59, %v20739_v35  ;;  %v17611_v33 = vadd.f32 %v11982_v19, %v7684_v53  ;;  %v20743_v19 = vld [vmem:[#allocation17_spill] sm:$0xff] }
 0x6a6   :  { %v7550_v13 = vpop.f32.mrf.mxu1  ;;  %v7965_v14 = vpop.f32.mrf.mxu0 }
 0x6a7   :  { %v7683_v49 = vadd.f32 %v7550_v13, %v17373_v39  ;;  %v17614_v41 = vadd.f32 %v7965_v14, %v7682_v48 }
 0x6a8   :  { %v11906_v62 = vpop.f32.mrf.mxu1  ;;  %12193 = vmatmul.mubr.bf16.gmra.mxu1 %v20741_v52  ;;  %v11983_v46 = vpop.f32.mrf.mxu0 }
 0x6a9   :  { %20740 = vst [vmem:[#allocation76_spill] sm:$0xff] %v17614_v41  ;;  %v7688_v2 = vadd.f32 %v11906_v62, %v17377_v28  ;;  %12196 = vmatprep.mubr.bf16.mxu1 %v20742_v20  ;;  %v17619_v3 = vadd.f32 %v11983_v46, %v7685_v31  ;;  %v20745_v46 = vld [vmem:[#allocation24_spill] sm:$0xff] }
 0x6aa   :  { %v7563_v4 = vpop.f32.mrf.mxu1  ;;  %v7968_v59 = vpop.f32.mrf.mxu0 }
 0x6ab   :  { %v7686_v53 = vadd.f32 %v7563_v4, %v17381_v17  ;;  %v17622_v35 = vadd.f32 %v7968_v59, %v7683_v49  ;;  %v20746_v49 = vld [vmem:[#allocation45_spill] sm:$0xff] }
 0x6ac   :  { %v11907_v39 = vpop.f32.mrf.mxu1  ;;  %v11986_v13 = vpop.f32.mrf.mxu0 }
 0x6ad   :  { %v7689_v48 = vadd.f32 %v11907_v39, %v20743_v19  ;;  %v17625_v14 = vadd.f32 %v11986_v13, %v7688_v2  ;;  %v20747_v13 = vld [vmem:[#allocation28_spill] sm:$0xff] }
 0x6ae   :  { %v7566_v52 = vpop.f32.mrf.mxu1  ;;  %v7981_v62 = vpop.f32.mrf.mxu0 }
 0x6af   :  { %v7687_v28 = vadd.f32 %v7566_v52, %v17389_v25  ;;  %v17628_v41 = vadd.f32 %v7981_v62, %v7686_v53 }
 0x6b0   :  { %v11910_v31 = vpop.f32.mrf.mxu1  ;;  %12197 = vmatmul.mubr.bf16.gmra.mxu1 %v20745_v46  ;;  %v11987_v20 = vpop.f32.mrf.mxu0 }
 0x6b1   :  { %20744 = vst [vmem:[#allocation61_spill] sm:$0xff] %v17628_v41  ;;  %v7692_v17 = vadd.f32 %v11910_v31, %v17393_v43  ;;  %12200 = vmatprep.mubr.bf16.mxu1 %v20746_v49  ;;  %v17633_v4 = vadd.f32 %v11987_v20, %v7689_v48  ;;  %v20750_v20 = vld [vmem:[#allocation16_spill] sm:$0xff] }
 0x6b2   :  { %v7579_v59 = vpop.f32.mrf.mxu1  ;;  %v7984_v39 = vpop.f32.mrf.mxu0 }
 0x6b3   :  { %v7690_v2 = vadd.f32 %v7579_v59, %v17397_v15  ;;  %v17636_v19 = vadd.f32 %v7984_v39, %v7687_v28  ;;  %v20751_v28 = vld [vmem:[#allocation107_spill] sm:$0xff] }
 0x6b4   :  { %v11911_v25 = vpop.f32.mrf.mxu1  ;;  %v11990_v52 = vpop.f32.mrf.mxu0 }
 0x6b5   :  { %v7693_v53 = vadd.f32 %v11911_v25, %v20747_v13  ;;  %v17639_v62 = vadd.f32 %v11990_v52, %v7692_v17  ;;  %v20752_v25 = vld [vmem:[#allocation50_spill] sm:$0xff] }
 0x6b6   :  { %v7582_v46 = vpop.f32.mrf.mxu1  ;;  %v7997_v31 = vpop.f32.mrf.mxu0 }
 0x6b7   :  { %20748 = vst [vmem:[#allocation117_spill] sm:$0xff] %v17639_v62  ;;  %v7691_v43 = vadd.f32 %v7582_v46, %v17405_v27  ;;  %v17642_v41 = vadd.f32 %v7997_v31, %v7690_v2  ;;  %v20753_v46 = vld [vmem:[#allocation52_spill] sm:$0xff] }
 0x6b8   :  { %v11914_v48 = vpop.f32.mrf.mxu1  ;;  %12201 = vmatmul.mubr.bf16.gmra.mxu1 %v20750_v20  ;;  %v11991_v49 = vpop.f32.mrf.mxu0 }
 0x6b9   :  { %20749 = vst [vmem:[#allocation68_spill] sm:$0xff] %v17642_v41  ;;  %v7696_v15 = vadd.f32 %v11914_v48, %v17409_v18  ;;  %12204 = vmatprep.mubr.bf16.mxu1 %v20751_v28  ;;  %v17647_v59 = vadd.f32 %v11991_v49, %v7693_v53  ;;  %v20755_v49 = vld [vmem:[#allocation121_spill] sm:$0xff] }
 0x6ba   :  { %v7595_v39 = vpop.f32.mrf.mxu1  ;;  %v8000_v13 = vpop.f32.mrf.mxu0 }
 0x6bb   :  { %v7694_v17 = vadd.f32 %v7595_v39, %v20752_v25  ;;  %v17650_v52 = vadd.f32 %v8000_v13, %v7691_v43  ;;  %v20756_v43 = vld [vmem:[#allocation49_spill] sm:$0xff] }
 0x6bc   :  { %v11915_v27 = vpop.f32.mrf.mxu1  ;;  %v11994_v31 = vpop.f32.mrf.mxu0 }
 0x6bd   :  { %v7697_v2 = vadd.f32 %v11915_v27, %v20753_v46  ;;  %v17653_v41 = vadd.f32 %v11994_v31, %v7696_v15 }
 0x6be   :  { %v7598_v20 = vpop.f32.mrf.mxu1  ;;  %v8013_v48 = vpop.f32.mrf.mxu0 }
 0x6bf   :  { %v7695_v18 = vadd.f32 %v7598_v20, %v17421_v21  ;;  %v17656_v62 = vadd.f32 %v8013_v48, %v7694_v17 }
 0x6c0   :  { %v11918_v53 = vpop.f32.mrf.mxu1  ;;  %12205 = vmatmul.mubr.bf16.gmra.mxu1 %v20755_v49  ;;  %v11995_v39 = vpop.f32.mrf.mxu0 }
 0x6c1   :  { %20754 = vst [vmem:[#allocation51_spill] sm:$0xff] %v17656_v62  ;;  %v7700_v28 = vadd.f32 %v11918_v53, %v17425_v54  ;;  %12208 = vmatprep.mubr.bf16.mxu1 %v20756_v43  ;;  %v17661_v25 = vadd.f32 %v11995_v39, %v7697_v2 }
 0x6c2   :  { %v7611_v13 = vpop.f32.mrf.mxu1  ;;  %v8016_v27 = vpop.f32.mrf.mxu0 }
 0x6c3   :  { %v7698_v15 = vadd.f32 %v7611_v13, %v17429_v58  ;;  %v17664_v46 = vadd.f32 %v8016_v27, %v7695_v18  ;;  %v20757_v18 = vld [vmem:[#allocation64_spill] sm:$0xff] }
 0x6c4   :  { %v11919_v21 = vpop.f32.mrf.mxu1  ;;  %v11998_v31 = vpop.f32.mrf.mxu0 }
 0x6c5   :  { %v7701_v17 = vadd.f32 %v11919_v21, %v17434_v9  ;;  %v17667_v20 = vadd.f32 %v11998_v31, %v7700_v28 }
 0x6c6   :  { %v7614_v48 = vpop.f32.mrf.mxu1  ;;  %v8029_v53 = vpop.f32.mrf.mxu0 }
 0x6c7   :  { %v7699_v54 = vadd.f32 %v7614_v48, %v17437_v23  ;;  %v17670_v62 = vadd.f32 %v8029_v53, %v7698_v15 }
 0x6c8   :  { %v11922_v2 = vpop.f32.mrf.mxu1  ;;  %12209 = vmatmul.mubr.bf16.gmra.mxu1 %v20755_v49  ;;  %v11999_v39 = vpop.f32.mrf.mxu0 }
 0x6c9   :  { %v7704_v58 = vadd.f32 %v11922_v2, %v17441_v36  ;;  %12212 = vmatprep.mubr.bf16.mxu1 %v20757_v18  ;;  %v17675_v43 = vadd.f32 %v11999_v39, %v7701_v17  ;;  %v20758_v2 = vld [vmem:[#allocation55_spill] sm:$0xff] }
 0x6ca   :  { %v7627_v9 = vpop.f32.mrf.mxu1  ;;  %v8032_v13 = vpop.f32.mrf.mxu0 }
 0x6cb   :  { %v7702_v28 = vadd.f32 %v7627_v9, %v17445_v6  ;;  %v17678_v27 = vadd.f32 %v8032_v13, %v7699_v54  ;;  %v20759_v54 = vld [vmem:[#allocation59_spill] sm:$0xff] }
 0x6cc   :  { %v11923_v23 = vpop.f32.mrf.mxu1  ;;  %v12002_v21 = vpop.f32.mrf.mxu0 }
 0x6cd   :  { %v7705_v15 = vadd.f32 %v11923_v23, %v17450_v45  ;;  %v17681_v31 = vadd.f32 %v12002_v21, %v7704_v58 }
 0x6ce   :  { %v7630_v49 = vpop.f32.mrf.mxu1  ;;  %v8045_v48 = vpop.f32.mrf.mxu0 }
 0x6cf   :  { %v7703_v36 = vadd.f32 %v7630_v49, %v17453_v47  ;;  %v17684_v53 = vadd.f32 %v8045_v48, %v7702_v28  ;;  %v20760_v48 = vld [vmem:[#allocation36_spill] sm:$0xff] }
 0x6d0   :  { %v12022_v17 = vpop.f32.mrf.mxu1  ;;  %12213 = vmatmul.mubr.bf16.gmra.mxu1 %v20758_v2  ;;  %v12003_v39 = vpop.f32.mrf.mxu0 }
 0x6d1   :  { %v17688_v6 = vadd.f32 %v12022_v17, %v17457_v1  ;;  %12216 = vmatprep.mubr.bf16.mxu1 %v20759_v54  ;;  %v17691_v18 = vadd.f32 %v12003_v39, %v7705_v15  ;;  %v20761_v17 = vld [vmem:[#allocation39_spill] sm:$0xff] }
 0x6d2   :  { %v8223_v45 = vpop.f32.mrf.mxu1  ;;  %v8048_v58 = vpop.f32.mrf.mxu0 }
 0x6d3   :  { %v17694_v9 = vadd.f32 %v8223_v45, %v17461_v16  ;;  %v17696_v47 = vadd.f32 %v8048_v58, %v7703_v36 }
 0x6d4   :  { %v12023_v28 = vpop.f32.mrf.mxu1  ;;  %v17701_v23 = vpop.f32.mrf.mxu0 }
 0x6d5   :  { %v17699_v13 = vadd.f32 %v12023_v28, %v17466_v37 }
 0x6d6   :  { %v8226_v21 = vpop.f32.mrf.mxu1  ;;  %v17706_v49 = vpop.f32.mrf.mxu0 }
 0x6d7   :  { %v17704_v1 = vadd.f32 %v8226_v21, %v17469_v10  ;;  %v20762_v21 = vld [vmem:[#allocation27_spill] sm:$0xff] }
 0x6d8   :  { %v12026_v15 = vpop.f32.mrf.mxu1  ;;  %12217 = vmatmul.mubr.bf16.gmra.mxu1 %v20760_v48  ;;  %v17712_v36 = vpop.f32.mrf.mxu0 }
 0x6d9   :  { %v17710_v16 = vadd.f32 %v12026_v15, %v17473_v11  ;;  %12220 = vmatprep.mubr.bf16.mxu1 %v20761_v17 }
 0x6da   :  { %v8239_v37 = vpop.f32.mrf.mxu1  ;;  %v17718_v39 = vpop.f32.mrf.mxu0 }
 0x6db   :  { %v17716_v2 = vadd.f32 %v8239_v37, %v17477_v61  ;;  %v20764_v61 = vld [vmem:[#allocation122_spill] sm:$0xff] }
 0x6dc   :  { %v12027_v10 = vpop.f32.mrf.mxu1  ;;  %v17723_v45 = vpop.f32.mrf.mxu0 }
 0x6dd   :  { %v17721_v54 = vadd.f32 %v12027_v10, %v17482_v22 }
 0x6de   :  { %v8242_v58 = vpop.f32.mrf.mxu1  ;;  %v17733_v48 = vpop.f32.mrf.mxu0 }
 0x6df   :  { %v17726_v11 = vadd.f32 %v8242_v58, %v17485_v38 }
 0x6e0   :  { %v12030_v28 = vpop.f32.mrf.mxu1  ;;  %12221 = vmatmul.mubr.bf16.gmra.mxu1 %v20762_v21  ;;  %v17741_v38 = vpop.f32.mrf.mxu0 }
 0x6e1   :  { %v17730_v15 = vadd.f32 %v12030_v28, %v17489_v55  ;;  %12224 = vmatprep.mubr.bf16.mxu1 %v20764_v61  ;;  %v20766_v28 = vld [vmem:[#allocation73_spill] sm:$0xff] }
 0x6e2   :  { %v8255_v17 = vpop.f32.mrf.mxu1 }
 0x6e3   :  { %20763 = vst [vmem:[#allocation129_spill] sm:$0xff] %v17730_v15  ;;  %v17736_v22 = vadd.f32 %v8255_v17, %v17493_v5  ;;  %v20768_v15 = vld [vmem:[#allocation74_spill] sm:$0xff]  ;;  %v17751_v5 = vpop.f32.mrf.mxu0 }
 0x6e4   :  { %v12031_v37 = vpop.f32.mrf.mxu1 }
 0x6e5   :  { %v17739_v10 = vadd.f32 %v12031_v37, %v17498_v12 }
 0x6e6   :  { %v8258_v58 = vpop.f32.mrf.mxu1 }
 0x6e7   :  { %20765 = vst [vmem:[#allocation41_spill] sm:$0xff] %v17739_v10  ;;  %v17744_v21 = vadd.f32 %v8258_v58, %v17501_v29  ;;  %v17759_v29 = vpop.f32.mrf.mxu0 }
 0x6e8   :  { %v12034_v55 = vpop.f32.mrf.mxu1  ;;  %12225 = vmatmul.mubr.bf16.gmra.mxu1 %v20766_v28  ;;  %20771 = vst [vmem:[#allocation110_spill] sm:$0xff] %v17759_v29  ;;  %v20784_v29 = vld [vmem:[#allocation48_spill] sm:$0xff] }
 0x6e9   :  { %v17748_v61 = vadd.f32 %v12034_v55, %v17505_v34  ;;  %12228 = vmatprep.mubr.bf16.mxu1 %v20768_v15  ;;  %v20773_v55 = vld [vmem:[#allocation47_spill] sm:$0xff] }
 0x6ea   :  { %v8271_v17 = vpop.f32.mrf.mxu1 }
 0x6eb   :  { %20767 = vst [vmem:[#allocation57_spill] sm:$0xff] %v17748_v61  ;;  %v17754_v12 = vadd.f32 %v8271_v17, %v17509_v32  ;;  %v20775_v61 = vld [vmem:[#allocation44_spill] sm:$0xff]  ;;  %v17769_v32 = vpop.f32.mrf.mxu0 }
 0x6ec   :  { %v12035_v37 = vpop.f32.mrf.mxu1 }
 0x6ed   :  { %20769 = vst [vmem:[#allocation111_spill] sm:$0xff] %v17754_v12  ;;  %v17757_v10 = vadd.f32 %v12035_v37, %v17514_v7 }
 0x6ee   :  { %v8274_v58 = vpop.f32.mrf.mxu1 }
 0x6ef   :  { %20770 = vst [vmem:[#allocation71_spill] sm:$0xff] %v17757_v10  ;;  %v17762_v28 = vadd.f32 %v8274_v58, %v17517_v8  ;;  %v20777_v10 = vld [vmem:[#allocation56_spill] sm:$0xff]  ;;  %v17777_v8 = vpop.f32.mrf.mxu0 }
 0x6f0   :  { %v12038_v34 = vpop.f32.mrf.mxu1  ;;  %12229 = vmatmul.mubr.bf16.gmra.mxu1 %v20773_v55 }
 0x6f1   :  { %20772 = vst [vmem:[#allocation81_spill] sm:$0xff] %v17762_v28  ;;  %v17766_v15 = vadd.f32 %v12038_v34, %v17521_v40  ;;  %12232 = vmatprep.mubr.bf16.mxu1 %v20775_v61  ;;  %v20779_v28 = vld [vmem:[#allocation31_spill] sm:$0xff]  ;;  %v20781_v34 = vld [vmem:[#allocation96_spill] sm:$0xff]  ;;  %v20782_v61 = vld [vmem:[#allocation26_spill] sm:$0xff] }
 0x6f2   :  { %v8287_v17 = vpop.f32.mrf.mxu1 }
 0x6f3   :  { %20774 = vst [vmem:[#allocation114_spill] sm:$0xff] %v17766_v15  ;;  %v17772_v7 = vadd.f32 %v8287_v17, %v17525_v30  ;;  %v17787_v30 = vpop.f32.mrf.mxu0 }
 0x6f4   :  { %v12039_v37 = vpop.f32.mrf.mxu1 }
 0x6f5   :  { %20776 = vst [vmem:[#allocation125_spill] sm:$0xff] %v17772_v7  ;;  %v17775_v12 = vadd.f32 %v12039_v37, %v20777_v10  ;;  %v20785_v7 = vld [vmem:[#allocation78_spill] sm:$0xff] }
 0x6f6   :  { %v8290_v58 = vpop.f32.mrf.mxu1 }
 0x6f7   :  { %20778 = vst [vmem:[#allocation87_spill] sm:$0xff] %v17775_v12  ;;  %v17780_v55 = vadd.f32 %v8290_v58, %v20779_v28  ;;  %v17795_v28 = vpop.f32.mrf.mxu0 }
 0x6f8   :  { %v12042_v40 = vpop.f32.mrf.mxu1  ;;  %12233 = vmatmul.mubr.bf16.gmra.mxu1 %v20781_v34 }
 0x6f9   :  { %20780 = vst [vmem:[#allocation33_spill] sm:$0xff] %v17780_v55  ;;  %v17784_v15 = vadd.f32 %v12042_v40, %v20782_v61  ;;  %12236 = vmatprep.mubr.bf16.mxu1 %v20784_v29  ;;  %v20789_v61 = vld [vmem:[#allocation123_spill] sm:$0xff]  ;;  %v20790_v29 = vld [vmem:[#allocation128_spill] sm:$0xff]  ;;  %v20792_v55 = vld [vmem:[#allocation29_spill] sm:$0xff] }
 0x6fa   :  { %v8303_v17 = vpop.f32.mrf.mxu1 }
 0x6fb   :  { %20783 = vst [vmem:[#allocation83_spill] sm:$0xff] %v17784_v15  ;;  %v17790_v10 = vadd.f32 %v8303_v17, %v20785_v7  ;;  %v17805_v7 = vpop.f32.mrf.mxu0 }
 0x6fc   :  { %v12043_v37 = vpop.f32.mrf.mxu1 }
 0x6fd   :  { %20786 = vst [vmem:[#allocation84_spill] sm:$0xff] %v17790_v10  ;;  %v17793_v12 = vadd.f32 %v12043_v37, %v17546_v56 }
 0x6fe   :  { %v8306_v58 = vpop.f32.mrf.mxu1 }
 0x6ff   :  { %20787 = vst [vmem:[#allocation65_spill] sm:$0xff] %v17793_v12  ;;  %v17798_v34 = vadd.f32 %v8306_v58, %v17549_v63  ;;  %v20794_v12 = vld [vmem:[#allocation54_spill] sm:$0xff]  ;;  %v17813_v63 = vpop.f32.mrf.mxu0 }
 0x700   :  { %v12046_v40 = vpop.f32.mrf.mxu1  ;;  %12237 = vmatmul.mubr.bf16.gmra.mxu1 %v20789_v61 }
 0x701   :  { %20788 = vst [vmem:[#allocation77_spill] sm:$0xff] %v17798_v34  ;;  %v17802_v15 = vadd.f32 %v12046_v40, %v20790_v29  ;;  %12240 = vmatprep.mubr.bf16.mxu1 %v20792_v55  ;;  %v20797_v55 = vld [vmem:[#allocation75_spill] sm:$0xff] }
 0x702   :  { %v8319_v17 = vpop.f32.mrf.mxu1 }
 0x703   :  { %20791 = vst [vmem:[#allocation89_spill] sm:$0xff] %v17802_v15  ;;  %v17808_v56 = vadd.f32 %v8319_v17, %v17557_v57  ;;  %v17822_v15 = vpop.f32.mrf.mxu0  ;;  %v20799_v17 = vld [vmem:[#allocation46_spill] sm:$0xff] }
 0x704   :  { %v12047_v37 = vpop.f32.mrf.mxu1 }
 0x705   :  { %20793 = vst [vmem:[#allocation34_spill] sm:$0xff] %v17808_v56  ;;  %v17811_v10 = vadd.f32 %v12047_v37, %v20794_v12 }
 0x706   :  { %v8322_v58 = vpop.f32.mrf.mxu1 }
 0x707   :  { %20795 = vst [vmem:[#allocation85_spill] sm:$0xff] %v17811_v10  ;;  %v17816_v34 = vadd.f32 %v8322_v58, %v17565_v26  ;;  %v17830_v10 = vpop.f32.mrf.mxu0 }
 0x708   :  { %v12050_v40 = vpop.f32.mrf.mxu1  ;;  %12241 = vmatmul.mubr.bf16.gmra.mxu1 %v20789_v61 }
 0x709   :  { %20796 = vst [vmem:[#allocation86_spill] sm:$0xff] %v17816_v34  ;;  %v17820_v29 = vadd.f32 %v12050_v40, %v20797_v55  ;;  %v17838_v55 = vpop.f32.mrf.mxu0  ;;  %v20804_v34 = vld [vmem:[#allocation106_spill] sm:$0xff] }
 0x70a   :  { %v8335_v57 = vpop.f32.mrf.mxu1 }
 0x70b   :  { %20798 = vst [vmem:[#allocation32_spill] sm:$0xff] %v17820_v29  ;;  %v17825_v56 = vadd.f32 %v8335_v57, %v20799_v17 }
 0x70c   :  { %v12051_v12 = vpop.f32.mrf.mxu1 }
 0x70d   :  { %20800 = vst [vmem:[#allocation118_spill] sm:$0xff] %v17825_v56  ;;  %v17828_v37 = vadd.f32 %v12051_v12, %v17577_v44  ;;  %v17846_v12 = vpop.f32.mrf.mxu0  ;;  %v20809_v56 = vld [vmem:[#allocation69_spill] sm:$0xff] }
 0x70e   :  { %v8338_v26 = vpop.f32.mrf.mxu1 }
 0x70f   :  { %20801 = vst [vmem:[#allocation91_spill] sm:$0xff] %v17828_v37  ;;  %v17833_v58 = vadd.f32 %v8338_v26, %v17580_v60 }
 0x710   :  { %v12054_v61 = vpop.f32.mrf.mxu1 }
 0x711   :  { %20802 = vst [vmem:[#allocation88_spill] sm:$0xff] %v17833_v58  ;;  %v17836_v40 = vadd.f32 %v12054_v61, %v17583_v42  ;;  %v20807_v58 = vld [vmem:[#allocation58_spill] sm:$0xff]  ;;  %v17854_v61 = vpop.f32.mrf.mxu0 }
 0x712   :  { %v8351_v29 = vpop.f32.mrf.mxu1 }
 0x713   :  { %20803 = vst [vmem:[#allocation115_spill] sm:$0xff] %v17836_v40  ;;  %v17841_v57 = vadd.f32 %v8351_v29, %v20804_v34 }
 0x714   :  { %v12055_v17 = vpop.f32.mrf.mxu1 }
 0x715   :  { %v17844_v44 = vadd.f32 %v12055_v17, %v17591_v0  ;;  %v17862_v17 = vpop.f32.mrf.mxu0 }
 0x716   :  { %v8354_v37 = vpop.f32.mrf.mxu1 }
 0x717   :  { %20805 = vst [vmem:[#allocation66_spill] sm:$0xff] %v17844_v44  ;;  %v17849_v60 = vadd.f32 %v8354_v37, %v17594_v24 }
 0x718   :  { %v12058_v26 = vpop.f32.mrf.mxu1 }
 0x719   :  { %20806 = vst [vmem:[#allocation19_spill] sm:$0xff] %v17849_v60  ;;  %v17852_v42 = vadd.f32 %v12058_v26, %v20807_v58  ;;  %v17870_v26 = vpop.f32.mrf.mxu0  ;;  %v20813_v60 = vld [vmem:[#allocation76_spill] sm:$0xff] }
 0x71a   :  { %v8367_v40 = vpop.f32.mrf.mxu1 }
 0x71b   :  { %20808 = vst [vmem:[#allocation53_spill] sm:$0xff] %v17852_v42  ;;  %v17857_v34 = vadd.f32 %v8367_v40, %v20809_v56 }
 0x71c   :  { %v12059_v29 = vpop.f32.mrf.mxu1 }
 0x71d   :  { %v17860_v0 = vadd.f32 %v12059_v29, %v17605_v50  ;;  %v17878_v29 = vpop.f32.mrf.mxu0 }
 0x71e   :  { %v8370_v44 = vpop.f32.mrf.mxu1 }
 0x71f   :  { %20810 = vst [vmem:[#allocation90_spill] sm:$0xff] %v17860_v0  ;;  %v17865_v24 = vadd.f32 %v8370_v44, %v17608_v51 }
 0x720   :  { %v12062_v37 = vpop.f32.mrf.mxu1 }
 0x721   :  { %20811 = vst [vmem:[#allocation124_spill] sm:$0xff] %v17865_v24  ;;  %v17868_v58 = vadd.f32 %v12062_v37, %v17611_v33  ;;  %v17886_v37 = vpop.f32.mrf.mxu0  ;;  %v20818_v24 = vld [vmem:[#allocation61_spill] sm:$0xff] }
 0x722   :  { %v8383_v42 = vpop.f32.mrf.mxu1 }
 0x723   :  { %20812 = vst [vmem:[#allocation126_spill] sm:$0xff] %v17868_v58  ;;  %v17873_v56 = vadd.f32 %v8383_v42, %v20813_v60 }
 0x724   :  { %v12063_v40 = vpop.f32.mrf.mxu1 }
 0x725   :  { %20814 = vst [vmem:[#allocation93_spill] sm:$0xff] %v17873_v56  ;;  %v17876_v50 = vadd.f32 %v12063_v40, %v17619_v3  ;;  %v17894_v40 = vpop.f32.mrf.mxu0  ;;  %v20823_v56 = vld [vmem:[#allocation68_spill] sm:$0xff] }
 0x726   :  { %v8386_v0 = vpop.f32.mrf.mxu1 }
 0x727   :  { %20815 = vst [vmem:[#allocation79_spill] sm:$0xff] %v17876_v50  ;;  %v17881_v51 = vadd.f32 %v8386_v0, %v17622_v35 }
 0x728   :  { %v12066_v44 = vpop.f32.mrf.mxu1 }
 0x729   :  { %20816 = vst [vmem:[#allocation95_spill] sm:$0xff] %v17881_v51  ;;  %v17884_v33 = vadd.f32 %v12066_v44, %v17625_v14  ;;  %v20821_v51 = vld [vmem:[#allocation117_spill] sm:$0xff]  ;;  %v17902_v44 = vpop.f32.mrf.mxu0 }
 0x72a   :  { %v8399_v58 = vpop.f32.mrf.mxu1 }
 0x72b   :  { %20817 = vst [vmem:[#allocation134_spill] sm:$0xff] %v17884_v33  ;;  %v17889_v60 = vadd.f32 %v8399_v58, %v20818_v24 }
 0x72c   :  { %v12067_v42 = vpop.f32.mrf.mxu1 }
 0x72d   :  { %v17892_v3 = vadd.f32 %v12067_v42, %v17633_v4  ;;  %v17910_v42 = vpop.f32.mrf.mxu0 }
 0x72e   :  { %v8402_v50 = vpop.f32.mrf.mxu1 }
 0x72f   :  { %20819 = vst [vmem:[#allocation82_spill] sm:$0xff] %v17892_v3  ;;  %v17897_v35 = vadd.f32 %v8402_v50, %v17636_v19 }
 0x730   :  { %v12070_v0 = vpop.f32.mrf.mxu1 }
 0x731   :  { %20820 = vst [vmem:[#allocation103_spill] sm:$0xff] %v17897_v35  ;;  %v17900_v14 = vadd.f32 %v12070_v0, %v20821_v51  ;;  %v17918_v0 = vpop.f32.mrf.mxu0  ;;  %v20826_v35 = vld [vmem:[#allocation51_spill] sm:$0xff] }
 0x732   :  { %v8415_v33 = vpop.f32.mrf.mxu1 }
 0x733   :  { %20822 = vst [vmem:[#allocation23_spill] sm:$0xff] %v17900_v14  ;;  %v17905_v24 = vadd.f32 %v8415_v33, %v20823_v56 }
 0x734   :  { %v12071_v58 = vpop.f32.mrf.mxu1 }
 0x735   :  { %v17908_v4 = vadd.f32 %v12071_v58, %v17647_v59  ;;  %v17926_v58 = vpop.f32.mrf.mxu0 }
 0x736   :  { %v8418_v3 = vpop.f32.mrf.mxu1 }
 0x737   :  { %20824 = vst [vmem:[#allocation60_spill] sm:$0xff] %v17908_v4  ;;  %v17913_v19 = vadd.f32 %v8418_v3, %v17650_v52 }
 0x738   :  { %v12074_v50 = vpop.f32.mrf.mxu1 }
 0x739   :  { %v17916_v51 = vadd.f32 %v12074_v50, %v17653_v41  ;;  %v17934_v50 = vpop.f32.mrf.mxu0 }
 0x73a   :  { %v8431_v14 = vpop.f32.mrf.mxu1 }
 0x73b   :  { %20825 = vst [vmem:[#allocation62_spill] sm:$0xff] %v17916_v51  ;;  %v17921_v56 = vadd.f32 %v8431_v14, %v20826_v35 }
 0x73c   :  { %v12075_v33 = vpop.f32.mrf.mxu1 }
 0x73d   :  { %v17924_v59 = vadd.f32 %v12075_v33, %v17661_v25  ;;  %v17942_v33 = vpop.f32.mrf.mxu0 }
 0x73e   :  { %v8434_v4 = vpop.f32.mrf.mxu1 }
 0x73f   :  { %20827 = vst [vmem:[#allocation101_spill] sm:$0xff] %v17924_v59  ;;  %v17929_v52 = vadd.f32 %v8434_v4, %v17664_v46 }
 0x740   :  { %v12078_v3 = vpop.f32.mrf.mxu1 }
 0x741   :  { %v17932_v41 = vadd.f32 %v12078_v3, %v17667_v20  ;;  %v17950_v3 = vpop.f32.mrf.mxu0 }
 0x742   :  { %v8447_v51 = vpop.f32.mrf.mxu1 }
 0x743   :  { %20828 = vst [vmem:[#allocation102_spill] sm:$0xff] %v17932_v41  ;;  %v17937_v35 = vadd.f32 %v8447_v51, %v17670_v62 }
 0x744   :  { %v12079_v14 = vpop.f32.mrf.mxu1 }
 0x745   :  { %v17940_v25 = vadd.f32 %v12079_v14, %v17675_v43  ;;  %v17958_v14 = vpop.f32.mrf.mxu0 }
 0x746   :  { %v8450_v59 = vpop.f32.mrf.mxu1 }
 0x747   :  { %20829 = vst [vmem:[#allocation37_spill] sm:$0xff] %v17940_v25  ;;  %v17945_v46 = vadd.f32 %v8450_v59, %v17678_v27 }
 0x748   :  { %v12082_v4 = vpop.f32.mrf.mxu1 }
 0x749   :  { %20830 = vst [vmem:[#allocation112_spill] sm:$0xff] %v17945_v46  ;;  %v17948_v20 = vadd.f32 %v12082_v4, %v17681_v31  ;;  %v17963_v46 = vpop.f32.mrf.mxu0 }
 0x74a   :  { %v8463_v41 = vpop.f32.mrf.mxu1 }
 0x74b   :  { %20831 = vst [vmem:[#allocation67_spill] sm:$0xff] %v17948_v20  ;;  %v17953_v62 = vadd.f32 %v8463_v41, %v17684_v53  ;;  %v8896_v20 = vadd.f32 %v17706_v49, %v17694_v9  ;;  %v8897_v53 = vadd.f32 %v17718_v39, %v17704_v1  ;;  %v17969_v41 = vpop.f32.mrf.mxu0  ;;  %v8900_v39 = vadd.f32 %v17733_v48, %v17716_v2 }
 0x74c   :  { %v12083_v51 = vpop.f32.mrf.mxu1 }
 0x74d   :  { %20832 = vst [vmem:[#allocation113_spill] sm:$0xff] %v17953_v62  ;;  %v17956_v43 = vadd.f32 %v12083_v51, %v17691_v18  ;;  %v8898_v51 = vadd.f32 %v17701_v23, %v17688_v6  ;;  %v17983_v1 = vpop.f32.mrf.mxu0 }
 0x74e   :  { %v8466_v25 = vpop.f32.mrf.mxu1 }
 0x74f   :  { %20833 = vst [vmem:[#allocation22_spill] sm:$0xff] %v17956_v43  ;;  %v17961_v27 = vadd.f32 %v8466_v25, %v17696_v47 }
 0x750   :  { %v12182_v59 = vpop.f32.mrf.mxu1 }
 0x751   :  { %20834 = vst [vmem:[#allocation119_spill] sm:$0xff] %v17961_v27  ;;  %v8899_v27 = vadd.f32 %v17712_v36, %v17699_v13  ;;  %v17979_v62 = vadd.f32 %v12182_v59, %v8898_v51  ;;  %v17995_v59 = vpop.f32.mrf.mxu0 }
 0x752   :  { %v9059_v31 = vpop.f32.mrf.mxu1 }
 0x753   :  { %v17973_v43 = vadd.f32 %v9059_v31, %v8896_v20  ;;  %v8901_v31 = vadd.f32 %v17751_v5, %v17726_v11  ;;  %v18007_v5 = vpop.f32.mrf.mxu0 }
 0x754   :  { %v12183_v4 = vpop.f32.mrf.mxu1 }
 0x755   :  { %v17987_v6 = vadd.f32 %v12183_v4, %v8899_v27  ;;  %v8903_v4 = vadd.f32 %v17741_v38, %v17721_v54  ;;  %v18019_v38 = vpop.f32.mrf.mxu0 }
 0x756   :  { %v9062_v18 = vpop.f32.mrf.mxu1 }
 0x757   :  { %v17975_v47 = vadd.f32 %v9062_v18, %v8897_v53  ;;  %v8902_v18 = vadd.f32 %v17723_v45, %v17710_v16 }
 0x758   :  { %v12186_v25 = vpop.f32.mrf.mxu1 }
 0x759   :  { %v9380_v9 = vadd.f32 %v17975_v47, %v17973_v43  ;;  %v18004_v51 = vadd.f32 %v12186_v25, %v8902_v18 }
 0x75a   :  { %v9075_v49 = vpop.f32.mrf.mxu1 }
 0x75b   :  { %v9381_v23 = vadd.f32 %v9380_v9, %v17979_v62  ;;  %v17992_v13 = vadd.f32 %v9075_v49, %v8900_v39  ;;  %v8904_v49 = vadd.f32 %v17769_v32, %v17736_v22 }
 0x75c   :  { %v12187_v20 = vpop.f32.mrf.mxu1 }
 0x75d   :  { %v9382_v36 = vadd.f32 %v9381_v23, %v17987_v6  ;;  %v18011_v39 = vadd.f32 %v12187_v20, %v8903_v4  ;;  %v8905_v23 = vadd.f32 %v17787_v30, %v17744_v21  ;;  %v18031_v30 = vpop.f32.mrf.mxu0 }
 0x75e   :  { %v9078_v53 = vpop.f32.mrf.mxu1 }
 0x75f   :  { %v9383_v2 = vadd.f32 %v9382_v36, %v17992_v13  ;;  %v18000_v48 = vadd.f32 %v9078_v53, %v8901_v31  ;;  %20835 = vst [vmem:[#allocation97_spill] sm:$0xff] %v18011_v39  ;;  %v20836_v36 = vld [vmem:[#allocation129_spill] sm:$0xff]  ;;  %v20837_v53 = vld [vmem:[#allocation110_spill] sm:$0xff] }
 0x760   :  { %v12190_v27 = vpop.f32.mrf.mxu1  ;;  %v8906_v18 = vadd.f32 %v20837_v53, %v20836_v36 }
 0x761   :  { %v9384_v11 = vadd.f32 %v9383_v2, %v18000_v48  ;;  %v20838_v2 = vld [vmem:[#allocation41_spill] sm:$0xff] }
 0x762   :  { %v9091_v9 = vpop.f32.mrf.mxu1  ;;  %v8907_v4 = vadd.f32 %v17777_v8, %v20838_v2 }
 0x763   :  { %v9385_v16 = vadd.f32 %v9384_v11, %v18004_v51  ;;  %v18016_v31 = vadd.f32 %v9091_v9, %v8904_v49  ;;  %v18028_v11 = vadd.f32 %v12190_v27, %v8906_v18  ;;  %v20840_v49 = vld [vmem:[#allocation111_spill] sm:$0xff]  ;;  %v18043_v27 = vpop.f32.mrf.mxu0 }
 0x764   :  { %v12191_v45 = vpop.f32.mrf.mxu1 }
 0x765   :  { %v9386_v54 = vadd.f32 %v9385_v16, %v18011_v39  ;;  %20839 = vst [vmem:[#allocation98_spill] sm:$0xff] %v18028_v11  ;;  %v8908_v16 = vadd.f32 %v17805_v7, %v20840_v49  ;;  %v18035_v39 = vadd.f32 %v12191_v45, %v8907_v4 }
 0x766   :  { %v9094_v25 = vpop.f32.mrf.mxu1 }
 0x767   :  { %v9387_v22 = vadd.f32 %v9386_v54, %v18016_v31  ;;  %v18024_v32 = vadd.f32 %v9094_v25, %v8905_v23  ;;  %20841 = vst [vmem:[#allocation104_spill] sm:$0xff] %v18035_v39  ;;  %v20842_v25 = vld [vmem:[#allocation81_spill] sm:$0xff] }
 0x768   :  { %v12194_v20 = vpop.f32.mrf.mxu1  ;;  %v8909_v36 = vadd.f32 %v17822_v15, %v20842_v25 }
 0x769   :  { %v9388_v21 = vadd.f32 %v9387_v22, %v18024_v32  ;;  %v20843_v22 = vld [vmem:[#allocation57_spill] sm:$0xff] }
 0x76a   :  { %v9107_v9 = vpop.f32.mrf.mxu1  ;;  %v8910_v2 = vadd.f32 %v17795_v28, %v20843_v22 }
 0x76b   :  { %v9389_v54 = vadd.f32 %v9388_v21, %v18028_v11  ;;  %v18040_v53 = vadd.f32 %v9107_v9, %v8908_v16  ;;  %v20844_v21 = vld [vmem:[#allocation71_spill] sm:$0xff]  ;;  %v18055_v9 = vpop.f32.mrf.mxu0 }
 0x76c   :  { %v12195_v23 = vpop.f32.mrf.mxu1  ;;  %v8911_v49 = vadd.f32 %v17813_v63, %v20844_v21  ;;  %v18052_v11 = vadd.f32 %v12194_v20, %v8910_v2 }
 0x76d   :  { %v9390_v8 = vadd.f32 %v9389_v54, %v18035_v39  ;;  %v20846_v54 = vld [vmem:[#allocation125_spill] sm:$0xff]  ;;  %v18067_v20 = vpop.f32.mrf.mxu0 }
 0x76e   :  { %v9110_v18 = vpop.f32.mrf.mxu1  ;;  %20845 = vst [vmem:[#allocation108_spill] sm:$0xff] %v18052_v11  ;;  %v8912_v25 = vadd.f32 %v17838_v55, %v20846_v54  ;;  %v18059_v39 = vadd.f32 %v12195_v23, %v8911_v49 }
 0x76f   :  { %v9391_v7 = vadd.f32 %v9390_v8, %v18040_v53  ;;  %v18048_v45 = vadd.f32 %v9110_v18, %v8909_v36  ;;  %v20848_v8 = vld [vmem:[#allocation33_spill] sm:$0xff] }
 0x770   :  { %v12198_v4 = vpop.f32.mrf.mxu1  ;;  %20847 = vst [vmem:[#allocation109_spill] sm:$0xff] %v18059_v39  ;;  %v8913_v18 = vadd.f32 %v17854_v61, %v20848_v8 }
 0x771   :  { %v9392_v15 = vadd.f32 %v9391_v7, %v18048_v45  ;;  %v20849_v7 = vld [vmem:[#allocation114_spill] sm:$0xff] }
 0x772   :  { %v9123_v16 = vpop.f32.mrf.mxu1  ;;  %v8914_v21 = vadd.f32 %v17830_v10, %v20849_v7 }
 0x773   :  { %v9393_v28 = vadd.f32 %v9392_v15, %v18052_v11  ;;  %v18064_v22 = vadd.f32 %v9123_v16, %v8912_v25  ;;  %v20850_v15 = vld [vmem:[#allocation87_spill] sm:$0xff]  ;;  %v18079_v16 = vpop.f32.mrf.mxu0 }
 0x774   :  { %v12199_v36 = vpop.f32.mrf.mxu1  ;;  %v8915_v54 = vadd.f32 %v17846_v12, %v20850_v15  ;;  %v18076_v11 = vadd.f32 %v12198_v4, %v8914_v21 }
 0x775   :  { %v9394_v63 = vadd.f32 %v9393_v28, %v18059_v39  ;;  %v20852_v28 = vld [vmem:[#allocation84_spill] sm:$0xff]  ;;  %v18091_v4 = vpop.f32.mrf.mxu0 }
 0x776   :  { %v9126_v2 = vpop.f32.mrf.mxu1  ;;  %20851 = vst [vmem:[#allocation100_spill] sm:$0xff] %v18076_v11  ;;  %v8916_v8 = vadd.f32 %v17870_v26, %v20852_v28  ;;  %v18083_v39 = vadd.f32 %v12199_v36, %v8915_v54 }
 0x777   :  { %v9395_v55 = vadd.f32 %v9394_v63, %v18064_v22  ;;  %v18072_v23 = vadd.f32 %v9126_v2, %v8913_v18  ;;  %v20854_v63 = vld [vmem:[#allocation77_spill] sm:$0xff] }
 0x778   :  { %v12202_v49 = vpop.f32.mrf.mxu1  ;;  %20853 = vst [vmem:[#allocation30_spill] sm:$0xff] %v18083_v39  ;;  %v8917_v2 = vadd.f32 %v17886_v37, %v20854_v63 }
 0x779   :  { %v9396_v61 = vadd.f32 %v9395_v55, %v18072_v23  ;;  %v20855_v55 = vld [vmem:[#allocation83_spill] sm:$0xff] }
 0x77a   :  { %v9139_v25 = vpop.f32.mrf.mxu1  ;;  %v8918_v15 = vadd.f32 %v17862_v17, %v20855_v55 }
 0x77b   :  { %v9397_v10 = vadd.f32 %v9396_v61, %v18076_v11  ;;  %v18088_v7 = vadd.f32 %v9139_v25, %v8916_v8  ;;  %v20856_v61 = vld [vmem:[#allocation65_spill] sm:$0xff]  ;;  %v18103_v25 = vpop.f32.mrf.mxu0 }
 0x77c   :  { %v12203_v18 = vpop.f32.mrf.mxu1  ;;  %v8919_v28 = vadd.f32 %v17878_v29, %v20856_v61  ;;  %v18100_v11 = vadd.f32 %v12202_v49, %v8918_v15 }
 0x77d   :  { %v9398_v12 = vadd.f32 %v9397_v10, %v18083_v39  ;;  %v20858_v10 = vld [vmem:[#allocation34_spill] sm:$0xff]  ;;  %v18115_v49 = vpop.f32.mrf.mxu0 }
 0x77e   :  { %v9142_v21 = vpop.f32.mrf.mxu1  ;;  %20857 = vst [vmem:[#allocation105_spill] sm:$0xff] %v18100_v11  ;;  %v8920_v63 = vadd.f32 %v17902_v44, %v20858_v10  ;;  %v18107_v39 = vadd.f32 %v12203_v18, %v8919_v28 }
 0x77f   :  { %v9399_v26 = vadd.f32 %v9398_v12, %v18088_v7  ;;  %v18096_v36 = vadd.f32 %v9142_v21, %v8917_v2  ;;  %v20860_v12 = vld [vmem:[#allocation86_spill] sm:$0xff] }
 0x780   :  { %v12206_v54 = vpop.f32.mrf.mxu1  ;;  %20859 = vst [vmem:[#allocation116_spill] sm:$0xff] %v18107_v39  ;;  %v8921_v21 = vadd.f32 %v17918_v0, %v20860_v12 }
 0x781   :  { %v9400_v37 = vadd.f32 %v9399_v26, %v18096_v36  ;;  %v20861_v26 = vld [vmem:[#allocation89_spill] sm:$0xff] }
 0x782   :  { %v9155_v8 = vpop.f32.mrf.mxu1  ;;  %v8922_v61 = vadd.f32 %v17894_v40, %v20861_v26 }
 0x783   :  { %v9401_v17 = vadd.f32 %v9400_v37, %v18100_v11  ;;  %v18112_v55 = vadd.f32 %v9155_v8, %v8920_v63  ;;  %v20862_v37 = vld [vmem:[#allocation85_spill] sm:$0xff]  ;;  %v18127_v8 = vpop.f32.mrf.mxu0 }
 0x784   :  { %v12207_v2 = vpop.f32.mrf.mxu1  ;;  %v8923_v10 = vadd.f32 %v17910_v42, %v20862_v37  ;;  %v18124_v11 = vadd.f32 %v12206_v54, %v8922_v61 }
 0x785   :  { %v9402_v29 = vadd.f32 %v9401_v17, %v18107_v39  ;;  %v20864_v17 = vld [vmem:[#allocation118_spill] sm:$0xff]  ;;  %v18139_v54 = vpop.f32.mrf.mxu0 }
 0x786   :  { %v9158_v15 = vpop.f32.mrf.mxu1  ;;  %20863 = vst [vmem:[#allocation20_spill] sm:$0xff] %v18124_v11  ;;  %v8924_v12 = vadd.f32 %v17934_v50, %v20864_v17  ;;  %v18131_v39 = vadd.f32 %v12207_v2, %v8923_v10 }
 0x787   :  { %v9403_v44 = vadd.f32 %v9402_v29, %v18112_v55  ;;  %v18120_v18 = vadd.f32 %v9158_v15, %v8921_v21  ;;  %v20865_v29 = vld [vmem:[#allocation88_spill] sm:$0xff] }
 0x788   :  { %v12210_v28 = vpop.f32.mrf.mxu1  ;;  %v8925_v15 = vadd.f32 %v17950_v3, %v20865_v29 }
 0x789   :  { %v9404_v0 = vadd.f32 %v9403_v44, %v18120_v18  ;;  %v20866_v44 = vld [vmem:[#allocation32_spill] sm:$0xff] }
 0x78a   :  { %v9171_v63 = vpop.f32.mrf.mxu1  ;;  %v8926_v37 = vadd.f32 %v17926_v58, %v20866_v44 }
 0x78b   :  { %v9405_v40 = vadd.f32 %v9404_v0, %v18124_v11  ;;  %v18136_v26 = vadd.f32 %v9171_v63, %v8924_v12  ;;  %v20867_v0 = vld [vmem:[#allocation91_spill] sm:$0xff]  ;;  %v18151_v63 = vpop.f32.mrf.mxu0 }
 0x78c   :  { %v12211_v21 = vpop.f32.mrf.mxu1  ;;  %v8927_v17 = vadd.f32 %v17942_v33, %v20867_v0  ;;  %v18148_v11 = vadd.f32 %v12210_v28, %v8926_v37 }
 0x78d   :  { %v9406_v42 = vadd.f32 %v9405_v40, %v18131_v39  ;;  %v8928_v40 = vadd.f32 %v17963_v46, %v17841_v57  ;;  %v18163_v28 = vpop.f32.mrf.mxu0 }
 0x78e   :  { %v9174_v61 = vpop.f32.mrf.mxu1  ;;  %20868 = vst [vmem:[#allocation70_spill] sm:$0xff] %v18148_v11  ;;  %v18155_v29 = vadd.f32 %v12211_v21, %v8927_v17  ;;  %v20874_v17 = vld [vmem:[#allocation66_spill] sm:$0xff] }
 0x78f   :  { %v9407_v50 = vadd.f32 %v9406_v42, %v18136_v26  ;;  %v18144_v2 = vadd.f32 %v9174_v61, %v8925_v15  ;;  %v20870_v42 = vld [vmem:[#allocation19_spill] sm:$0xff] }
 0x790   :  { %v12214_v10 = vpop.f32.mrf.mxu1  ;;  %20869 = vst [vmem:[#allocation38_spill] sm:$0xff] %v18155_v29  ;;  %v8929_v61 = vadd.f32 %v17983_v1, %v20870_v42 }
 0x791   :  { %v9408_v3 = vadd.f32 %v9407_v50, %v18144_v2  ;;  %v20872_v50 = vld [vmem:[#allocation115_spill] sm:$0xff] }
 0x792   :  { %v9187_v12 = vpop.f32.mrf.mxu1  ;;  %v8930_v0 = vadd.f32 %v17958_v14, %v20872_v50 }
 0x793   :  { %v9409_v58 = vadd.f32 %v9408_v3, %v18148_v11  ;;  %v18160_v44 = vadd.f32 %v9187_v12, %v8928_v40  ;;  %v8931_v3 = vadd.f32 %v17969_v41, %v20874_v17  ;;  %v8836_v12 = vpop.f32.mrf.mxu0 }
 0x794   :  { %v12215_v15 = vpop.f32.mrf.mxu1  ;;  %v18172_v11 = vadd.f32 %v12214_v10, %v8930_v0 }
 0x795   :  { %20871 = vst [vmem:[#allocation136_spill] sm:$0xff] %v18160_v44  ;;  %v9410_v33 = vadd.f32 %v9409_v58, %v18155_v29  ;;  %v8932_v58 = vadd.f32 %v18007_v5, %v17857_v34  ;;  %v18177_v42 = vadd.f32 %v12215_v15, %v8931_v3  ;;  %v18185_v10 = vpop.f32.mrf.mxu0  ;;  %v20881_v3 = vld [vmem:[#allocation90_spill] sm:$0xff] }
 0x796   :  { %v9190_v37 = vpop.f32.mrf.mxu1  ;;  %20875 = vst [vmem:[#allocation63_spill] sm:$0xff] %v18172_v11 }
 0x797   :  { %v9411_v57 = vadd.f32 %v9410_v33, %v18160_v44  ;;  %v18168_v46 = vadd.f32 %v9190_v37, %v8929_v61  ;;  %20876 = vst [vmem:[#allocation99_spill] sm:$0xff] %v18177_v42  ;;  %v20877_v61 = vld [vmem:[#allocation124_spill] sm:$0xff] }
 0x798   :  { %v12218_v21 = vpop.f32.mrf.mxu1  ;;  %v8933_v37 = vadd.f32 %v18031_v30, %v20877_v61 }
 0x799   :  { %20873 = vst [vmem:[#allocation35_spill] sm:$0xff] %v18168_v46  ;;  %v9412_v1 = vadd.f32 %v9411_v57, %v18168_v46  ;;  %v20879_v57 = vld [vmem:[#allocation53_spill] sm:$0xff] }
 0x79a   :  { %v9203_v40 = vpop.f32.mrf.mxu1  ;;  %v8934_v17 = vadd.f32 %v17995_v59, %v20879_v57 }
 0x79b   :  { %v9413_v14 = vadd.f32 %v9412_v1, %v18172_v11  ;;  %v18182_v50 = vadd.f32 %v9203_v40, %v8932_v58  ;;  %v8935_v1 = vadd.f32 %v18019_v38, %v20881_v3  ;;  %v8849_v40 = vpop.f32.mrf.mxu0 }
 0x79c   :  { %v12219_v33 = vpop.f32.mrf.mxu1  ;;  %v18194_v11 = vadd.f32 %v12218_v21, %v8934_v17 }
 0x79d   :  { %20878 = vst [vmem:[#allocation135_spill] sm:$0xff] %v18182_v50  ;;  %v9414_v41 = vadd.f32 %v9413_v14, %v18177_v42  ;;  %v20883_v14 = vld [vmem:[#allocation93_spill] sm:$0xff]  ;;  %v18199_v42 = vadd.f32 %v12219_v33, %v8935_v1  ;;  %v12155_v21 = vpop.f32.mrf.mxu0  ;;  %v20889_v1 = vld [vmem:[#allocation79_spill] sm:$0xff] }
 0x79e   :  { %v9206_v0 = vpop.f32.mrf.mxu1  ;;  %20882 = vst [vmem:[#allocation72_spill] sm:$0xff] %v18194_v11  ;;  %v8936_v61 = vadd.f32 %v18055_v9, %v20883_v14 }
 0x79f   :  { %v9415_v34 = vadd.f32 %v9414_v41, %v18182_v50  ;;  %v18190_v5 = vadd.f32 %v9206_v0, %v8933_v37  ;;  %20884 = vst [vmem:[#allocation80_spill] sm:$0xff] %v18199_v42  ;;  %v20885_v37 = vld [vmem:[#allocation95_spill] sm:$0xff] }
 0x7a0   :  { %v12222_v15 = vpop.f32.mrf.mxu1  ;;  %v8937_v0 = vadd.f32 %v18079_v16, %v20885_v37 }
 0x7a1   :  { %20880 = vst [vmem:[#allocation40_spill] sm:$0xff] %v18190_v5  ;;  %v9416_v30 = vadd.f32 %v9415_v34, %v18190_v5  ;;  %v20887_v34 = vld [vmem:[#allocation126_spill] sm:$0xff] }
 0x7a2   :  { %v9219_v58 = vpop.f32.mrf.mxu1  ;;  %v8938_v3 = vadd.f32 %v18043_v27, %v20887_v34 }
 0x7a3   :  { %v9417_v59 = vadd.f32 %v9416_v30, %v18194_v11  ;;  %v18204_v57 = vadd.f32 %v9219_v58, %v8936_v61  ;;  %v8939_v30 = vadd.f32 %v18067_v20, %v20889_v1  ;;  %v8852_v58 = vpop.f32.mrf.mxu0 }
 0x7a4   :  { %v12223_v41 = vpop.f32.mrf.mxu1  ;;  %v18214_v14 = vadd.f32 %v12222_v15, %v8938_v3 }
 0x7a5   :  { %20886 = vst [vmem:[#allocation43_spill] sm:$0xff] %v18204_v57  ;;  %v9418_v38 = vadd.f32 %v9417_v59, %v18199_v42  ;;  %v8940_v59 = vadd.f32 %v18103_v25, %v17889_v60  ;;  %v18219_v37 = vadd.f32 %v12223_v41, %v8939_v30  ;;  %v12158_v15 = vpop.f32.mrf.mxu0  ;;  %v20895_v41 = vld [vmem:[#allocation82_spill] sm:$0xff] }
 0x7a6   :  { %v9222_v17 = vpop.f32.mrf.mxu1  ;;  %20890 = vst [vmem:[#allocation42_spill] sm:$0xff] %v18214_v14  ;;  %v8943_v30 = vadd.f32 %v18115_v49, %v20895_v41 }
 0x7a7   :  { %v9419_v5 = vadd.f32 %v9418_v38, %v18204_v57  ;;  %v18210_v9 = vadd.f32 %v9222_v17, %v8937_v0  ;;  %20891 = vst [vmem:[#allocation127_spill] sm:$0xff] %v18219_v37  ;;  %v20892_v0 = vld [vmem:[#allocation103_spill] sm:$0xff] }
 0x7a8   :  { %v12226_v33 = vpop.f32.mrf.mxu1  ;;  %v8941_v17 = vadd.f32 %v18127_v8, %v20892_v0 }
 0x7a9   :  { %20888 = vst [vmem:[#allocation92_spill] sm:$0xff] %v18210_v9  ;;  %v9420_v16 = vadd.f32 %v9419_v5, %v18210_v9  ;;  %v20894_v5 = vld [vmem:[#allocation134_spill] sm:$0xff] }
 0x7aa   :  { %v9235_v61 = vpop.f32.mrf.mxu1  ;;  %v8942_v1 = vadd.f32 %v18091_v4, %v20894_v5 }
 0x7ab   :  { %v9421_v27 = vadd.f32 %v9420_v16, %v18214_v14  ;;  %v18224_v34 = vadd.f32 %v9235_v61, %v8940_v59  ;;  %v8865_v61 = vpop.f32.mrf.mxu0  ;;  %v20899_v14 = vld [vmem:[#allocation101_spill] sm:$0xff] }
 0x7ac   :  { %v12227_v38 = vpop.f32.mrf.mxu1  ;;  %v18234_v16 = vadd.f32 %v12226_v33, %v8942_v1  ;;  %v20896_v1 = vld [vmem:[#allocation23_spill] sm:$0xff]  ;;  %v8952_v57 = vadd.f32 %v8865_v61, %v17937_v35  ;;  %v20903_v61 = vld [vmem:[#allocation113_spill] sm:$0xff] }
 0x7ad   :  { %20893 = vst [vmem:[#allocation132_spill] sm:$0xff] %v18224_v34  ;;  %v9422_v20 = vadd.f32 %v9421_v27, %v18219_v37  ;;  %v8944_v27 = vadd.f32 %v18151_v63, %v17905_v24  ;;  %v18239_v0 = vadd.f32 %v12227_v38, %v8943_v30  ;;  %v12159_v33 = vpop.f32.mrf.mxu0  ;;  %v20897_v63 = vld [vmem:[#allocation60_spill] sm:$0xff] }
 0x7ae   :  { %v9238_v3 = vpop.f32.mrf.mxu1  ;;  %v8947_v38 = vadd.f32 %v18163_v28, %v20897_v63 }
 0x7af   :  { %v9423_v9 = vadd.f32 %v9422_v20, %v18224_v34  ;;  %v18230_v60 = vadd.f32 %v9238_v3, %v8941_v17  ;;  %v8945_v17 = vadd.f32 %v8836_v12, %v17913_v19  ;;  %v8868_v12 = vpop.f32.mrf.mxu0 }
 0x7b0   :  { %v12230_v25 = vpop.f32.mrf.mxu1 }
 0x7b1   :  { %v9424_v8 = vadd.f32 %v9423_v9, %v18230_v60  ;;  %v8946_v9 = vadd.f32 %v18139_v54, %v20896_v1  ;;  %v12162_v1 = vpop.f32.mrf.mxu0 }
 0x7b2   :  { %v9251_v59 = vpop.f32.mrf.mxu1 }
 0x7b3   :  { %v9425_v4 = vadd.f32 %v9424_v8, %v18234_v16  ;;  %v18243_v3 = vadd.f32 %v9251_v59, %v8944_v27  ;;  %v18253_v30 = vadd.f32 %v12230_v25, %v8946_v9  ;;  %v8948_v59 = vadd.f32 %v8849_v40, %v17921_v56  ;;  %v20898_v25 = vld [vmem:[#allocation62_spill] sm:$0xff] }
 0x7b4   :  { %v12231_v20 = vpop.f32.mrf.mxu1  ;;  %v8950_v9 = vadd.f32 %v18185_v10, %v20898_v25  ;;  %v8951_v56 = vadd.f32 %v12155_v21, %v20899_v14  ;;  %v20902_v14 = vld [vmem:[#allocation37_spill] sm:$0xff] }
 0x7b5   :  { %v9426_v49 = vadd.f32 %v9425_v4, %v18239_v0  ;;  %v18257_v27 = vadd.f32 %v12231_v20, %v8947_v38  ;;  %v8881_v38 = vpop.f32.mrf.mxu0 }
 0x7b6   :  { %v9254_v5 = vpop.f32.mrf.mxu1 }
 0x7b7   :  { %v9427_v41 = vadd.f32 %v9426_v49, %v18243_v3  ;;  %v18249_v34 = vadd.f32 %v9254_v5, %v8945_v17  ;;  %v8949_v17 = vadd.f32 %v8852_v58, %v17929_v52  ;;  %v12163_v50 = vpop.f32.mrf.mxu0 }
 0x7b8   :  { %v12234_v24 = vpop.f32.mrf.mxu1 }
 0x7b9   :  { %v9428_v19 = vadd.f32 %v9427_v41, %v18249_v34  ;;  %v9368_v40 = vadd.f32 %v12234_v24, %v8950_v9  ;;  %v8955_v24 = vadd.f32 %v12159_v33, %v20902_v14  ;;  %v8884_v46 = vpop.f32.mrf.mxu0 }
 0x7ba   :  { %v9267_v8 = vpop.f32.mrf.mxu1 }
 0x7bb   :  { %v9429_v54 = vadd.f32 %v9428_v19, %v18253_v30  ;;  %v9366_v49 = vadd.f32 %v9267_v8, %v8948_v59  ;;  %v20900_v59 = vld [vmem:[#allocation112_spill] sm:$0xff] }
 0x7bc   :  { %v12235_v4 = vpop.f32.mrf.mxu1 }
 0x7bd   :  { %v9430_v5 = vadd.f32 %v9429_v54, %v18257_v27  ;;  %v9369_v52 = vadd.f32 %v12235_v4, %v8951_v56  ;;  %v8953_v54 = vadd.f32 %v8868_v12, %v20900_v59  ;;  %v8956_v4 = vadd.f32 %v8881_v38, %v20903_v61 }
 0x7be   :  { %v9270_v28 = vpop.f32.mrf.mxu1 }
 0x7bf   :  { %v9431_v41 = vadd.f32 %v9430_v5, %v9366_v49  ;;  %v9367_v63 = vadd.f32 %v9270_v28, %v8949_v17  ;;  %v20901_v5 = vld [vmem:[#allocation102_spill] sm:$0xff] }
 0x7c0   :  { %v12238_v37 = vpop.f32.mrf.mxu1  ;;  %v8954_v17 = vadd.f32 %v12158_v15, %v20901_v5  ;;  %v20905_v15 = vld [vmem:[#allocation67_spill] sm:$0xff]  ;;  %v20906_v5 = vld [vmem:[#allocation22_spill] sm:$0xff] }
 0x7c1   :  { %v9432_v20 = vadd.f32 %v9431_v41, %v9367_v63  ;;  %v8959_v33 = vadd.f32 %v12163_v50, %v20906_v5 }
 0x7c2   :  { %v9283_v19 = vpop.f32.mrf.mxu1  ;;  %v9372_v9 = vadd.f32 %v12238_v37, %v8954_v17 }
 0x7c3   :  { %v9433_v58 = vadd.f32 %v9432_v20, %v9368_v40  ;;  %v9370_v42 = vadd.f32 %v9283_v19, %v8952_v57  ;;  %v20904_v57 = vld [vmem:[#allocation119_spill] sm:$0xff] }
 0x7c4   :  { %v12239_v8 = vpop.f32.mrf.mxu1  ;;  %v8957_v19 = vadd.f32 %v8884_v46, %v20904_v57 }
 0x7c5   :  { %v9434_v11 = vadd.f32 %v9433_v58, %v9369_v52  ;;  %v9373_v56 = vadd.f32 %v12239_v8, %v8955_v24 }
 0x7c6   :  { %v9286_v10 = vpop.f32.mrf.mxu1 }
 0x7c7   :  { %v9435_v28 = vadd.f32 %v9434_v11, %v9370_v42  ;;  %v9371_v25 = vadd.f32 %v9286_v10, %v8953_v54  ;;  %v8958_v11 = vadd.f32 %v12162_v1, %v20905_v15 }
 0x7c8   :  { %v12242_v21 = vpop.f32.mrf.mxu1 }
 0x7c9   :  { %v9436_v41 = vadd.f32 %v9435_v28, %v9371_v25  ;;  %v9376_v37 = vadd.f32 %v12242_v21, %v8958_v11 }
 0x7ca   :  { %v9299_v35 = vpop.f32.mrf.mxu1 }
 0x7cb   :  { %v9437_v20 = vadd.f32 %v9436_v41, %v9372_v9  ;;  %v9374_v58 = vadd.f32 %v9299_v35, %v8956_v4 }
 0x7cc   :  { %v12243_v12 = vpop.f32.mrf.mxu1 }
 0x7cd   :  { %v9438_v59 = vadd.f32 %v9437_v20, %v9373_v56  ;;  %v9377_v28 = vadd.f32 %v12243_v12, %v8959_v33 }
 0x7ce   :  { %v9302_v44 = vpop.f32.mrf.mxu1 }
 0x7cf   :  { %v9439_v54 = vadd.f32 %v9438_v59, %v9374_v58  ;;  %v9375_v10 = vadd.f32 %v9302_v44, %v8957_v19 }
 0x7d1   :  { %v9440_v17 = vadd.f32 %v9439_v54, %v9375_v10  ;;  %v20913_v54 = vld [vmem:[#allocation97_spill] sm:$0xff] }
 0x7d3   :  { %v9441_v14 = vadd.f32 %v9440_v17, %v9376_v37 }
 0x7d5   :  { %v9442_v29 = vadd.f32 %v9441_v14, %v9377_v28 }
 0x7d7   :  { %v9443_v38 = vrot.slane %v9442_v29, 4 }
 0x7d9   :  { %v9444_v8 = vadd.f32 %v9443_v38, %v9442_v29  ;;  %v20914_v38 = vld [vmem:[#allocation98_spill] sm:$0xff] }
 0x7db   :  { %v9445_v24 = vrot.slane %v9444_v8, 2 }
 0x7dd   :  { %v9446_v41 = vadd.f32 %v9445_v24, %v9444_v8 }
 0x7df   :  { %v9447_v61 = vrot.slane %v9446_v41, 1 }
 0x7e1   :  { %v9448_v46 = vadd.f32 %v9447_v61, %v9446_v41  ;;  %v20915_v41 = vld [vmem:[#allocation104_spill] sm:$0xff] }
 0x7e3   :  { %v18273_v35 = vmul.f32 0.001953125, %v9448_v46 }
 0x7e5   :  { %v18277_v1 = vsub.f32 %v18230_v60, %v18273_v35  ;;  %v18281_v44 = vsub.f32 %v18234_v16, %v18273_v35  ;;  %v18285_v50 = vsub.f32 %v18239_v0, %v18273_v35  ;;  %v18289_v29 = vsub.f32 %v18243_v3, %v18273_v35 }
 0x7e6   :  { %v18293_v21 = vsub.f32 %v18249_v34, %v18273_v35  ;;  %v18297_v60 = vsub.f32 %v18253_v30, %v18273_v35  ;;  %v18301_v16 = vsub.f32 %v18257_v27, %v18273_v35  ;;  %v18304_v4 = vsub.f32 %v9366_v49, %v18273_v35 }
 0x7e7   :  { %v18307_v0 = vsub.f32 %v9367_v63, %v18273_v35  ;;  %v18310_v3 = vsub.f32 %v9368_v40, %v18273_v35  ;;  %v18313_v34 = vsub.f32 %v9369_v52, %v18273_v35  ;;  %v18316_v20 = vsub.f32 %v9370_v42, %v18273_v35 }
 0x7e8   :  { %v18319_v30 = vsub.f32 %v9371_v25, %v18273_v35  ;;  %v18322_v27 = vsub.f32 %v9372_v9, %v18273_v35  ;;  %v18325_v49 = vsub.f32 %v9373_v56, %v18273_v35  ;;  %v18328_v63 = vsub.f32 %v9374_v58, %v18273_v35 }
 0x7e9   :  { %v18331_v40 = vsub.f32 %v9375_v10, %v18273_v35  ;;  %v18334_v52 = vsub.f32 %v9376_v37, %v18273_v35  ;;  %v18337_v42 = vsub.f32 %v9377_v28, %v18273_v35  ;;  %v18341_v25 = vsub.f32 %v17973_v43, %v18273_v35 }
 0x7ea   :  { %20907 = vst [vmem:[#allocation120_spill] sm:$0xff] %v18319_v30  ;;  %20908 = vst [vmem:[#allocation18_spill] sm:$0xff] %v18322_v27  ;;  %v18345_v9 = vsub.f32 %v17975_v47, %v18273_v35  ;;  %v18349_v56 = vsub.f32 %v17979_v62, %v18273_v35  ;;  %v18357_v19 = vsub.f32 %v17987_v6, %v18273_v35 }
 0x7eb   :  { %20909 = vst [vmem:[#allocation130_spill] sm:$0xff] %v18325_v49  ;;  %20910 = vst [vmem:[#allocation131_spill] sm:$0xff] %v18328_v63  ;;  %v9514_v12 = vmul.f32 %v18341_v25, %v18341_v25  ;;  %v18361_v43 = vsub.f32 %v17992_v13, %v18273_v35  ;;  %v18367_v62 = vsub.f32 %v18000_v48, %v18273_v35 }
 0x7ec   :  { %20911 = vst [vmem:[#allocation21_spill] sm:$0xff] %v18334_v52  ;;  %20912 = vst [vmem:[#allocation94_spill] sm:$0xff] %v18337_v42  ;;  %v9515_v57 = vmul.f32 %v18345_v9, %v18345_v9  ;;  %v9516_v47 = vmul.f32 %v18349_v56, %v18349_v56  ;;  %v9517_v59 = vmul.f32 %v18357_v19, %v18357_v19 }
 0x7ed   :  { %v18373_v6 = vsub.f32 %v18004_v51, %v18273_v35  ;;  %v9518_v13 = vmul.f32 %v18361_v43, %v18361_v43  ;;  %v18379_v10 = vsub.f32 %v20913_v54, %v18273_v35  ;;  %v9519_v48 = vmul.f32 %v18367_v62, %v18367_v62 }
 0x7ee   :  { %v9578_v58 = vadd.f32 %v9515_v57, %v9514_v12  ;;  %v18385_v33 = vsub.f32 %v18016_v31, %v18273_v35  ;;  %v18391_v17 = vsub.f32 %v18024_v32, %v18273_v35  ;;  %v18397_v8 = vsub.f32 %v20914_v38, %v18273_v35 }
 0x7ef   :  { %v9520_v51 = vmul.f32 %v18373_v6, %v18373_v6  ;;  %v9521_v28 = vmul.f32 %v18379_v10, %v18379_v10  ;;  %v18403_v61 = vsub.f32 %v20915_v41, %v18273_v35  ;;  %v18409_v12 = vsub.f32 %v18040_v53, %v18273_v35  ;;  %v20918_v41 = vld [vmem:[#allocation100_spill] sm:$0xff] }
 0x7f0   :  { %v9579_v15 = vadd.f32 %v9578_v58, %v9516_v47  ;;  %v9522_v31 = vmul.f32 %v18385_v33, %v18385_v33  ;;  %v9523_v32 = vmul.f32 %v18391_v17, %v18391_v17  ;;  %v9524_v57 = vmul.f32 %v18397_v8, %v18397_v8 }
 0x7f1   :  { %v18415_v58 = vsub.f32 %v18048_v45, %v18273_v35  ;;  %v9526_v53 = vmul.f32 %v18409_v12, %v18409_v12  ;;  %v18439_v38 = vsub.f32 %v18072_v23, %v18273_v35 }
 0x7f2   :  { %v9580_v11 = vadd.f32 %v9579_v15, %v9517_v59  ;;  %v9525_v59 = vmul.f32 %v18403_v61, %v18403_v61 }
 0x7f3   :  { %v9527_v45 = vmul.f32 %v18415_v58, %v18415_v58  ;;  %v9531_v23 = vmul.f32 %v18439_v38, %v18439_v38 }
 0x7f4   :  { %v9581_v5 = vadd.f32 %v9580_v11, %v9518_v13  ;;  %v20916_v13 = vld [vmem:[#allocation108_spill] sm:$0xff] }
 0x7f5   :  { %v18421_v11 = vsub.f32 %v20916_v13, %v18273_v35 }
 0x7f6   :  { %v9582_v37 = vadd.f32 %v9581_v5, %v9519_v48  ;;  %v20917_v48 = vld [vmem:[#allocation109_spill] sm:$0xff] }
 0x7f7   :  { %v18427_v5 = vsub.f32 %v20917_v48, %v18273_v35 }
 0x7f8   :  { %v9583_v14 = vadd.f32 %v9582_v37, %v9520_v51  ;;  %v18433_v37 = vsub.f32 %v18064_v22, %v18273_v35 }
 0x7fa   :  { %v9584_v24 = vadd.f32 %v9583_v14, %v9521_v28  ;;  %v9528_v28 = vmul.f32 %v18421_v11, %v18421_v11  ;;  %v9530_v22 = vmul.f32 %v18433_v37, %v18433_v37 }
 0x7fc   :  { %v9585_v46 = vadd.f32 %v9584_v24, %v9522_v31  ;;  %v9529_v31 = vmul.f32 %v18427_v5, %v18427_v5 }
 0x7fe   :  { %v9586_v47 = vadd.f32 %v9585_v46, %v9523_v32  ;;  %v18445_v32 = vsub.f32 %v20918_v41, %v18273_v35 }
 0x800   :  { %v9587_v15 = vadd.f32 %v9586_v47, %v9524_v57  ;;  %v20919_v57 = vld [vmem:[#allocation30_spill] sm:$0xff]  ;;  %v9532_v13 = vmul.f32 %v18445_v32, %v18445_v32 }
 0x801   :  { %v18451_v47 = vsub.f32 %v20919_v57, %v18273_v35 }
 0x802   :  { %v9588_v54 = vadd.f32 %v9587_v15, %v9525_v59  ;;  %v18457_v15 = vsub.f32 %v18088_v7, %v18273_v35 }
 0x803   :  { %v9533_v48 = vmul.f32 %v18451_v47, %v18451_v47 }
 0x804   :  { %v9589_v51 = vadd.f32 %v9588_v54, %v9526_v53  ;;  %v18463_v54 = vsub.f32 %v18096_v36, %v18273_v35  ;;  %v9534_v7 = vmul.f32 %v18457_v15, %v18457_v15 }
 0x806   :  { %v9590_v14 = vadd.f32 %v9589_v51, %v9527_v45  ;;  %v20920_v51 = vld [vmem:[#allocation105_spill] sm:$0xff]  ;;  %v9535_v36 = vmul.f32 %v18463_v54, %v18463_v54 }
 0x808   :  { %v9591_v24 = vadd.f32 %v9590_v14, %v9528_v28  ;;  %v18469_v28 = vsub.f32 %v20920_v51, %v18273_v35  ;;  %v18499_v51 = vsub.f32 %v18131_v39, %v18273_v35 }
 0x80a   :  { %v9592_v46 = vadd.f32 %v9591_v24, %v9529_v31  ;;  %v20921_v31 = vld [vmem:[#allocation116_spill] sm:$0xff]  ;;  %v9541_v39 = vmul.f32 %v18499_v51, %v18499_v51 }
 0x80b   :  { %v18475_v24 = vsub.f32 %v20921_v31, %v18273_v35 }
 0x80c   :  { %v9593_v59 = vadd.f32 %v9592_v46, %v9530_v22  ;;  %v18481_v22 = vsub.f32 %v18112_v55, %v18273_v35  ;;  %v9536_v46 = vmul.f32 %v18469_v28, %v18469_v28 }
 0x80e   :  { %v9594_v53 = vadd.f32 %v9593_v59, %v9531_v23  ;;  %v18487_v23 = vsub.f32 %v18120_v18, %v18273_v35  ;;  %v9537_v59 = vmul.f32 %v18475_v24, %v18475_v24  ;;  %v9538_v55 = vmul.f32 %v18481_v22, %v18481_v22 }
 0x810   :  { %v9595_v45 = vadd.f32 %v9594_v53, %v9532_v13  ;;  %v20922_v53 = vld [vmem:[#allocation20_spill] sm:$0xff]  ;;  %v9539_v18 = vmul.f32 %v18487_v23, %v18487_v23 }
 0x812   :  { %v9596_v14 = vadd.f32 %v9595_v45, %v9533_v48  ;;  %v18493_v48 = vsub.f32 %v20922_v53, %v18273_v35  ;;  %v20927_v53 = vld [vmem:[#allocation38_spill] sm:$0xff] }
 0x814   :  { %v9597_v41 = vadd.f32 %v9596_v14, %v9534_v7  ;;  %v18505_v14 = vsub.f32 %v18136_v26, %v18273_v35  ;;  %v9540_v31 = vmul.f32 %v18493_v48, %v18493_v48 }
 0x816   :  { %v9598_v57 = vadd.f32 %v9597_v41, %v9535_v36  ;;  %20923 = vst [vmem:[#allocation133_spill] sm:$0xff] %v18505_v14  ;;  %v18511_v41 = vsub.f32 %v18144_v2, %v18273_v35  ;;  %v9542_v26 = vmul.f32 %v18505_v14, %v18505_v14 }
 0x818   :  { %v9599_v13 = vadd.f32 %v9598_v57, %v9536_v46  ;;  %20924 = vst [vmem:[#allocation25_spill] sm:$0xff] %v18511_v41  ;;  %v20925_v57 = vld [vmem:[#allocation70_spill] sm:$0xff]  ;;  %v9543_v2 = vmul.f32 %v18511_v41, %v18511_v41 }
 0x81a   :  { %v9600_v45 = vadd.f32 %v9599_v13, %v9537_v59  ;;  %v18517_v59 = vsub.f32 %v20925_v57, %v18273_v35  ;;  %v20931_v57 = vld [vmem:[#allocation35_spill] sm:$0xff] }
 0x81b   :  { %v18535_v14 = vsub.f32 %v20931_v57, %v18273_v35  ;;  %v20937_v57 = vld [vmem:[#allocation135_spill] sm:$0xff] }
 0x81c   :  { %v9601_v7 = vadd.f32 %v9600_v45, %v9538_v55  ;;  %20926 = vst [vmem:[#allocation17_spill] sm:$0xff] %v18517_v59  ;;  %v18523_v55 = vsub.f32 %v20927_v53, %v18273_v35  ;;  %v20933_v53 = vld [vmem:[#allocation63_spill] sm:$0xff] }
 0x81d   :  { %20932 = vst [vmem:[#allocation28_spill] sm:$0xff] %v18535_v14  ;;  %v18541_v41 = vsub.f32 %v20933_v53, %v18273_v35  ;;  %v20939_v53 = vld [vmem:[#allocation40_spill] sm:$0xff] }
 0x81e   :  { %v9602_v36 = vadd.f32 %v9601_v7, %v9539_v18  ;;  %20928 = vst [vmem:[#allocation24_spill] sm:$0xff] %v18523_v55  ;;  %v20929_v18 = vld [vmem:[#allocation136_spill] sm:$0xff] }
 0x81f   :  { %v18529_v7 = vsub.f32 %v20929_v18, %v18273_v35  ;;  %20934 = vst [vmem:[#allocation16_spill] sm:$0xff] %v18541_v41  ;;  %v20935_v18 = vld [vmem:[#allocation99_spill] sm:$0xff] }
 0x820   :  { %v9603_v46 = vadd.f32 %v9602_v36, %v9540_v31  ;;  %v9544_v31 = vmul.f32 %v18517_v59, %v18517_v59  ;;  %v18547_v59 = vsub.f32 %v20935_v18, %v18273_v35  ;;  %v20941_v18 = vld [vmem:[#allocation72_spill] sm:$0xff] }
 0x821   :  { %20930 = vst [vmem:[#allocation45_spill] sm:$0xff] %v18529_v7 }
 0x822   :  { %v9604_v13 = vadd.f32 %v9603_v46, %v9541_v39  ;;  %v9545_v39 = vmul.f32 %v18523_v55, %v18523_v55  ;;  %20936 = vst [vmem:[#allocation107_spill] sm:$0xff] %v18547_v59  ;;  %v18553_v55 = vsub.f32 %v20937_v57, %v18273_v35  ;;  %v20943_v57 = vld [vmem:[#allocation80_spill] sm:$0xff] }
 0x824   :  { %v9605_v45 = vadd.f32 %v9604_v13, %v9542_v26  ;;  %v9546_v26 = vmul.f32 %v18529_v7, %v18529_v7  ;;  %20938 = vst [vmem:[#allocation50_spill] sm:$0xff] %v18553_v55  ;;  %v18559_v7 = vsub.f32 %v20939_v53, %v18273_v35  ;;  %v20945_v53 = vld [vmem:[#allocation43_spill] sm:$0xff] }
 0x826   :  { %v9606_v36 = vadd.f32 %v9605_v45, %v9543_v2  ;;  %v9547_v2 = vmul.f32 %v18535_v14, %v18535_v14  ;;  %20940 = vst [vmem:[#allocation52_spill] sm:$0xff] %v18559_v7  ;;  %v18565_v14 = vsub.f32 %v20941_v18, %v18273_v35  ;;  %v20946_v18 = vld [vmem:[#allocation92_spill] sm:$0xff] }
 0x828   :  { %v9607_v46 = vadd.f32 %v9606_v36, %v9544_v31  ;;  %v9548_v31 = vmul.f32 %v18541_v41, %v18541_v41  ;;  %20942 = vst [vmem:[#allocation121_spill] sm:$0xff] %v18565_v14  ;;  %v18571_v41 = vsub.f32 %v20943_v57, %v18273_v35  ;;  %v20948_v57 = vld [vmem:[#allocation42_spill] sm:$0xff] }
 0x82a   :  { %v9608_v13 = vadd.f32 %v9607_v46, %v9545_v39  ;;  %v9549_v39 = vmul.f32 %v18547_v59, %v18547_v59  ;;  %20944 = vst [vmem:[#allocation49_spill] sm:$0xff] %v18571_v41  ;;  %v18577_v59 = vsub.f32 %v20945_v53, %v18273_v35  ;;  %v20949_v53 = vld [vmem:[#allocation127_spill] sm:$0xff] }
 0x82c   :  { %v9609_v45 = vadd.f32 %v9608_v13, %v9546_v26  ;;  %v9550_v26 = vmul.f32 %v18553_v55, %v18553_v55  ;;  %v18583_v55 = vsub.f32 %v20946_v18, %v18273_v35  ;;  %v20950_v18 = vld [vmem:[#allocation132_spill] sm:$0xff] }
 0x82e   :  { %v9610_v36 = vadd.f32 %v9609_v45, %v9547_v2  ;;  %v9551_v2 = vmul.f32 %v18559_v7, %v18559_v7  ;;  %20947 = vst [vmem:[#allocation64_spill] sm:$0xff] %v18583_v55  ;;  %v18589_v7 = vsub.f32 %v20948_v57, %v18273_v35 }
 0x830   :  { %v9611_v46 = vadd.f32 %v9610_v36, %v9548_v31  ;;  %v9552_v31 = vmul.f32 %v18565_v14, %v18565_v14  ;;  %v18595_v14 = vsub.f32 %v20949_v53, %v18273_v35 }
 0x832   :  { %v9612_v13 = vadd.f32 %v9611_v46, %v9549_v39  ;;  %v9553_v39 = vmul.f32 %v18571_v41, %v18571_v41  ;;  %v18601_v41 = vsub.f32 %v20950_v18, %v18273_v35  ;;  %v9557_v57 = vmul.f32 %v18595_v14, %v18595_v14 }
 0x833   :  { %v9560_v35 = vmul.f32 %v18281_v44, %v18281_v44  ;;  %v9561_v18 = vmul.f32 %v18285_v50, %v18285_v50 }
 0x834   :  { %v9613_v45 = vadd.f32 %v9612_v13, %v9550_v26  ;;  %v9554_v26 = vmul.f32 %v18577_v59, %v18577_v59 }
 0x836   :  { %v9614_v36 = vadd.f32 %v9613_v45, %v9551_v2  ;;  %v9555_v2 = vmul.f32 %v18583_v55, %v18583_v55  ;;  %v9559_v55 = vmul.f32 %v18277_v1, %v18277_v1 }
 0x838   :  { %v9615_v46 = vadd.f32 %v9614_v36, %v9552_v31  ;;  %v9556_v31 = vmul.f32 %v18589_v7, %v18589_v7 }
 0x83a   :  { %v9616_v13 = vadd.f32 %v9615_v46, %v9553_v39  ;;  %v9558_v46 = vmul.f32 %v18601_v41, %v18601_v41 }
 0x83c   :  { %v9617_v45 = vadd.f32 %v9616_v13, %v9554_v26 }
 0x83e   :  { %v9618_v36 = vadd.f32 %v9617_v45, %v9555_v2  ;;  %v9562_v45 = vmul.f32 %v18289_v29, %v18289_v29 }
 0x840   :  { %v9619_v39 = vadd.f32 %v9618_v36, %v9556_v31  ;;  %v9563_v36 = vmul.f32 %v18293_v21, %v18293_v21 }
 0x842   :  { %v9620_v53 = vadd.f32 %v9619_v39, %v9557_v57  ;;  %v9564_v39 = vmul.f32 %v18297_v60, %v18297_v60 }
 0x844   :  { %v9621_v26 = vadd.f32 %v9620_v53, %v9558_v46  ;;  %v9565_v53 = vmul.f32 %v18301_v16, %v18301_v16 }
 0x846   :  { %v9622_v13 = vadd.f32 %v9621_v26, %v9559_v55  ;;  %v9566_v26 = vmul.f32 %v18304_v4, %v18304_v4 }
 0x848   :  { %v9623_v2 = vadd.f32 %v9622_v13, %v9560_v35  ;;  %v9567_v13 = vmul.f32 %v18307_v0, %v18307_v0 }
 0x84a   :  { %v9624_v31 = vadd.f32 %v9623_v2, %v9561_v18  ;;  %v9568_v2 = vmul.f32 %v18310_v3, %v18310_v3 }
 0x84c   :  { %v9625_v57 = vadd.f32 %v9624_v31, %v9562_v45  ;;  %v9569_v31 = vmul.f32 %v18313_v34, %v18313_v34 }
 0x84e   :  { %v9626_v46 = vadd.f32 %v9625_v57, %v9563_v36  ;;  %v9570_v57 = vmul.f32 %v18316_v20, %v18316_v20 }
 0x850   :  { %v9627_v55 = vadd.f32 %v9626_v46, %v9564_v39  ;;  %v9571_v46 = vmul.f32 %v18319_v30, %v18319_v30 }
 0x852   :  { %v9628_v35 = vadd.f32 %v9627_v55, %v9565_v53  ;;  %v9572_v55 = vmul.f32 %v18322_v27, %v18322_v27 }
 0x854   :  { %v9629_v18 = vadd.f32 %v9628_v35, %v9566_v26  ;;  %v9573_v35 = vmul.f32 %v18325_v49, %v18325_v49 }
 0x856   :  { %v9630_v45 = vadd.f32 %v9629_v18, %v9567_v13  ;;  %v9574_v18 = vmul.f32 %v18328_v63, %v18328_v63 }
 0x858   :  { %v9631_v36 = vadd.f32 %v9630_v45, %v9568_v2  ;;  %v9575_v45 = vmul.f32 %v18331_v40, %v18331_v40 }
 0x85a   :  { %v9632_v39 = vadd.f32 %v9631_v36, %v9569_v31  ;;  %v9576_v36 = vmul.f32 %v18334_v52, %v18334_v52 }
 0x85c   :  { %v9633_v53 = vadd.f32 %v9632_v39, %v9570_v57  ;;  %v9577_v39 = vmul.f32 %v18337_v42, %v18337_v42 }
 0x85e   :  { %v9634_v26 = vadd.f32 %v9633_v53, %v9571_v46 }
 0x860   :  { %v9635_v13 = vadd.f32 %v9634_v26, %v9572_v55 }
 0x862   :  { %v9636_v2 = vadd.f32 %v9635_v13, %v9573_v35 }
 0x864   :  { %v9637_v31 = vadd.f32 %v9636_v2, %v9574_v18  ;;  %v9378_v18 = vld [vmem:[%s19243_s5] sm:$0x1]  ;;  %s12623_s5 = smov [#allocation10]  }
 0x866   :  { %v9638_v57 = vadd.f32 %v9637_v31, %v9575_v45  ;;  %v20951_v31 = vld [vmem:[#allocation15_spill] sm:$0xff] }
 0x867   :  { %v20952_v52 = vsub.s32 0, %v20951_v31 }
 0x868   :  { %v9639_v46 = vadd.f32 %v9638_v57, %v9576_v36 }
 0x86a   :  { %v9640_v53 = vadd.f32 %v9639_v46, %v9577_v39  ;;  %v12443_v39 = vld [vmem:[#allocation2 + $0x1e8] sm:$0xff] }
 0x86c   :  { %v9641_v27 = vrot.slane %v9640_v53, 4 }
 0x86e   :  { %v9642_v49 = vadd.f32 %v9641_v27, %v9640_v53  ;;  %v18657_v27 = vld [vmem:[%s19244_s6] ss:$0 sm:$0xff]  ;;  %v20953_v53 = vld [vmem:[#allocation133_spill] sm:$0xff]  ;;  %s19217_s6 = sshll.u32 %s12623_s5, 4  ;;  %s9925_s6 = int_to_ptr.vmem [resolvable:$true] %s19217_s6 }
 0x86f   :  { %s12587_s27 = scalar_lea.vmem %s9925_s6, 8192  ;;  %p12592_p7 = scmp.lt.s32.totalorder %s9925_s6, %s9925_s6 }
 0x870   :  { %v9643_v55 = vrot.slane %v9642_v49, 2  ;;  %p12588_p6 = scmp.ne.s32.totalorder %s9925_s6, %s12587_s27  ;;  %p12593_p8 = scmp.lt.s32.totalorder %s12587_s27, %s12587_s27 }
 0x872   :  { %v9644_v26 = vadd.f32 %v9643_v55, %v9642_v49  ;;  %v20954_v55 = vld [vmem:[#allocation25_spill] sm:$0xff]  ;;  %p12594_p9 = por %p12593_p8, %p12592_p7 }
 0x874   :  { %v9645_v30 = vrot.slane %v9644_v26, 1  ;;  %p12595_p10 = pnand %p12594_p9, %p12588_p6 }
 0x876   :  { %v9646_v63 = vadd.f32 %v9645_v30, %v9644_v26  ;;  %v20955_v26 = vld [vmem:[#allocation17_spill] sm:$0xff] }
 0x878   :  { %v9647_v35 = vmul.f32 0.001953125, %v9646_v63 }
 0x87a   :  { %v9648_v13 = vadd.f32 1e-05, %v9647_v35  ;;  %v20956_v35 = vld [vmem:[#allocation24_spill] sm:$0xff] }
 0x87c   :  { %12399 = vrsqrt.f32 %v9648_v13  ;;  %v20957_v13 = vld [vmem:[#allocation45_spill] sm:$0xff] }
 0x889   :  { %v12400_v2 = vpop.eup %12399 }
 0x88a   :  { %v9650_v45 = vmul.f32 %v12400_v2, %v9378_v18  ;;  %v20958_v18 = vld [vmem:[#allocation28_spill] sm:$0xff] }
 0x88c   :  { %v18652_v42 = vrot.slane %v9650_v45, %v20952_v52  ;;  %v20959_v45 = vld [vmem:[#allocation16_spill] sm:$0xff] }
 0x88e   :  { %v9718_v30 = vmul.f32 %v18652_v42, %v18331_v40  ;;  %v18663_v49 = vmul.f32 %v18652_v42, %v18341_v25  ;;  %v18667_v63 = vmul.f32 %v18652_v42, %v18345_v9  ;;  %v18671_v52 = vmul.f32 %v18652_v42, %v18349_v56 }
 0x88f   :  { %v18675_v36 = vmul.f32 %v18652_v42, %v18357_v19  ;;  %v18679_v57 = vmul.f32 %v18652_v42, %v18361_v43  ;;  %v18683_v40 = vmul.f32 %v18652_v42, %v18367_v62  ;;  %v18687_v25 = vmul.f32 %v18652_v42, %v18373_v6 }
 0x890   :  { %v9788_v9 = vadd.f32 %v18657_v27, %v9718_v30  ;;  %v18692_v56 = vmul.f32 %v18652_v42, %v18379_v10  ;;  %v18696_v19 = vmul.f32 %v18652_v42, %v18385_v33  ;;  %v18700_v43 = vmul.f32 %v18652_v42, %v18391_v17  ;;  %v20960_v30 = vld [vmem:[#allocation107_spill] sm:$0xff] }
 0x891   :  { %v18704_v62 = vmul.f32 %v18652_v42, %v18397_v8  ;;  %v18708_v6 = vmul.f32 %v18652_v42, %v18403_v61  ;;  %v18712_v10 = vmul.f32 %v18652_v42, %v18409_v12  ;;  %v18716_v33 = vmul.f32 %v18652_v42, %v18415_v58 }
 0x892   :  { %v9852_v46 = vadd.f32 %v12443_v39, %v9788_v9  ;;  %v18720_v17 = vmul.f32 %v18652_v42, %v18421_v11  ;;  %v18724_v8 = vmul.f32 %v18652_v42, %v18427_v5  ;;  %v18728_v61 = vmul.f32 %v18652_v42, %v18433_v37  ;;  %v20961_v39 = vld [vmem:[#allocation50_spill] sm:$0xff] }
 0x893   :  { %v18732_v12 = vmul.f32 %v18652_v42, %v18439_v38  ;;  %v18736_v58 = vmul.f32 %v18652_v42, %v18445_v32  ;;  %v18740_v11 = vmul.f32 %v18652_v42, %v18451_v47  ;;  %v18744_v5 = vmul.f32 %v18652_v42, %v18457_v15 }
 0x894   :  { %9916 = vst [vmem:[#allocation10 + $0x1e8] sm:$0xff] %v9852_v46  ;;  %v18748_v37 = vmul.f32 %v18652_v42, %v18463_v54  ;;  %v18752_v38 = vmul.f32 %v18652_v42, %v18469_v28  ;;  %v18756_v32 = vmul.f32 %v18652_v42, %v18475_v24  ;;  %v18760_v47 = vmul.f32 %v18652_v42, %v18481_v22 }
 0x895   :  { %v18764_v15 = vmul.f32 %v18652_v42, %v18487_v23  ;;  %v18768_v54 = vmul.f32 %v18652_v42, %v18493_v48  ;;  %v18772_v28 = vmul.f32 %v18652_v42, %v18499_v51  ;;  %v18776_v24 = vmul.f32 %v18652_v42, %v20953_v53  ;;  %v20962_v53 = vld [vmem:[#allocation52_spill] sm:$0xff] }
 0x896   :  { %v18780_v22 = vmul.f32 %v18652_v42, %v20954_v55  ;;  %v18784_v23 = vmul.f32 %v18652_v42, %v20955_v26  ;;  %v18788_v48 = vmul.f32 %v18652_v42, %v20956_v35  ;;  %v18792_v51 = vmul.f32 %v18652_v42, %v20957_v13  ;;  %v20963_v26 = vld [vmem:[#allocation121_spill] sm:$0xff] }
 0x897   :  { %v18796_v2 = vmul.f32 %v18652_v42, %v20958_v18  ;;  %v18800_v31 = vmul.f32 %v18652_v42, %v20959_v45  ;;  %v18804_v9 = vmul.f32 %v18652_v42, %v20960_v30  ;;  %v18808_v46 = vmul.f32 %v18652_v42, %v20961_v39  ;;  %v20964_v13 = vld [vmem:[#allocation49_spill] sm:$0xff]  ;;  %v20965_v30 = vld [vmem:[#allocation64_spill] sm:$0xff] }
 0x898   :  { %v18812_v55 = vmul.f32 %v18652_v42, %v20962_v53  ;;  %v18816_v35 = vmul.f32 %v18652_v42, %v20963_v26  ;;  %v18820_v18 = vmul.f32 %v18652_v42, %v20964_v13  ;;  %v18824_v45 = vmul.f32 %v18652_v42, %v18577_v59 }
 0x899   :  { %v18828_v39 = vmul.f32 %v18652_v42, %v20965_v30  ;;  %v18832_v53 = vmul.f32 %v18652_v42, %v18589_v7  ;;  %v18836_v26 = vmul.f32 %v18652_v42, %v18595_v14  ;;  %v18840_v13 = vmul.f32 %v18652_v42, %v18601_v41 }
 0x89a   :  { %v18844_v59 = vmul.f32 %v18652_v42, %v18277_v1  ;;  %v18848_v30 = vmul.f32 %v18652_v42, %v18281_v44  ;;  %v18852_v7 = vmul.f32 %v18652_v42, %v18285_v50  ;;  %v18856_v14 = vmul.f32 %v18652_v42, %v18289_v29 }
 0x89b   :  { %v18860_v41 = vmul.f32 %v18652_v42, %v18293_v21  ;;  %v18864_v1 = vmul.f32 %v18652_v42, %v18297_v60  ;;  %v18868_v44 = vmul.f32 %v18652_v42, %v18301_v16  ;;  %v18872_v50 = vmul.f32 %v18652_v42, %v18304_v4 }
 0x89c   :  { %v18876_v29 = vmul.f32 %v18652_v42, %v18307_v0  ;;  %v18880_v21 = vmul.f32 %v18652_v42, %v18310_v3  ;;  %v18884_v60 = vmul.f32 %v18652_v42, %v18313_v34  ;;  %v18888_v16 = vmul.f32 %v18652_v42, %v18316_v20 }
 0x89d   :  { %20966 = vst [vmem:[#allocation55_spill] sm:$0xff] %v18868_v44  ;;  %20967 = vst [vmem:[#allocation59_spill] sm:$0xff] %v18872_v50  ;;  %v20972_v44 = vld [vmem:[#allocation120_spill] sm:$0xff]  ;;  %v20973_v50 = vld [vmem:[#allocation18_spill] sm:$0xff] }
 0x89e   :  { %20968 = vst [vmem:[#allocation36_spill] sm:$0xff] %v18876_v29  ;;  %20969 = vst [vmem:[#allocation39_spill] sm:$0xff] %v18880_v21  ;;  %v18892_v4 = vmul.f32 %v18652_v42, %v20972_v44  ;;  %v18896_v0 = vmul.f32 %v18652_v42, %v20973_v50  ;;  %v20974_v29 = vld [vmem:[#allocation130_spill] sm:$0xff]  ;;  %v20975_v21 = vld [vmem:[#allocation131_spill] sm:$0xff]  ;;  %v18916_v50 = vadd.f32 %v18657_v27, %v18663_v49 }
 0x89f   :  { %20970 = vst [vmem:[#allocation27_spill] sm:$0xff] %v18884_v60  ;;  %20971 = vst [vmem:[#allocation122_spill] sm:$0xff] %v18888_v16  ;;  %v18900_v3 = vmul.f32 %v18652_v42, %v20974_v29  ;;  %v18904_v34 = vmul.f32 %v18652_v42, %v20975_v21  ;;  %v20976_v60 = vld [vmem:[#allocation21_spill] sm:$0xff]  ;;  %v20977_v16 = vld [vmem:[#allocation94_spill] sm:$0xff]  ;;  %v18920_v29 = vadd.f32 %v18657_v27, %v18667_v63 }
 0x8a0   :  { %v18908_v20 = vmul.f32 %v18652_v42, %v20976_v60  ;;  %v18912_v44 = vmul.f32 %v18652_v42, %v20977_v16  ;;  %v18924_v21 = vadd.f32 %v18657_v27, %v18671_v52  ;;  %v18928_v60 = vadd.f32 %v18657_v27, %v18675_v36 }
 0x8a1   :  { %v18932_v42 = vadd.f32 %v18657_v27, %v18679_v57  ;;  %v18936_v49 = vadd.f32 %v18657_v27, %v18683_v40  ;;  %v18940_v63 = vadd.f32 %v18657_v27, %v18687_v25  ;;  %v18944_v52 = vadd.f32 %v18657_v27, %v18692_v56 }
 0x8a2   :  { %v18948_v36 = vadd.f32 %v18657_v27, %v18696_v19  ;;  %v18952_v57 = vadd.f32 %v18657_v27, %v18700_v43  ;;  %v18956_v40 = vadd.f32 %v18657_v27, %v18704_v62  ;;  %v18960_v25 = vadd.f32 %v18657_v27, %v18708_v6 }
 0x8a3   :  { %v18964_v56 = vadd.f32 %v18657_v27, %v18712_v10  ;;  %v18968_v19 = vadd.f32 %v18657_v27, %v18716_v33  ;;  %v18972_v43 = vadd.f32 %v18657_v27, %v18720_v17  ;;  %v18976_v62 = vadd.f32 %v18657_v27, %v18724_v8 }
 0x8a4   :  { %v18980_v6 = vadd.f32 %v18657_v27, %v18728_v61  ;;  %v18984_v10 = vadd.f32 %v18657_v27, %v18732_v12  ;;  %v18988_v33 = vadd.f32 %v18657_v27, %v18736_v58  ;;  %v18992_v17 = vadd.f32 %v18657_v27, %v18740_v11  ;;  %v20983_v16 = vld [vmem:[#allocation55_spill] sm:$0xff] }
 0x8a5   :  { %v18996_v8 = vadd.f32 %v18657_v27, %v18744_v5  ;;  %v19000_v61 = vadd.f32 %v18657_v27, %v18748_v37  ;;  %v19004_v12 = vadd.f32 %v18657_v27, %v18752_v38  ;;  %v19008_v58 = vadd.f32 %v18657_v27, %v18756_v32 }
 0x8a6   :  { %v19012_v11 = vadd.f32 %v18657_v27, %v18760_v47  ;;  %v19016_v5 = vadd.f32 %v18657_v27, %v18764_v15  ;;  %v19020_v37 = vadd.f32 %v18657_v27, %v18768_v54  ;;  %v19024_v38 = vadd.f32 %v18657_v27, %v18772_v28 }
 0x8a7   :  { %v19028_v32 = vadd.f32 %v18657_v27, %v18776_v24  ;;  %v19032_v47 = vadd.f32 %v18657_v27, %v18780_v22  ;;  %v19036_v15 = vadd.f32 %v18657_v27, %v18784_v23  ;;  %v19040_v54 = vadd.f32 %v18657_v27, %v18788_v48 }
 0x8a8   :  { %v19044_v28 = vadd.f32 %v18657_v27, %v18792_v51  ;;  %v19048_v24 = vadd.f32 %v18657_v27, %v18796_v2  ;;  %v19052_v22 = vadd.f32 %v18657_v27, %v18800_v31  ;;  %v19056_v23 = vadd.f32 %v18657_v27, %v18804_v9 }
 0x8a9   :  { %v19060_v48 = vadd.f32 %v18657_v27, %v18808_v46  ;;  %v19064_v51 = vadd.f32 %v18657_v27, %v18812_v55  ;;  %v19068_v2 = vadd.f32 %v18657_v27, %v18816_v35  ;;  %v19072_v31 = vadd.f32 %v18657_v27, %v18820_v18 }
 0x8aa   :  { %v19076_v9 = vadd.f32 %v18657_v27, %v18824_v45  ;;  %v19080_v46 = vadd.f32 %v18657_v27, %v18828_v39  ;;  %v19084_v55 = vadd.f32 %v18657_v27, %v18832_v53  ;;  %v19088_v35 = vadd.f32 %v18657_v27, %v18836_v26 }
 0x8ab   :  { %v19092_v18 = vadd.f32 %v18657_v27, %v18840_v13  ;;  %v19096_v45 = vadd.f32 %v18657_v27, %v18844_v59  ;;  %v19100_v39 = vadd.f32 %v18657_v27, %v18848_v30  ;;  %v19104_v53 = vadd.f32 %v18657_v27, %v18852_v7 }
 0x8ac   :  { %v19108_v26 = vadd.f32 %v18657_v27, %v18856_v14  ;;  %v19112_v13 = vadd.f32 %v18657_v27, %v18860_v41  ;;  %v19116_v59 = vadd.f32 %v18657_v27, %v18864_v1  ;;  %v19120_v30 = vadd.f32 %v18657_v27, %v20983_v16 }
 0x8ad   :  { %20978 = vst [vmem:[#allocation73_spill] sm:$0xff] %v19100_v39  ;;  %20979 = vst [vmem:[#allocation74_spill] sm:$0xff] %v19104_v53  ;;  %v20984_v39 = vld [vmem:[#allocation59_spill] sm:$0xff]  ;;  %v20985_v53 = vld [vmem:[#allocation36_spill] sm:$0xff] }
 0x8ae   :  { %20980 = vst [vmem:[#allocation47_spill] sm:$0xff] %v19108_v26  ;;  %20981 = vst [vmem:[#allocation44_spill] sm:$0xff] %v19112_v13  ;;  %v19124_v7 = vadd.f32 %v18657_v27, %v20984_v39  ;;  %v19128_v14 = vadd.f32 %v18657_v27, %v20985_v53  ;;  %v20986_v26 = vld [vmem:[#allocation39_spill] sm:$0xff]  ;;  %v19144_v39 = vadd.f32 %v18657_v27, %v18892_v4 }
 0x8af   :  { %20982 = vst [vmem:[#allocation56_spill] sm:$0xff] %v19116_v59  ;;  %v19132_v41 = vadd.f32 %v18657_v27, %v20986_v26  ;;  %v20988_v13 = vld [vmem:[#allocation27_spill] sm:$0xff]  ;;  %v20990_v59 = vld [vmem:[#allocation122_spill] sm:$0xff]  ;;  %v19148_v53 = vadd.f32 %v18657_v27, %v18896_v0  ;;  %v19152_v26 = vadd.f32 %v18657_v27, %v18900_v3  ;;  %v19164_v4 = vadd.f32 %v18657_v27, %v18912_v44  ;;  %v12446_v3 = vld [vmem:[#allocation2 + $0x10] sm:$0xff] }
 0x8b0   :  { %v19136_v1 = vadd.f32 %v18657_v27, %v20988_v13  ;;  %v19140_v16 = vadd.f32 %v18657_v27, %v20990_v59  ;;  %20992 = vst [vmem:[#allocation48_spill] sm:$0xff] %v19144_v39  ;;  %v19156_v13 = vadd.f32 %v18657_v27, %v18904_v34  ;;  %v19160_v59 = vadd.f32 %v18657_v27, %v18908_v20  ;;  %v12444_v39 = vld [vmem:[#allocation2] sm:$0xff]  ;;  %v12450_v27 = vld [vmem:[#allocation2 + $0x30] sm:$0xff] }
 0x8b1   :  { %20987 = vst [vmem:[#allocation31_spill] sm:$0xff] %v19132_v41  ;;  %20993 = vst [vmem:[#allocation78_spill] sm:$0xff] %v19148_v53  ;;  %v9791_v0 = vadd.f32 %v12444_v39, %v18916_v50  ;;  %v12445_v53 = vld [vmem:[#allocation2 + $0x8] sm:$0xff]  ;;  %v9797_v44 = vadd.f32 %v12450_v27, %v18940_v63  ;;  %v12452_v39 = vld [vmem:[#allocation2 + $0x40] sm:$0xff] }
 0x8b2   :  { %20989 = vst [vmem:[#allocation96_spill] sm:$0xff] %v19136_v1  ;;  %20991 = vst [vmem:[#allocation26_spill] sm:$0xff] %v19140_v16  ;;  %v9792_v16 = vadd.f32 %v12445_v53, %v18920_v29  ;;  %v12447_v1 = vld [vmem:[#allocation2 + $0x18] sm:$0xff]  ;;  %v9799_v29 = vadd.f32 %v12452_v39, %v18948_v36  ;;  %v12453_v53 = vld [vmem:[#allocation2 + $0x48] sm:$0xff] }
 0x8b3   :  { %20994 = vst [vmem:[#allocation123_spill] sm:$0xff] %v19152_v26  ;;  %20995 = vst [vmem:[#allocation128_spill] sm:$0xff] %v19156_v13  ;;  %v9793_v26 = vadd.f32 %v12446_v3, %v18924_v21  ;;  %v9794_v34 = vadd.f32 %v12447_v1, %v18928_v60  ;;  %v12448_v13 = vld [vmem:[#allocation2 + $0x20] sm:$0xff]  ;;  %v9800_v21 = vadd.f32 %v12453_v53, %v18952_v57  ;;  %v12454_v3 = vld [vmem:[#allocation2 + $0x50] sm:$0xff] }
 0x8b4   :  { %20996 = vst [vmem:[#allocation29_spill] sm:$0xff] %v19160_v59  ;;  %20997 = vst [vmem:[#allocation54_spill] sm:$0xff] %v19164_v4  ;;  %v9795_v20 = vadd.f32 %v12448_v13, %v18932_v42  ;;  %v12449_v59 = vld [vmem:[#allocation2 + $0x28] sm:$0xff]  ;;  %v12451_v4 = vld [vmem:[#allocation2 + $0x38] sm:$0xff]  ;;  %v9801_v60 = vadd.f32 %v12454_v3, %v18956_v40 }
 0x8b5   :  { %v9796_v41 = vadd.f32 %v12449_v59, %v18936_v49  ;;  %v9798_v50 = vadd.f32 %v12451_v4, %v18944_v52  ;;  %9855 = vst [vmem:[#allocation10] sm:$0xff] %v9791_v0  ;;  %9856 = vst [vmem:[#allocation10 + $0x8] sm:$0xff] %v9792_v16  ;;  %v12455_v42 = vld [vmem:[#allocation2 + $0x58] sm:$0xff]  ;;  %v12456_v1 = vld [vmem:[#allocation2 + $0x60] sm:$0xff] }
 0x8b6   :  { %9857 = vst [vmem:[#allocation10 + $0x10] sm:$0xff] %v9793_v26  ;;  %v9802_v49 = vadd.f32 %v12455_v42, %v18960_v25  ;;  %v9803_v63 = vadd.f32 %v12456_v1, %v18964_v56  ;;  %v12457_v13 = vld [vmem:[#allocation2 + $0x68] sm:$0xff]  ;;  %v12458_v59 = vld [vmem:[#allocation2 + $0x70] sm:$0xff]  ;;  %9858 = vst [vmem:[#allocation10 + $0x18] sm:$0xff] %v9794_v34 }
 0x8b7   :  { %v9804_v52 = vadd.f32 %v12457_v13, %v18968_v19  ;;  %v9805_v36 = vadd.f32 %v12458_v59, %v18972_v43  ;;  %9859 = vst [vmem:[#allocation10 + $0x20] sm:$0xff] %v9795_v20  ;;  %9860 = vst [vmem:[#allocation10 + $0x28] sm:$0xff] %v9796_v41  ;;  %v12459_v57 = vld [vmem:[#allocation2 + $0x78] sm:$0xff]  ;;  %v12460_v16 = vld [vmem:[#allocation2 + $0x80] sm:$0xff] }
 0x8b8   :  { %9861 = vst [vmem:[#allocation10 + $0x30] sm:$0xff] %v9797_v44  ;;  %v9806_v40 = vadd.f32 %v12459_v57, %v18976_v62  ;;  %v9807_v26 = vadd.f32 %v12460_v16, %v18980_v6  ;;  %v12461_v25 = vld [vmem:[#allocation2 + $0x88] sm:$0xff]  ;;  %v12462_v56 = vld [vmem:[#allocation2 + $0x90] sm:$0xff]  ;;  %9862 = vst [vmem:[#allocation10 + $0x38] sm:$0xff] %v9798_v50 }
 0x8b9   :  { %v9808_v4 = vadd.f32 %v12461_v25, %v18984_v10  ;;  %v9809_v0 = vadd.f32 %v12462_v56, %v18988_v33  ;;  %9863 = vst [vmem:[#allocation10 + $0x40] sm:$0xff] %v9799_v29  ;;  %9864 = vst [vmem:[#allocation10 + $0x48] sm:$0xff] %v9800_v21  ;;  %v12463_v19 = vld [vmem:[#allocation2 + $0x98] sm:$0xff]  ;;  %v12464_v41 = vld [vmem:[#allocation2 + $0xa0] sm:$0xff] }
 0x8ba   :  { %9865 = vst [vmem:[#allocation10 + $0x50] sm:$0xff] %v9801_v60  ;;  %v9810_v43 = vadd.f32 %v12463_v19, %v18992_v17  ;;  %v9811_v34 = vadd.f32 %v12464_v41, %v18996_v8  ;;  %v12465_v62 = vld [vmem:[#allocation2 + $0xa8] sm:$0xff]  ;;  %v12466_v6 = vld [vmem:[#allocation2 + $0xb0] sm:$0xff]  ;;  %9866 = vst [vmem:[#allocation10 + $0x58] sm:$0xff] %v9802_v49 }
 0x8bb   :  { %v9812_v20 = vadd.f32 %v12465_v62, %v19000_v61  ;;  %v9813_v27 = vadd.f32 %v12466_v6, %v19004_v12  ;;  %9867 = vst [vmem:[#allocation10 + $0x60] sm:$0xff] %v9803_v63  ;;  %9868 = vst [vmem:[#allocation10 + $0x68] sm:$0xff] %v9804_v52  ;;  %v12467_v10 = vld [vmem:[#allocation2 + $0xb8] sm:$0xff]  ;;  %v12468_v44 = vld [vmem:[#allocation2 + $0xc0] sm:$0xff] }
 0x8bc   :  { %9869 = vst [vmem:[#allocation10 + $0x70] sm:$0xff] %v9805_v36  ;;  %v9814_v33 = vadd.f32 %v12467_v10, %v19008_v58  ;;  %v9815_v50 = vadd.f32 %v12468_v44, %v19012_v11  ;;  %v12469_v17 = vld [vmem:[#allocation2 + $0xc8] sm:$0xff]  ;;  %v12470_v8 = vld [vmem:[#allocation2 + $0xd0] sm:$0xff]  ;;  %9870 = vst [vmem:[#allocation10 + $0x78] sm:$0xff] %v9806_v40 }
 0x8bd   :  { %v9816_v39 = vadd.f32 %v12469_v17, %v19016_v5  ;;  %v9817_v29 = vadd.f32 %v12470_v8, %v19020_v37  ;;  %9871 = vst [vmem:[#allocation10 + $0x80] sm:$0xff] %v9807_v26  ;;  %9872 = vst [vmem:[#allocation10 + $0x88] sm:$0xff] %v9808_v4  ;;  %v12471_v61 = vld [vmem:[#allocation2 + $0xd8] sm:$0xff]  ;;  %v12472_v53 = vld [vmem:[#allocation2 + $0xe0] sm:$0xff] }
 0x8be   :  { %9873 = vst [vmem:[#allocation10 + $0x90] sm:$0xff] %v9809_v0  ;;  %v9818_v12 = vadd.f32 %v12471_v61, %v19024_v38  ;;  %v9819_v21 = vadd.f32 %v12472_v53, %v19028_v32  ;;  %v12473_v58 = vld [vmem:[#allocation2 + $0xe8] sm:$0xff]  ;;  %v12474_v11 = vld [vmem:[#allocation2 + $0xf0] sm:$0xff]  ;;  %9874 = vst [vmem:[#allocation10 + $0x98] sm:$0xff] %v9810_v43 }
 0x8bf   :  { %v9820_v3 = vadd.f32 %v12473_v58, %v19032_v47  ;;  %v9821_v60 = vadd.f32 %v12474_v11, %v19036_v15  ;;  %9875 = vst [vmem:[#allocation10 + $0xa0] sm:$0xff] %v9811_v34  ;;  %9876 = vst [vmem:[#allocation10 + $0xa8] sm:$0xff] %v9812_v20  ;;  %v12475_v5 = vld [vmem:[#allocation2 + $0xf8] sm:$0xff]  ;;  %v12476_v42 = vld [vmem:[#allocation2 + $0x100] sm:$0xff] }
 0x8c0   :  { %9877 = vst [vmem:[#allocation10 + $0xb0] sm:$0xff] %v9813_v27  ;;  %v9822_v37 = vadd.f32 %v12475_v5, %v19040_v54  ;;  %v9823_v49 = vadd.f32 %v12476_v42, %v19044_v28  ;;  %v12477_v38 = vld [vmem:[#allocation2 + $0x108] sm:$0xff]  ;;  %v12478_v32 = vld [vmem:[#allocation2 + $0x110] sm:$0xff]  ;;  %9878 = vst [vmem:[#allocation10 + $0xb8] sm:$0xff] %v9814_v33 }
 0x8c1   :  { %v9824_v1 = vadd.f32 %v12477_v38, %v19048_v24  ;;  %v9825_v63 = vadd.f32 %v12478_v32, %v19052_v22  ;;  %9879 = vst [vmem:[#allocation10 + $0xc0] sm:$0xff] %v9815_v50  ;;  %9880 = vst [vmem:[#allocation10 + $0xc8] sm:$0xff] %v9816_v39  ;;  %v12479_v47 = vld [vmem:[#allocation2 + $0x118] sm:$0xff]  ;;  %v12480_v13 = vld [vmem:[#allocation2 + $0x120] sm:$0xff] }
 0x8c2   :  { %9881 = vst [vmem:[#allocation10 + $0xd0] sm:$0xff] %v9817_v29  ;;  %v9826_v15 = vadd.f32 %v12479_v47, %v19056_v23  ;;  %v9827_v52 = vadd.f32 %v12480_v13, %v19060_v48  ;;  %v12481_v54 = vld [vmem:[#allocation2 + $0x128] sm:$0xff]  ;;  %v12482_v28 = vld [vmem:[#allocation2 + $0x130] sm:$0xff]  ;;  %9882 = vst [vmem:[#allocation10 + $0xd8] sm:$0xff] %v9818_v12 }
 0x8c3   :  { %v9828_v59 = vadd.f32 %v12481_v54, %v19064_v51  ;;  %v9829_v36 = vadd.f32 %v12482_v28, %v19068_v2  ;;  %9883 = vst [vmem:[#allocation10 + $0xe0] sm:$0xff] %v9819_v21  ;;  %9884 = vst [vmem:[#allocation10 + $0xe8] sm:$0xff] %v9820_v3  ;;  %v12483_v24 = vld [vmem:[#allocation2 + $0x138] sm:$0xff]  ;;  %v12484_v57 = vld [vmem:[#allocation2 + $0x140] sm:$0xff] }
 0x8c4   :  { %9885 = vst [vmem:[#allocation10 + $0xf0] sm:$0xff] %v9821_v60  ;;  %v9830_v22 = vadd.f32 %v12483_v24, %v19072_v31  ;;  %v9831_v40 = vadd.f32 %v12484_v57, %v19076_v9  ;;  %v12485_v23 = vld [vmem:[#allocation2 + $0x148] sm:$0xff]  ;;  %v12486_v48 = vld [vmem:[#allocation2 + $0x150] sm:$0xff]  ;;  %9886 = vst [vmem:[#allocation10 + $0xf8] sm:$0xff] %v9822_v37 }
 0x8c5   :  { %v9832_v16 = vadd.f32 %v12485_v23, %v19080_v46  ;;  %v9833_v26 = vadd.f32 %v12486_v48, %v19084_v55  ;;  %9887 = vst [vmem:[#allocation10 + $0x100] sm:$0xff] %v9823_v49  ;;  %9888 = vst [vmem:[#allocation10 + $0x108] sm:$0xff] %v9824_v1  ;;  %v12487_v51 = vld [vmem:[#allocation2 + $0x158] sm:$0xff]  ;;  %v12488_v25 = vld [vmem:[#allocation2 + $0x160] sm:$0xff] }
 0x8c6   :  { %9889 = vst [vmem:[#allocation10 + $0x110] sm:$0xff] %v9825_v63  ;;  %v9834_v2 = vadd.f32 %v12487_v51, %v19088_v35  ;;  %v9835_v4 = vadd.f32 %v12488_v25, %v19092_v18  ;;  %v12489_v31 = vld [vmem:[#allocation2 + $0x168] sm:$0xff]  ;;  %v12490_v9 = vld [vmem:[#allocation2 + $0x170] sm:$0xff]  ;;  %9890 = vst [vmem:[#allocation10 + $0x118] sm:$0xff] %v9826_v15 }
 0x8c7   :  { %v9836_v56 = vadd.f32 %v12489_v31, %v19096_v45  ;;  %v20998_v0 = vld [vmem:[#allocation73_spill] sm:$0xff]  ;;  %9891 = vst [vmem:[#allocation10 + $0x120] sm:$0xff] %v9827_v52  ;;  %9892 = vst [vmem:[#allocation10 + $0x128] sm:$0xff] %v9828_v59  ;;  %v20999_v55 = vld [vmem:[#allocation74_spill] sm:$0xff] }
 0x8c8   :  { %v9837_v19 = vadd.f32 %v12490_v9, %v20998_v0  ;;  %9893 = vst [vmem:[#allocation10 + $0x130] sm:$0xff] %v9829_v36  ;;  %v12491_v46 = vld [vmem:[#allocation2 + $0x178] sm:$0xff]  ;;  %v12492_v41 = vld [vmem:[#allocation2 + $0x180] sm:$0xff]  ;;  %v12493_v35 = vld [vmem:[#allocation2 + $0x188] sm:$0xff] }
 0x8c9   :  { %v9838_v43 = vadd.f32 %v12491_v46, %v20999_v55  ;;  %v21000_v34 = vld [vmem:[#allocation47_spill] sm:$0xff]  ;;  %v21001_v20 = vld [vmem:[#allocation44_spill] sm:$0xff]  ;;  %9894 = vst [vmem:[#allocation10 + $0x138] sm:$0xff] %v9830_v22  ;;  %9895 = vst [vmem:[#allocation10 + $0x140] sm:$0xff] %v9831_v40 }
 0x8ca   :  { %v9839_v62 = vadd.f32 %v12492_v41, %v21000_v34  ;;  %v9840_v6 = vadd.f32 %v12493_v35, %v21001_v20  ;;  %v12494_v18 = vld [vmem:[#allocation2 + $0x190] sm:$0xff]  ;;  %9896 = vst [vmem:[#allocation10 + $0x148] sm:$0xff] %v9832_v16  ;;  %9897 = vst [vmem:[#allocation10 + $0x150] sm:$0xff] %v9833_v26  ;;  %v12495_v45 = vld [vmem:[#allocation2 + $0x198] sm:$0xff] }
 0x8cb   :  { %v21002_v27 = vld [vmem:[#allocation56_spill] sm:$0xff]  ;;  %v9842_v33 = vadd.f32 %v12495_v45, %v19120_v30  ;;  %v12496_v44 = vld [vmem:[#allocation2 + $0x1a0] sm:$0xff]  ;;  %9898 = vst [vmem:[#allocation10 + $0x158] sm:$0xff] %v9834_v2  ;;  %9899 = vst [vmem:[#allocation10 + $0x160] sm:$0xff] %v9835_v4 }
 0x8cc   :  { %v9841_v10 = vadd.f32 %v12494_v18, %v21002_v27  ;;  %v9843_v50 = vadd.f32 %v12496_v44, %v19124_v7  ;;  %v12497_v17 = vld [vmem:[#allocation2 + $0x1a8] sm:$0xff]  ;;  %v12498_v8 = vld [vmem:[#allocation2 + $0x1b0] sm:$0xff]  ;;  %9900 = vst [vmem:[#allocation10 + $0x168] sm:$0xff] %v9836_v56  ;;  %9901 = vst [vmem:[#allocation10 + $0x170] sm:$0xff] %v9837_v19 }
 0x8cd   :  { %v9844_v39 = vadd.f32 %v12497_v17, %v19128_v14  ;;  %v21003_v29 = vld [vmem:[#allocation31_spill] sm:$0xff]  ;;  %v12499_v12 = vld [vmem:[#allocation2 + $0x1b8] sm:$0xff]  ;;  %v21004_v53 = vld [vmem:[#allocation96_spill] sm:$0xff]  ;;  %9902 = vst [vmem:[#allocation10 + $0x178] sm:$0xff] %v9838_v43 }
 0x8ce   :  { %v9845_v61 = vadd.f32 %v12498_v8, %v21003_v29  ;;  %v9846_v21 = vadd.f32 %v12499_v12, %v21004_v53  ;;  %v12500_v58 = vld [vmem:[#allocation2 + $0x1c0] sm:$0xff]  ;;  %v12501_v30 = vld [vmem:[#allocation2 + $0x1c8] sm:$0xff]  ;;  %v12502_v7 = vld [vmem:[#allocation2 + $0x1d0] sm:$0xff]  ;;  %9903 = vst [vmem:[#allocation10 + $0x180] sm:$0xff] %v9839_v62 }
 0x8cf   :  { %v21005_v3 = vld [vmem:[#allocation26_spill] sm:$0xff]  ;;  %v21006_v60 = vld [vmem:[#allocation48_spill] sm:$0xff]  ;;  %9904 = vst [vmem:[#allocation10 + $0x188] sm:$0xff] %v9840_v6  ;;  %9905 = vst [vmem:[#allocation10 + $0x190] sm:$0xff] %v9841_v10 }
 0x8d0   :  { %v9847_v11 = vadd.f32 %v12500_v58, %v21005_v3  ;;  %v9848_v5 = vadd.f32 %v12501_v30, %v21006_v60  ;;  %v21007_v37 = vld [vmem:[#allocation78_spill] sm:$0xff]  ;;  %v21008_v49 = vld [vmem:[#allocation123_spill] sm:$0xff]  ;;  %v21009_v32 = vld [vmem:[#allocation128_spill] sm:$0xff]  ;;  %9906 = vst [vmem:[#allocation10 + $0x198] sm:$0xff] %v9842_v33 }
 0x8d1   :  { %v9849_v42 = vadd.f32 %v12502_v7, %v21007_v37  ;;  %v12503_v14 = vld [vmem:[#allocation2 + $0x1d8] sm:$0xff]  ;;  %v12504_v1 = vld [vmem:[#allocation2 + $0x1e0] sm:$0xff]  ;;  %v12505_v47 = vld [vmem:[#allocation2 + $0x1f0] sm:$0xff]  ;;  %9907 = vst [vmem:[#allocation10 + $0x1a0] sm:$0xff] %v9843_v50 }
 0x8d2   :  { %v9850_v38 = vadd.f32 %v12503_v14, %v21008_v49  ;;  %v9851_v63 = vadd.f32 %v12504_v1, %v21009_v32  ;;  %v21010_v15 = vld [vmem:[#allocation29_spill] sm:$0xff]  ;;  %v21011_v54 = vld [vmem:[#allocation54_spill] sm:$0xff]  ;;  %9908 = vst [vmem:[#allocation10 + $0x1a8] sm:$0xff] %v9844_v39  ;;  %9909 = vst [vmem:[#allocation10 + $0x1b0] sm:$0xff] %v9845_v61 }
 0x8d3   :  { %v9853_v13 = vadd.f32 %v12505_v47, %v21010_v15  ;;  %v12506_v52 = vld [vmem:[#allocation2 + $0x1f8] sm:$0xff]  ;;  %9910 = vst [vmem:[#allocation10 + $0x1b8] sm:$0xff] %v9846_v21  ;;  %9911 = vst [vmem:[#allocation10 + $0x1c0] sm:$0xff] %v9847_v11 }
 0x8d4   :  { %v9854_v59 = vadd.f32 %v12506_v52, %v21011_v54  ;;  %9912 = vst [vmem:[#allocation10 + $0x1c8] sm:$0xff] %v9848_v5  ;;  %9913 = vst [vmem:[#allocation10 + $0x1d0] sm:$0xff] %v9849_v42 }
 0x8d5   :  { %9914 = vst [vmem:[#allocation10 + $0x1d8] sm:$0xff] %v9850_v38  ;;  %9915 = vst [vmem:[#allocation10 + $0x1e0] sm:$0xff] %v9851_v63 }
 0x8d6   :  { %9917 = vst [vmem:[#allocation10 + $0x1f0] sm:$0xff] %v9853_v13  ;;  %9918 = vst [vmem:[#allocation10 + $0x1f8] sm:$0xff] %v9854_v59 }
 0x8d7   :  { %12598 = shalt.err (!%p12595_p10)
}
 0x8d8   :  { %9930 = dma.vmem_to_hbm [thread:$0]  %s9925_s6, 8192, %s19245_s7, [#allocation4], %s12619_s11, %s12619_s11, %s12620_s12  }
 0x8d9   :  { %12613 = dma.done.wait [#allocation4], 8192  }
 0x8da   :  { %12614 = vsyncadd [#allocation4], 4294959104 }
 0x8db   :  { %9934 = vsyncpa [#allocation3], 1 }
 0x8dc   :  { %9935 = vsyncpa [#allocation6], 1 }
 0x8dd   :  { %9936 = vsyncpa [#allocation9], 1 }
 0x8de   :  { %9937 = vsyncpa [#allocation4], 1 }

</bundles_post_ra>
